<compile_context>
chip_gen: v6e
topology: v6e:2x2x1
jax: 0.10.0
libtpu: 0.0.40
codegen_flags: <defaults>
</compile_context>

<pallas_src>
import functools

import jax
import jax.numpy as jnp
from jax.experimental import pallas as pl
from jax.experimental.pallas import tpu as pltpu


# ----------------------------- Pallas kernel ------------------------------ #
def _decoder_kernel(B, Bp, T, E, H, Hp, Vp, L, ids_ref, feat_ref, emb_ref, *refs):
    """Ref order after the 3 leading inputs:
         w_ih0 (E,4Hp), w_hh0 (Hp,4Hp), b0 (1,4Hp),
         [w_ih_l (Hp,4Hp), w_hh_l (Hp,4Hp), b_l (1,4Hp)] for l in 1..L-1,
         lin_w (Hp,Vp), lin_b (1,Vp),
         out_ref (Bp,T,Vp),
         scratch: emb_scr (T,Bp,E), g0_scr (T,Bp,4Hp), htop_scr (T,Bp,Hp)
    """
    n_w = 3 + 3 * (L - 1)
    w_refs = refs[:n_w]
    lin_w_ref = refs[n_w]
    lin_b_ref = refs[n_w + 1]
    out_ref = refs[n_w + 2]
    emb_scr = refs[n_w + 3]
    g0_scr = refs[n_w + 4]
    htop_scr = refs[n_w + 5]

    G = 4 * Hp
    f32 = jnp.float32
    bf16 = jnp.bfloat16

    # ---- 1) Embedding lookup: small table lives in VMEM; direct dynamic row
    #         reads driven by SMEM ids (no DMA descriptors).  Padded batch rows
    #         are zero-initialised so no stale VMEM is ever read.
    emb_scr[...] = jnp.zeros_like(emb_scr)
    for t in range(T):
        for b in range(B):
            emb_scr[t, pl.ds(b, 1), :] = emb_ref[pl.ds(ids_ref[t, b], 1), :]
    # TODO(synk): production-sized tables should be DMA-gathered (deduped rows,
    # chunked semaphores) from HBM instead of being VMEM-resident.
    # TODO(synk): nn.Dropout(0.5) uses eval-mode (identity) semantics; a
    # train-mode mask would use pltpu.prng_seed / pltpu.prng_random_bits.

    # ---- 2) LSTM weights (small; hoisted).  The vocab head weights are NOT
    #         loaded here — they are read after the recurrence so their live
    #         range never spans the unrolled time loop.
    w_ih0 = w_refs[0][...]                                     # (E, 4Hp)  bf16
    w_hh0 = w_refs[1][...]                                     # (Hp, 4Hp) bf16
    b0 = w_refs[2][...]                                        # (1, 4Hp)  f32
    w_ih_up = [w_refs[3 + 3 * (l - 1)][...] for l in range(1, L)]   # (Hp,4Hp) bf16
    w_hh_up = [w_refs[4 + 3 * (l - 1)][...] for l in range(1, L)]   # (Hp,4Hp) bf16
    b_up = [w_refs[5 + 3 * (l - 1)][...] for l in range(1, L)]      # (1,4Hp)  f32

    def nonlin(gates, c):                                      # PyTorch order i,f,g,o
        i = jax.nn.sigmoid(gates[:, 0 * Hp:1 * Hp])            # lane-tile aligned
        f = jax.nn.sigmoid(gates[:, 1 * Hp:2 * Hp])
        g = jnp.tanh(gates[:, 2 * Hp:3 * Hp])
        o = jax.nn.sigmoid(gates[:, 3 * Hp:4 * Hp])
        c_new = f * c + i * g
        return o * jnp.tanh(c_new), c_new

    # ---- 3) First LSTM call: image features from zero state (h = c = 0, so
    #         the recurrent matmul and the f*c term vanish exactly).
    zero_c = jnp.zeros((Bp, Hp), f32)
    x = feat_ref[...].astype(bf16)                             # (Bp, E)
    gates = jnp.dot(x, w_ih0, preferred_element_type=f32) + b0
    h_l, c_l = nonlin(gates, zero_c)
    hs, cs = [h_l], [c_l]
    for l in range(1, L):
        gates = (jnp.dot(hs[-1].astype(bf16), w_ih_up[l - 1],
                         preferred_element_type=f32) + b_up[l - 1])
        h_l, c_l = nonlin(gates, zero_c)
        hs.append(h_l)
        cs.append(c_l)

    # ---- 4) Hoisted layer-0 input projection for the whole caption sequence:
    #         a single (T*Bp, E) @ (E, 4Hp) matmul (bias added once).
    emb_flat = emb_scr[...].reshape(T * Bp, E).astype(bf16)
    g0_scr[...] = (jnp.dot(emb_flat, w_ih0, preferred_element_type=f32)
                   + b0).reshape(T, Bp, G)

    # ---- 5) Serial recurrence: only the small recurrent matmuls remain on the
    #         critical path.  Upper layers use two summed dots (no lane concat).
    b_bc = [jnp.broadcast_to(b_up[l - 1], (Bp, G)) for l in range(1, L)]  # hoisted

    def body(t, carry):
        hs_c = list(carry[:L])
        cs_c = list(carry[L:])
        gates = g0_scr[t] + jnp.dot(hs_c[0].astype(bf16), w_hh0,
                                    preferred_element_type=f32)
        h_new, c_new = nonlin(gates, cs_c[0])
        hs_c[0], cs_c[0] = h_new, c_new
        x_t = h_new
        for l in range(1, L):
            gates = (jnp.dot(x_t.astype(bf16), w_ih_up[l - 1],
                             preferred_element_type=f32)
                     + jnp.dot(hs_c[l].astype(bf16), w_hh_up[l - 1],
                               preferred_element_type=f32)
                     + b_bc[l - 1])
            h_new, c_new = nonlin(gates, cs_c[l])
            hs_c[l], cs_c[l] = h_new, c_new
            x_t = h_new
        htop_scr[t] = x_t                                      # deferred head input
        return tuple(hs_c) + tuple(cs_c)

    # T is small/static here; bound the unroll (e.g. unroll=4) for larger T.
    jax.lax.fori_loop(0, T, body, tuple(hs) + tuple(cs), unroll=True)

    # ---- 6) Deferred vocab head: ONE (T*Bp, Hp) @ (Hp, Vp) matmul, lane-dense
    #         (Vp multiple of 128); head weights are loaded only now.
    lin_w = lin_w_ref[...]                                     # (Hp, Vp) bf16
    lin_b = lin_b_ref[...]                                     # (1, Vp)  f32
    h_flat = htop_scr[...].reshape(T * Bp, Hp).astype(bf16)
    logits = (jnp.dot(h_flat, lin_w, preferred_element_type=f32)
              + lin_b).reshape(T, Bp, Vp)
    # Emit batch-major so the wrapper never transposes the largest tensor.
    for t in range(T):                                         # static strided stores
        out_ref[:, t, :] = logits[t]


# --------------------------- wrapper-side helpers --------------------------- #
def _pad_gate_cols(w, H, Hp):
    """(R, 4H) -> (R, 4Hp): each of the 4 PyTorch gate blocks placed at k*Hp."""
    out = jnp.zeros((w.shape[0], 4 * Hp), w.dtype)
    for k in range(4):
        out = out.at[:, k * Hp:k * Hp + H].set(w[:, k * H:(k + 1) * H])
    return out


def _pad_rows(w, Hp):
    """(H, C) -> (Hp, C) zero-padded rows."""
    return jnp.zeros((Hp, w.shape[1]), w.dtype).at[:w.shape[0]].set(w)


def _pad_gate_bias(b, H, Hp):
    """(4H,) -> (1, 4Hp) with per-gate placement at k*Hp."""
    out = jnp.zeros((4 * Hp,), b.dtype)
    for k in range(4):
        out = out.at[k * Hp:k * Hp + H].set(b[k * H:(k + 1) * H])
    return out[None, :]


# ------------------------------ JAX wrapper -------------------------------- #
def decoder_forward(features, captions, params, *, num_layers):
    """features: (B, E) float32, captions: (B, T) int32 -> logits (B, T, V)."""
    B, E = features.shape
    _, T = captions.shape
    V, E2 = params["emb"].shape
    assert E2 == E
    H = params["lstm"][0]["w_hh"].shape[1]
    L = num_layers

    Bp = max(8, ((B + 7) // 8) * 8)        # sublane-pad the batch
    Hp = ((H + 127) // 128) * 128          # lane-pad hidden (gate slices aligned)
    Vp = ((V + 127) // 128) * 128          # lane-pad vocab (unmasked stores)
    bf16 = jnp.bfloat16

    # Glue: time-major ids (SMEM), zero-padded features, padded/bf16 weights.
    ids = captions.T.astype(jnp.int32)                                   # (T, B)
    feat_p = jnp.zeros((Bp, E), jnp.float32).at[:B].set(features.astype(jnp.float32))

    kernel_inputs = [ids, feat_p, params["emb"].astype(jnp.float32)]
    p0 = params["lstm"][0]
    kernel_inputs += [
        _pad_gate_cols(p0["w_ih"].T, H, Hp).astype(bf16),                 # (E, 4Hp)
        _pad_rows(_pad_gate_cols(p0["w_hh"].T, H, Hp), Hp).astype(bf16),  # (Hp, 4Hp)
        _pad_gate_bias(p0["b_ih"] + p0["b_hh"], H, Hp),                   # (1, 4Hp)
    ]
    for l in range(1, L):
        p = params["lstm"][l]
        kernel_inputs += [
            _pad_rows(_pad_gate_cols(p["w_ih"].T, H, Hp), Hp).astype(bf16),
            _pad_rows(_pad_gate_cols(p["w_hh"].T, H, Hp), Hp).astype(bf16),
            _pad_gate_bias(p["b_ih"] + p["b_hh"], H, Hp),
        ]
    lin_w_p = (jnp.zeros((Hp, Vp), jnp.float32)
               .at[:H, :V].set(params["lin_w"].T).astype(bf16))
    lin_b_p = jnp.zeros((1, Vp), jnp.float32).at[:, :V].set(params["lin_b"][None, :])
    kernel_inputs += [lin_w_p, lin_b_p]

    vmem = pl.BlockSpec(memory_space=pltpu.MemorySpace.VMEM)
    smem = pl.BlockSpec(memory_space=pltpu.MemorySpace.SMEM)
    in_specs = [smem] + [vmem] * (len(kernel_inputs) - 1)

    out = pl.pallas_call(
        functools.partial(_decoder_kernel, B, Bp, T, E, H, Hp, Vp, L),
        out_shape=jax.ShapeDtypeStruct((Bp, T, Vp), jnp.float32),   # batch-major
        in_specs=in_specs,
        out_specs=vmem,
        scratch_shapes=[
            pltpu.VMEM((T, Bp, E), jnp.float32),        # gathered embeddings
            pltpu.VMEM((T, Bp, 4 * Hp), jnp.float32),   # hoisted layer-0 gates
            pltpu.VMEM((T, Bp, Hp), jnp.float32),       # top-layer h (deferred head)
        ],
        compiler_params=pltpu.CompilerParams(vmem_limit_bytes=64 * 1024 * 1024),
    )(*kernel_inputs)

    return out[:B, :, :V]                                # (B, T, V), no transpose


# ---------------------------- pure-JAX reference --------------------------- #
def decoder_reference(features, captions, params, *, num_layers):
    L = num_layers
    H = params["lstm"][0]["w_hh"].shape[1]
    B, T = captions.shape

    def cell(x, h, c, p):
        gates = x @ p["w_ih"].T + h @ p["w_hh"].T + p["b_ih"] + p["b_hh"]
        i = jax.nn.sigmoid(gates[:, 0 * H:1 * H])
        f = jax.nn.sigmoid(gates[:, 1 * H:2 * H])
        g = jnp.tanh(gates[:, 2 * H:3 * H])
        o = jax.nn.sigmoid(gates[:, 3 * H:4 * H])
        c_new = f * c + i * g
        return o * jnp.tanh(c_new), c_new

    emb = params["emb"][captions]                               # (B, T, E)
    x = features
    hs = [jnp.zeros((B, H), jnp.float32)] * L
    cs = [jnp.zeros((B, H), jnp.float32)] * L
    for l in range(L):
        hs[l], cs[l] = cell(x, hs[l], cs[l], params["lstm"][l])
        x = hs[l]
    outs = []
    for t in range(T):
        x = emb[:, t, :]
        for l in range(L):
            hs[l], cs[l] = cell(x, hs[l], cs[l], params["lstm"][l])
            x = hs[l]
        outs.append(x @ params["lin_w"].T + params["lin_b"])
    return jnp.stack(outs, axis=1)                              # (B, T, V)


# ---------------------------------- main ----------------------------------- #
if __name__ == "__main__":
    B, T = 2, 8
    E, H, V, L = 32, 32, 64, 2

    key = jax.random.PRNGKey(0)
    ks = jax.random.split(key, 4 + 4 * L + 2)
    s = 1.0 / jnp.sqrt(H)

    params = {
        "emb": jax.random.normal(ks[0], (V, E), jnp.float32) * 0.1,
        "lstm": [],
        "lin_w": jax.random.uniform(ks[1], (V, H), jnp.float32, -s, s),
        "lin_b": jax.random.uniform(ks[2], (V,), jnp.float32, -s, s),
    }
    for l in range(L):
        in_dim = E if l == 0 else H
        kk = ks[4 + 4 * l: 4 + 4 * (l + 1)]
        params["lstm"].append({
            "w_ih": jax.random.uniform(kk[0], (4 * H, in_dim), jnp.float32, -s, s),
            "w_hh": jax.random.uniform(kk[1], (4 * H, H), jnp.float32, -s, s),
            "b_ih": jax.random.uniform(kk[2], (4 * H,), jnp.float32, -s, s),
            "b_hh": jax.random.uniform(kk[3], (4 * H,), jnp.float32, -s, s),
        })

    feat_key, cap_key = jax.random.split(ks[3])
    features = jax.random.normal(feat_key, (B, E), jnp.float32)
    captions = jax.random.randint(cap_key, (B, T), 0, V, jnp.int32)

    out = decoder_forward(features, captions, params, num_layers=L)
    out = jax.block_until_ready(out)

    ref = decoder_reference(features, captions, params, num_layers=L)
    assert out.shape == (B, T, V), out.shape
    # bf16 MXU operands in the kernel vs. a pure-f32 reference -> looser tolerance.
    assert jnp.allclose(out, ref, atol=5e-2, rtol=5e-2), "mismatch vs JAX reference"

    print("KERNEL_OK")
</pallas_src>

<mosaic_0001>
module attributes {stable_mosaic.version = 11 : i64} {
  func.func @_decoder_kernel(%arg0: memref<8x2xi32, #tpu.memory_space<smem>>, %arg1: memref<8x32xf32, #tpu.memory_space<vmem>>, %arg2: memref<64x32xf32, #tpu.memory_space<vmem>>, %arg3: memref<32x512xbf16, #tpu.memory_space<vmem>>, %arg4: memref<128x512xbf16, #tpu.memory_space<vmem>>, %arg5: memref<1x512xf32, #tpu.memory_space<vmem>>, %arg6: memref<128x512xbf16, #tpu.memory_space<vmem>>, %arg7: memref<128x512xbf16, #tpu.memory_space<vmem>>, %arg8: memref<1x512xf32, #tpu.memory_space<vmem>>, %arg9: memref<128x128xbf16, #tpu.memory_space<vmem>>, %arg10: memref<1x128xf32, #tpu.memory_space<vmem>>, %arg11: memref<8x8x128xf32, #tpu.memory_space<vmem>>, %arg12: memref<8x8x32xf32, #tpu.memory_space<vmem>>, %arg13: memref<8x8x512xf32, #tpu.memory_space<vmem>>, %arg14: memref<8x8x128xf32, #tpu.memory_space<vmem>>) attributes {dimension_semantics = [], scalar_prefetch = 0 : i64, scratch_operands = 3 : i64, tpu.core_type = #tpu.core_type<tc>} {
    %cst = arith.constant 0.000000e+00 : f32
    %0 = vector.broadcast %cst : f32 to vector<8x8x32xf32>
    %c0 = arith.constant 0 : index
    %c0_0 = arith.constant 0 : index
    %c0_1 = arith.constant 0 : index
    %1 = vector.load %arg12[%c0, %c0_0, %c0_1] : memref<8x8x32xf32, #tpu.memory_space<vmem>>, vector<8x8x32xf32>
    tpu.vector_store %arg12[%c0, %c0_0, %c0_1], %0 {strides = array<i32>} : memref<8x8x32xf32, #tpu.memory_space<vmem>>, vector<8x8x32xf32>,
    %c0_2 = arith.constant 0 : index
    %c0_3 = arith.constant 0 : index
    %2 = memref.load %arg0[%c0_2, %c0_3] : memref<8x2xi32, #tpu.memory_space<smem>>
    %3 = arith.index_cast %2 : i32 to index
    %c0_4 = arith.constant 0 : index
    %4 = vector.load %arg2[%3, %c0_4] : memref<64x32xf32, #tpu.memory_space<vmem>>, vector<1x32xf32>
    %c0_5 = arith.constant 0 : index
    %c0_6 = arith.constant 0 : index
    %c0_7 = arith.constant 0 : index
    %5 = vector.load %arg12[%c0_5, %c0_6, %c0_7] : memref<8x8x32xf32, #tpu.memory_space<vmem>>, vector<1x1x32xf32>
    %6 = vector.shape_cast %5 : vector<1x1x32xf32> to vector<1x32xf32>
    %7 = vector.shape_cast %4 : vector<1x32xf32> to vector<1x1x32xf32>
    tpu.vector_store %arg12[%c0_5, %c0_6, %c0_7], %7 {strides = array<i32>} : memref<8x8x32xf32, #tpu.memory_space<vmem>>, vector<1x1x32xf32>,
    %c0_8 = arith.constant 0 : index
    %c1 = arith.constant 1 : index
    %8 = memref.load %arg0[%c0_8, %c1] : memref<8x2xi32, #tpu.memory_space<smem>>
    %9 = arith.index_cast %8 : i32 to index
    %c0_9 = arith.constant 0 : index
    %10 = vector.load %arg2[%9, %c0_9] : memref<64x32xf32, #tpu.memory_space<vmem>>, vector<1x32xf32>
    %c0_10 = arith.constant 0 : index
    %c1_11 = arith.constant 1 : index
    %c0_12 = arith.constant 0 : index
    %11 = vector.load %arg12[%c0_10, %c1_11, %c0_12] : memref<8x8x32xf32, #tpu.memory_space<vmem>>, vector<1x1x32xf32>
    %12 = vector.shape_cast %11 : vector<1x1x32xf32> to vector<1x32xf32>
    %13 = vector.shape_cast %10 : vector<1x32xf32> to vector<1x1x32xf32>
    tpu.vector_store %arg12[%c0_10, %c1_11, %c0_12], %13 {strides = array<i32>} : memref<8x8x32xf32, #tpu.memory_space<vmem>>, vector<1x1x32xf32>,
    %c1_13 = arith.constant 1 : index
    %c0_14 = arith.constant 0 : index
    %14 = memref.load %arg0[%c1_13, %c0_14] : memref<8x2xi32, #tpu.memory_space<smem>>
    %15 = arith.index_cast %14 : i32 to index
    %c0_15 = arith.constant 0 : index
    %16 = vector.load %arg2[%15, %c0_15] : memref<64x32xf32, #tpu.memory_space<vmem>>, vector<1x32xf32>
    %c1_16 = arith.constant 1 : index
    %c0_17 = arith.constant 0 : index
    %c0_18 = arith.constant 0 : index
    %17 = vector.load %arg12[%c1_16, %c0_17, %c0_18] : memref<8x8x32xf32, #tpu.memory_space<vmem>>, vector<1x1x32xf32>
    %18 = vector.shape_cast %17 : vector<1x1x32xf32> to vector<1x32xf32>
    %19 = vector.shape_cast %16 : vector<1x32xf32> to vector<1x1x32xf32>
    tpu.vector_store %arg12[%c1_16, %c0_17, %c0_18], %19 {strides = array<i32>} : memref<8x8x32xf32, #tpu.memory_space<vmem>>, vector<1x1x32xf32>,
    %c1_19 = arith.constant 1 : index
    %c1_20 = arith.constant 1 : index
    %20 = memref.load %arg0[%c1_19, %c1_20] : memref<8x2xi32, #tpu.memory_space<smem>>
    %21 = arith.index_cast %20 : i32 to index
    %c0_21 = arith.constant 0 : index
    %22 = vector.load %arg2[%21, %c0_21] : memref<64x32xf32, #tpu.memory_space<vmem>>, vector<1x32xf32>
    %c1_22 = arith.constant 1 : index
    %c1_23 = arith.constant 1 : index
    %c0_24 = arith.constant 0 : index
    %23 = vector.load %arg12[%c1_22, %c1_23, %c0_24] : memref<8x8x32xf32, #tpu.memory_space<vmem>>, vector<1x1x32xf32>
    %24 = vector.shape_cast %23 : vector<1x1x32xf32> to vector<1x32xf32>
    %25 = vector.shape_cast %22 : vector<1x32xf32> to vector<1x1x32xf32>
    tpu.vector_store %arg12[%c1_22, %c1_23, %c0_24], %25 {strides = array<i32>} : memref<8x8x32xf32, #tpu.memory_space<vmem>>, vector<1x1x32xf32>,
    %c2 = arith.constant 2 : index
    %c0_25 = arith.constant 0 : index
    %26 = memref.load %arg0[%c2, %c0_25] : memref<8x2xi32, #tpu.memory_space<smem>>
    %27 = arith.index_cast %26 : i32 to index
    %c0_26 = arith.constant 0 : index
    %28 = vector.load %arg2[%27, %c0_26] : memref<64x32xf32, #tpu.memory_space<vmem>>, vector<1x32xf32>
    %c2_27 = arith.constant 2 : index
    %c0_28 = arith.constant 0 : index
    %c0_29 = arith.constant 0 : index
    %29 = vector.load %arg12[%c2_27, %c0_28, %c0_29] : memref<8x8x32xf32, #tpu.memory_space<vmem>>, vector<1x1x32xf32>
    %30 = vector.shape_cast %29 : vector<1x1x32xf32> to vector<1x32xf32>
    %31 = vector.shape_cast %28 : vector<1x32xf32> to vector<1x1x32xf32>
    tpu.vector_store %arg12[%c2_27, %c0_28, %c0_29], %31 {strides = array<i32>} : memref<8x8x32xf32, #tpu.memory_space<vmem>>, vector<1x1x32xf32>,
    %c2_30 = arith.constant 2 : index
    %c1_31 = arith.constant 1 : index
    %32 = memref.load %arg0[%c2_30, %c1_31] : memref<8x2xi32, #tpu.memory_space<smem>>
    %33 = arith.index_cast %32 : i32 to index
    %c0_32 = arith.constant 0 : index
    %34 = vector.load %arg2[%33, %c0_32] : memref<64x32xf32, #tpu.memory_space<vmem>>, vector<1x32xf32>
    %c2_33 = arith.constant 2 : index
    %c1_34 = arith.constant 1 : index
    %c0_35 = arith.constant 0 : index
    %35 = vector.load %arg12[%c2_33, %c1_34, %c0_35] : memref<8x8x32xf32, #tpu.memory_space<vmem>>, vector<1x1x32xf32>
    %36 = vector.shape_cast %35 : vector<1x1x32xf32> to vector<1x32xf32>
    %37 = vector.shape_cast %34 : vector<1x32xf32> to vector<1x1x32xf32>
    tpu.vector_store %arg12[%c2_33, %c1_34, %c0_35], %37 {strides = array<i32>} : memref<8x8x32xf32, #tpu.memory_space<vmem>>, vector<1x1x32xf32>,
    %c3 = arith.constant 3 : index
    %c0_36 = arith.constant 0 : index
    %38 = memref.load %arg0[%c3, %c0_36] : memref<8x2xi32, #tpu.memory_space<smem>>
    %39 = arith.index_cast %38 : i32 to index
    %c0_37 = arith.constant 0 : index
    %40 = vector.load %arg2[%39, %c0_37] : memref<64x32xf32, #tpu.memory_space<vmem>>, vector<1x32xf32>
    %c3_38 = arith.constant 3 : index
    %c0_39 = arith.constant 0 : index
    %c0_40 = arith.constant 0 : index
    %41 = vector.load %arg12[%c3_38, %c0_39, %c0_40] : memref<8x8x32xf32, #tpu.memory_space<vmem>>, vector<1x1x32xf32>
    %42 = vector.shape_cast %41 : vector<1x1x32xf32> to vector<1x32xf32>
    %43 = vector.shape_cast %40 : vector<1x32xf32> to vector<1x1x32xf32>
    tpu.vector_store %arg12[%c3_38, %c0_39, %c0_40], %43 {strides = array<i32>} : memref<8x8x32xf32, #tpu.memory_space<vmem>>, vector<1x1x32xf32>,
    %c3_41 = arith.constant 3 : index
    %c1_42 = arith.constant 1 : index
    %44 = memref.load %arg0[%c3_41, %c1_42] : memref<8x2xi32, #tpu.memory_space<smem>>
    %45 = arith.index_cast %44 : i32 to index
    %c0_43 = arith.constant 0 : index
    %46 = vector.load %arg2[%45, %c0_43] : memref<64x32xf32, #tpu.memory_space<vmem>>, vector<1x32xf32>
    %c3_44 = arith.constant 3 : index
    %c1_45 = arith.constant 1 : index
    %c0_46 = arith.constant 0 : index
    %47 = vector.load %arg12[%c3_44, %c1_45, %c0_46] : memref<8x8x32xf32, #tpu.memory_space<vmem>>, vector<1x1x32xf32>
    %48 = vector.shape_cast %47 : vector<1x1x32xf32> to vector<1x32xf32>
    %49 = vector.shape_cast %46 : vector<1x32xf32> to vector<1x1x32xf32>
    tpu.vector_store %arg12[%c3_44, %c1_45, %c0_46], %49 {strides = array<i32>} : memref<8x8x32xf32, #tpu.memory_space<vmem>>, vector<1x1x32xf32>,
    %c4 = arith.constant 4 : index
    %c0_47 = arith.constant 0 : index
    %50 = memref.load %arg0[%c4, %c0_47] : memref<8x2xi32, #tpu.memory_space<smem>>
    %51 = arith.index_cast %50 : i32 to index
    %c0_48 = arith.constant 0 : index
    %52 = vector.load %arg2[%51, %c0_48] : memref<64x32xf32, #tpu.memory_space<vmem>>, vector<1x32xf32>
    %c4_49 = arith.constant 4 : index
    %c0_50 = arith.constant 0 : index
    %c0_51 = arith.constant 0 : index
    %53 = vector.load %arg12[%c4_49, %c0_50, %c0_51] : memref<8x8x32xf32, #tpu.memory_space<vmem>>, vector<1x1x32xf32>
    %54 = vector.shape_cast %53 : vector<1x1x32xf32> to vector<1x32xf32>
    %55 = vector.shape_cast %52 : vector<1x32xf32> to vector<1x1x32xf32>
    tpu.vector_store %arg12[%c4_49, %c0_50, %c0_51], %55 {strides = array<i32>} : memref<8x8x32xf32, #tpu.memory_space<vmem>>, vector<1x1x32xf32>,
    %c4_52 = arith.constant 4 : index
    %c1_53 = arith.constant 1 : index
    %56 = memref.load %arg0[%c4_52, %c1_53] : memref<8x2xi32, #tpu.memory_space<smem>>
    %57 = arith.index_cast %56 : i32 to index
    %c0_54 = arith.constant 0 : index
    %58 = vector.load %arg2[%57, %c0_54] : memref<64x32xf32, #tpu.memory_space<vmem>>, vector<1x32xf32>
    %c4_55 = arith.constant 4 : index
    %c1_56 = arith.constant 1 : index
    %c0_57 = arith.constant 0 : index
    %59 = vector.load %arg12[%c4_55, %c1_56, %c0_57] : memref<8x8x32xf32, #tpu.memory_space<vmem>>, vector<1x1x32xf32>
    %60 = vector.shape_cast %59 : vector<1x1x32xf32> to vector<1x32xf32>
    %61 = vector.shape_cast %58 : vector<1x32xf32> to vector<1x1x32xf32>
    tpu.vector_store %arg12[%c4_55, %c1_56, %c0_57], %61 {strides = array<i32>} : memref<8x8x32xf32, #tpu.memory_space<vmem>>, vector<1x1x32xf32>,
    %c5 = arith.constant 5 : index
    %c0_58 = arith.constant 0 : index
    %62 = memref.load %arg0[%c5, %c0_58] : memref<8x2xi32, #tpu.memory_space<smem>>
    %63 = arith.index_cast %62 : i32 to index
    %c0_59 = arith.constant 0 : index
    %64 = vector.load %arg2[%63, %c0_59] : memref<64x32xf32, #tpu.memory_space<vmem>>, vector<1x32xf32>
    %c5_60 = arith.constant 5 : index
    %c0_61 = arith.constant 0 : index
    %c0_62 = arith.constant 0 : index
    %65 = vector.load %arg12[%c5_60, %c0_61, %c0_62] : memref<8x8x32xf32, #tpu.memory_space<vmem>>, vector<1x1x32xf32>
    %66 = vector.shape_cast %65 : vector<1x1x32xf32> to vector<1x32xf32>
    %67 = vector.shape_cast %64 : vector<1x32xf32> to vector<1x1x32xf32>
    tpu.vector_store %arg12[%c5_60, %c0_61, %c0_62], %67 {strides = array<i32>} : memref<8x8x32xf32, #tpu.memory_space<vmem>>, vector<1x1x32xf32>,
    %c5_63 = arith.constant 5 : index
    %c1_64 = arith.constant 1 : index
    %68 = memref.load %arg0[%c5_63, %c1_64] : memref<8x2xi32, #tpu.memory_space<smem>>
    %69 = arith.index_cast %68 : i32 to index
    %c0_65 = arith.constant 0 : index
    %70 = vector.load %arg2[%69, %c0_65] : memref<64x32xf32, #tpu.memory_space<vmem>>, vector<1x32xf32>
    %c5_66 = arith.constant 5 : index
    %c1_67 = arith.constant 1 : index
    %c0_68 = arith.constant 0 : index
    %71 = vector.load %arg12[%c5_66, %c1_67, %c0_68] : memref<8x8x32xf32, #tpu.memory_space<vmem>>, vector<1x1x32xf32>
    %72 = vector.shape_cast %71 : vector<1x1x32xf32> to vector<1x32xf32>
    %73 = vector.shape_cast %70 : vector<1x32xf32> to vector<1x1x32xf32>
    tpu.vector_store %arg12[%c5_66, %c1_67, %c0_68], %73 {strides = array<i32>} : memref<8x8x32xf32, #tpu.memory_space<vmem>>, vector<1x1x32xf32>,
    %c6 = arith.constant 6 : index
    %c0_69 = arith.constant 0 : index
    %74 = memref.load %arg0[%c6, %c0_69] : memref<8x2xi32, #tpu.memory_space<smem>>
    %75 = arith.index_cast %74 : i32 to index
    %c0_70 = arith.constant 0 : index
    %76 = vector.load %arg2[%75, %c0_70] : memref<64x32xf32, #tpu.memory_space<vmem>>, vector<1x32xf32>
    %c6_71 = arith.constant 6 : index
    %c0_72 = arith.constant 0 : index
    %c0_73 = arith.constant 0 : index
    %77 = vector.load %arg12[%c6_71, %c0_72, %c0_73] : memref<8x8x32xf32, #tpu.memory_space<vmem>>, vector<1x1x32xf32>
    %78 = vector.shape_cast %77 : vector<1x1x32xf32> to vector<1x32xf32>
    %79 = vector.shape_cast %76 : vector<1x32xf32> to vector<1x1x32xf32>
    tpu.vector_store %arg12[%c6_71, %c0_72, %c0_73], %79 {strides = array<i32>} : memref<8x8x32xf32, #tpu.memory_space<vmem>>, vector<1x1x32xf32>,
    %c6_74 = arith.constant 6 : index
    %c1_75 = arith.constant 1 : index
    %80 = memref.load %arg0[%c6_74, %c1_75] : memref<8x2xi32, #tpu.memory_space<smem>>
    %81 = arith.index_cast %80 : i32 to index
    %c0_76 = arith.constant 0 : index
    %82 = vector.load %arg2[%81, %c0_76] : memref<64x32xf32, #tpu.memory_space<vmem>>, vector<1x32xf32>
    %c6_77 = arith.constant 6 : index
    %c1_78 = arith.constant 1 : index
    %c0_79 = arith.constant 0 : index
    %83 = vector.load %arg12[%c6_77, %c1_78, %c0_79] : memref<8x8x32xf32, #tpu.memory_space<vmem>>, vector<1x1x32xf32>
    %84 = vector.shape_cast %83 : vector<1x1x32xf32> to vector<1x32xf32>
    %85 = vector.shape_cast %82 : vector<1x32xf32> to vector<1x1x32xf32>
    tpu.vector_store %arg12[%c6_77, %c1_78, %c0_79], %85 {strides = array<i32>} : memref<8x8x32xf32, #tpu.memory_space<vmem>>, vector<1x1x32xf32>,
    %c7 = arith.constant 7 : index
    %c0_80 = arith.constant 0 : index
    %86 = memref.load %arg0[%c7, %c0_80] : memref<8x2xi32, #tpu.memory_space<smem>>
    %87 = arith.index_cast %86 : i32 to index
    %c0_81 = arith.constant 0 : index
    %88 = vector.load %arg2[%87, %c0_81] : memref<64x32xf32, #tpu.memory_space<vmem>>, vector<1x32xf32>
    %c7_82 = arith.constant 7 : index
    %c0_83 = arith.constant 0 : index
    %c0_84 = arith.constant 0 : index
    %89 = vector.load %arg12[%c7_82, %c0_83, %c0_84] : memref<8x8x32xf32, #tpu.memory_space<vmem>>, vector<1x1x32xf32>
    %90 = vector.shape_cast %89 : vector<1x1x32xf32> to vector<1x32xf32>
    %91 = vector.shape_cast %88 : vector<1x32xf32> to vector<1x1x32xf32>
    tpu.vector_store %arg12[%c7_82, %c0_83, %c0_84], %91 {strides = array<i32>} : memref<8x8x32xf32, #tpu.memory_space<vmem>>, vector<1x1x32xf32>,
    %c7_85 = arith.constant 7 : index
    %c1_86 = arith.constant 1 : index
    %92 = memref.load %arg0[%c7_85, %c1_86] : memref<8x2xi32, #tpu.memory_space<smem>>
    %93 = arith.index_cast %92 : i32 to index
    %c0_87 = arith.constant 0 : index
    %94 = vector.load %arg2[%93, %c0_87] : memref<64x32xf32, #tpu.memory_space<vmem>>, vector<1x32xf32>
    %c7_88 = arith.constant 7 : index
    %c1_89 = arith.constant 1 : index
    %c0_90 = arith.constant 0 : index
    %95 = vector.load %arg12[%c7_88, %c1_89, %c0_90] : memref<8x8x32xf32, #tpu.memory_space<vmem>>, vector<1x1x32xf32>
    %96 = vector.shape_cast %95 : vector<1x1x32xf32> to vector<1x32xf32>
    %97 = vector.shape_cast %94 : vector<1x32xf32> to vector<1x1x32xf32>
    tpu.vector_store %arg12[%c7_88, %c1_89, %c0_90], %97 {strides = array<i32>} : memref<8x8x32xf32, #tpu.memory_space<vmem>>, vector<1x1x32xf32>,
    %c0_91 = arith.constant 0 : index
    %c0_92 = arith.constant 0 : index
    %98 = vector.load %arg3[%c0_91, %c0_92] : memref<32x512xbf16, #tpu.memory_space<vmem>>, vector<32x512xbf16>
    %c0_93 = arith.constant 0 : index
    %c0_94 = arith.constant 0 : index
    %99 = vector.load %arg4[%c0_93, %c0_94] : memref<128x512xbf16, #tpu.memory_space<vmem>>, vector<128x512xbf16>
    %c0_95 = arith.constant 0 : index
    %c0_96 = arith.constant 0 : index
    %100 = vector.load %arg5[%c0_95, %c0_96] : memref<1x512xf32, #tpu.memory_space<vmem>>, vector<1x512xf32>
    %c0_97 = arith.constant 0 : index
    %c0_98 = arith.constant 0 : index
    %101 = vector.load %arg6[%c0_97, %c0_98] : memref<128x512xbf16, #tpu.memory_space<vmem>>, vector<128x512xbf16>
    %c0_99 = arith.constant 0 : index
    %c0_100 = arith.constant 0 : index
    %102 = vector.load %arg7[%c0_99, %c0_100] : memref<128x512xbf16, #tpu.memory_space<vmem>>, vector<128x512xbf16>
    %c0_101 = arith.constant 0 : index
    %c0_102 = arith.constant 0 : index
    %103 = vector.load %arg8[%c0_101, %c0_102] : memref<1x512xf32, #tpu.memory_space<vmem>>, vector<1x512xf32>
    %cst_103 = arith.constant 0.000000e+00 : f32
    %104 = vector.broadcast %cst_103 : f32 to vector<8x128xf32>
    %c0_104 = arith.constant 0 : index
    %c0_105 = arith.constant 0 : index
    %105 = vector.load %arg1[%c0_104, %c0_105] : memref<8x32xf32, #tpu.memory_space<vmem>>, vector<8x32xf32>
    %106 = arith.truncf %105 : vector<8x32xf32> to vector<8x32xbf16>
    %cst_106 = arith.constant dense<0.000000e+00> : vector<8x512xf32>
    %107 = tpu.matmul %106, %98, %cst_106 {dimension_numbers = #tpu.dot_dimension_numbers<[1], [0], [0], [1], [0, 0, 1, 1], [], []>} : vector<8x32xbf16>, vector<32x512xbf16>, vector<8x512xf32> -> vector<8x512xf32>
    %108 = vector.broadcast %100 : vector<1x512xf32> to vector<8x512xf32>
    %109 = arith.addf %107, %108 : vector<8x512xf32>
    %110 = vector.extract_strided_slice %109 {offsets = [0, 0], sizes = [8, 128], strides = [1, 1]} : vector<8x512xf32> to vector<8x128xf32>
    %111 = arith.negf %110 : vector<8x128xf32>
    %112 = math.exp %111 : vector<8x128xf32>
    %cst_107 = arith.constant 1.000000e+00 : f32
    %113 = vector.broadcast %cst_107 : f32 to vector<8x128xf32>
    %114 = arith.addf %113, %112 : vector<8x128xf32>
    %115 = arith.divf %113, %114 : vector<8x128xf32>
    %116 = vector.extract_strided_slice %109 {offsets = [0, 128], sizes = [8, 128], strides = [1, 1]} : vector<8x512xf32> to vector<8x128xf32>
    %117 = arith.negf %116 : vector<8x128xf32>
    %118 = math.exp %117 : vector<8x128xf32>
    %cst_108 = arith.constant 1.000000e+00 : f32
    %119 = vector.broadcast %cst_108 : f32 to vector<8x128xf32>
    %120 = arith.addf %119, %118 : vector<8x128xf32>
    %121 = arith.divf %119, %120 : vector<8x128xf32>
    %122 = vector.extract_strided_slice %109 {offsets = [0, 256], sizes = [8, 128], strides = [1, 1]} : vector<8x512xf32> to vector<8x128xf32>
    %123 = math.tanh %122 : vector<8x128xf32>
    %124 = vector.extract_strided_slice %109 {offsets = [0, 384], sizes = [8, 128], strides = [1, 1]} : vector<8x512xf32> to vector<8x128xf32>
    %125 = arith.negf %124 : vector<8x128xf32>
    %126 = math.exp %125 : vector<8x128xf32>
    %cst_109 = arith.constant 1.000000e+00 : f32
    %127 = vector.broadcast %cst_109 : f32 to vector<8x128xf32>
    %128 = arith.addf %127, %126 : vector<8x128xf32>
    %129 = arith.divf %127, %128 : vector<8x128xf32>
    %130 = arith.mulf %121, %104 : vector<8x128xf32>
    %131 = arith.mulf %115, %123 : vector<8x128xf32>
    %132 = arith.addf %130, %131 : vector<8x128xf32>
    %133 = math.tanh %132 : vector<8x128xf32>
    %134 = arith.mulf %129, %133 : vector<8x128xf32>
    %135 = arith.truncf %134 : vector<8x128xf32> to vector<8x128xbf16>
    %cst_110 = arith.constant dense<0.000000e+00> : vector<8x512xf32>
    %136 = tpu.matmul %135, %101, %cst_110 {dimension_numbers = #tpu.dot_dimension_numbers<[1], [0], [0], [1], [0, 0, 1, 1], [], []>} : vector<8x128xbf16>, vector<128x512xbf16>, vector<8x512xf32> -> vector<8x512xf32>
    %137 = vector.broadcast %103 : vector<1x512xf32> to vector<8x512xf32>
    %138 = arith.addf %136, %137 : vector<8x512xf32>
    %139 = vector.extract_strided_slice %138 {offsets = [0, 0], sizes = [8, 128], strides = [1, 1]} : vector<8x512xf32> to vector<8x128xf32>
    %140 = arith.negf %139 : vector<8x128xf32>
    %141 = math.exp %140 : vector<8x128xf32>
    %cst_111 = arith.constant 1.000000e+00 : f32
    %142 = vector.broadcast %cst_111 : f32 to vector<8x128xf32>
    %143 = arith.addf %142, %141 : vector<8x128xf32>
    %144 = arith.divf %142, %143 : vector<8x128xf32>
    %145 = vector.extract_strided_slice %138 {offsets = [0, 128], sizes = [8, 128], strides = [1, 1]} : vector<8x512xf32> to vector<8x128xf32>
    %146 = arith.negf %145 : vector<8x128xf32>
    %147 = math.exp %146 : vector<8x128xf32>
    %cst_112 = arith.constant 1.000000e+00 : f32
    %148 = vector.broadcast %cst_112 : f32 to vector<8x128xf32>
    %149 = arith.addf %148, %147 : vector<8x128xf32>
    %150 = arith.divf %148, %149 : vector<8x128xf32>
    %151 = vector.extract_strided_slice %138 {offsets = [0, 256], sizes = [8, 128], strides = [1, 1]} : vector<8x512xf32> to vector<8x128xf32>
    %152 = math.tanh %151 : vector<8x128xf32>
    %153 = vector.extract_strided_slice %138 {offsets = [0, 384], sizes = [8, 128], strides = [1, 1]} : vector<8x512xf32> to vector<8x128xf32>
    %154 = arith.negf %153 : vector<8x128xf32>
    %155 = math.exp %154 : vector<8x128xf32>
    %cst_113 = arith.constant 1.000000e+00 : f32
    %156 = vector.broadcast %cst_113 : f32 to vector<8x128xf32>
    %157 = arith.addf %156, %155 : vector<8x128xf32>
    %158 = arith.divf %156, %157 : vector<8x128xf32>
    %159 = arith.mulf %150, %104 : vector<8x128xf32>
    %160 = arith.mulf %144, %152 : vector<8x128xf32>
    %161 = arith.addf %159, %160 : vector<8x128xf32>
    %162 = math.tanh %161 : vector<8x128xf32>
    %163 = arith.mulf %158, %162 : vector<8x128xf32>
    %c0_114 = arith.constant 0 : index
    %c0_115 = arith.constant 0 : index
    %c0_116 = arith.constant 0 : index
    %164 = vector.load %arg12[%c0_114, %c0_115, %c0_116] : memref<8x8x32xf32, #tpu.memory_space<vmem>>, vector<8x8x32xf32>
    %165 = vector.shape_cast %164 : vector<8x8x32xf32> to vector<64x32xf32>
    %166 = arith.truncf %165 : vector<64x32xf32> to vector<64x32xbf16>
    %cst_117 = arith.constant dense<0.000000e+00> : vector<64x512xf32>
    %167 = tpu.matmul %166, %98, %cst_117 {dimension_numbers = #tpu.dot_dimension_numbers<[1], [0], [0], [1], [0, 0, 1, 1], [], []>} : vector<64x32xbf16>, vector<32x512xbf16>, vector<64x512xf32> -> vector<64x512xf32>
    %168 = vector.broadcast %100 : vector<1x512xf32> to vector<64x512xf32>
    %169 = arith.addf %167, %168 : vector<64x512xf32>
    %170 = vector.shape_cast %169 : vector<64x512xf32> to vector<8x8x512xf32>
    %c0_118 = arith.constant 0 : index
    %c0_119 = arith.constant 0 : index
    %c0_120 = arith.constant 0 : index
    %171 = vector.load %arg13[%c0_118, %c0_119, %c0_120] : memref<8x8x512xf32, #tpu.memory_space<vmem>>, vector<8x8x512xf32>
    tpu.vector_store %arg13[%c0_118, %c0_119, %c0_120], %170 {strides = array<i32>} : memref<8x8x512xf32, #tpu.memory_space<vmem>>, vector<8x8x512xf32>,
    %172 = vector.shape_cast %103 : vector<1x512xf32> to vector<1x512xf32>
    %173 = vector.broadcast %172 : vector<1x512xf32> to vector<8x512xf32>
    %c0_i32 = arith.constant 0 : i32
    %174 = arith.index_cast %c0_i32 : i32 to index
    %c0_121 = arith.constant 0 : index
    %c0_122 = arith.constant 0 : index
    %175 = vector.load %arg13[%174, %c0_121, %c0_122] : memref<8x8x512xf32, #tpu.memory_space<vmem>>, vector<1x8x512xf32>
    %176 = vector.shape_cast %175 : vector<1x8x512xf32> to vector<8x512xf32>
    %177 = arith.truncf %134 : vector<8x128xf32> to vector<8x128xbf16>
    %cst_123 = arith.constant dense<0.000000e+00> : vector<8x512xf32>
    %178 = tpu.matmul %177, %99, %cst_123 {dimension_numbers = #tpu.dot_dimension_numbers<[1], [0], [0], [1], [0, 0, 1, 1], [], []>} : vector<8x128xbf16>, vector<128x512xbf16>, vector<8x512xf32> -> vector<8x512xf32>
    %179 = arith.addf %176, %178 : vector<8x512xf32>
    %180 = vector.extract_strided_slice %179 {offsets = [0, 0], sizes = [8, 128], strides = [1, 1]} : vector<8x512xf32> to vector<8x128xf32>
    %181 = arith.negf %180 : vector<8x128xf32>
    %182 = math.exp %181 : vector<8x128xf32>
    %cst_124 = arith.constant 1.000000e+00 : f32
    %183 = vector.broadcast %cst_124 : f32 to vector<8x128xf32>
    %184 = arith.addf %183, %182 : vector<8x128xf32>
    %185 = arith.divf %183, %184 : vector<8x128xf32>
    %186 = vector.extract_strided_slice %179 {offsets = [0, 128], sizes = [8, 128], strides = [1, 1]} : vector<8x512xf32> to vector<8x128xf32>
    %187 = arith.negf %186 : vector<8x128xf32>
    %188 = math.exp %187 : vector<8x128xf32>
    %cst_125 = arith.constant 1.000000e+00 : f32
    %189 = vector.broadcast %cst_125 : f32 to vector<8x128xf32>
    %190 = arith.addf %189, %188 : vector<8x128xf32>
    %191 = arith.divf %189, %190 : vector<8x128xf32>
    %192 = vector.extract_strided_slice %179 {offsets = [0, 256], sizes = [8, 128], strides = [1, 1]} : vector<8x512xf32> to vector<8x128xf32>
    %193 = math.tanh %192 : vector<8x128xf32>
    %194 = vector.extract_strided_slice %179 {offsets = [0, 384], sizes = [8, 128], strides = [1, 1]} : vector<8x512xf32> to vector<8x128xf32>
    %195 = arith.negf %194 : vector<8x128xf32>
    %196 = math.exp %195 : vector<8x128xf32>
    %cst_126 = arith.constant 1.000000e+00 : f32
    %197 = vector.broadcast %cst_126 : f32 to vector<8x128xf32>
    %198 = arith.addf %197, %196 : vector<8x128xf32>
    %199 = arith.divf %197, %198 : vector<8x128xf32>
    %200 = arith.mulf %191, %132 : vector<8x128xf32>
    %201 = arith.mulf %185, %193 : vector<8x128xf32>
    %202 = arith.addf %200, %201 : vector<8x128xf32>
    %203 = math.tanh %202 : vector<8x128xf32>
    %204 = arith.mulf %199, %203 : vector<8x128xf32>
    %205 = arith.truncf %204 : vector<8x128xf32> to vector<8x128xbf16>
    %cst_127 = arith.constant dense<0.000000e+00> : vector<8x512xf32>
    %206 = tpu.matmul %205, %101, %cst_127 {dimension_numbers = #tpu.dot_dimension_numbers<[1], [0], [0], [1], [0, 0, 1, 1], [], []>} : vector<8x128xbf16>, vector<128x512xbf16>, vector<8x512xf32> -> vector<8x512xf32>
    %207 = arith.truncf %163 : vector<8x128xf32> to vector<8x128xbf16>
    %cst_128 = arith.constant dense<0.000000e+00> : vector<8x512xf32>
    %208 = tpu.matmul %207, %102, %cst_128 {dimension_numbers = #tpu.dot_dimension_numbers<[1], [0], [0], [1], [0, 0, 1, 1], [], []>} : vector<8x128xbf16>, vector<128x512xbf16>, vector<8x512xf32> -> vector<8x512xf32>
    %209 = arith.addf %206, %208 : vector<8x512xf32>
    %210 = arith.addf %209, %173 : vector<8x512xf32>
    %211 = vector.extract_strided_slice %210 {offsets = [0, 0], sizes = [8, 128], strides = [1, 1]} : vector<8x512xf32> to vector<8x128xf32>
    %212 = arith.negf %211 : vector<8x128xf32>
    %213 = math.exp %212 : vector<8x128xf32>
    %cst_129 = arith.constant 1.000000e+00 : f32
    %214 = vector.broadcast %cst_129 : f32 to vector<8x128xf32>
    %215 = arith.addf %214, %213 : vector<8x128xf32>
    %216 = arith.divf %214, %215 : vector<8x128xf32>
    %217 = vector.extract_strided_slice %210 {offsets = [0, 128], sizes = [8, 128], strides = [1, 1]} : vector<8x512xf32> to vector<8x128xf32>
    %218 = arith.negf %217 : vector<8x128xf32>
    %219 = math.exp %218 : vector<8x128xf32>
    %cst_130 = arith.constant 1.000000e+00 : f32
    %220 = vector.broadcast %cst_130 : f32 to vector<8x128xf32>
    %221 = arith.addf %220, %219 : vector<8x128xf32>
    %222 = arith.divf %220, %221 : vector<8x128xf32>
    %223 = vector.extract_strided_slice %210 {offsets = [0, 256], sizes = [8, 128], strides = [1, 1]} : vector<8x512xf32> to vector<8x128xf32>
    %224 = math.tanh %223 : vector<8x128xf32>
    %225 = vector.extract_strided_slice %210 {offsets = [0, 384], sizes = [8, 128], strides = [1, 1]} : vector<8x512xf32> to vector<8x128xf32>
    %226 = arith.negf %225 : vector<8x128xf32>
    %227 = math.exp %226 : vector<8x128xf32>
    %cst_131 = arith.constant 1.000000e+00 : f32
    %228 = vector.broadcast %cst_131 : f32 to vector<8x128xf32>
    %229 = arith.addf %228, %227 : vector<8x128xf32>
    %230 = arith.divf %228, %229 : vector<8x128xf32>
    %231 = arith.mulf %222, %161 : vector<8x128xf32>
    %232 = arith.mulf %216, %224 : vector<8x128xf32>
    %233 = arith.addf %231, %232 : vector<8x128xf32>
    %234 = math.tanh %233 : vector<8x128xf32>
    %235 = arith.mulf %230, %234 : vector<8x128xf32>
    %236 = arith.index_cast %c0_i32 : i32 to index
    %c0_132 = arith.constant 0 : index
    %c0_133 = arith.constant 0 : index
    %237 = vector.load %arg14[%236, %c0_132, %c0_133] : memref<8x8x128xf32, #tpu.memory_space<vmem>>, vector<1x8x128xf32>
    %238 = vector.shape_cast %237 : vector<1x8x128xf32> to vector<8x128xf32>
    %239 = vector.shape_cast %235 : vector<8x128xf32> to vector<1x8x128xf32>
    tpu.vector_store %arg14[%236, %c0_132, %c0_133], %239 {strides = array<i32>} : memref<8x8x128xf32, #tpu.memory_space<vmem>>, vector<1x8x128xf32>,
    %c1_i32 = arith.constant 1 : i32
    %240 = arith.index_cast %c1_i32 : i32 to index
    %c0_134 = arith.constant 0 : index
    %c0_135 = arith.constant 0 : index
    %241 = vector.load %arg13[%240, %c0_134, %c0_135] : memref<8x8x512xf32, #tpu.memory_space<vmem>>, vector<1x8x512xf32>
    %242 = vector.shape_cast %241 : vector<1x8x512xf32> to vector<8x512xf32>
    %243 = arith.truncf %204 : vector<8x128xf32> to vector<8x128xbf16>
    %cst_136 = arith.constant dense<0.000000e+00> : vector<8x512xf32>
    %244 = tpu.matmul %243, %99, %cst_136 {dimension_numbers = #tpu.dot_dimension_numbers<[1], [0], [0], [1], [0, 0, 1, 1], [], []>} : vector<8x128xbf16>, vector<128x512xbf16>, vector<8x512xf32> -> vector<8x512xf32>
    %245 = arith.addf %242, %244 : vector<8x512xf32>
    %246 = vector.extract_strided_slice %245 {offsets = [0, 0], sizes = [8, 128], strides = [1, 1]} : vector<8x512xf32> to vector<8x128xf32>
    %247 = arith.negf %246 : vector<8x128xf32>
    %248 = math.exp %247 : vector<8x128xf32>
    %cst_137 = arith.constant 1.000000e+00 : f32
    %249 = vector.broadcast %cst_137 : f32 to vector<8x128xf32>
    %250 = arith.addf %249, %248 : vector<8x128xf32>
    %251 = arith.divf %249, %250 : vector<8x128xf32>
    %252 = vector.extract_strided_slice %245 {offsets = [0, 128], sizes = [8, 128], strides = [1, 1]} : vector<8x512xf32> to vector<8x128xf32>
    %253 = arith.negf %252 : vector<8x128xf32>
    %254 = math.exp %253 : vector<8x128xf32>
    %cst_138 = arith.constant 1.000000e+00 : f32
    %255 = vector.broadcast %cst_138 : f32 to vector<8x128xf32>
    %256 = arith.addf %255, %254 : vector<8x128xf32>
    %257 = arith.divf %255, %256 : vector<8x128xf32>
    %258 = vector.extract_strided_slice %245 {offsets = [0, 256], sizes = [8, 128], strides = [1, 1]} : vector<8x512xf32> to vector<8x128xf32>
    %259 = math.tanh %258 : vector<8x128xf32>
    %260 = vector.extract_strided_slice %245 {offsets = [0, 384], sizes = [8, 128], strides = [1, 1]} : vector<8x512xf32> to vector<8x128xf32>
    %261 = arith.negf %260 : vector<8x128xf32>
    %262 = math.exp %261 : vector<8x128xf32>
    %cst_139 = arith.constant 1.000000e+00 : f32
    %263 = vector.broadcast %cst_139 : f32 to vector<8x128xf32>
    %264 = arith.addf %263, %262 : vector<8x128xf32>
    %265 = arith.divf %263, %264 : vector<8x128xf32>
    %266 = arith.mulf %257, %202 : vector<8x128xf32>
    %267 = arith.mulf %251, %259 : vector<8x128xf32>
    %268 = arith.addf %266, %267 : vector<8x128xf32>
    %269 = math.tanh %268 : vector<8x128xf32>
    %270 = arith.mulf %265, %269 : vector<8x128xf32>
    %271 = arith.truncf %270 : vector<8x128xf32> to vector<8x128xbf16>
    %cst_140 = arith.constant dense<0.000000e+00> : vector<8x512xf32>
    %272 = tpu.matmul %271, %101, %cst_140 {dimension_numbers = #tpu.dot_dimension_numbers<[1], [0], [0], [1], [0, 0, 1, 1], [], []>} : vector<8x128xbf16>, vector<128x512xbf16>, vector<8x512xf32> -> vector<8x512xf32>
    %273 = arith.truncf %235 : vector<8x128xf32> to vector<8x128xbf16>
    %cst_141 = arith.constant dense<0.000000e+00> : vector<8x512xf32>
    %274 = tpu.matmul %273, %102, %cst_141 {dimension_numbers = #tpu.dot_dimension_numbers<[1], [0], [0], [1], [0, 0, 1, 1], [], []>} : vector<8x128xbf16>, vector<128x512xbf16>, vector<8x512xf32> -> vector<8x512xf32>
    %275 = arith.addf %272, %274 : vector<8x512xf32>
    %276 = arith.addf %275, %173 : vector<8x512xf32>
    %277 = vector.extract_strided_slice %276 {offsets = [0, 0], sizes = [8, 128], strides = [1, 1]} : vector<8x512xf32> to vector<8x128xf32>
    %278 = arith.negf %277 : vector<8x128xf32>
    %279 = math.exp %278 : vector<8x128xf32>
    %cst_142 = arith.constant 1.000000e+00 : f32
    %280 = vector.broadcast %cst_142 : f32 to vector<8x128xf32>
    %281 = arith.addf %280, %279 : vector<8x128xf32>
    %282 = arith.divf %280, %281 : vector<8x128xf32>
    %283 = vector.extract_strided_slice %276 {offsets = [0, 128], sizes = [8, 128], strides = [1, 1]} : vector<8x512xf32> to vector<8x128xf32>
    %284 = arith.negf %283 : vector<8x128xf32>
    %285 = math.exp %284 : vector<8x128xf32>
    %cst_143 = arith.constant 1.000000e+00 : f32
    %286 = vector.broadcast %cst_143 : f32 to vector<8x128xf32>
    %287 = arith.addf %286, %285 : vector<8x128xf32>
    %288 = arith.divf %286, %287 : vector<8x128xf32>
    %289 = vector.extract_strided_slice %276 {offsets = [0, 256], sizes = [8, 128], strides = [1, 1]} : vector<8x512xf32> to vector<8x128xf32>
    %290 = math.tanh %289 : vector<8x128xf32>
    %291 = vector.extract_strided_slice %276 {offsets = [0, 384], sizes = [8, 128], strides = [1, 1]} : vector<8x512xf32> to vector<8x128xf32>
    %292 = arith.negf %291 : vector<8x128xf32>
    %293 = math.exp %292 : vector<8x128xf32>
    %cst_144 = arith.constant 1.000000e+00 : f32
    %294 = vector.broadcast %cst_144 : f32 to vector<8x128xf32>
    %295 = arith.addf %294, %293 : vector<8x128xf32>
    %296 = arith.divf %294, %295 : vector<8x128xf32>
    %297 = arith.mulf %288, %233 : vector<8x128xf32>
    %298 = arith.mulf %282, %290 : vector<8x128xf32>
    %299 = arith.addf %297, %298 : vector<8x128xf32>
    %300 = math.tanh %299 : vector<8x128xf32>
    %301 = arith.mulf %296, %300 : vector<8x128xf32>
    %302 = arith.index_cast %c1_i32 : i32 to index
    %c0_145 = arith.constant 0 : index
    %c0_146 = arith.constant 0 : index
    %303 = vector.load %arg14[%302, %c0_145, %c0_146] : memref<8x8x128xf32, #tpu.memory_space<vmem>>, vector<1x8x128xf32>
    %304 = vector.shape_cast %303 : vector<1x8x128xf32> to vector<8x128xf32>
    %305 = vector.shape_cast %301 : vector<8x128xf32> to vector<1x8x128xf32>
    tpu.vector_store %arg14[%302, %c0_145, %c0_146], %305 {strides = array<i32>} : memref<8x8x128xf32, #tpu.memory_space<vmem>>, vector<1x8x128xf32>,
    %c2_i32 = arith.constant 2 : i32
    %306 = arith.index_cast %c2_i32 : i32 to index
    %c0_147 = arith.constant 0 : index
    %c0_148 = arith.constant 0 : index
    %307 = vector.load %arg13[%306, %c0_147, %c0_148] : memref<8x8x512xf32, #tpu.memory_space<vmem>>, vector<1x8x512xf32>
    %308 = vector.shape_cast %307 : vector<1x8x512xf32> to vector<8x512xf32>
    %309 = arith.truncf %270 : vector<8x128xf32> to vector<8x128xbf16>
    %cst_149 = arith.constant dense<0.000000e+00> : vector<8x512xf32>
    %310 = tpu.matmul %309, %99, %cst_149 {dimension_numbers = #tpu.dot_dimension_numbers<[1], [0], [0], [1], [0, 0, 1, 1], [], []>} : vector<8x128xbf16>, vector<128x512xbf16>, vector<8x512xf32> -> vector<8x512xf32>
    %311 = arith.addf %308, %310 : vector<8x512xf32>
    %312 = vector.extract_strided_slice %311 {offsets = [0, 0], sizes = [8, 128], strides = [1, 1]} : vector<8x512xf32> to vector<8x128xf32>
    %313 = arith.negf %312 : vector<8x128xf32>
    %314 = math.exp %313 : vector<8x128xf32>
    %cst_150 = arith.constant 1.000000e+00 : f32
    %315 = vector.broadcast %cst_150 : f32 to vector<8x128xf32>
    %316 = arith.addf %315, %314 : vector<8x128xf32>
    %317 = arith.divf %315, %316 : vector<8x128xf32>
    %318 = vector.extract_strided_slice %311 {offsets = [0, 128], sizes = [8, 128], strides = [1, 1]} : vector<8x512xf32> to vector<8x128xf32>
    %319 = arith.negf %318 : vector<8x128xf32>
    %320 = math.exp %319 : vector<8x128xf32>
    %cst_151 = arith.constant 1.000000e+00 : f32
    %321 = vector.broadcast %cst_151 : f32 to vector<8x128xf32>
    %322 = arith.addf %321, %320 : vector<8x128xf32>
    %323 = arith.divf %321, %322 : vector<8x128xf32>
    %324 = vector.extract_strided_slice %311 {offsets = [0, 256], sizes = [8, 128], strides = [1, 1]} : vector<8x512xf32> to vector<8x128xf32>
    %325 = math.tanh %324 : vector<8x128xf32>
    %326 = vector.extract_strided_slice %311 {offsets = [0, 384], sizes = [8, 128], strides = [1, 1]} : vector<8x512xf32> to vector<8x128xf32>
    %327 = arith.negf %326 : vector<8x128xf32>
    %328 = math.exp %327 : vector<8x128xf32>
    %cst_152 = arith.constant 1.000000e+00 : f32
    %329 = vector.broadcast %cst_152 : f32 to vector<8x128xf32>
    %330 = arith.addf %329, %328 : vector<8x128xf32>
    %331 = arith.divf %329, %330 : vector<8x128xf32>
    %332 = arith.mulf %323, %268 : vector<8x128xf32>
    %333 = arith.mulf %317, %325 : vector<8x128xf32>
    %334 = arith.addf %332, %333 : vector<8x128xf32>
    %335 = math.tanh %334 : vector<8x128xf32>
    %336 = arith.mulf %331, %335 : vector<8x128xf32>
    %337 = arith.truncf %336 : vector<8x128xf32> to vector<8x128xbf16>
    %cst_153 = arith.constant dense<0.000000e+00> : vector<8x512xf32>
    %338 = tpu.matmul %337, %101, %cst_153 {dimension_numbers = #tpu.dot_dimension_numbers<[1], [0], [0], [1], [0, 0, 1, 1], [], []>} : vector<8x128xbf16>, vector<128x512xbf16>, vector<8x512xf32> -> vector<8x512xf32>
    %339 = arith.truncf %301 : vector<8x128xf32> to vector<8x128xbf16>
    %cst_154 = arith.constant dense<0.000000e+00> : vector<8x512xf32>
    %340 = tpu.matmul %339, %102, %cst_154 {dimension_numbers = #tpu.dot_dimension_numbers<[1], [0], [0], [1], [0, 0, 1, 1], [], []>} : vector<8x128xbf16>, vector<128x512xbf16>, vector<8x512xf32> -> vector<8x512xf32>
    %341 = arith.addf %338, %340 : vector<8x512xf32>
    %342 = arith.addf %341, %173 : vector<8x512xf32>
    %343 = vector.extract_strided_slice %342 {offsets = [0, 0], sizes = [8, 128], strides = [1, 1]} : vector<8x512xf32> to vector<8x128xf32>
    %344 = arith.negf %343 : vector<8x128xf32>
    %345 = math.exp %344 : vector<8x128xf32>
    %cst_155 = arith.constant 1.000000e+00 : f32
    %346 = vector.broadcast %cst_155 : f32 to vector<8x128xf32>
    %347 = arith.addf %346, %345 : vector<8x128xf32>
    %348 = arith.divf %346, %347 : vector<8x128xf32>
    %349 = vector.extract_strided_slice %342 {offsets = [0, 128], sizes = [8, 128], strides = [1, 1]} : vector<8x512xf32> to vector<8x128xf32>
    %350 = arith.negf %349 : vector<8x128xf32>
    %351 = math.exp %350 : vector<8x128xf32>
    %cst_156 = arith.constant 1.000000e+00 : f32
    %352 = vector.broadcast %cst_156 : f32 to vector<8x128xf32>
    %353 = arith.addf %352, %351 : vector<8x128xf32>
    %354 = arith.divf %352, %353 : vector<8x128xf32>
    %355 = vector.extract_strided_slice %342 {offsets = [0, 256], sizes = [8, 128], strides = [1, 1]} : vector<8x512xf32> to vector<8x128xf32>
    %356 = math.tanh %355 : vector<8x128xf32>
    %357 = vector.extract_strided_slice %342 {offsets = [0, 384], sizes = [8, 128], strides = [1, 1]} : vector<8x512xf32> to vector<8x128xf32>
    %358 = arith.negf %357 : vector<8x128xf32>
    %359 = math.exp %358 : vector<8x128xf32>
    %cst_157 = arith.constant 1.000000e+00 : f32
    %360 = vector.broadcast %cst_157 : f32 to vector<8x128xf32>
    %361 = arith.addf %360, %359 : vector<8x128xf32>
    %362 = arith.divf %360, %361 : vector<8x128xf32>
    %363 = arith.mulf %354, %299 : vector<8x128xf32>
    %364 = arith.mulf %348, %356 : vector<8x128xf32>
    %365 = arith.addf %363, %364 : vector<8x128xf32>
    %366 = math.tanh %365 : vector<8x128xf32>
    %367 = arith.mulf %362, %366 : vector<8x128xf32>
    %368 = arith.index_cast %c2_i32 : i32 to index
    %c0_158 = arith.constant 0 : index
    %c0_159 = arith.constant 0 : index
    %369 = vector.load %arg14[%368, %c0_158, %c0_159] : memref<8x8x128xf32, #tpu.memory_space<vmem>>, vector<1x8x128xf32>
    %370 = vector.shape_cast %369 : vector<1x8x128xf32> to vector<8x128xf32>
    %371 = vector.shape_cast %367 : vector<8x128xf32> to vector<1x8x128xf32>
    tpu.vector_store %arg14[%368, %c0_158, %c0_159], %371 {strides = array<i32>} : memref<8x8x128xf32, #tpu.memory_space<vmem>>, vector<1x8x128xf32>,
    %c3_i32 = arith.constant 3 : i32
    %372 = arith.index_cast %c3_i32 : i32 to index
    %c0_160 = arith.constant 0 : index
    %c0_161 = arith.constant 0 : index
    %373 = vector.load %arg13[%372, %c0_160, %c0_161] : memref<8x8x512xf32, #tpu.memory_space<vmem>>, vector<1x8x512xf32>
    %374 = vector.shape_cast %373 : vector<1x8x512xf32> to vector<8x512xf32>
    %375 = arith.truncf %336 : vector<8x128xf32> to vector<8x128xbf16>
    %cst_162 = arith.constant dense<0.000000e+00> : vector<8x512xf32>
    %376 = tpu.matmul %375, %99, %cst_162 {dimension_numbers = #tpu.dot_dimension_numbers<[1], [0], [0], [1], [0, 0, 1, 1], [], []>} : vector<8x128xbf16>, vector<128x512xbf16>, vector<8x512xf32> -> vector<8x512xf32>
    %377 = arith.addf %374, %376 : vector<8x512xf32>
    %378 = vector.extract_strided_slice %377 {offsets = [0, 0], sizes = [8, 128], strides = [1, 1]} : vector<8x512xf32> to vector<8x128xf32>
    %379 = arith.negf %378 : vector<8x128xf32>
    %380 = math.exp %379 : vector<8x128xf32>
    %cst_163 = arith.constant 1.000000e+00 : f32
    %381 = vector.broadcast %cst_163 : f32 to vector<8x128xf32>
    %382 = arith.addf %381, %380 : vector<8x128xf32>
    %383 = arith.divf %381, %382 : vector<8x128xf32>
    %384 = vector.extract_strided_slice %377 {offsets = [0, 128], sizes = [8, 128], strides = [1, 1]} : vector<8x512xf32> to vector<8x128xf32>
    %385 = arith.negf %384 : vector<8x128xf32>
    %386 = math.exp %385 : vector<8x128xf32>
    %cst_164 = arith.constant 1.000000e+00 : f32
    %387 = vector.broadcast %cst_164 : f32 to vector<8x128xf32>
    %388 = arith.addf %387, %386 : vector<8x128xf32>
    %389 = arith.divf %387, %388 : vector<8x128xf32>
    %390 = vector.extract_strided_slice %377 {offsets = [0, 256], sizes = [8, 128], strides = [1, 1]} : vector<8x512xf32> to vector<8x128xf32>
    %391 = math.tanh %390 : vector<8x128xf32>
    %392 = vector.extract_strided_slice %377 {offsets = [0, 384], sizes = [8, 128], strides = [1, 1]} : vector<8x512xf32> to vector<8x128xf32>
    %393 = arith.negf %392 : vector<8x128xf32>
    %394 = math.exp %393 : vector<8x128xf32>
    %cst_165 = arith.constant 1.000000e+00 : f32
    %395 = vector.broadcast %cst_165 : f32 to vector<8x128xf32>
    %396 = arith.addf %395, %394 : vector<8x128xf32>
    %397 = arith.divf %395, %396 : vector<8x128xf32>
    %398 = arith.mulf %389, %334 : vector<8x128xf32>
    %399 = arith.mulf %383, %391 : vector<8x128xf32>
    %400 = arith.addf %398, %399 : vector<8x128xf32>
    %401 = math.tanh %400 : vector<8x128xf32>
    %402 = arith.mulf %397, %401 : vector<8x128xf32>
    %403 = arith.truncf %402 : vector<8x128xf32> to vector<8x128xbf16>
    %cst_166 = arith.constant dense<0.000000e+00> : vector<8x512xf32>
    %404 = tpu.matmul %403, %101, %cst_166 {dimension_numbers = #tpu.dot_dimension_numbers<[1], [0], [0], [1], [0, 0, 1, 1], [], []>} : vector<8x128xbf16>, vector<128x512xbf16>, vector<8x512xf32> -> vector<8x512xf32>
    %405 = arith.truncf %367 : vector<8x128xf32> to vector<8x128xbf16>
    %cst_167 = arith.constant dense<0.000000e+00> : vector<8x512xf32>
    %406 = tpu.matmul %405, %102, %cst_167 {dimension_numbers = #tpu.dot_dimension_numbers<[1], [0], [0], [1], [0, 0, 1, 1], [], []>} : vector<8x128xbf16>, vector<128x512xbf16>, vector<8x512xf32> -> vector<8x512xf32>
    %407 = arith.addf %404, %406 : vector<8x512xf32>
    %408 = arith.addf %407, %173 : vector<8x512xf32>
    %409 = vector.extract_strided_slice %408 {offsets = [0, 0], sizes = [8, 128], strides = [1, 1]} : vector<8x512xf32> to vector<8x128xf32>
    %410 = arith.negf %409 : vector<8x128xf32>
    %411 = math.exp %410 : vector<8x128xf32>
    %cst_168 = arith.constant 1.000000e+00 : f32
    %412 = vector.broadcast %cst_168 : f32 to vector<8x128xf32>
    %413 = arith.addf %412, %411 : vector<8x128xf32>
    %414 = arith.divf %412, %413 : vector<8x128xf32>
    %415 = vector.extract_strided_slice %408 {offsets = [0, 128], sizes = [8, 128], strides = [1, 1]} : vector<8x512xf32> to vector<8x128xf32>
    %416 = arith.negf %415 : vector<8x128xf32>
    %417 = math.exp %416 : vector<8x128xf32>
    %cst_169 = arith.constant 1.000000e+00 : f32
    %418 = vector.broadcast %cst_169 : f32 to vector<8x128xf32>
    %419 = arith.addf %418, %417 : vector<8x128xf32>
    %420 = arith.divf %418, %419 : vector<8x128xf32>
    %421 = vector.extract_strided_slice %408 {offsets = [0, 256], sizes = [8, 128], strides = [1, 1]} : vector<8x512xf32> to vector<8x128xf32>
    %422 = math.tanh %421 : vector<8x128xf32>
    %423 = vector.extract_strided_slice %408 {offsets = [0, 384], sizes = [8, 128], strides = [1, 1]} : vector<8x512xf32> to vector<8x128xf32>
    %424 = arith.negf %423 : vector<8x128xf32>
    %425 = math.exp %424 : vector<8x128xf32>
    %cst_170 = arith.constant 1.000000e+00 : f32
    %426 = vector.broadcast %cst_170 : f32 to vector<8x128xf32>
    %427 = arith.addf %426, %425 : vector<8x128xf32>
    %428 = arith.divf %426, %427 : vector<8x128xf32>
    %429 = arith.mulf %420, %365 : vector<8x128xf32>
    %430 = arith.mulf %414, %422 : vector<8x128xf32>
    %431 = arith.addf %429, %430 : vector<8x128xf32>
    %432 = math.tanh %431 : vector<8x128xf32>
    %433 = arith.mulf %428, %432 : vector<8x128xf32>
    %434 = arith.index_cast %c3_i32 : i32 to index
    %c0_171 = arith.constant 0 : index
    %c0_172 = arith.constant 0 : index
    %435 = vector.load %arg14[%434, %c0_171, %c0_172] : memref<8x8x128xf32, #tpu.memory_space<vmem>>, vector<1x8x128xf32>
    %436 = vector.shape_cast %435 : vector<1x8x128xf32> to vector<8x128xf32>
    %437 = vector.shape_cast %433 : vector<8x128xf32> to vector<1x8x128xf32>
    tpu.vector_store %arg14[%434, %c0_171, %c0_172], %437 {strides = array<i32>} : memref<8x8x128xf32, #tpu.memory_space<vmem>>, vector<1x8x128xf32>,
    %c4_i32 = arith.constant 4 : i32
    %438 = arith.index_cast %c4_i32 : i32 to index
    %c0_173 = arith.constant 0 : index
    %c0_174 = arith.constant 0 : index
    %439 = vector.load %arg13[%438, %c0_173, %c0_174] : memref<8x8x512xf32, #tpu.memory_space<vmem>>, vector<1x8x512xf32>
    %440 = vector.shape_cast %439 : vector<1x8x512xf32> to vector<8x512xf32>
    %441 = arith.truncf %402 : vector<8x128xf32> to vector<8x128xbf16>
    %cst_175 = arith.constant dense<0.000000e+00> : vector<8x512xf32>
    %442 = tpu.matmul %441, %99, %cst_175 {dimension_numbers = #tpu.dot_dimension_numbers<[1], [0], [0], [1], [0, 0, 1, 1], [], []>} : vector<8x128xbf16>, vector<128x512xbf16>, vector<8x512xf32> -> vector<8x512xf32>
    %443 = arith.addf %440, %442 : vector<8x512xf32>
    %444 = vector.extract_strided_slice %443 {offsets = [0, 0], sizes = [8, 128], strides = [1, 1]} : vector<8x512xf32> to vector<8x128xf32>
    %445 = arith.negf %444 : vector<8x128xf32>
    %446 = math.exp %445 : vector<8x128xf32>
    %cst_176 = arith.constant 1.000000e+00 : f32
    %447 = vector.broadcast %cst_176 : f32 to vector<8x128xf32>
    %448 = arith.addf %447, %446 : vector<8x128xf32>
    %449 = arith.divf %447, %448 : vector<8x128xf32>
    %450 = vector.extract_strided_slice %443 {offsets = [0, 128], sizes = [8, 128], strides = [1, 1]} : vector<8x512xf32> to vector<8x128xf32>
    %451 = arith.negf %450 : vector<8x128xf32>
    %452 = math.exp %451 : vector<8x128xf32>
    %cst_177 = arith.constant 1.000000e+00 : f32
    %453 = vector.broadcast %cst_177 : f32 to vector<8x128xf32>
    %454 = arith.addf %453, %452 : vector<8x128xf32>
    %455 = arith.divf %453, %454 : vector<8x128xf32>
    %456 = vector.extract_strided_slice %443 {offsets = [0, 256], sizes = [8, 128], strides = [1, 1]} : vector<8x512xf32> to vector<8x128xf32>
    %457 = math.tanh %456 : vector<8x128xf32>
    %458 = vector.extract_strided_slice %443 {offsets = [0, 384], sizes = [8, 128], strides = [1, 1]} : vector<8x512xf32> to vector<8x128xf32>
    %459 = arith.negf %458 : vector<8x128xf32>
    %460 = math.exp %459 : vector<8x128xf32>
    %cst_178 = arith.constant 1.000000e+00 : f32
    %461 = vector.broadcast %cst_178 : f32 to vector<8x128xf32>
    %462 = arith.addf %461, %460 : vector<8x128xf32>
    %463 = arith.divf %461, %462 : vector<8x128xf32>
    %464 = arith.mulf %455, %400 : vector<8x128xf32>
    %465 = arith.mulf %449, %457 : vector<8x128xf32>
    %466 = arith.addf %464, %465 : vector<8x128xf32>
    %467 = math.tanh %466 : vector<8x128xf32>
    %468 = arith.mulf %463, %467 : vector<8x128xf32>
    %469 = arith.truncf %468 : vector<8x128xf32> to vector<8x128xbf16>
    %cst_179 = arith.constant dense<0.000000e+00> : vector<8x512xf32>
    %470 = tpu.matmul %469, %101, %cst_179 {dimension_numbers = #tpu.dot_dimension_numbers<[1], [0], [0], [1], [0, 0, 1, 1], [], []>} : vector<8x128xbf16>, vector<128x512xbf16>, vector<8x512xf32> -> vector<8x512xf32>
    %471 = arith.truncf %433 : vector<8x128xf32> to vector<8x128xbf16>
    %cst_180 = arith.constant dense<0.000000e+00> : vector<8x512xf32>
    %472 = tpu.matmul %471, %102, %cst_180 {dimension_numbers = #tpu.dot_dimension_numbers<[1], [0], [0], [1], [0, 0, 1, 1], [], []>} : vector<8x128xbf16>, vector<128x512xbf16>, vector<8x512xf32> -> vector<8x512xf32>
    %473 = arith.addf %470, %472 : vector<8x512xf32>
    %474 = arith.addf %473, %173 : vector<8x512xf32>
    %475 = vector.extract_strided_slice %474 {offsets = [0, 0], sizes = [8, 128], strides = [1, 1]} : vector<8x512xf32> to vector<8x128xf32>
    %476 = arith.negf %475 : vector<8x128xf32>
    %477 = math.exp %476 : vector<8x128xf32>
    %cst_181 = arith.constant 1.000000e+00 : f32
    %478 = vector.broadcast %cst_181 : f32 to vector<8x128xf32>
    %479 = arith.addf %478, %477 : vector<8x128xf32>
    %480 = arith.divf %478, %479 : vector<8x128xf32>
    %481 = vector.extract_strided_slice %474 {offsets = [0, 128], sizes = [8, 128], strides = [1, 1]} : vector<8x512xf32> to vector<8x128xf32>
    %482 = arith.negf %481 : vector<8x128xf32>
    %483 = math.exp %482 : vector<8x128xf32>
    %cst_182 = arith.constant 1.000000e+00 : f32
    %484 = vector.broadcast %cst_182 : f32 to vector<8x128xf32>
    %485 = arith.addf %484, %483 : vector<8x128xf32>
    %486 = arith.divf %484, %485 : vector<8x128xf32>
    %487 = vector.extract_strided_slice %474 {offsets = [0, 256], sizes = [8, 128], strides = [1, 1]} : vector<8x512xf32> to vector<8x128xf32>
    %488 = math.tanh %487 : vector<8x128xf32>
    %489 = vector.extract_strided_slice %474 {offsets = [0, 384], sizes = [8, 128], strides = [1, 1]} : vector<8x512xf32> to vector<8x128xf32>
    %490 = arith.negf %489 : vector<8x128xf32>
    %491 = math.exp %490 : vector<8x128xf32>
    %cst_183 = arith.constant 1.000000e+00 : f32
    %492 = vector.broadcast %cst_183 : f32 to vector<8x128xf32>
    %493 = arith.addf %492, %491 : vector<8x128xf32>
    %494 = arith.divf %492, %493 : vector<8x128xf32>
    %495 = arith.mulf %486, %431 : vector<8x128xf32>
    %496 = arith.mulf %480, %488 : vector<8x128xf32>
    %497 = arith.addf %495, %496 : vector<8x128xf32>
    %498 = math.tanh %497 : vector<8x128xf32>
    %499 = arith.mulf %494, %498 : vector<8x128xf32>
    %500 = arith.index_cast %c4_i32 : i32 to index
    %c0_184 = arith.constant 0 : index
    %c0_185 = arith.constant 0 : index
    %501 = vector.load %arg14[%500, %c0_184, %c0_185] : memref<8x8x128xf32, #tpu.memory_space<vmem>>, vector<1x8x128xf32>
    %502 = vector.shape_cast %501 : vector<1x8x128xf32> to vector<8x128xf32>
    %503 = vector.shape_cast %499 : vector<8x128xf32> to vector<1x8x128xf32>
    tpu.vector_store %arg14[%500, %c0_184, %c0_185], %503 {strides = array<i32>} : memref<8x8x128xf32, #tpu.memory_space<vmem>>, vector<1x8x128xf32>,
    %c5_i32 = arith.constant 5 : i32
    %504 = arith.index_cast %c5_i32 : i32 to index
    %c0_186 = arith.constant 0 : index
    %c0_187 = arith.constant 0 : index
    %505 = vector.load %arg13[%504, %c0_186, %c0_187] : memref<8x8x512xf32, #tpu.memory_space<vmem>>, vector<1x8x512xf32>
    %506 = vector.shape_cast %505 : vector<1x8x512xf32> to vector<8x512xf32>
    %507 = arith.truncf %468 : vector<8x128xf32> to vector<8x128xbf16>
    %cst_188 = arith.constant dense<0.000000e+00> : vector<8x512xf32>
    %508 = tpu.matmul %507, %99, %cst_188 {dimension_numbers = #tpu.dot_dimension_numbers<[1], [0], [0], [1], [0, 0, 1, 1], [], []>} : vector<8x128xbf16>, vector<128x512xbf16>, vector<8x512xf32> -> vector<8x512xf32>
    %509 = arith.addf %506, %508 : vector<8x512xf32>
    %510 = vector.extract_strided_slice %509 {offsets = [0, 0], sizes = [8, 128], strides = [1, 1]} : vector<8x512xf32> to vector<8x128xf32>
    %511 = arith.negf %510 : vector<8x128xf32>
    %512 = math.exp %511 : vector<8x128xf32>
    %cst_189 = arith.constant 1.000000e+00 : f32
    %513 = vector.broadcast %cst_189 : f32 to vector<8x128xf32>
    %514 = arith.addf %513, %512 : vector<8x128xf32>
    %515 = arith.divf %513, %514 : vector<8x128xf32>
    %516 = vector.extract_strided_slice %509 {offsets = [0, 128], sizes = [8, 128], strides = [1, 1]} : vector<8x512xf32> to vector<8x128xf32>
    %517 = arith.negf %516 : vector<8x128xf32>
    %518 = math.exp %517 : vector<8x128xf32>
    %cst_190 = arith.constant 1.000000e+00 : f32
    %519 = vector.broadcast %cst_190 : f32 to vector<8x128xf32>
    %520 = arith.addf %519, %518 : vector<8x128xf32>
    %521 = arith.divf %519, %520 : vector<8x128xf32>
    %522 = vector.extract_strided_slice %509 {offsets = [0, 256], sizes = [8, 128], strides = [1, 1]} : vector<8x512xf32> to vector<8x128xf32>
    %523 = math.tanh %522 : vector<8x128xf32>
    %524 = vector.extract_strided_slice %509 {offsets = [0, 384], sizes = [8, 128], strides = [1, 1]} : vector<8x512xf32> to vector<8x128xf32>
    %525 = arith.negf %524 : vector<8x128xf32>
    %526 = math.exp %525 : vector<8x128xf32>
    %cst_191 = arith.constant 1.000000e+00 : f32
    %527 = vector.broadcast %cst_191 : f32 to vector<8x128xf32>
    %528 = arith.addf %527, %526 : vector<8x128xf32>
    %529 = arith.divf %527, %528 : vector<8x128xf32>
    %530 = arith.mulf %521, %466 : vector<8x128xf32>
    %531 = arith.mulf %515, %523 : vector<8x128xf32>
    %532 = arith.addf %530, %531 : vector<8x128xf32>
    %533 = math.tanh %532 : vector<8x128xf32>
    %534 = arith.mulf %529, %533 : vector<8x128xf32>
    %535 = arith.truncf %534 : vector<8x128xf32> to vector<8x128xbf16>
    %cst_192 = arith.constant dense<0.000000e+00> : vector<8x512xf32>
    %536 = tpu.matmul %535, %101, %cst_192 {dimension_numbers = #tpu.dot_dimension_numbers<[1], [0], [0], [1], [0, 0, 1, 1], [], []>} : vector<8x128xbf16>, vector<128x512xbf16>, vector<8x512xf32> -> vector<8x512xf32>
    %537 = arith.truncf %499 : vector<8x128xf32> to vector<8x128xbf16>
    %cst_193 = arith.constant dense<0.000000e+00> : vector<8x512xf32>
    %538 = tpu.matmul %537, %102, %cst_193 {dimension_numbers = #tpu.dot_dimension_numbers<[1], [0], [0], [1], [0, 0, 1, 1], [], []>} : vector<8x128xbf16>, vector<128x512xbf16>, vector<8x512xf32> -> vector<8x512xf32>
    %539 = arith.addf %536, %538 : vector<8x512xf32>
    %540 = arith.addf %539, %173 : vector<8x512xf32>
    %541 = vector.extract_strided_slice %540 {offsets = [0, 0], sizes = [8, 128], strides = [1, 1]} : vector<8x512xf32> to vector<8x128xf32>
    %542 = arith.negf %541 : vector<8x128xf32>
    %543 = math.exp %542 : vector<8x128xf32>
    %cst_194 = arith.constant 1.000000e+00 : f32
    %544 = vector.broadcast %cst_194 : f32 to vector<8x128xf32>
    %545 = arith.addf %544, %543 : vector<8x128xf32>
    %546 = arith.divf %544, %545 : vector<8x128xf32>
    %547 = vector.extract_strided_slice %540 {offsets = [0, 128], sizes = [8, 128], strides = [1, 1]} : vector<8x512xf32> to vector<8x128xf32>
    %548 = arith.negf %547 : vector<8x128xf32>
    %549 = math.exp %548 : vector<8x128xf32>
    %cst_195 = arith.constant 1.000000e+00 : f32
    %550 = vector.broadcast %cst_195 : f32 to vector<8x128xf32>
    %551 = arith.addf %550, %549 : vector<8x128xf32>
    %552 = arith.divf %550, %551 : vector<8x128xf32>
    %553 = vector.extract_strided_slice %540 {offsets = [0, 256], sizes = [8, 128], strides = [1, 1]} : vector<8x512xf32> to vector<8x128xf32>
    %554 = math.tanh %553 : vector<8x128xf32>
    %555 = vector.extract_strided_slice %540 {offsets = [0, 384], sizes = [8, 128], strides = [1, 1]} : vector<8x512xf32> to vector<8x128xf32>
    %556 = arith.negf %555 : vector<8x128xf32>
    %557 = math.exp %556 : vector<8x128xf32>
    %cst_196 = arith.constant 1.000000e+00 : f32
    %558 = vector.broadcast %cst_196 : f32 to vector<8x128xf32>
    %559 = arith.addf %558, %557 : vector<8x128xf32>
    %560 = arith.divf %558, %559 : vector<8x128xf32>
    %561 = arith.mulf %552, %497 : vector<8x128xf32>
    %562 = arith.mulf %546, %554 : vector<8x128xf32>
    %563 = arith.addf %561, %562 : vector<8x128xf32>
    %564 = math.tanh %563 : vector<8x128xf32>
    %565 = arith.mulf %560, %564 : vector<8x128xf32>
    %566 = arith.index_cast %c5_i32 : i32 to index
    %c0_197 = arith.constant 0 : index
    %c0_198 = arith.constant 0 : index
    %567 = vector.load %arg14[%566, %c0_197, %c0_198] : memref<8x8x128xf32, #tpu.memory_space<vmem>>, vector<1x8x128xf32>
    %568 = vector.shape_cast %567 : vector<1x8x128xf32> to vector<8x128xf32>
    %569 = vector.shape_cast %565 : vector<8x128xf32> to vector<1x8x128xf32>
    tpu.vector_store %arg14[%566, %c0_197, %c0_198], %569 {strides = array<i32>} : memref<8x8x128xf32, #tpu.memory_space<vmem>>, vector<1x8x128xf32>,
    %c6_i32 = arith.constant 6 : i32
    %570 = arith.index_cast %c6_i32 : i32 to index
    %c0_199 = arith.constant 0 : index
    %c0_200 = arith.constant 0 : index
    %571 = vector.load %arg13[%570, %c0_199, %c0_200] : memref<8x8x512xf32, #tpu.memory_space<vmem>>, vector<1x8x512xf32>
    %572 = vector.shape_cast %571 : vector<1x8x512xf32> to vector<8x512xf32>
    %573 = arith.truncf %534 : vector<8x128xf32> to vector<8x128xbf16>
    %cst_201 = arith.constant dense<0.000000e+00> : vector<8x512xf32>
    %574 = tpu.matmul %573, %99, %cst_201 {dimension_numbers = #tpu.dot_dimension_numbers<[1], [0], [0], [1], [0, 0, 1, 1], [], []>} : vector<8x128xbf16>, vector<128x512xbf16>, vector<8x512xf32> -> vector<8x512xf32>
    %575 = arith.addf %572, %574 : vector<8x512xf32>
    %576 = vector.extract_strided_slice %575 {offsets = [0, 0], sizes = [8, 128], strides = [1, 1]} : vector<8x512xf32> to vector<8x128xf32>
    %577 = arith.negf %576 : vector<8x128xf32>
    %578 = math.exp %577 : vector<8x128xf32>
    %cst_202 = arith.constant 1.000000e+00 : f32
    %579 = vector.broadcast %cst_202 : f32 to vector<8x128xf32>
    %580 = arith.addf %579, %578 : vector<8x128xf32>
    %581 = arith.divf %579, %580 : vector<8x128xf32>
    %582 = vector.extract_strided_slice %575 {offsets = [0, 128], sizes = [8, 128], strides = [1, 1]} : vector<8x512xf32> to vector<8x128xf32>
    %583 = arith.negf %582 : vector<8x128xf32>
    %584 = math.exp %583 : vector<8x128xf32>
    %cst_203 = arith.constant 1.000000e+00 : f32
    %585 = vector.broadcast %cst_203 : f32 to vector<8x128xf32>
    %586 = arith.addf %585, %584 : vector<8x128xf32>
    %587 = arith.divf %585, %586 : vector<8x128xf32>
    %588 = vector.extract_strided_slice %575 {offsets = [0, 256], sizes = [8, 128], strides = [1, 1]} : vector<8x512xf32> to vector<8x128xf32>
    %589 = math.tanh %588 : vector<8x128xf32>
    %590 = vector.extract_strided_slice %575 {offsets = [0, 384], sizes = [8, 128], strides = [1, 1]} : vector<8x512xf32> to vector<8x128xf32>
    %591 = arith.negf %590 : vector<8x128xf32>
    %592 = math.exp %591 : vector<8x128xf32>
    %cst_204 = arith.constant 1.000000e+00 : f32
    %593 = vector.broadcast %cst_204 : f32 to vector<8x128xf32>
    %594 = arith.addf %593, %592 : vector<8x128xf32>
    %595 = arith.divf %593, %594 : vector<8x128xf32>
    %596 = arith.mulf %587, %532 : vector<8x128xf32>
    %597 = arith.mulf %581, %589 : vector<8x128xf32>
    %598 = arith.addf %596, %597 : vector<8x128xf32>
    %599 = math.tanh %598 : vector<8x128xf32>
    %600 = arith.mulf %595, %599 : vector<8x128xf32>
    %601 = arith.truncf %600 : vector<8x128xf32> to vector<8x128xbf16>
    %cst_205 = arith.constant dense<0.000000e+00> : vector<8x512xf32>
    %602 = tpu.matmul %601, %101, %cst_205 {dimension_numbers = #tpu.dot_dimension_numbers<[1], [0], [0], [1], [0, 0, 1, 1], [], []>} : vector<8x128xbf16>, vector<128x512xbf16>, vector<8x512xf32> -> vector<8x512xf32>
    %603 = arith.truncf %565 : vector<8x128xf32> to vector<8x128xbf16>
    %cst_206 = arith.constant dense<0.000000e+00> : vector<8x512xf32>
    %604 = tpu.matmul %603, %102, %cst_206 {dimension_numbers = #tpu.dot_dimension_numbers<[1], [0], [0], [1], [0, 0, 1, 1], [], []>} : vector<8x128xbf16>, vector<128x512xbf16>, vector<8x512xf32> -> vector<8x512xf32>
    %605 = arith.addf %602, %604 : vector<8x512xf32>
    %606 = arith.addf %605, %173 : vector<8x512xf32>
    %607 = vector.extract_strided_slice %606 {offsets = [0, 0], sizes = [8, 128], strides = [1, 1]} : vector<8x512xf32> to vector<8x128xf32>
    %608 = arith.negf %607 : vector<8x128xf32>
    %609 = math.exp %608 : vector<8x128xf32>
    %cst_207 = arith.constant 1.000000e+00 : f32
    %610 = vector.broadcast %cst_207 : f32 to vector<8x128xf32>
    %611 = arith.addf %610, %609 : vector<8x128xf32>
    %612 = arith.divf %610, %611 : vector<8x128xf32>
    %613 = vector.extract_strided_slice %606 {offsets = [0, 128], sizes = [8, 128], strides = [1, 1]} : vector<8x512xf32> to vector<8x128xf32>
    %614 = arith.negf %613 : vector<8x128xf32>
    %615 = math.exp %614 : vector<8x128xf32>
    %cst_208 = arith.constant 1.000000e+00 : f32
    %616 = vector.broadcast %cst_208 : f32 to vector<8x128xf32>
    %617 = arith.addf %616, %615 : vector<8x128xf32>
    %618 = arith.divf %616, %617 : vector<8x128xf32>
    %619 = vector.extract_strided_slice %606 {offsets = [0, 256], sizes = [8, 128], strides = [1, 1]} : vector<8x512xf32> to vector<8x128xf32>
    %620 = math.tanh %619 : vector<8x128xf32>
    %621 = vector.extract_strided_slice %606 {offsets = [0, 384], sizes = [8, 128], strides = [1, 1]} : vector<8x512xf32> to vector<8x128xf32>
    %622 = arith.negf %621 : vector<8x128xf32>
    %623 = math.exp %622 : vector<8x128xf32>
    %cst_209 = arith.constant 1.000000e+00 : f32
    %624 = vector.broadcast %cst_209 : f32 to vector<8x128xf32>
    %625 = arith.addf %624, %623 : vector<8x128xf32>
    %626 = arith.divf %624, %625 : vector<8x128xf32>
    %627 = arith.mulf %618, %563 : vector<8x128xf32>
    %628 = arith.mulf %612, %620 : vector<8x128xf32>
    %629 = arith.addf %627, %628 : vector<8x128xf32>
    %630 = math.tanh %629 : vector<8x128xf32>
    %631 = arith.mulf %626, %630 : vector<8x128xf32>
    %632 = arith.index_cast %c6_i32 : i32 to index
    %c0_210 = arith.constant 0 : index
    %c0_211 = arith.constant 0 : index
    %633 = vector.load %arg14[%632, %c0_210, %c0_211] : memref<8x8x128xf32, #tpu.memory_space<vmem>>, vector<1x8x128xf32>
    %634 = vector.shape_cast %633 : vector<1x8x128xf32> to vector<8x128xf32>
    %635 = vector.shape_cast %631 : vector<8x128xf32> to vector<1x8x128xf32>
    tpu.vector_store %arg14[%632, %c0_210, %c0_211], %635 {strides = array<i32>} : memref<8x8x128xf32, #tpu.memory_space<vmem>>, vector<1x8x128xf32>,
    %c7_i32 = arith.constant 7 : i32
    %636 = arith.index_cast %c7_i32 : i32 to index
    %c0_212 = arith.constant 0 : index
    %c0_213 = arith.constant 0 : index
    %637 = vector.load %arg13[%636, %c0_212, %c0_213] : memref<8x8x512xf32, #tpu.memory_space<vmem>>, vector<1x8x512xf32>
    %638 = vector.shape_cast %637 : vector<1x8x512xf32> to vector<8x512xf32>
    %639 = arith.truncf %600 : vector<8x128xf32> to vector<8x128xbf16>
    %cst_214 = arith.constant dense<0.000000e+00> : vector<8x512xf32>
    %640 = tpu.matmul %639, %99, %cst_214 {dimension_numbers = #tpu.dot_dimension_numbers<[1], [0], [0], [1], [0, 0, 1, 1], [], []>} : vector<8x128xbf16>, vector<128x512xbf16>, vector<8x512xf32> -> vector<8x512xf32>
    %641 = arith.addf %638, %640 : vector<8x512xf32>
    %642 = vector.extract_strided_slice %641 {offsets = [0, 0], sizes = [8, 128], strides = [1, 1]} : vector<8x512xf32> to vector<8x128xf32>
    %643 = arith.negf %642 : vector<8x128xf32>
    %644 = math.exp %643 : vector<8x128xf32>
    %cst_215 = arith.constant 1.000000e+00 : f32
    %645 = vector.broadcast %cst_215 : f32 to vector<8x128xf32>
    %646 = arith.addf %645, %644 : vector<8x128xf32>
    %647 = arith.divf %645, %646 : vector<8x128xf32>
    %648 = vector.extract_strided_slice %641 {offsets = [0, 128], sizes = [8, 128], strides = [1, 1]} : vector<8x512xf32> to vector<8x128xf32>
    %649 = arith.negf %648 : vector<8x128xf32>
    %650 = math.exp %649 : vector<8x128xf32>
    %cst_216 = arith.constant 1.000000e+00 : f32
    %651 = vector.broadcast %cst_216 : f32 to vector<8x128xf32>
    %652 = arith.addf %651, %650 : vector<8x128xf32>
    %653 = arith.divf %651, %652 : vector<8x128xf32>
    %654 = vector.extract_strided_slice %641 {offsets = [0, 256], sizes = [8, 128], strides = [1, 1]} : vector<8x512xf32> to vector<8x128xf32>
    %655 = math.tanh %654 : vector<8x128xf32>
    %656 = vector.extract_strided_slice %641 {offsets = [0, 384], sizes = [8, 128], strides = [1, 1]} : vector<8x512xf32> to vector<8x128xf32>
    %657 = arith.negf %656 : vector<8x128xf32>
    %658 = math.exp %657 : vector<8x128xf32>
    %cst_217 = arith.constant 1.000000e+00 : f32
    %659 = vector.broadcast %cst_217 : f32 to vector<8x128xf32>
    %660 = arith.addf %659, %658 : vector<8x128xf32>
    %661 = arith.divf %659, %660 : vector<8x128xf32>
    %662 = arith.mulf %653, %598 : vector<8x128xf32>
    %663 = arith.mulf %647, %655 : vector<8x128xf32>
    %664 = arith.addf %662, %663 : vector<8x128xf32>
    %665 = math.tanh %664 : vector<8x128xf32>
    %666 = arith.mulf %661, %665 : vector<8x128xf32>
    %667 = arith.truncf %666 : vector<8x128xf32> to vector<8x128xbf16>
    %cst_218 = arith.constant dense<0.000000e+00> : vector<8x512xf32>
    %668 = tpu.matmul %667, %101, %cst_218 {dimension_numbers = #tpu.dot_dimension_numbers<[1], [0], [0], [1], [0, 0, 1, 1], [], []>} : vector<8x128xbf16>, vector<128x512xbf16>, vector<8x512xf32> -> vector<8x512xf32>
    %669 = arith.truncf %631 : vector<8x128xf32> to vector<8x128xbf16>
    %cst_219 = arith.constant dense<0.000000e+00> : vector<8x512xf32>
    %670 = tpu.matmul %669, %102, %cst_219 {dimension_numbers = #tpu.dot_dimension_numbers<[1], [0], [0], [1], [0, 0, 1, 1], [], []>} : vector<8x128xbf16>, vector<128x512xbf16>, vector<8x512xf32> -> vector<8x512xf32>
    %671 = arith.addf %668, %670 : vector<8x512xf32>
    %672 = arith.addf %671, %173 : vector<8x512xf32>
    %673 = vector.extract_strided_slice %672 {offsets = [0, 0], sizes = [8, 128], strides = [1, 1]} : vector<8x512xf32> to vector<8x128xf32>
    %674 = arith.negf %673 : vector<8x128xf32>
    %675 = math.exp %674 : vector<8x128xf32>
    %cst_220 = arith.constant 1.000000e+00 : f32
    %676 = vector.broadcast %cst_220 : f32 to vector<8x128xf32>
    %677 = arith.addf %676, %675 : vector<8x128xf32>
    %678 = arith.divf %676, %677 : vector<8x128xf32>
    %679 = vector.extract_strided_slice %672 {offsets = [0, 128], sizes = [8, 128], strides = [1, 1]} : vector<8x512xf32> to vector<8x128xf32>
    %680 = arith.negf %679 : vector<8x128xf32>
    %681 = math.exp %680 : vector<8x128xf32>
    %cst_221 = arith.constant 1.000000e+00 : f32
    %682 = vector.broadcast %cst_221 : f32 to vector<8x128xf32>
    %683 = arith.addf %682, %681 : vector<8x128xf32>
    %684 = arith.divf %682, %683 : vector<8x128xf32>
    %685 = vector.extract_strided_slice %672 {offsets = [0, 256], sizes = [8, 128], strides = [1, 1]} : vector<8x512xf32> to vector<8x128xf32>
    %686 = math.tanh %685 : vector<8x128xf32>
    %687 = vector.extract_strided_slice %672 {offsets = [0, 384], sizes = [8, 128], strides = [1, 1]} : vector<8x512xf32> to vector<8x128xf32>
    %688 = arith.negf %687 : vector<8x128xf32>
    %689 = math.exp %688 : vector<8x128xf32>
    %cst_222 = arith.constant 1.000000e+00 : f32
    %690 = vector.broadcast %cst_222 : f32 to vector<8x128xf32>
    %691 = arith.addf %690, %689 : vector<8x128xf32>
    %692 = arith.divf %690, %691 : vector<8x128xf32>
    %693 = arith.mulf %684, %629 : vector<8x128xf32>
    %694 = arith.mulf %678, %686 : vector<8x128xf32>
    %695 = arith.addf %693, %694 : vector<8x128xf32>
    %696 = math.tanh %695 : vector<8x128xf32>
    %697 = arith.mulf %692, %696 : vector<8x128xf32>
    %698 = arith.index_cast %c7_i32 : i32 to index
    %c0_223 = arith.constant 0 : index
    %c0_224 = arith.constant 0 : index
    %699 = vector.load %arg14[%698, %c0_223, %c0_224] : memref<8x8x128xf32, #tpu.memory_space<vmem>>, vector<1x8x128xf32>
    %700 = vector.shape_cast %699 : vector<1x8x128xf32> to vector<8x128xf32>
    %701 = vector.shape_cast %697 : vector<8x128xf32> to vector<1x8x128xf32>
    tpu.vector_store %arg14[%698, %c0_223, %c0_224], %701 {strides = array<i32>} : memref<8x8x128xf32, #tpu.memory_space<vmem>>, vector<1x8x128xf32>,
    %c8_i32 = arith.constant 8 : i32
    %c0_225 = arith.constant 0 : index
    %c0_226 = arith.constant 0 : index
    %702 = vector.load %arg9[%c0_225, %c0_226] : memref<128x128xbf16, #tpu.memory_space<vmem>>, vector<128x128xbf16>
    %c0_227 = arith.constant 0 : index
    %c0_228 = arith.constant 0 : index
    %703 = vector.load %arg10[%c0_227, %c0_228] : memref<1x128xf32, #tpu.memory_space<vmem>>, vector<1x128xf32>
    %c0_229 = arith.constant 0 : index
    %c0_230 = arith.constant 0 : index
    %c0_231 = arith.constant 0 : index
    %704 = vector.load %arg14[%c0_229, %c0_230, %c0_231] : memref<8x8x128xf32, #tpu.memory_space<vmem>>, vector<8x8x128xf32>
    %705 = vector.shape_cast %704 : vector<8x8x128xf32> to vector<64x128xf32>
    %706 = arith.truncf %705 : vector<64x128xf32> to vector<64x128xbf16>
    %cst_232 = arith.constant dense<0.000000e+00> : vector<64x128xf32>
    %707 = tpu.matmul %706, %702, %cst_232 {dimension_numbers = #tpu.dot_dimension_numbers<[1], [0], [0], [1], [0, 0, 1, 1], [], []>} : vector<64x128xbf16>, vector<128x128xbf16>, vector<64x128xf32> -> vector<64x128xf32>
    %708 = vector.broadcast %703 : vector<1x128xf32> to vector<64x128xf32>
    %709 = arith.addf %707, %708 : vector<64x128xf32>
    %710 = vector.shape_cast %709 : vector<64x128xf32> to vector<8x8x128xf32>
    %711 = vector.extract_strided_slice %710 {offsets = [0, 0, 0], sizes = [1, 8, 128], strides = [1, 1, 1]} : vector<8x8x128xf32> to vector<1x8x128xf32>
    %712 = vector.shape_cast %711 : vector<1x8x128xf32> to vector<8x128xf32>
    %c0_233 = arith.constant 0 : index
    %c0_234 = arith.constant 0 : index
    %c0_235 = arith.constant 0 : index
    %713 = vector.load %arg11[%c0_233, %c0_234, %c0_235] : memref<8x8x128xf32, #tpu.memory_space<vmem>>, vector<8x1x128xf32>
    %714 = vector.shape_cast %713 : vector<8x1x128xf32> to vector<8x128xf32>
    %715 = vector.shape_cast %712 : vector<8x128xf32> to vector<8x1x128xf32>
    tpu.vector_store %arg11[%c0_233, %c0_234, %c0_235], %715 {strides = array<i32>} : memref<8x8x128xf32, #tpu.memory_space<vmem>>, vector<8x1x128xf32>,
    %716 = vector.extract_strided_slice %710 {offsets = [1, 0, 0], sizes = [1, 8, 128], strides = [1, 1, 1]} : vector<8x8x128xf32> to vector<1x8x128xf32>
    %717 = vector.shape_cast %716 : vector<1x8x128xf32> to vector<8x128xf32>
    %c0_236 = arith.constant 0 : index
    %c1_237 = arith.constant 1 : index
    %c0_238 = arith.constant 0 : index
    %718 = vector.load %arg11[%c0_236, %c1_237, %c0_238] : memref<8x8x128xf32, #tpu.memory_space<vmem>>, vector<8x1x128xf32>
    %719 = vector.shape_cast %718 : vector<8x1x128xf32> to vector<8x128xf32>
    %720 = vector.shape_cast %717 : vector<8x128xf32> to vector<8x1x128xf32>
    tpu.vector_store %arg11[%c0_236, %c1_237, %c0_238], %720 {strides = array<i32>} : memref<8x8x128xf32, #tpu.memory_space<vmem>>, vector<8x1x128xf32>,
    %721 = vector.extract_strided_slice %710 {offsets = [2, 0, 0], sizes = [1, 8, 128], strides = [1, 1, 1]} : vector<8x8x128xf32> to vector<1x8x128xf32>
    %722 = vector.shape_cast %721 : vector<1x8x128xf32> to vector<8x128xf32>
    %c0_239 = arith.constant 0 : index
    %c2_240 = arith.constant 2 : index
    %c0_241 = arith.constant 0 : index
    %723 = vector.load %arg11[%c0_239, %c2_240, %c0_241] : memref<8x8x128xf32, #tpu.memory_space<vmem>>, vector<8x1x128xf32>
    %724 = vector.shape_cast %723 : vector<8x1x128xf32> to vector<8x128xf32>
    %725 = vector.shape_cast %722 : vector<8x128xf32> to vector<8x1x128xf32>
    tpu.vector_store %arg11[%c0_239, %c2_240, %c0_241], %725 {strides = array<i32>} : memref<8x8x128xf32, #tpu.memory_space<vmem>>, vector<8x1x128xf32>,
    %726 = vector.extract_strided_slice %710 {offsets = [3, 0, 0], sizes = [1, 8, 128], strides = [1, 1, 1]} : vector<8x8x128xf32> to vector<1x8x128xf32>
    %727 = vector.shape_cast %726 : vector<1x8x128xf32> to vector<8x128xf32>
    %c0_242 = arith.constant 0 : index
    %c3_243 = arith.constant 3 : index
    %c0_244 = arith.constant 0 : index
    %728 = vector.load %arg11[%c0_242, %c3_243, %c0_244] : memref<8x8x128xf32, #tpu.memory_space<vmem>>, vector<8x1x128xf32>
    %729 = vector.shape_cast %728 : vector<8x1x128xf32> to vector<8x128xf32>
    %730 = vector.shape_cast %727 : vector<8x128xf32> to vector<8x1x128xf32>
    tpu.vector_store %arg11[%c0_242, %c3_243, %c0_244], %730 {strides = array<i32>} : memref<8x8x128xf32, #tpu.memory_space<vmem>>, vector<8x1x128xf32>,
    %731 = vector.extract_strided_slice %710 {offsets = [4, 0, 0], sizes = [1, 8, 128], strides = [1, 1, 1]} : vector<8x8x128xf32> to vector<1x8x128xf32>
    %732 = vector.shape_cast %731 : vector<1x8x128xf32> to vector<8x128xf32>
    %c0_245 = arith.constant 0 : index
    %c4_246 = arith.constant 4 : index
    %c0_247 = arith.constant 0 : index
    %733 = vector.load %arg11[%c0_245, %c4_246, %c0_247] : memref<8x8x128xf32, #tpu.memory_space<vmem>>, vector<8x1x128xf32>
    %734 = vector.shape_cast %733 : vector<8x1x128xf32> to vector<8x128xf32>
    %735 = vector.shape_cast %732 : vector<8x128xf32> to vector<8x1x128xf32>
    tpu.vector_store %arg11[%c0_245, %c4_246, %c0_247], %735 {strides = array<i32>} : memref<8x8x128xf32, #tpu.memory_space<vmem>>, vector<8x1x128xf32>,
    %736 = vector.extract_strided_slice %710 {offsets = [5, 0, 0], sizes = [1, 8, 128], strides = [1, 1, 1]} : vector<8x8x128xf32> to vector<1x8x128xf32>
    %737 = vector.shape_cast %736 : vector<1x8x128xf32> to vector<8x128xf32>
    %c0_248 = arith.constant 0 : index
    %c5_249 = arith.constant 5 : index
    %c0_250 = arith.constant 0 : index
    %738 = vector.load %arg11[%c0_248, %c5_249, %c0_250] : memref<8x8x128xf32, #tpu.memory_space<vmem>>, vector<8x1x128xf32>
    %739 = vector.shape_cast %738 : vector<8x1x128xf32> to vector<8x128xf32>
    %740 = vector.shape_cast %737 : vector<8x128xf32> to vector<8x1x128xf32>
    tpu.vector_store %arg11[%c0_248, %c5_249, %c0_250], %740 {strides = array<i32>} : memref<8x8x128xf32, #tpu.memory_space<vmem>>, vector<8x1x128xf32>,
    %741 = vector.extract_strided_slice %710 {offsets = [6, 0, 0], sizes = [1, 8, 128], strides = [1, 1, 1]} : vector<8x8x128xf32> to vector<1x8x128xf32>
    %742 = vector.shape_cast %741 : vector<1x8x128xf32> to vector<8x128xf32>
    %c0_251 = arith.constant 0 : index
    %c6_252 = arith.constant 6 : index
    %c0_253 = arith.constant 0 : index
    %743 = vector.load %arg11[%c0_251, %c6_252, %c0_253] : memref<8x8x128xf32, #tpu.memory_space<vmem>>, vector<8x1x128xf32>
    %744 = vector.shape_cast %743 : vector<8x1x128xf32> to vector<8x128xf32>
    %745 = vector.shape_cast %742 : vector<8x128xf32> to vector<8x1x128xf32>
    tpu.vector_store %arg11[%c0_251, %c6_252, %c0_253], %745 {strides = array<i32>} : memref<8x8x128xf32, #tpu.memory_space<vmem>>, vector<8x1x128xf32>,
    %746 = vector.extract_strided_slice %710 {offsets = [7, 0, 0], sizes = [1, 8, 128], strides = [1, 1, 1]} : vector<8x8x128xf32> to vector<1x8x128xf32>
    %747 = vector.shape_cast %746 : vector<1x8x128xf32> to vector<8x128xf32>
    %c0_254 = arith.constant 0 : index
    %c7_255 = arith.constant 7 : index
    %c0_256 = arith.constant 0 : index
    %748 = vector.load %arg11[%c0_254, %c7_255, %c0_256] : memref<8x8x128xf32, #tpu.memory_space<vmem>>, vector<8x1x128xf32>
    %749 = vector.shape_cast %748 : vector<8x1x128xf32> to vector<8x128xf32>
    %750 = vector.shape_cast %747 : vector<8x128xf32> to vector<8x1x128xf32>
    tpu.vector_store %arg11[%c0_254, %c7_255, %c0_256], %750 {strides = array<i32>} : memref<8x8x128xf32, #tpu.memory_space<vmem>>, vector<8x1x128xf32>,
    return
  }
}

</mosaic_0001>

<bundles_post_ra>
// kernel: tpu_custom_call.1
= control target key start
LH: loop header
LB: loop body
LE: loop exit
PB: predicated region body
PF: predicated region fallthrough
CT: control target
= control target key end

     0   :  { %16 = vsyncpa [#allocation8], 0  ;;  %s7548_s0 = inlined_call_operand.vmem [shape: s32[8,2], index: 0, kind: input, shape index: {}]   ;;  %s7549_s1 = inlined_call_operand.vmem [shape: f32[8,32], index: 1, kind: input, shape index: {}]   ;;  %s7550_s2 = inlined_call_operand.vmem [shape: f32[64,32], index: 2, kind: input, shape index: {}]   ;;  %s7551_s3 = inlined_call_operand.vmem [shape: bf16[32,512], index: 3, kind: input, shape index: {}]   ;;  %s7552_s4 = inlined_call_operand.hbm [shape: bf16[128,512], index: 4, kind: input, shape index: {}]   ;;  %s7553_s5 = inlined_call_operand.vmem [shape: f32[1,512], index: 5, kind: input, shape index: {}]   ;;  %s7554_s6 = inlined_call_operand.hbm [shape: bf16[128,512], index: 6, kind: input, shape index: {}]   ;;  %s7555_s7 = inlined_call_operand.hbm [shape: bf16[128,512], index: 7, kind: input, shape index: {}]   ;;  %s7556_s8 = inlined_call_operand.vmem [shape: f32[1,512], index: 8, kind: input, shape index: {}]   ;;  %s7557_s9 = inlined_call_operand.hbm [shape: bf16[128,128], index: 9, kind: input, shape index: {}]   ;;  %s7558_s10 = inlined_call_operand.vmem [shape: f32[1,128], index: 10, kind: input, shape index: {}]   ;;  %s7559_s11 = inlined_call_operand.hbm [shape: f32[8,8,128], index: 11, kind: output, shape index: {}]  }
   0x1   :  { %17 = vsyncpa [#allocation6], 0 }
   0x2   :  { %18 = vsyncpa [#allocation11], 0 }
   0x3   :  { %19 = vsyncpa [#allocation14], 0 }
   0x4   :  { %20 = vsyncpa [#allocation7], 0  ;;  %s27_s19 = sshll.u32 %s7548_s0, 4  ;;  %s5536_s20 = smov [#allocation10]   ;;  %s28_s19 = int_to_ptr.vmem [resolvable:$true] %s27_s19 }
   0x5   :  { %s56_s21 = sshll.u32 %s5536_s20, 4  ;;  %s57_s21 = int_to_ptr.vmem [resolvable:$true] %s56_s21 }
   0x6   :  { %s5422_s22 = scalar_lea.vmem %s57_s21, 4096  ;;  %p5427_p1 = scmp.lt.s32.totalorder %s57_s21, %s57_s21 }
   0x7   :  { %p5423_p0 = scmp.ne.s32.totalorder %s57_s21, %s5422_s22  ;;  %p5428_p2 = scmp.lt.s32.totalorder %s5422_s22, %s5422_s22 }
   0x9   :  { %p5429_p3 = por %p5428_p2, %p5427_p1 }
   0xb   :  { %p5430_p4 = pnand %p5429_p3, %p5423_p0 }
   0xd   :  { %5433 = shalt.err (!%p5430_p4)
}
   0xe   :  { %s5537_s23 = smov 256   ;;  %s5538_s24 = smov 16  }
   0xf   :  { %62 = dma.hbm_to_vmem [thread:$0]  %s7554_s6, 4096, %s57_s21, [#allocation11], %s5537_s23, %s5537_s23, %s5538_s24  }
  0x10   :  { %s5434_s0 = scalar_lea.vmem %s28_s19, 128  ;;  %p5439_p6 = scmp.lt.s32.totalorder %s28_s19, %s28_s19 }
  0x11   :  { %p5435_p5 = scmp.ne.s32.totalorder %s28_s19, %s5434_s0  ;;  %p5440_p7 = scmp.lt.s32.totalorder %s5434_s0, %s5434_s0 }
  0x13   :  { %p5441_p8 = por %p5440_p7, %p5439_p6 }
  0x15   :  { %p5442_p9 = pnand %p5441_p8, %p5435_p5 }
  0x17   :  { %5445 = shalt.err (!%p5442_p9)
}
  0x18   :  { %s5539_s27 = smov [#allocation5]   ;;  %s5540_s28 = smov [#allocation9]  }
  0x19   :  { %30 = dma.vmem_to_smem %s28_s19, 128, %s5539_s27, [#allocation8]  }
  0x1a   :  { %s42_s29 = sshll.u32 %s5540_s28, 4  ;;  %s5541_s30 = smov [#allocation12]   ;;  %s43_s29 = int_to_ptr.vmem [resolvable:$true] %s42_s29 }
  0x1b   :  { %s68_s12 = sshll.u32 %s5541_s30, 4  ;;  %s5454_s13 = scalar_lea.vmem %s43_s29, 4096  ;;  %s69_s12 = int_to_ptr.vmem [resolvable:$true] %s68_s12 }
  0x1c   :  { %p5455_p10 = scmp.ne.s32.totalorder %s43_s29, %s5454_s13  ;;  %p5459_p11 = scmp.lt.s32.totalorder %s43_s29, %s43_s29 }
  0x1d   :  { %p5460_p12 = scmp.lt.s32.totalorder %s5454_s13, %s5454_s13 }
  0x1f   :  { %p5461_p13 = por %p5460_p12, %p5459_p11 }
  0x21   :  { %p5462_p0 = pnand %p5461_p13, %p5455_p10 }
  0x23   :  { %5465 = shalt.err (!%p5462_p0)
}
  0x24   :  { %48 = dma.hbm_to_vmem [thread:$0]  %s7552_s4, 4096, %s43_s29, [#allocation6], %s5537_s23, %s5537_s23, %s5538_s24  }
  0x25   :  { %s5474_s15 = scalar_lea.vmem %s69_s12, 4096  ;;  %p5479_p2 = scmp.lt.s32.totalorder %s69_s12, %s69_s12 }
  0x26   :  { %p5475_p1 = scmp.ne.s32.totalorder %s69_s12, %s5474_s15  ;;  %p5480_p3 = scmp.lt.s32.totalorder %s5474_s15, %s5474_s15 }
  0x28   :  { %p5481_p4 = por %p5480_p3, %p5479_p2 }
  0x2a   :  { %p5482_p5 = pnand %p5481_p4, %p5475_p1 }
  0x2c   :  { %5485 = shalt.err (!%p5482_p5)
}
  0x2d   :  { %74 = dma.hbm_to_vmem [thread:$0]  %s7555_s7, 4096, %s69_s12, [#allocation11], %s5537_s23, %s5537_s23, %s5538_s24  }
  0x2e   :  { %s5542_s18 = smov [#allocation13]  }
  0x2f   :  { %s82_s19 = sshll.u32 %s5542_s18, 4  ;;  %s83_s19 = int_to_ptr.vmem [resolvable:$true] %s82_s19 }
  0x30   :  { %s5494_s20 = scalar_lea.vmem %s83_s19, 1024  ;;  %p5499_p7 = scmp.lt.s32.totalorder %s83_s19, %s83_s19 }
  0x31   :  { %p5495_p6 = scmp.ne.s32.totalorder %s83_s19, %s5494_s20  ;;  %p5500_p8 = scmp.lt.s32.totalorder %s5494_s20, %s5494_s20 }
  0x33   :  { %p5501_p9 = por %p5500_p8, %p5499_p7 }
  0x35   :  { %p5502_p10 = pnand %p5501_p9, %p5495_p6 }
  0x37   :  { %5505 = shalt.err (!%p5502_p10)
}
  0x38   :  { %s5543_s4 = smov 64   ;;  %s5544_s21 = smov 4  }
  0x39   :  { %88 = dma.hbm_to_vmem [thread:$0]  %s7557_s9, 1024, %s83_s19, [#allocation14], %s5543_s4, %s5543_s4, %s5544_s21  }
  0x3a   :  { %5526 = dma.done.wait [#allocation8], 128  }
  0x3b   :  { %5527 = vsyncadd [#allocation8], 4294967168 }
  0x3c   :  { %5528 = dma.done.wait [#allocation6], 4096  }
  0x3d   :  { %5529 = vsyncadd [#allocation6], 4294963200 }
  0x3e   :  { %5530 = dma.done.wait [#allocation11], 8192  }
  0x3f   :  { %5531 = vsyncadd [#allocation11], 4294959104 }
  0x40   :  { %5532 = dma.done.wait [#allocation14], 1024  }
  0x41   :  { %5533 = vsyncadd [#allocation14], 4294966272 }
  0x42   :  { %106 = sfence }
  0x43   :  { %v5638_v0 = vld [vmem:[%s7551_s3 + $0x24] ss:$16 sps:$4 sm:$0xff]   ;;  %v5643_v1 = vld [vmem:[%s7551_s3 + $0x20] ss:$16 sps:$4 sm:$0xff]   ;;  %v7570_v2 = vmov 0   ;;  %vm108_vm0 = vcmask 261120   ;;  %v298_v60 = vlaneseq }
  0x44   :  { %393 = vmatprep.mubr.bf16.mxu1 %v7570_v2  ;;  %681 = vmatprep.mubr.bf16.mxu0 %v7570_v2  ;;  %v5651_v3 = vld [vmem:[%s7551_s3 + $0x4] ss:$16 sps:$4 sm:$0xff]   ;;  %v5656_v4 = vld [vmem:[%s7551_s3] ss:$16 sps:$4 sm:$0xff]   ;;  %v5666_v6 = vld [vmem:[%s7551_s3 + $0x2c] ss:$16 sps:$4 sm:$0xff]  }
  0x45   :  { %373 = vmatprep.subr.bf16.mxu1 %v5638_v0  ;;  %v295_v5 = vld [vmem:[%s7549_s1] sm:$0xff]  ;;  %v5671_v7 = vld [vmem:[%s7551_s3 + $0x28] ss:$16 sps:$4 sm:$0xff]   ;;  %v5676_v9 = vld [vmem:[%s7551_s3 + $0xc] ss:$16 sps:$4 sm:$0xff]   ;;  %s4475_s18 = sld [smem:[#allocation5 + $0x1]] }
  0x46   :  { %374 = vmatpush1.bf16.msra.mxu1 %v5643_v1  ;;  %v296_v8 = vpack.c.bf16 %v295_v5, %v295_v5  ;;  %v5683_v10 = vld [vmem:[%s7551_s3 + $0x8] ss:$16 sps:$4 sm:$0xff]   ;;  %v5692_v11 = vld [vmem:[#allocation10 + $0xe4] ss:$16 sps:$4 sm:$0xff]   ;;  %v5694_v12 = vld [vmem:[#allocation10 + $0xec] ss:$16 sps:$4 sm:$0xff]  }
  0x47   :  { %375 = vmatprep.subr.bf16.mxu1 %v5651_v3  ;;  %v5696_v13 = vld [vmem:[#allocation10 + $0xe0] ss:$16 sps:$4 sm:$0xff]   ;;  %v5698_v14 = vld [vmem:[#allocation10 + $0xe8] ss:$16 sps:$4 sm:$0xff]   ;;  %649 = vmatprep.subr.bf16.mxu0 %v5692_v11  ;;  %v5704_v15 = vld [vmem:[#allocation10 + $0xc4] ss:$16 sps:$4 sm:$0xff]  }
  0x48   :  { %650 = vmatpush1.bf16.msra.mxu0 %v5696_v13  ;;  %v5706_v16 = vld [vmem:[#allocation10 + $0xcc] ss:$16 sps:$4 sm:$0xff]   ;;  %v5708_v17 = vld [vmem:[#allocation10 + $0xc0] ss:$16 sps:$4 sm:$0xff]   ;;  %v5710_v18 = vld [vmem:[#allocation10 + $0xc8] ss:$16 sps:$4 sm:$0xff]  }
  0x49   :  { %651 = vmatprep.subr.bf16.mxu0 %v5704_v15  ;;  %v5716_v19 = vld [vmem:[#allocation10 + $0xa4] ss:$16 sps:$4 sm:$0xff]   ;;  %v5718_v20 = vld [vmem:[#allocation10 + $0xac] ss:$16 sps:$4 sm:$0xff]   ;;  %v5720_v21 = vld [vmem:[#allocation10 + $0xa0] ss:$16 sps:$4 sm:$0xff]  }
  0x4a   :  { %376 = vmatpush1.bf16.msra.mxu1 %v5656_v4  ;;  %v5722_v22 = vld [vmem:[#allocation10 + $0xa8] ss:$16 sps:$4 sm:$0xff]   ;;  %v5728_v23 = vld [vmem:[#allocation10 + $0x84] ss:$16 sps:$4 sm:$0xff]   ;;  %v5730_v24 = vld [vmem:[#allocation10 + $0x8c] ss:$16 sps:$4 sm:$0xff]  }
  0x4b   :  { %414 = vmatprep.subr.bf16.mxu1 %v5666_v6  ;;  %v5732_v25 = vld [vmem:[#allocation10 + $0x80] ss:$16 sps:$4 sm:$0xff]   ;;  %v5734_v26 = vld [vmem:[#allocation10 + $0x88] ss:$16 sps:$4 sm:$0xff]   ;;  %v5740_v27 = vld [vmem:[#allocation10 + $0x64] ss:$16 sps:$4 sm:$0xff]   ;;  %s123_s23 = scalar_lea.vmem %s7550_s2, %s4475_s18 }
  0x4c   :  { %652 = vmatpush1.bf16.msra.mxu0 %v5708_v17  ;;  %v5742_v28 = vld [vmem:[#allocation10 + $0x60] ss:$16 sps:$4 sm:$0xff]   ;;  %v5744_v29 = vld [vmem:[#allocation10 + $0x6c] ss:$16 sps:$4 sm:$0xff]   ;;  %v5746_v30 = vld [vmem:[#allocation10 + $0x68] ss:$16 sps:$4 sm:$0xff]  }
  0x4d   :  { %4498 = vmatmul.mubr.msk.bf16.vlgmr.msra.gmra.mxu1 %vm108_vm0, %v296_v8  ;;  %653 = vmatprep.subr.bf16.mxu0 %v5716_v19  ;;  %v5748_v31 = vld [vmem:[#allocation10 + $0x44] ss:$16 sps:$4 sm:$0xff]   ;;  %v5752_v32 = vld [vmem:[#allocation10 + $0x4c] ss:$16 sps:$4 sm:$0xff]   ;;  %v5756_v33 = vld [vmem:[#allocation10 + $0x40] ss:$16 sps:$4 sm:$0xff]  }
  0x4e   :  { %415 = vmatpush1.bf16.msra.mxu1 %v5671_v7  ;;  %434 = vmatprep.mubr.bf16.mxu1 %v7570_v2  ;;  %v5758_v34 = vld [vmem:[#allocation10 + $0x48] ss:$16 sps:$4 sm:$0xff]   ;;  %v5762_v35 = vld [vmem:[#allocation10 + $0x24] ss:$16 sps:$4 sm:$0xff]   ;;  %v5764_v36 = vld [vmem:[#allocation10 + $0x2c] ss:$16 sps:$4 sm:$0xff]  }
  0x4f   :  { %416 = vmatprep.subr.bf16.mxu1 %v5676_v9  ;;  %v5768_v37 = vld [vmem:[#allocation10 + $0x20] ss:$16 sps:$4 sm:$0xff]   ;;  %v5770_v38 = vld [vmem:[#allocation10 + $0x28] ss:$16 sps:$4 sm:$0xff]   ;;  %v5774_v39 = vld [vmem:[#allocation10 + $0x4] ss:$16 sps:$4 sm:$0xff]  }
  0x50   :  { %654 = vmatpush1.bf16.msra.mxu0 %v5720_v21  ;;  %v5776_v40 = vld [vmem:[#allocation10 + $0xc] ss:$16 sps:$4 sm:$0xff]   ;;  %s117_s3 = sld [smem:[#allocation5]]  ;;  %v5782_v41 = vld [vmem:[#allocation10] ss:$16 sps:$4 sm:$0xff]   ;;  %v5546_v43 = vmov 0.0  }
  0x51   :  { %655 = vmatprep.subr.bf16.mxu0 %v5728_v23  ;;  %s5778_s19 = sld [smem:[#allocation5 + $0x80]]  ;;  %v5784_v42 = vld [vmem:[#allocation10 + $0x8] ss:$16 sps:$4 sm:$0xff]   ;;  %109 = vst.msk [vmem:[#allocation2] sm:$0xff] %vm108_vm0, %v5546_v43  ;;  %110 = vst.msk [vmem:[#allocation2 + $0x8] sm:$0xff] %vm108_vm0, %v5546_v43  ;;  %vm120_vm1 = vcmask 253952  }
  0x52   :  { %417 = vmatpush1.bf16.msra.mxu1 %v5683_v10  ;;  %s5786_s20 = sld [smem:[#allocation5 + $0x81]]  ;;  %111 = vst.msk [vmem:[#allocation2 + $0x10] sm:$0xff] %vm108_vm0, %v5546_v43  ;;  %112 = vst.msk [vmem:[#allocation2 + $0x18] sm:$0xff] %vm108_vm0, %v5546_v43  ;;  %v124_v45 = vld [vmem:[%s123_s23] sm:$0x1]  ;;  %v5868_v61 = vshrl.u32 %v298_v60, 7 }
  0x53   :  { %690 = vmatprep.subr.bf16.mxu1 %v5694_v12  ;;  %113 = vst.msk [vmem:[#allocation2 + $0x20] sm:$0xff] %vm108_vm0, %v5546_v43  ;;  %114 = vst.msk [vmem:[#allocation2 + $0x28] sm:$0xff] %vm108_vm0, %v5546_v43  ;;  %s4478_s0 = sld [smem:[#allocation5 + $0x100]]  ;;  %v229_v63 = vld [vmem:[%s7553_s5] sm:$0xf] }
  0x54   :  { %656 = vmatpush1.bf16.msra.mxu0 %v5732_v25  ;;  %115 = vst.msk [vmem:[#allocation2 + $0x30] sm:$0xff] %vm108_vm0, %v5546_v43  ;;  %116 = vst.msk [vmem:[#allocation2 + $0x38] sm:$0xff] %vm108_vm0, %v5546_v43  ;;  %s4479_s30 = sld [smem:[#allocation5 + $0x101]]  ;;  %v7563_v62 = vsub.s32 0, %v5868_v61 }
  0x55   :  { %4499 = vmatmul.mubr.msk.bf16.vlgmr.msra.gmra.mxu1 %vm108_vm0, %v296_v8  ;;  %657 = vmatprep.subr.bf16.mxu0 %v5740_v27  ;;  %125 = vst.msk [vmem:[#allocation2 + $0x1] sm:$0x1] %vm120_vm1, %v124_v45  ;;  %s4480_s12 = sld [smem:[#allocation5 + $0x180]]  ;;  %7942 = vst [vmem:[#allocation21_spill] sm:$0xff] %v5868_v61 }
  0x56   :  { %722 = vmatprep.mubr.bf16.mxu1 %v7570_v2  ;;  %691 = vmatpush1.bf16.msra.mxu1 %v5698_v14  ;;  %s118_s22 = scalar_lea.vmem %s7550_s2, %s117_s3  ;;  %s4481_s13 = sld [smem:[#allocation5 + $0x181]]  ;;  %v5877_v5 = vrot.slane %v229_v63, %v7563_v62 }
  0x57   :  { %692 = vmatprep.subr.bf16.mxu1 %v5706_v16  ;;  %v119_v44 = vld [vmem:[%s118_s22] sm:$0x1]  ;;  %s127_s9 = scalar_lea.vmem %s7550_s2, %s5778_s19  ;;  %s4482_s22 = sld [smem:[#allocation5 + $0x200]] }
  0x58   :  { %658 = vmatpush1.bf16.msra.mxu0 %v5742_v28  ;;  %121 = vst.msk [vmem:[#allocation2] sm:$0x1] %vm120_vm1, %v119_v44  ;;  %v128_v46 = vld [vmem:[%s127_s9] sm:$0x1]  ;;  %s132_s29 = scalar_lea.vmem %s7550_s2, %s5786_s20  ;;  %s4483_s25 = sld [smem:[#allocation5 + $0x201]]  ;;  %7943 = vst [vmem:[#allocation22_spill] sm:$0xff] %v5877_v5 }
  0x59   :  { %659 = vmatprep.subr.bf16.mxu0 %v5748_v31  ;;  %130 = vst.msk [vmem:[#allocation2 + $0x8] sm:$0x1] %vm120_vm1, %v128_v46  ;;  %v133_v47 = vld [vmem:[%s132_s29] sm:$0x1]  ;;  %s136_s15 = scalar_lea.vmem %s7550_s2, %s4478_s0  ;;  %s4484_s7 = sld [smem:[#allocation5 + $0x280]] }
  0x5a   :  { %693 = vmatpush1.bf16.msra.mxu1 %v5710_v18  ;;  %134 = vst.msk [vmem:[#allocation2 + $0x9] sm:$0x1] %vm120_vm1, %v133_v47  ;;  %s141_s17 = scalar_lea.vmem %s7550_s2, %s4479_s30  ;;  %v137_v48 = vld [vmem:[%s136_s15] sm:$0x1]  ;;  %s4485_s23 = sld [smem:[#allocation5 + $0x281]] }
  0x5b   :  { %694 = vmatprep.subr.bf16.mxu1 %v5718_v20  ;;  %s145_s19 = scalar_lea.vmem %s7550_s2, %s4480_s12  ;;  %139 = vst.msk [vmem:[#allocation2 + $0x10] sm:$0x1] %vm120_vm1, %v137_v48  ;;  %v142_v49 = vld [vmem:[%s141_s17] sm:$0x1]  ;;  %s4486_s0 = sld [smem:[#allocation5 + $0x300]]  ;;  %v7561_v48 = vsub.s32 3, %v5868_v61 }
  0x5c   :  { %660 = vmatpush1.bf16.msra.mxu0 %v5756_v33  ;;  %v146_v50 = vld [vmem:[%s145_s19] sm:$0x1]  ;;  %s150_s21 = scalar_lea.vmem %s7550_s2, %s4481_s13  ;;  %143 = vst.msk [vmem:[#allocation2 + $0x11] sm:$0x1] %vm120_vm1, %v142_v49  ;;  %s4487_s6 = sld [smem:[#allocation5 + $0x301]] }
  0x5d   :  { %661 = vmatprep.subr.bf16.mxu0 %v5762_v35  ;;  %148 = vst.msk [vmem:[#allocation2 + $0x18] sm:$0x1] %vm120_vm1, %v146_v50  ;;  %v151_v51 = vld [vmem:[%s150_s21] sm:$0x1]  ;;  %s154_s9 = scalar_lea.vmem %s7550_s2, %s4482_s22  ;;  %s4488_s1 = sld [smem:[#allocation5 + $0x380]] }
  0x5e   :  { %695 = vmatpush1.bf16.msra.mxu1 %v5722_v22  ;;  %152 = vst.msk [vmem:[#allocation2 + $0x19] sm:$0x1] %vm120_vm1, %v151_v51  ;;  %v155_v52 = vld [vmem:[%s154_s9] sm:$0x1]  ;;  %s159_s29 = scalar_lea.vmem %s7550_s2, %s4483_s25  ;;  %s4489_s17 = sld [smem:[#allocation5 + $0x381]]  ;;  %v7560_v51 = vsub.s32 2, %v5868_v61 }
  0x5f   :  { %696 = vmatprep.subr.bf16.mxu1 %v5730_v24  ;;  %157 = vst.msk [vmem:[#allocation2 + $0x20] sm:$0x1] %vm120_vm1, %v155_v52  ;;  %v160_v53 = vld [vmem:[%s159_s29] sm:$0x1]  ;;  %s163_s13 = scalar_lea.vmem %s7550_s2, %s4484_s7 }
  0x60   :  { %662 = vmatpush1.bf16.msra.mxu0 %v5768_v37  ;;  %161 = vst.msk [vmem:[#allocation2 + $0x21] sm:$0x1] %vm120_vm1, %v160_v53  ;;  %v164_v54 = vld [vmem:[%s163_s13] sm:$0x1]  ;;  %s168_s16 = scalar_lea.vmem %s7550_s2, %s4485_s23  ;;  %v5889_v53 = vrot.slane %v229_v63, %v7561_v48  ;;  %v5964_v48 = vld [vmem:[#allocation9 + $0x64] ss:$16 sps:$4 sm:$0xff]  }
  0x61   :  { %663 = vmatprep.subr.bf16.mxu0 %v5774_v39  ;;  %166 = vst.msk [vmem:[#allocation2 + $0x28] sm:$0x1] %vm120_vm1, %v164_v54  ;;  %v169_v55 = vld [vmem:[%s168_s16] sm:$0x1]  ;;  %s172_s19 = scalar_lea.vmem %s7550_s2, %s4486_s0  ;;  %7954 = vst [vmem:[#allocation33_spill] sm:$0xff] %v5964_v48 }
  0x62   :  { %697 = vmatpush1.bf16.msra.mxu1 %v5734_v26  ;;  %170 = vst.msk [vmem:[#allocation2 + $0x29] sm:$0x1] %vm120_vm1, %v169_v55  ;;  %v173_v56 = vld [vmem:[%s172_s19] sm:$0x1]  ;;  %s177_s21 = scalar_lea.vmem %s7550_s2, %s4487_s6  ;;  %v5893_v55 = vrot.slane %v229_v63, %v7560_v51 }
  0x63   :  { %698 = vmatprep.subr.bf16.mxu1 %v5744_v29  ;;  %175 = vst.msk [vmem:[#allocation2 + $0x30] sm:$0x1] %vm120_vm1, %v173_v56  ;;  %v178_v57 = vld [vmem:[%s177_s21] sm:$0x1]  ;;  %s181_s7 = scalar_lea.vmem %s7550_s2, %s4488_s1 }
  0x64   :  { %664 = vmatpush1.bf16.msra.mxu0 %v5782_v41  ;;  %179 = vst.msk [vmem:[#allocation2 + $0x31] sm:$0x1] %vm120_vm1, %v178_v57  ;;  %v182_v58 = vld [vmem:[%s181_s7] sm:$0x1]  ;;  %s186_s26 = scalar_lea.vmem %s7550_s2, %s4489_s17 }
  0x65   :  { %791 = vmatprep.subr.bf16.mxu0 %v5638_v0  ;;  %184 = vst.msk [vmem:[#allocation2 + $0x38] sm:$0x1] %vm120_vm1, %v182_v58  ;;  %v187_v59 = vld [vmem:[%s186_s26] sm:$0x1]  ;;  %v7562_v0 = vsub.s32 1, %v5868_v61 }
  0x66   :  { %699 = vmatpush1.bf16.msra.mxu1 %v5746_v30  ;;  %188 = vst.msk [vmem:[#allocation2 + $0x39] sm:$0x1] %vm120_vm1, %v187_v59 }
  0x67   :  { %700 = vmatprep.subr.bf16.mxu1 %v5752_v32 }
  0x6a   :  { %701 = vmatpush1.bf16.msra.mxu1 %v5758_v34 }
  0x6b   :  { %702 = vmatprep.subr.bf16.mxu1 %v5764_v36 }
  0x6e   :  { %703 = vmatpush1.bf16.msra.mxu1 %v5770_v38 }
  0x6f   :  { %704 = vmatprep.subr.bf16.mxu1 %v5776_v40 }
  0x72   :  { %705 = vmatpush1.bf16.msra.mxu1 %v5784_v42 }
  0x73   :  { %864 = vmatprep.subr.bf16.mxu1 %v5666_v6  ;;  %v5881_v6 = vrot.slane %v229_v63, %v7562_v0  ;;  %v5966_v0 = vld [vmem:[#allocation9 + $0x6c] ss:$16 sps:$4 sm:$0xff]  }
  0x74   :  { %7955 = vst [vmem:[#allocation34_spill] sm:$0xff] %v5966_v0 }
 0x10d   :  { %v395_v8 = vpop.f32.mrf.mxu1 }
 0x10e   :  { %v396_v43 = vadd.f32 %v395_v8, %v5877_v5 }
 0x10f   :  { %v397_v44 = vpop.f32.mrf.mxu1 }
 0x110   :  { %v4500_v45 = vmul.f32 -1.442695, %v396_v43  ;;  %v398_v46 = vadd.f32 %v397_v44, %v5881_v6 }
 0x111   :  { %v399_v47 = vpop.f32.mrf.mxu1 }
 0x112   :  { %4910 = vpow2.f32 %v4500_v45  ;;  %v4501_v49 = vmul.f32 -1.442695, %v398_v46 }
 0x113   :  { %v400_v50 = vpop.f32.mrf.mxu1 }
 0x114   :  { %4912 = vpow2.f32 %v4501_v49 }
 0x115   :  { %v436_v52 = vpop.f32.mrf.mxu1 }
 0x116   :  { %v437_v59 = vadd.f32 %v436_v52, %v5893_v55 }
 0x117   :  { %v438_v54 = vpop.f32.mrf.mxu1 }
 0x118   :  { %v439_v56 = vadd.f32 %v438_v54, %v5889_v53  ;;  %4914 = vtanh.f32 %v437_v59 }
 0x119   :  { %v440_v57 = vpop.f32.mrf.mxu1 }
 0x11a   :  { %v4502_v60 = vmul.f32 -1.442695, %v439_v56 }
 0x11b   :  { %v441_v58 = vpop.f32.mrf.mxu1 }
 0x11c   :  { %4916 = vpow2.f32 %v4502_v60  ;;  %v225_v60 = vld [vmem:[#allocation9 + $0xe0] sm:$0xff] }
 0x11f   :  { %v4911_v8 = vpop.eup %4910 }
 0x120   :  { %v446_v43 = vadd.f32 1.0, %v4911_v8  ;;  %v755_v8 = vld [vmem:[#allocation2] sm:$0xff] }
 0x121   :  { %v4913_v44 = vpop.eup %4912 }
 0x122   :  { %4918 = vrcp.f32 %v446_v43  ;;  %v452_v45 = vadd.f32 1.0, %v4913_v44  ;;  %v227_v43 = vld [vmem:[#allocation9 + $0xf0] sm:$0xff] }
 0x123   :  { %v5908_v44 = vld [vmem:[#allocation9 + $0xe4] ss:$16 sps:$4 sm:$0xff]  }
 0x124   :  { %4920 = vrcp.f32 %v452_v45  ;;  %v5910_v45 = vld [vmem:[#allocation9 + $0xec] ss:$16 sps:$4 sm:$0xff]  }
 0x125   :  { %v4915_v46 = vpop.eup %4914 }
 0x129   :  { %v4917_v47 = vpop.eup %4916 }
 0x12a   :  { %v459_v50 = vadd.f32 1.0, %v4917_v47  ;;  %v5928_v47 = vld [vmem:[#allocation9 + $0xc0] ss:$16 sps:$4 sm:$0xff]  }
 0x12c   :  { %4922 = vrcp.f32 %v459_v50  ;;  %v219_v50 = vld [vmem:[#allocation9 + $0xb0] sm:$0xff] }
 0x12f   :  { %v4919_v49 = vpop.eup %4918 }
 0x130   :  { %v463_v54 = vmul.f32 %v4919_v49, %v4915_v46  ;;  %v757_v49 = vld [vmem:[#allocation2 + $0x10] sm:$0xff] }
 0x131   :  { %v4921_v63 = vpop.eup %4920 }
 0x132   :  { %v462_v51 = vmul.f32 0.0, %v4921_v63  ;;  %v758_v63 = vld [vmem:[#allocation2 + $0x18] sm:$0xff] }
 0x134   :  { %v5897_v57 = vadd.f32 %v463_v54, %v462_v51  ;;  %v756_v51 = vld [vmem:[#allocation2 + $0x8] sm:$0xff]  ;;  %v5936_v54 = vld [vmem:[#allocation9 + $0xa4] ss:$16 sps:$4 sm:$0xff]  }
 0x135   :  { %v763_v46 = vpack.c.bf16 %v756_v51, %v755_v8  ;;  %7946 = vst [vmem:[#allocation25_spill] sm:$0xff] %v5936_v54  ;;  %v5950_v8 = vld [vmem:[#allocation9 + $0x84] ss:$16 sps:$4 sm:$0xff]   ;;  %v5952_v51 = vld [vmem:[#allocation9 + $0x8c] ss:$16 sps:$4 sm:$0xff]  }
 0x136   :  { %4924 = vtanh.f32 %v5897_v57  ;;  %7950 = vst [vmem:[#allocation29_spill] sm:$0xff] %v5950_v8  ;;  %7951 = vst [vmem:[#allocation30_spill] sm:$0xff] %v5952_v51 }
 0x139   :  { %v4923_v52 = vpop.eup %4922 }
 0x143   :  { %v4925_v56 = vpop.eup %4924 }
 0x144   :  { %v466_v58 = vmul.f32 %v4925_v56, %v4923_v52  ;;  %v5938_v52 = vld [vmem:[#allocation9 + $0xac] ss:$16 sps:$4 sm:$0xff]   ;;  %v764_v56 = vpack.c.bf16 %v758_v63, %v757_v49  ;;  %v759_v49 = vld [vmem:[#allocation2 + $0x20] sm:$0xff] }
 0x145   :  { %7947 = vst [vmem:[#allocation26_spill] sm:$0xff] %v5938_v52  ;;  %v760_v63 = vld [vmem:[#allocation2 + $0x28] sm:$0xff] }
 0x146   :  { %v5900_v59 = vpack.c.bf16 %v466_v58, %v466_v58 }
 0x148   :  { %682 = vmatmul.mubr.bf16.vlgmr.msra.gmra.mxu0 %v5900_v59  ;;  %723 = vmatmul.mubr.bf16.vlgmr.msra.gmra.mxu1 %v5900_v59 }
 0x149   :  { %792 = vmatpush1.bf16.msra.mxu0 %v5643_v1  ;;  %865 = vmatpush1.bf16.msra.mxu1 %v5671_v7  ;;  %v5916_v1 = vcombine.low %v225_v60, %v227_v43  ;;  %v5918_v7 = vld [vmem:[#allocation9 + $0xe8] ss:$16 sps:$4 sm:$0xff]   ;;  %v5956_v43 = vld [vmem:[#allocation9 + $0x80] ss:$16 sps:$4 sm:$0xff]  }
 0x14a   :  { %793 = vmatprep.subr.bf16.mxu0 %v5651_v3  ;;  %866 = vmatprep.subr.bf16.mxu1 %v5676_v9  ;;  %v5922_v3 = vld [vmem:[#allocation9 + $0xc4] ss:$16 sps:$4 sm:$0xff]   ;;  %v5924_v9 = vld [vmem:[#allocation9 + $0xcc] ss:$16 sps:$4 sm:$0xff]   ;;  %v5946_v60 = vld [vmem:[#allocation9 + $0xa8] ss:$16 sps:$4 sm:$0xff]  }
 0x14b   :  { %811 = vmatprep.mubr.bf16.mxu0 %v7570_v2  ;;  %884 = vmatprep.mubr.bf16.mxu1 %v7570_v2  ;;  %7944 = vst [vmem:[#allocation23_spill] sm:$0xff] %v5916_v1  ;;  %7949 = vst [vmem:[#allocation28_spill] sm:$0xff] %v5946_v60 }
 0x14c   :  { %7952 = vst [vmem:[#allocation31_spill] sm:$0xff] %v5956_v43 }
 0x14d   :  { %794 = vmatpush1.bf16.msra.mxu0 %v5656_v4  ;;  %867 = vmatpush1.bf16.msra.mxu1 %v5683_v10  ;;  %v5930_v4 = vld [vmem:[#allocation9 + $0xc8] ss:$16 sps:$4 sm:$0xff]   ;;  %v217_v10 = vld [vmem:[#allocation9 + $0xa0] sm:$0xff] }
 0x14e   :  { %1121 = vmatprep.subr.bf16.mxu0 %v5908_v44  ;;  %1162 = vmatprep.subr.bf16.mxu1 %v5910_v45  ;;  %7945 = vst [vmem:[#allocation24_spill] sm:$0xff] %v5930_v4  ;;  %v5944_v58 = vcombine.low %v217_v10, %v219_v50  ;;  %v209_v10 = vld [vmem:[#allocation9 + $0x60] sm:$0xff]  ;;  %v211_v50 = vld [vmem:[#allocation9 + $0x70] sm:$0xff] }
 0x14f   :  { %v5972_v62 = vcombine.low %v209_v10, %v211_v50  ;;  %v201_v10 = vld [vmem:[#allocation9 + $0x20] sm:$0xff]  ;;  %v761_v50 = vld [vmem:[#allocation2 + $0x30] sm:$0xff] }
 0x150   :  { %4538 = vmatmul.mubr.msk.bf16.vlgmr.msra.gmra.mxu0 %vm108_vm0, %v763_v46  ;;  %4542 = vmatmul.mubr.msk.bf16.vlgmr.msra.gmra.mxu1 %vm108_vm0, %v763_v46  ;;  %7948 = vst [vmem:[#allocation27_spill] sm:$0xff] %v5944_v58  ;;  %v5958_v46 = vld [vmem:[#allocation9 + $0x88] ss:$16 sps:$4 sm:$0xff]  }
 0x151   :  { %1122 = vmatpush1.bf16.msra.mxu0 %v5916_v1  ;;  %1163 = vmatpush1.bf16.msra.mxu1 %v5918_v7  ;;  %7953 = vst [vmem:[#allocation32_spill] sm:$0xff] %v5958_v46  ;;  %7956 = vst [vmem:[#allocation35_spill] sm:$0xff] %v5972_v62 }
 0x152   :  { %1123 = vmatprep.subr.bf16.mxu0 %v5922_v3  ;;  %1164 = vmatprep.subr.bf16.mxu1 %v5924_v9 }
 0x153   :  { %821 = vmatprep.mubr.bf16.mxu0 %v7570_v2  ;;  %894 = vmatprep.mubr.bf16.mxu1 %v7570_v2 }
 0x155   :  { %1124 = vmatpush1.bf16.msra.mxu0 %v5928_v47  ;;  %1165 = vmatpush1.bf16.msra.mxu1 %v5930_v4 }
 0x156   :  { %1125 = vmatprep.subr.bf16.mxu0 %v5936_v54  ;;  %1166 = vmatprep.subr.bf16.mxu1 %v5938_v52 }
 0x158   :  { %4539 = vmatmul.mubr.msk.bf16.gmra.mxu0 %vm108_vm0, %v764_v56  ;;  %4543 = vmatmul.mubr.msk.bf16.gmra.mxu1 %vm108_vm0, %v764_v56  ;;  %v765_v56 = vpack.c.bf16 %v760_v63, %v759_v49  ;;  %v5984_v49 = vld [vmem:[#allocation9 + $0x40] ss:$16 sps:$4 sm:$0xff]   ;;  %v5986_v63 = vld [vmem:[#allocation9 + $0x48] ss:$16 sps:$4 sm:$0xff]  }
 0x159   :  { %1126 = vmatpush1.bf16.msra.mxu0 %v5944_v58  ;;  %1167 = vmatpush1.bf16.msra.mxu1 %v5946_v60  ;;  %v5974_v60 = vld [vmem:[#allocation9 + $0x68] ss:$16 sps:$4 sm:$0xff]   ;;  %7960 = vst [vmem:[#allocation39_spill] sm:$0xff] %v5984_v49  ;;  %7961 = vst [vmem:[#allocation40_spill] sm:$0xff] %v5986_v63  ;;  %v8007_v58 = vsub.s32 3, %v5868_v61 }
 0x15a   :  { %1127 = vmatprep.subr.bf16.mxu0 %v5950_v8  ;;  %1168 = vmatprep.subr.bf16.mxu1 %v5952_v51  ;;  %7957 = vst [vmem:[#allocation36_spill] sm:$0xff] %v5974_v60  ;;  %v5978_v51 = vld [vmem:[#allocation9 + $0x44] ss:$16 sps:$4 sm:$0xff]   ;;  %v5980_v8 = vld [vmem:[#allocation9 + $0x4c] ss:$16 sps:$4 sm:$0xff]  }
 0x15b   :  { %831 = vmatprep.mubr.bf16.mxu0 %v7570_v2  ;;  %904 = vmatprep.mubr.bf16.mxu1 %v7570_v2  ;;  %7958 = vst [vmem:[#allocation37_spill] sm:$0xff] %v5978_v51  ;;  %7959 = vst [vmem:[#allocation38_spill] sm:$0xff] %v5980_v8  ;;  %v762_v2 = vld [vmem:[#allocation2 + $0x38] sm:$0xff] }
 0x15d   :  { %1128 = vmatpush1.bf16.msra.mxu0 %v5956_v43  ;;  %1169 = vmatpush1.bf16.msra.mxu1 %v5958_v46  ;;  %v5994_v46 = vld [vmem:[#allocation9 + $0x2c] ss:$16 sps:$4 sm:$0xff]   ;;  %v766_v43 = vpack.c.bf16 %v762_v2, %v761_v50  ;;  %v6014_v2 = vld [vmem:[#allocation9] ss:$16 sps:$4 sm:$0xff]  }
 0x15e   :  { %1129 = vmatprep.subr.bf16.mxu0 %v5964_v48  ;;  %1170 = vmatprep.subr.bf16.mxu1 %v5966_v0  ;;  %v203_v0 = vld [vmem:[#allocation9 + $0x30] sm:$0xff]  ;;  %7963 = vst [vmem:[#allocation42_spill] sm:$0xff] %v5994_v46  ;;  %7969 = vst [vmem:[#allocation47_spill] sm:$0xff] %v6014_v2 }
 0x15f   :  { %v5992_v48 = vld [vmem:[#allocation9 + $0x24] ss:$16 sps:$4 sm:$0xff]   ;;  %v6032_v50 = vld [vmem:[#allocation12 + $0xe0] ss:$16 sps:$4 sm:$0xff]  }
 0x160   :  { %4540 = vmatmul.mubr.msk.bf16.gmra.mxu0 %vm108_vm0, %v765_v56  ;;  %4544 = vmatmul.mubr.msk.bf16.gmra.mxu1 %vm108_vm0, %v765_v56  ;;  %7962 = vst [vmem:[#allocation41_spill] sm:$0xff] %v5992_v48  ;;  %v7964_v56 = vmov 0   ;;  %7973 = vst [vmem:[#allocation51_spill] sm:$0xff] %v6032_v50 }
 0x161   :  { %1130 = vmatpush1.bf16.msra.mxu0 %v5972_v62  ;;  %1171 = vmatpush1.bf16.msra.mxu1 %v5974_v60  ;;  %v6000_v60 = vcombine.low %v201_v10, %v203_v0  ;;  %v6002_v62 = vld [vmem:[#allocation9 + $0x28] ss:$16 sps:$4 sm:$0xff]   ;;  %v6030_v10 = vld [vmem:[#allocation12 + $0xec] ss:$16 sps:$4 sm:$0xff]  }
 0x162   :  { %1131 = vmatprep.subr.bf16.mxu0 %v5978_v51  ;;  %1172 = vmatprep.subr.bf16.mxu1 %v5980_v8  ;;  %7966 = vst [vmem:[#allocation44_spill] sm:$0xff] %v6002_v62  ;;  %v6006_v8 = vld [vmem:[#allocation9 + $0x4] ss:$16 sps:$4 sm:$0xff]   ;;  %v6008_v51 = vld [vmem:[#allocation9 + $0xc] ss:$16 sps:$4 sm:$0xff]   ;;  %7972 = vst [vmem:[#allocation50_spill] sm:$0xff] %v6030_v10 }
 0x163   :  { %841 = vmatprep.mubr.bf16.mxu0 %v7964_v56  ;;  %914 = vmatprep.mubr.bf16.mxu1 %v7964_v56  ;;  %7965 = vst [vmem:[#allocation43_spill] sm:$0xff] %v6000_v60  ;;  %7967 = vst [vmem:[#allocation45_spill] sm:$0xff] %v6006_v8  ;;  %v6016_v0 = vld [vmem:[#allocation9 + $0x8] ss:$16 sps:$4 sm:$0xff]  }
 0x164   :  { %7968 = vst [vmem:[#allocation46_spill] sm:$0xff] %v6008_v51  ;;  %7970 = vst [vmem:[#allocation48_spill] sm:$0xff] %v6016_v0 }
 0x165   :  { %1132 = vmatpush1.bf16.msra.mxu0 %v5984_v49  ;;  %1173 = vmatpush1.bf16.msra.mxu1 %v5986_v63 }
 0x166   :  { %1133 = vmatprep.subr.bf16.mxu0 %v5992_v48  ;;  %1174 = vmatprep.subr.bf16.mxu1 %v5994_v46 }
 0x168   :  { %4541 = vmatmul.mubr.msk.bf16.gmra.mxu0 %vm108_vm0, %v766_v43  ;;  %4545 = vmatmul.mubr.msk.bf16.gmra.mxu1 %vm108_vm0, %v766_v43  ;;  %v6028_v43 = vld [vmem:[#allocation12 + $0xe4] ss:$16 sps:$4 sm:$0xff]  }
 0x169   :  { %1134 = vmatpush1.bf16.msra.mxu0 %v6000_v60  ;;  %1175 = vmatpush1.bf16.msra.mxu1 %v6002_v62  ;;  %7971 = vst [vmem:[#allocation49_spill] sm:$0xff] %v6028_v43 }
 0x16a   :  { %1135 = vmatprep.subr.bf16.mxu0 %v6006_v8  ;;  %1176 = vmatprep.subr.bf16.mxu1 %v6008_v51  ;;  %v6034_v51 = vld [vmem:[#allocation12 + $0xe8] ss:$16 sps:$4 sm:$0xff]  }
 0x16b   :  { %1153 = vmatprep.mubr.bf16.mxu0 %v7964_v56  ;;  %1194 = vmatprep.mubr.bf16.mxu1 %v7964_v56  ;;  %7974 = vst [vmem:[#allocation52_spill] sm:$0xff] %v6034_v51  ;;  %v6046_v8 = vld [vmem:[#allocation12 + $0xc8] ss:$16 sps:$4 sm:$0xff]  }
 0x16c   :  { %7978 = vst [vmem:[#allocation56_spill] sm:$0xff] %v6046_v8 }
 0x16d   :  { %1136 = vmatpush1.bf16.msra.mxu0 %v6014_v2  ;;  %1177 = vmatpush1.bf16.msra.mxu1 %v6016_v0  ;;  %v6042_v0 = vld [vmem:[#allocation12 + $0xcc] ss:$16 sps:$4 sm:$0xff]   ;;  %v6044_v2 = vld [vmem:[#allocation12 + $0xc0] ss:$16 sps:$4 sm:$0xff]  }
 0x16e   :  { %1393 = vmatprep.subr.bf16.mxu0 %v6028_v43  ;;  %1434 = vmatprep.subr.bf16.mxu1 %v6030_v10  ;;  %7976 = vst [vmem:[#allocation54_spill] sm:$0xff] %v6042_v0  ;;  %7977 = vst [vmem:[#allocation55_spill] sm:$0xff] %v6044_v2  ;;  %v6052_v10 = vld [vmem:[#allocation12 + $0xa4] ss:$16 sps:$4 sm:$0xff]   ;;  %v6058_v43 = vld [vmem:[#allocation12 + $0xa8] ss:$16 sps:$4 sm:$0xff]  }
 0x16f   :  { %7979 = vst [vmem:[#allocation57_spill] sm:$0xff] %v6052_v10  ;;  %7982 = vst [vmem:[#allocation60_spill] sm:$0xff] %v6058_v43 }
 0x170   :  { %1154 = vmatmul.mubr.bf16.vlgmr.msra.gmra.mxu0 %v5900_v59  ;;  %1195 = vmatmul.mubr.bf16.vlgmr.msra.gmra.mxu1 %v5900_v59  ;;  %v6040_v59 = vld [vmem:[#allocation12 + $0xc4] ss:$16 sps:$4 sm:$0xff]  }
 0x171   :  { %1425 = vmatprep.mubr.bf16.mxu0 %v7964_v56  ;;  %1466 = vmatprep.mubr.bf16.mxu1 %v7964_v56  ;;  %7975 = vst [vmem:[#allocation53_spill] sm:$0xff] %v6040_v59 }
 0x172   :  { %1394 = vmatpush1.bf16.msra.mxu0 %v6032_v50  ;;  %1435 = vmatpush1.bf16.msra.mxu1 %v6034_v51  ;;  %v6054_v50 = vld [vmem:[#allocation12 + $0xac] ss:$16 sps:$4 sm:$0xff]   ;;  %v6056_v51 = vld [vmem:[#allocation12 + $0xa0] ss:$16 sps:$4 sm:$0xff]  }
 0x173   :  { %1395 = vmatprep.subr.bf16.mxu0 %v6040_v59  ;;  %1436 = vmatprep.subr.bf16.mxu1 %v6042_v0  ;;  %7980 = vst [vmem:[#allocation58_spill] sm:$0xff] %v6054_v50  ;;  %7981 = vst [vmem:[#allocation59_spill] sm:$0xff] %v6056_v51  ;;  %v6064_v0 = vld [vmem:[#allocation12 + $0x84] ss:$16 sps:$4 sm:$0xff]   ;;  %v6070_v59 = vld [vmem:[#allocation12 + $0x88] ss:$16 sps:$4 sm:$0xff]  }
 0x174   :  { %7983 = vst [vmem:[#allocation61_spill] sm:$0xff] %v6064_v0  ;;  %7986 = vst [vmem:[#allocation64_spill] sm:$0xff] %v6070_v59 }
 0x176   :  { %1396 = vmatpush1.bf16.msra.mxu0 %v6044_v2  ;;  %1437 = vmatpush1.bf16.msra.mxu1 %v6046_v8  ;;  %v6066_v2 = vld [vmem:[#allocation12 + $0x8c] ss:$16 sps:$4 sm:$0xff]   ;;  %v6068_v8 = vld [vmem:[#allocation12 + $0x80] ss:$16 sps:$4 sm:$0xff]  }
 0x177   :  { %1397 = vmatprep.subr.bf16.mxu0 %v6052_v10  ;;  %1438 = vmatprep.subr.bf16.mxu1 %v6054_v50  ;;  %7984 = vst [vmem:[#allocation62_spill] sm:$0xff] %v6066_v2  ;;  %7985 = vst [vmem:[#allocation63_spill] sm:$0xff] %v6068_v8  ;;  %v6076_v50 = vld [vmem:[#allocation12 + $0x64] ss:$16 sps:$4 sm:$0xff]   ;;  %v6082_v10 = vld [vmem:[#allocation12 + $0x68] ss:$16 sps:$4 sm:$0xff]  }
 0x178   :  { %7987 = vst [vmem:[#allocation65_spill] sm:$0xff] %v6076_v50  ;;  %7990 = vst [vmem:[#allocation68_spill] sm:$0xff] %v6082_v10 }
 0x17a   :  { %1398 = vmatpush1.bf16.msra.mxu0 %v6056_v51  ;;  %1439 = vmatpush1.bf16.msra.mxu1 %v6058_v43  ;;  %v6078_v51 = vld [vmem:[#allocation12 + $0x6c] ss:$16 sps:$4 sm:$0xff]   ;;  %v6080_v43 = vld [vmem:[#allocation12 + $0x60] ss:$16 sps:$4 sm:$0xff]  }
 0x17b   :  { %1399 = vmatprep.subr.bf16.mxu0 %v6064_v0  ;;  %1440 = vmatprep.subr.bf16.mxu1 %v6066_v2  ;;  %7988 = vst [vmem:[#allocation66_spill] sm:$0xff] %v6078_v51  ;;  %7989 = vst [vmem:[#allocation67_spill] sm:$0xff] %v6080_v43  ;;  %v6088_v2 = vld [vmem:[#allocation12 + $0x44] ss:$16 sps:$4 sm:$0xff]   ;;  %v6094_v0 = vld [vmem:[#allocation12 + $0x48] ss:$16 sps:$4 sm:$0xff]  }
 0x17c   :  { %7991 = vst [vmem:[#allocation69_spill] sm:$0xff] %v6088_v2  ;;  %7994 = vst [vmem:[#allocation72_spill] sm:$0xff] %v6094_v0 }
 0x17e   :  { %1400 = vmatpush1.bf16.msra.mxu0 %v6068_v8  ;;  %1441 = vmatpush1.bf16.msra.mxu1 %v6070_v59  ;;  %v6090_v8 = vld [vmem:[#allocation12 + $0x4c] ss:$16 sps:$4 sm:$0xff]   ;;  %v6092_v59 = vld [vmem:[#allocation12 + $0x40] ss:$16 sps:$4 sm:$0xff]  }
 0x17f   :  { %1401 = vmatprep.subr.bf16.mxu0 %v6076_v50  ;;  %1442 = vmatprep.subr.bf16.mxu1 %v6078_v51  ;;  %7992 = vst [vmem:[#allocation70_spill] sm:$0xff] %v6090_v8  ;;  %7993 = vst [vmem:[#allocation71_spill] sm:$0xff] %v6092_v59  ;;  %v6100_v51 = vld [vmem:[#allocation12 + $0x24] ss:$16 sps:$4 sm:$0xff]   ;;  %v6106_v50 = vld [vmem:[#allocation12 + $0x28] ss:$16 sps:$4 sm:$0xff]  }
 0x180   :  { %7995 = vst [vmem:[#allocation73_spill] sm:$0xff] %v6100_v51  ;;  %7998 = vst [vmem:[#allocation76_spill] sm:$0xff] %v6106_v50 }
 0x182   :  { %1402 = vmatpush1.bf16.msra.mxu0 %v6080_v43  ;;  %1443 = vmatpush1.bf16.msra.mxu1 %v6082_v10  ;;  %v6102_v43 = vld [vmem:[#allocation12 + $0x2c] ss:$16 sps:$4 sm:$0xff]   ;;  %v6104_v10 = vld [vmem:[#allocation12 + $0x20] ss:$16 sps:$4 sm:$0xff]  }
 0x183   :  { %1403 = vmatprep.subr.bf16.mxu0 %v6088_v2  ;;  %1444 = vmatprep.subr.bf16.mxu1 %v6090_v8  ;;  %7996 = vst [vmem:[#allocation74_spill] sm:$0xff] %v6102_v43  ;;  %7997 = vst [vmem:[#allocation75_spill] sm:$0xff] %v6104_v10  ;;  %v6112_v8 = vld [vmem:[#allocation12 + $0x4] ss:$16 sps:$4 sm:$0xff]   ;;  %v6118_v2 = vld [vmem:[#allocation12 + $0x8] ss:$16 sps:$4 sm:$0xff]  }
 0x184   :  { %7999 = vst [vmem:[#allocation77_spill] sm:$0xff] %v6112_v8  ;;  %8002 = vst [vmem:[#allocation80_spill] sm:$0xff] %v6118_v2 }
 0x186   :  { %1404 = vmatpush1.bf16.msra.mxu0 %v6092_v59  ;;  %1445 = vmatpush1.bf16.msra.mxu1 %v6094_v0  ;;  %v6114_v59 = vld [vmem:[#allocation12 + $0xc] ss:$16 sps:$4 sm:$0xff]   ;;  %v6116_v0 = vld [vmem:[#allocation12] ss:$16 sps:$4 sm:$0xff]  }
 0x187   :  { %1405 = vmatprep.subr.bf16.mxu0 %v6100_v51  ;;  %1446 = vmatprep.subr.bf16.mxu1 %v6102_v43  ;;  %8000 = vst [vmem:[#allocation78_spill] sm:$0xff] %v6114_v59  ;;  %8001 = vst [vmem:[#allocation79_spill] sm:$0xff] %v6116_v0 }
 0x18a   :  { %1406 = vmatpush1.bf16.msra.mxu0 %v6104_v10  ;;  %1447 = vmatpush1.bf16.msra.mxu1 %v6106_v50  ;;  %v294_v50 = vld [vmem:[%s7556_s8] sm:$0xf]  ;;  %v8003_v10 = vsub.s32 0, %v5868_v61 }
 0x18b   :  { %1407 = vmatprep.subr.bf16.mxu0 %v6112_v8  ;;  %1448 = vmatprep.subr.bf16.mxu1 %v6114_v59  ;;  %v8005_v8 = vsub.s32 1, %v5868_v61 }
 0x18c   :  { %v6131_v43 = vrot.slane %v294_v50, %v8003_v10 }
 0x18d   :  { %v6135_v51 = vrot.slane %v294_v50, %v8005_v8  ;;  %v6141_v8 = vrot.slane %v294_v50, %v8007_v58 }
 0x18e   :  { %1408 = vmatpush1.bf16.msra.mxu0 %v6116_v0  ;;  %1449 = vmatpush1.bf16.msra.mxu1 %v6118_v2  ;;  %8004 = vst [vmem:[#allocation81_spill] sm:$0xff] %v6131_v43 }
 0x18f   :  { %1475 = vmatprep.subr.bf16.mxu0 %v5692_v11  ;;  %1516 = vmatprep.subr.bf16.mxu1 %v5694_v12  ;;  %8006 = vst [vmem:[#allocation82_spill] sm:$0xff] %v6135_v51  ;;  %8008 = vst [vmem:[#allocation83_spill] sm:$0xff] %v6141_v8 }
 0x208   :  { %v683_v59 = vpop.f32.mrf.mxu0  ;;  %v724_v0 = vpop.f32.mrf.mxu1 }
 0x209   :  { %v684_v2 = vadd.f32 %v683_v59, %v6131_v43 }
 0x20a   :  { %v685_v62 = vpop.f32.mrf.mxu0  ;;  %v726_v11 = vpop.f32.mrf.mxu1 }
 0x20b   :  { %v4535_v60 = vmul.f32 -1.442695, %v684_v2  ;;  %v686_v12 = vadd.f32 %v685_v62, %v6135_v51  ;;  %v727_v2 = vadd.f32 %v726_v11, %v6141_v8 }
 0x20c   :  { %v687_v46 = vpop.f32.mrf.mxu0  ;;  %v728_v48 = vpop.f32.mrf.mxu1 }
 0x20d   :  { %4926 = vpow2.f32 %v4535_v60  ;;  %v4536_v63 = vmul.f32 -1.442695, %v686_v12  ;;  %v8011_v60 = vsub.s32 2, %v5868_v61 }
 0x20e   :  { %v688_v49 = vpop.f32.mrf.mxu0  ;;  %v729_v10 = vpop.f32.mrf.mxu1 }
 0x20f   :  { %4928 = vpow2.f32 %v4536_v63  ;;  %v6154_v46 = vrot.slane %v294_v50, %v8011_v60  ;;  %v4537_v63 = vmul.f32 -1.442695, %v727_v2 }
 0x210   :  { %v813_v52 = vpop.f32.mrf.mxu0  ;;  %v6143_v54 = vpop.f32.mrf.mxu1 }
 0x211   :  { %8012 = vst [vmem:[#allocation86_spill] sm:$0xff] %v6154_v46  ;;  %v725_v11 = vadd.f32 %v724_v0, %v6154_v46  ;;  %4930 = vpow2.f32 %v4537_v63 }
 0x212   :  { %v815_v59 = vpop.f32.mrf.mxu0  ;;  %v6145_v43 = vpop.f32.mrf.mxu1 }
 0x214   :  { %v6148_v62 = vpop.f32.mrf.mxu0  ;;  %v6150_v48 = vpop.f32.mrf.mxu1 }
 0x215   :  { %8009 = vst [vmem:[#allocation84_spill] sm:$0xff] %v6148_v62  ;;  %8010 = vst [vmem:[#allocation85_spill] sm:$0xff] %v6150_v48 }
 0x216   :  { %v6156_v49 = vpop.f32.mrf.mxu0  ;;  %v6158_v58 = vpop.f32.mrf.mxu1 }
 0x217   :  { %8013 = vst [vmem:[#allocation87_spill] sm:$0xff] %v6156_v49  ;;  %8014 = vst [vmem:[#allocation88_spill] sm:$0xff] %v6158_v58  ;;  %v814_v49 = vadd.f32 %v813_v52, %v5877_v5  ;;  %v889_v52 = vadd.f32 %v6145_v43, %v5889_v53 }
 0x218   :  { %v6160_v12 = vpop.f32.mrf.mxu0  ;;  %v6162_v10 = vpop.f32.mrf.mxu1 }
 0x219   :  { %8015 = vst [vmem:[#allocation89_spill] sm:$0xff] %v6160_v12  ;;  %8016 = vst [vmem:[#allocation90_spill] sm:$0xff] %v6162_v10 }
 0x21a   :  { %v4927_v51 = vpop.eup %4926  ;;  %v6165_v8 = vpop.f32.mrf.mxu0 }
 0x21b   :  { %8017 = vst [vmem:[#allocation91_spill] sm:$0xff] %v6165_v8  ;;  %v6167_v62 = vpop.f32.mrf.mxu1  ;;  %v734_v48 = vadd.f32 1.0, %v4927_v51 }
 0x21c   :  { %8018 = vst [vmem:[#allocation92_spill] sm:$0xff] %v6167_v62  ;;  %v4929_v61 = vpop.eup %4928  ;;  %v6169_v50 = vpop.f32.mrf.mxu0 }
 0x21d   :  { %8019 = vst [vmem:[#allocation93_spill] sm:$0xff] %v6169_v50  ;;  %v6171_v60 = vpop.f32.mrf.mxu1  ;;  %4932 = vrcp.f32 %v734_v48  ;;  %v740_v2 = vadd.f32 1.0, %v4929_v61 }
 0x21e   :  { %8020 = vst [vmem:[#allocation94_spill] sm:$0xff] %v6171_v60  ;;  %4934 = vtanh.f32 %v725_v11  ;;  %v6173_v12 = vpop.f32.mrf.mxu0 }
 0x21f   :  { %8021 = vst [vmem:[#allocation95_spill] sm:$0xff] %v6173_v12  ;;  %v6175_v10 = vpop.f32.mrf.mxu1  ;;  %4936 = vrcp.f32 %v740_v2  ;;  %v4931_v2 = vpop.eup %4930 }
 0x220   :  { %8022 = vst [vmem:[#allocation96_spill] sm:$0xff] %v6175_v10  ;;  %v6177_v0 = vpop.f32.mrf.mxu0  ;;  %v747_v12 = vadd.f32 1.0, %v4931_v2  ;;  %v816_v2 = vadd.f32 %v815_v59, %v5881_v6  ;;  %v887_v59 = vadd.f32 %v6143_v54, %v5893_v55  ;;  %v8067_v54 = vld [vmem:[#allocation51_spill] sm:$0xff] }
 0x221   :  { %8023 = vst [vmem:[#allocation97_spill] sm:$0xff] %v6177_v0  ;;  %v6179_v8 = vpop.f32.mrf.mxu1 }
 0x222   :  { %8024 = vst [vmem:[#allocation98_spill] sm:$0xff] %v6179_v8  ;;  %v6181_v62 = vpop.f32.mrf.mxu0  ;;  %4938 = vrcp.f32 %v747_v12 }
 0x223   :  { %8025 = vst [vmem:[#allocation99_spill] sm:$0xff] %v6181_v62  ;;  %v6183_v51 = vpop.f32.mrf.mxu1 }
 0x224   :  { %8026 = vst [vmem:[#allocation100_spill] sm:$0xff] %v6183_v51  ;;  %v6185_v63 = vpop.f32.mrf.mxu0 }
 0x225   :  { %8027 = vst [vmem:[#allocation101_spill] sm:$0xff] %v6185_v63  ;;  %v6187_v50 = vpop.f32.mrf.mxu1 }
 0x226   :  { %8028 = vst [vmem:[#allocation102_spill] sm:$0xff] %v6187_v50  ;;  %v6189_v48 = vpop.f32.mrf.mxu0 }
 0x227   :  { %8029 = vst [vmem:[#allocation103_spill] sm:$0xff] %v6189_v48  ;;  %v6191_v61 = vpop.f32.mrf.mxu1 }
 0x228   :  { %8030 = vst [vmem:[#allocation104_spill] sm:$0xff] %v6191_v61  ;;  %v6193_v11 = vpop.f32.mrf.mxu0 }
 0x229   :  { %8031 = vst [vmem:[#allocation105_spill] sm:$0xff] %v6193_v11  ;;  %v6195_v60 = vpop.f32.mrf.mxu1 }
 0x22a   :  { %8032 = vst [vmem:[#allocation106_spill] sm:$0xff] %v6195_v60  ;;  %v4933_v0 = vpop.eup %4932  ;;  %v6197_v10 = vpop.f32.mrf.mxu0 }
 0x22b   :  { %8033 = vst [vmem:[#allocation107_spill] sm:$0xff] %v6197_v10  ;;  %v6199_v8 = vpop.f32.mrf.mxu1  ;;  %v4935_v62 = vpop.eup %4934 }
 0x22c   :  { %8034 = vst [vmem:[#allocation108_spill] sm:$0xff] %v6199_v8  ;;  %v4937_v51 = vpop.eup %4936  ;;  %v6201_v63 = vpop.f32.mrf.mxu0  ;;  %v751_v58 = vmul.f32 %v4935_v62, %v4933_v0 }
 0x22d   :  { %8035 = vst [vmem:[#allocation109_spill] sm:$0xff] %v6201_v63  ;;  %v6203_v50 = vpop.f32.mrf.mxu1  ;;  %v750_v48 = vmul.f32 0.0, %v4937_v51 }
 0x22e   :  { %8036 = vst [vmem:[#allocation110_spill] sm:$0xff] %v6203_v50  ;;  %v6205_v61 = vpop.f32.mrf.mxu0 }
 0x22f   :  { %8037 = vst [vmem:[#allocation111_spill] sm:$0xff] %v6205_v61  ;;  %v6207_v11 = vpop.f32.mrf.mxu1  ;;  %v6209_v60 = vadd.f32 %v751_v58, %v750_v48  ;;  %v4939_v5 = vpop.eup %4938 }
 0x230   :  { %8038 = vst [vmem:[#allocation112_spill] sm:$0xff] %v6207_v11  ;;  %v1155_v10 = vpop.f32.mrf.mxu0 }
 0x231   :  { %8039 = vst [vmem:[#allocation113_spill] sm:$0xff] %v6209_v60  ;;  %v1196_v8 = vpop.f32.mrf.mxu1  ;;  %4940 = vtanh.f32 %v6209_v60  ;;  %v1203_v63 = vadd.f32 %v1155_v10, %v814_v49 }
 0x232   :  { %v1157_v46 = vpop.f32.mrf.mxu0 }
 0x233   :  { %v1198_v50 = vpop.f32.mrf.mxu1  ;;  %v4578_v51 = vmul.f32 -1.442695, %v1203_v63  ;;  %v1204_v62 = vadd.f32 %v1157_v46, %v816_v2  ;;  %v1205_v63 = vadd.f32 %v1196_v8, %v887_v59  ;;  %v8068_v8 = vld [vmem:[#allocation52_spill] sm:$0xff]  ;;  %v8079_v59 = vld [vmem:[#allocation63_spill] sm:$0xff] }
 0x234   :  { %v1159_v0 = vpop.f32.mrf.mxu0  ;;  %v1206_v12 = vadd.f32 %v1198_v50, %v889_v52  ;;  %v8069_v50 = vld [vmem:[#allocation53_spill] sm:$0xff] }
 0x235   :  { %v1200_v61 = vpop.f32.mrf.mxu1  ;;  %4942 = vpow2.f32 %v4578_v51  ;;  %v4579_v11 = vmul.f32 -1.442695, %v1204_v62  ;;  %v8072_v51 = vld [vmem:[#allocation56_spill] sm:$0xff]  ;;  %v8073_v62 = vld [vmem:[#allocation57_spill] sm:$0xff]  ;;  %v8074_v0 = vld [vmem:[#allocation58_spill] sm:$0xff] }
 0x236   :  { %v1160_v58 = vpop.f32.mrf.mxu0  ;;  %v4580_v49 = vmul.f32 -1.442695, %v1206_v12  ;;  %v8077_v52 = vld [vmem:[#allocation61_spill] sm:$0xff]  ;;  %v8078_v12 = vld [vmem:[#allocation62_spill] sm:$0xff] }
 0x237   :  { %v1201_v48 = vpop.f32.mrf.mxu1  ;;  %4944 = vpow2.f32 %v4579_v11  ;;  %v8071_v11 = vld [vmem:[#allocation55_spill] sm:$0xff] }
 0x238   :  { %4946 = vpow2.f32 %v4580_v49  ;;  %v8075_v58 = vld [vmem:[#allocation59_spill] sm:$0xff]  ;;  %v8076_v48 = vld [vmem:[#allocation60_spill] sm:$0xff] }
 0x239   :  { %v8080_v49 = vld [vmem:[#allocation64_spill] sm:$0xff] }
 0x23e   :  { %v4941_v60 = vpop.eup %4940 }
 0x23f   :  { %v754_v4 = vmul.f32 %v4941_v60, %v4939_v5  ;;  %v8058_v5 = vld [vmem:[#allocation42_spill] sm:$0xff] }
 0x240   :  { %v8070_v60 = vld [vmem:[#allocation54_spill] sm:$0xff] }
 0x241   :  { %v1232_v10 = vpack.c.bf16 %v754_v4, %v754_v4  ;;  %v8066_v4 = vld [vmem:[#allocation50_spill] sm:$0xff] }
 0x242   :  { %v4943_v46 = vpop.eup %4942 }
 0x243   :  { %v1210_v61 = vadd.f32 1.0, %v4943_v46  ;;  %1426 = vmatmul.mubr.bf16.vlgmr.msra.gmra.mxu0 %v1232_v10  ;;  %1467 = vmatmul.mubr.bf16.vlgmr.msra.gmra.mxu1 %v1232_v10  ;;  %v8081_v10 = vld [vmem:[#allocation65_spill] sm:$0xff]  ;;  %v8082_v46 = vld [vmem:[#allocation66_spill] sm:$0xff] }
 0x244   :  { %v4945_v2 = vpop.eup %4944  ;;  %1476 = vmatpush1.bf16.msra.mxu0 %v5696_v13  ;;  %1517 = vmatpush1.bf16.msra.mxu1 %v5698_v14 }
 0x245   :  { %4948 = vrcp.f32 %v1210_v61  ;;  %v1216_v43 = vadd.f32 1.0, %v4945_v2  ;;  %1477 = vmatprep.subr.bf16.mxu0 %v5704_v15  ;;  %1518 = vmatprep.subr.bf16.mxu1 %v5706_v16  ;;  %v4947_v13 = vpop.eup %4946  ;;  %v8084_v61 = vld [vmem:[#allocation68_spill] sm:$0xff]  ;;  %v8085_v2 = vld [vmem:[#allocation69_spill] sm:$0xff] }
 0x246   :  { %4950 = vtanh.f32 %v1205_v63  ;;  %1507 = vmatprep.mubr.bf16.mxu0 %v7964_v56  ;;  %1548 = vmatprep.mubr.bf16.mxu1 %v7964_v56  ;;  %v8083_v63 = vld [vmem:[#allocation67_spill] sm:$0xff] }
 0x247   :  { %4952 = vrcp.f32 %v1216_v43  ;;  %v8086_v43 = vld [vmem:[#allocation70_spill] sm:$0xff] }
 0x248   :  { %1478 = vmatpush1.bf16.msra.mxu0 %v5708_v17  ;;  %1519 = vmatpush1.bf16.msra.mxu1 %v5710_v18  ;;  %v1223_v17 = vadd.f32 1.0, %v4947_v13  ;;  %v8087_v13 = vld [vmem:[#allocation71_spill] sm:$0xff] }
 0x249   :  { %1479 = vmatprep.subr.bf16.mxu0 %v5716_v19  ;;  %1520 = vmatprep.subr.bf16.mxu1 %v5718_v20 }
 0x24a   :  { %4954 = vrcp.f32 %v1223_v17  ;;  %v8091_v17 = vld [vmem:[#allocation75_spill] sm:$0xff] }
 0x24c   :  { %1480 = vmatpush1.bf16.msra.mxu0 %v5720_v21  ;;  %1521 = vmatpush1.bf16.msra.mxu1 %v5722_v22 }
 0x24d   :  { %1481 = vmatprep.subr.bf16.mxu0 %v5728_v23  ;;  %1522 = vmatprep.subr.bf16.mxu1 %v5730_v24 }
 0x250   :  { %1482 = vmatpush1.bf16.msra.mxu0 %v5732_v25  ;;  %1523 = vmatpush1.bf16.msra.mxu1 %v5734_v26  ;;  %v8040_v25 = vld [vmem:[#allocation24_spill] sm:$0xff]  ;;  %v8041_v26 = vld [vmem:[#allocation25_spill] sm:$0xff] }
 0x251   :  { %1483 = vmatprep.subr.bf16.mxu0 %v5740_v27  ;;  %1524 = vmatprep.subr.bf16.mxu1 %v5744_v29  ;;  %v8042_v27 = vld [vmem:[#allocation26_spill] sm:$0xff]  ;;  %v8044_v29 = vld [vmem:[#allocation28_spill] sm:$0xff] }
 0x252   :  { %v4949_v14 = vpop.eup %4948 }
 0x253   :  { %v4951_v15 = vpop.eup %4950 }
 0x254   :  { %v4953_v16 = vpop.eup %4952  ;;  %1484 = vmatpush1.bf16.msra.mxu0 %v5742_v28  ;;  %1525 = vmatpush1.bf16.msra.mxu1 %v5746_v30  ;;  %v1227_v18 = vmul.f32 %v4951_v15, %v4949_v14  ;;  %v8043_v28 = vld [vmem:[#allocation27_spill] sm:$0xff]  ;;  %v8045_v30 = vld [vmem:[#allocation29_spill] sm:$0xff]  ;;  %v8088_v14 = vld [vmem:[#allocation72_spill] sm:$0xff] }
 0x255   :  { %v1226_v19 = vmul.f32 %v4953_v16, %v5897_v57  ;;  %1485 = vmatprep.subr.bf16.mxu0 %v5748_v31  ;;  %1526 = vmatprep.subr.bf16.mxu1 %v5752_v32  ;;  %v8046_v31 = vld [vmem:[#allocation30_spill] sm:$0xff]  ;;  %v8047_v32 = vld [vmem:[#allocation31_spill] sm:$0xff]  ;;  %v8089_v15 = vld [vmem:[#allocation73_spill] sm:$0xff] }
 0x256   :  { %v8059_v57 = vld [vmem:[#allocation43_spill] sm:$0xff]  ;;  %v8090_v16 = vld [vmem:[#allocation74_spill] sm:$0xff] }
 0x257   :  { %v6241_v20 = vadd.f32 %v1227_v18, %v1226_v19  ;;  %v4955_v21 = vpop.eup %4954  ;;  %v8092_v18 = vld [vmem:[#allocation76_spill] sm:$0xff]  ;;  %v8093_v19 = vld [vmem:[#allocation77_spill] sm:$0xff] }
 0x258   :  { %1486 = vmatpush1.bf16.msra.mxu0 %v5756_v33  ;;  %1527 = vmatpush1.bf16.msra.mxu1 %v5758_v34  ;;  %v8048_v33 = vld [vmem:[#allocation32_spill] sm:$0xff]  ;;  %v8049_v34 = vld [vmem:[#allocation33_spill] sm:$0xff] }
 0x259   :  { %1487 = vmatprep.subr.bf16.mxu0 %v5762_v35  ;;  %1528 = vmatprep.subr.bf16.mxu1 %v5764_v36  ;;  %4956 = vtanh.f32 %v6241_v20  ;;  %v8050_v35 = vld [vmem:[#allocation34_spill] sm:$0xff]  ;;  %v8051_v36 = vld [vmem:[#allocation35_spill] sm:$0xff] }
 0x25c   :  { %1488 = vmatpush1.bf16.msra.mxu0 %v5768_v37  ;;  %1529 = vmatpush1.bf16.msra.mxu1 %v5770_v38  ;;  %v8052_v37 = vld [vmem:[#allocation36_spill] sm:$0xff]  ;;  %v8053_v38 = vld [vmem:[#allocation37_spill] sm:$0xff] }
 0x25d   :  { %1489 = vmatprep.subr.bf16.mxu0 %v5774_v39  ;;  %1530 = vmatprep.subr.bf16.mxu1 %v5776_v40  ;;  %v8054_v39 = vld [vmem:[#allocation38_spill] sm:$0xff]  ;;  %v8055_v40 = vld [vmem:[#allocation39_spill] sm:$0xff] }
 0x260   :  { %1490 = vmatpush1.bf16.msra.mxu0 %v5782_v41  ;;  %1531 = vmatpush1.bf16.msra.mxu1 %v5784_v42  ;;  %v8056_v41 = vld [vmem:[#allocation40_spill] sm:$0xff]  ;;  %v8057_v42 = vld [vmem:[#allocation41_spill] sm:$0xff] }
 0x261   :  { %1591 = vmatprep.subr.bf16.mxu0 %v5908_v44  ;;  %1632 = vmatprep.subr.bf16.mxu1 %v5910_v45  ;;  %v8060_v44 = vld [vmem:[#allocation44_spill] sm:$0xff]  ;;  %v8061_v45 = vld [vmem:[#allocation45_spill] sm:$0xff] }
 0x266   :  { %v4957_v22 = vpop.eup %4956 }
 0x267   :  { %v1230_v23 = vmul.f32 %v4957_v22, %v4955_v21  ;;  %v8094_v21 = vld [vmem:[#allocation78_spill] sm:$0xff]  ;;  %v8095_v22 = vld [vmem:[#allocation79_spill] sm:$0xff] }
 0x269   :  { %v1231_v24 = vpack.c.bf16 %v1230_v23, %v1230_v23  ;;  %v8096_v23 = vld [vmem:[#allocation80_spill] sm:$0xff] }
 0x26b   :  { %1508 = vmatmul.mubr.bf16.vlgmr.msra.gmra.mxu0 %v1231_v24  ;;  %1549 = vmatmul.mubr.bf16.vlgmr.msra.gmra.mxu1 %v1231_v24 }
 0x26c   :  { %1592 = vmatpush1.bf16.msra.mxu0 %v5916_v1  ;;  %1633 = vmatpush1.bf16.msra.mxu1 %v5918_v7  ;;  %v8062_v7 = vld [vmem:[#allocation46_spill] sm:$0xff] }
 0x26d   :  { %1593 = vmatprep.subr.bf16.mxu0 %v5922_v3  ;;  %1634 = vmatprep.subr.bf16.mxu1 %v5924_v9  ;;  %v8063_v3 = vld [vmem:[#allocation47_spill] sm:$0xff]  ;;  %v8064_v9 = vld [vmem:[#allocation48_spill] sm:$0xff] }
 0x26e   :  { %1623 = vmatprep.mubr.bf16.mxu0 %v7964_v56  ;;  %1664 = vmatprep.mubr.bf16.mxu1 %v7964_v56 }
 0x270   :  { %1594 = vmatpush1.bf16.msra.mxu0 %v5928_v47  ;;  %1635 = vmatpush1.bf16.msra.mxu1 %v8040_v25  ;;  %v8065_v47 = vld [vmem:[#allocation49_spill] sm:$0xff]  ;;  %v6325_v25 = vld [vmem:[#allocation10 + $0xec] ss:$16 sps:$4 sm:$0xff]  }
 0x271   :  { %1595 = vmatprep.subr.bf16.mxu0 %v8041_v26  ;;  %1636 = vmatprep.subr.bf16.mxu1 %v8042_v27  ;;  %8098 = vst [vmem:[#allocation25_spill] sm:$0xff] %v6325_v25 }
 0x274   :  { %1596 = vmatpush1.bf16.msra.mxu0 %v8043_v28  ;;  %1637 = vmatpush1.bf16.msra.mxu1 %v8044_v29 }
 0x275   :  { %1597 = vmatprep.subr.bf16.mxu0 %v8045_v30  ;;  %1638 = vmatprep.subr.bf16.mxu1 %v8046_v31 }
 0x278   :  { %1598 = vmatpush1.bf16.msra.mxu0 %v8047_v32  ;;  %1639 = vmatpush1.bf16.msra.mxu1 %v8048_v33 }
 0x279   :  { %1599 = vmatprep.subr.bf16.mxu0 %v8049_v34  ;;  %1640 = vmatprep.subr.bf16.mxu1 %v8050_v35 }
 0x27c   :  { %1600 = vmatpush1.bf16.msra.mxu0 %v8051_v36  ;;  %1641 = vmatpush1.bf16.msra.mxu1 %v8052_v37 }
 0x27d   :  { %1601 = vmatprep.subr.bf16.mxu0 %v8053_v38  ;;  %1642 = vmatprep.subr.bf16.mxu1 %v8054_v39 }
 0x280   :  { %1602 = vmatpush1.bf16.msra.mxu0 %v8055_v40  ;;  %1643 = vmatpush1.bf16.msra.mxu1 %v8056_v41 }
 0x281   :  { %1603 = vmatprep.subr.bf16.mxu0 %v8057_v42  ;;  %1644 = vmatprep.subr.bf16.mxu1 %v8058_v5 }
 0x284   :  { %1604 = vmatpush1.bf16.msra.mxu0 %v8059_v57  ;;  %1645 = vmatpush1.bf16.msra.mxu1 %v8060_v44 }
 0x285   :  { %1605 = vmatprep.subr.bf16.mxu0 %v8061_v45  ;;  %1646 = vmatprep.subr.bf16.mxu1 %v8062_v7 }
 0x288   :  { %1606 = vmatpush1.bf16.msra.mxu0 %v8063_v3  ;;  %1647 = vmatpush1.bf16.msra.mxu1 %v8064_v9 }
 0x289   :  { %1703 = vmatprep.subr.bf16.mxu0 %v8065_v47  ;;  %1744 = vmatprep.subr.bf16.mxu1 %v8066_v4 }
 0x28b   :  { %1624 = vmatmul.mubr.bf16.vlgmr.msra.gmra.mxu0 %v1231_v24  ;;  %1665 = vmatmul.mubr.bf16.vlgmr.msra.gmra.mxu1 %v1231_v24  ;;  %v6322_v24 = vld [vmem:[#allocation10 + $0xe4] ss:$16 sps:$4 sm:$0xff]  }
 0x28c   :  { %1704 = vmatpush1.bf16.msra.mxu0 %v8067_v54  ;;  %1745 = vmatpush1.bf16.msra.mxu1 %v8068_v8  ;;  %8097 = vst [vmem:[#allocation24_spill] sm:$0xff] %v6322_v24 }
 0x28d   :  { %1705 = vmatprep.subr.bf16.mxu0 %v8069_v50  ;;  %1746 = vmatprep.subr.bf16.mxu1 %v8070_v60 }
 0x28e   :  { %1735 = vmatprep.mubr.bf16.mxu0 %v7964_v56  ;;  %1776 = vmatprep.mubr.bf16.mxu1 %v7964_v56 }
 0x290   :  { %1706 = vmatpush1.bf16.msra.mxu0 %v8071_v11  ;;  %1747 = vmatpush1.bf16.msra.mxu1 %v8072_v51 }
 0x291   :  { %1707 = vmatprep.subr.bf16.mxu0 %v8073_v62  ;;  %1748 = vmatprep.subr.bf16.mxu1 %v8074_v0 }
 0x294   :  { %1708 = vmatpush1.bf16.msra.mxu0 %v8075_v58  ;;  %1749 = vmatpush1.bf16.msra.mxu1 %v8076_v48  ;;  %v8102_v48 = vld [vmem:[#allocation86_spill] sm:$0xff] }
 0x295   :  { %1709 = vmatprep.subr.bf16.mxu0 %v8077_v52  ;;  %1750 = vmatprep.subr.bf16.mxu1 %v8078_v12 }
 0x298   :  { %1710 = vmatpush1.bf16.msra.mxu0 %v8079_v59  ;;  %1751 = vmatpush1.bf16.msra.mxu1 %v8080_v49 }
 0x299   :  { %1711 = vmatprep.subr.bf16.mxu0 %v8081_v10  ;;  %1752 = vmatprep.subr.bf16.mxu1 %v8082_v46 }
 0x29c   :  { %1712 = vmatpush1.bf16.msra.mxu0 %v8083_v63  ;;  %1753 = vmatpush1.bf16.msra.mxu1 %v8084_v61 }
 0x29d   :  { %1713 = vmatprep.subr.bf16.mxu0 %v8085_v2  ;;  %1754 = vmatprep.subr.bf16.mxu1 %v8086_v43  ;;  %v8099_v2 = vld [vmem:[#allocation81_spill] sm:$0xff] }
 0x2a0   :  { %1714 = vmatpush1.bf16.msra.mxu0 %v8087_v13  ;;  %1755 = vmatpush1.bf16.msra.mxu1 %v8088_v14 }
 0x2a1   :  { %1715 = vmatprep.subr.bf16.mxu0 %v8089_v15  ;;  %1756 = vmatprep.subr.bf16.mxu1 %v8090_v16 }
 0x2a4   :  { %1716 = vmatpush1.bf16.msra.mxu0 %v8091_v17  ;;  %1757 = vmatpush1.bf16.msra.mxu1 %v8092_v18 }
 0x2a5   :  { %1717 = vmatprep.subr.bf16.mxu0 %v8093_v19  ;;  %1758 = vmatprep.subr.bf16.mxu1 %v8094_v21 }
 0x2a8   :  { %1718 = vmatpush1.bf16.msra.mxu0 %v8095_v22  ;;  %1759 = vmatpush1.bf16.msra.mxu1 %v8096_v23 }
 0x2a9   :  { %1785 = vmatprep.subr.bf16.mxu0 %v6322_v24  ;;  %1826 = vmatprep.subr.bf16.mxu1 %v6325_v25  ;;  %v8100_v25 = vld [vmem:[#allocation82_spill] sm:$0xff] }
 0x303   :  { %v1427_v26 = vpop.f32.mrf.mxu0  ;;  %v1468_v27 = vpop.f32.mrf.mxu1 }
 0x305   :  { %v1429_v17 = vpop.f32.mrf.mxu0  ;;  %v1470_v18 = vpop.f32.mrf.mxu1 }
 0x307   :  { %v1431_v16 = vpop.f32.mrf.mxu0  ;;  %v1472_v19 = vpop.f32.mrf.mxu1 }
 0x308   :  { %v8101_v19 = vld [vmem:[#allocation83_spill] sm:$0xff] }
 0x309   :  { %v1432_v15 = vpop.f32.mrf.mxu0  ;;  %v1473_v21 = vpop.f32.mrf.mxu1 }
 0x32b   :  { %v1509_v14 = vpop.f32.mrf.mxu0  ;;  %v1550_v22 = vpop.f32.mrf.mxu1 }
 0x32c   :  { %v1510_v13 = vadd.f32 %v1509_v14, %v1427_v26  ;;  %v1551_v52 = vadd.f32 %v1550_v22, %v1468_v27 }
 0x32d   :  { %v1511_v23 = vpop.f32.mrf.mxu0  ;;  %v1552_v43 = vpop.f32.mrf.mxu1 }
 0x32e   :  { %v1557_v61 = vadd.f32 %v1510_v13, %v8099_v2  ;;  %v1512_v24 = vadd.f32 %v1511_v23, %v1429_v17  ;;  %v1553_v15 = vadd.f32 %v1552_v43, %v1470_v18  ;;  %v1559_v58 = vadd.f32 %v1551_v52, %v8102_v48 }
 0x32f   :  { %v1513_v63 = vpop.f32.mrf.mxu0  ;;  %v1554_v46 = vpop.f32.mrf.mxu1 }
 0x330   :  { %v4613_v10 = vmul.f32 -1.442695, %v1557_v61  ;;  %v1558_v49 = vadd.f32 %v1512_v24, %v8100_v25  ;;  %v1560_v21 = vadd.f32 %v1553_v15, %v8101_v19  ;;  %v8105_v61 = vld [vmem:[#allocation87_spill] sm:$0xff] }
 0x331   :  { %v1514_v59 = vpop.f32.mrf.mxu0  ;;  %v1555_v12 = vpop.f32.mrf.mxu1  ;;  %v820_v43 = vadd.f32 %v8105_v61, %v5881_v6 }
 0x332   :  { %4958 = vpow2.f32 %v4613_v10  ;;  %v4614_v16 = vmul.f32 -1.442695, %v1558_v49  ;;  %v4615_v14 = vmul.f32 -1.442695, %v1560_v21  ;;  %v8103_v59 = vld [vmem:[#allocation22_spill] sm:$0xff]  ;;  %v8104_v12 = vld [vmem:[#allocation84_spill] sm:$0xff] }
 0x333   :  { %v818_v10 = vadd.f32 %v8104_v12, %v8103_v59  ;;  %v8106_v59 = vld [vmem:[#allocation113_spill] sm:$0xff] }
 0x334   :  { %4960 = vpow2.f32 %v4614_v16 }
 0x335   :  { %4962 = vpow2.f32 %v4615_v14 }
 0x33f   :  { %v4959_v26 = vpop.eup %4958 }
 0x340   :  { %v1564_v13 = vadd.f32 1.0, %v4959_v26 }
 0x341   :  { %v4961_v17 = vpop.eup %4960 }
 0x342   :  { %4964 = vrcp.f32 %v1564_v13  ;;  %v1570_v46 = vadd.f32 1.0, %v4961_v17  ;;  %v4963_v24 = vpop.eup %4962 }
 0x343   :  { %4966 = vtanh.f32 %v1559_v58  ;;  %v1577_v13 = vadd.f32 1.0, %v4963_v24 }
 0x344   :  { %4968 = vrcp.f32 %v1570_v46 }
 0x34b   :  { %v1625_v49 = vpop.f32.mrf.mxu0  ;;  %v1666_v63 = vpop.f32.mrf.mxu1 }
 0x34c   :  { %v1673_v18 = vadd.f32 %v1625_v49, %v818_v10  ;;  %v8107_v49 = vld [vmem:[#allocation88_spill] sm:$0xff] }
 0x34d   :  { %v1627_v22 = vpop.f32.mrf.mxu0  ;;  %v1668_v23 = vpop.f32.mrf.mxu1  ;;  %v893_v61 = vadd.f32 %v8107_v49, %v5889_v53  ;;  %v6362_v49 = vld [vmem:[#allocation10 + $0xc0] ss:$16 sps:$4 sm:$0xff]  }
 0x34e   :  { %v4616_v52 = vmul.f32 -1.442695, %v1673_v18  ;;  %v1674_v27 = vadd.f32 %v1627_v22, %v820_v43  ;;  %v8108_v18 = vld [vmem:[#allocation85_spill] sm:$0xff] }
 0x34f   :  { %v4965_v16 = vpop.eup %4964  ;;  %v1629_v15 = vpop.f32.mrf.mxu0  ;;  %v1676_v43 = vadd.f32 %v1668_v23, %v893_v61  ;;  %v891_v22 = vadd.f32 %v8108_v18, %v5893_v55  ;;  %v6365_v61 = vld [vmem:[#allocation10 + $0xc8] ss:$16 sps:$4 sm:$0xff]   ;;  %v6368_v18 = vld [vmem:[#allocation10 + $0xa4] ss:$16 sps:$4 sm:$0xff]  }
 0x350   :  { %v1670_v21 = vpop.f32.mrf.mxu1  ;;  %v4967_v14 = vpop.eup %4966  ;;  %4970 = vpow2.f32 %v4616_v52  ;;  %v4617_v58 = vmul.f32 -1.442695, %v1674_v27 }
 0x351   :  { %v4969_v26 = vpop.eup %4968  ;;  %v1630_v17 = vpop.f32.mrf.mxu0  ;;  %v1581_v12 = vmul.f32 %v4967_v14, %v4965_v16  ;;  %v1675_v52 = vadd.f32 %v1666_v63, %v891_v22  ;;  %v4618_v24 = vmul.f32 -1.442695, %v1676_v43  ;;  %v6351_v63 = vld [vmem:[#allocation10 + $0xe8] ss:$16 sps:$4 sm:$0xff]   ;;  %v6371_v22 = vld [vmem:[#allocation10 + $0xac] ss:$16 sps:$4 sm:$0xff]  }
 0x352   :  { %v1671_v46 = vpop.f32.mrf.mxu1  ;;  %v1580_v48 = vmul.f32 %v4969_v26, %v8106_v59  ;;  %4972 = vpow2.f32 %v4617_v58  ;;  %v6348_v58 = vld [vmem:[#allocation10 + $0xe0] ss:$16 sps:$4 sm:$0xff]   ;;  %v6354_v26 = vld [vmem:[#allocation10 + $0xc4] ss:$16 sps:$4 sm:$0xff]  }
 0x353   :  { %4974 = vrcp.f32 %v1577_v13  ;;  %v6357_v13 = vld [vmem:[#allocation10 + $0xcc] ss:$16 sps:$4 sm:$0xff]  }
 0x354   :  { %v6337_v10 = vadd.f32 %v1581_v12, %v1580_v48 }
 0x356   :  { %4976 = vtanh.f32 %v6337_v10 }
 0x357   :  { %4978 = vtanh.f32 %v1675_v52 }
 0x358   :  { %4980 = vpow2.f32 %v4618_v24 }
 0x35d   :  { %v4971_v27 = vpop.eup %4970 }
 0x35e   :  { %v1680_v15 = vadd.f32 1.0, %v4971_v27 }
 0x35f   :  { %v4973_v16 = vpop.eup %4972 }
 0x360   :  { %4982 = vrcp.f32 %v1680_v15  ;;  %v1686_v48 = vadd.f32 1.0, %v4973_v16  ;;  %v4975_v59 = vpop.eup %4974  ;;  %v6375_v15 = vld [vmem:[#allocation10 + $0xa0] ss:$16 sps:$4 sm:$0xff]   ;;  %v6378_v16 = vld [vmem:[#allocation10 + $0xa8] ss:$16 sps:$4 sm:$0xff]  }
 0x362   :  { %4984 = vrcp.f32 %v1686_v48 }
 0x363   :  { %v4977_v21 = vpop.eup %4976 }
 0x364   :  { %v6344_v14 = vmul.f32 %v4977_v21, %v4975_v59  ;;  %v4979_v17 = vpop.eup %4978  ;;  %v6383_v59 = vld [vmem:[#allocation10 + $0x84] ss:$16 sps:$4 sm:$0xff]   ;;  %v6386_v21 = vld [vmem:[#allocation10 + $0x8c] ss:$16 sps:$4 sm:$0xff]  }
 0x365   :  { %v4981_v46 = vpop.eup %4980 }
 0x366   :  { %8109 = vst [vmem:[#allocation26_spill] sm:$0xff] %v6344_v14  ;;  %v1702_v23 = vpack.c.bf16 %v6344_v14, %v6344_v14  ;;  %v1693_v24 = vadd.f32 1.0, %v4981_v46  ;;  %v6399_v46 = vld [vmem:[#allocation10 + $0x6c] ss:$16 sps:$4 sm:$0xff]   ;;  %v6417_v14 = vld [vmem:[#allocation10 + $0x48] ss:$16 sps:$4 sm:$0xff]  }
 0x367   :  { %8113 = vst [vmem:[#allocation31_spill] sm:$0xff] %v6399_v46  ;;  %8119 = vst [vmem:[#allocation38_spill] sm:$0xff] %v6417_v14 }
 0x368   :  { %1736 = vmatmul.mubr.bf16.vlgmr.msra.gmra.mxu0 %v1702_v23  ;;  %1777 = vmatmul.mubr.bf16.vlgmr.msra.gmra.mxu1 %v1702_v23  ;;  %4986 = vrcp.f32 %v1693_v24  ;;  %v6393_v23 = vld [vmem:[#allocation10 + $0x88] ss:$16 sps:$4 sm:$0xff]   ;;  %v6411_v24 = vld [vmem:[#allocation10 + $0x4c] ss:$16 sps:$4 sm:$0xff]  }
 0x369   :  { %1786 = vmatpush1.bf16.msra.mxu0 %v6348_v58  ;;  %1827 = vmatpush1.bf16.msra.mxu1 %v6351_v63  ;;  %8111 = vst [vmem:[#allocation29_spill] sm:$0xff] %v6393_v23  ;;  %8117 = vst [vmem:[#allocation36_spill] sm:$0xff] %v6411_v24 }
 0x36a   :  { %1787 = vmatprep.subr.bf16.mxu0 %v6354_v26  ;;  %1828 = vmatprep.subr.bf16.mxu1 %v6357_v13 }
 0x36b   :  { %1817 = vmatprep.mubr.bf16.mxu0 %v7964_v56  ;;  %1858 = vmatprep.mubr.bf16.mxu1 %v7964_v56 }
 0x36d   :  { %v4983_v12 = vpop.eup %4982  ;;  %1788 = vmatpush1.bf16.msra.mxu0 %v6362_v49  ;;  %1829 = vmatpush1.bf16.msra.mxu1 %v6365_v61 }
 0x36e   :  { %v1697_v43 = vmul.f32 %v4983_v12, %v4979_v17  ;;  %1789 = vmatprep.subr.bf16.mxu0 %v6368_v18  ;;  %1830 = vmatprep.subr.bf16.mxu1 %v6371_v22  ;;  %v6396_v17 = vld [vmem:[#allocation10 + $0x64] ss:$16 sps:$4 sm:$0xff]   ;;  %v6402_v12 = vld [vmem:[#allocation10 + $0x60] ss:$16 sps:$4 sm:$0xff]  }
 0x36f   :  { %v4985_v52 = vpop.eup %4984  ;;  %8112 = vst [vmem:[#allocation30_spill] sm:$0xff] %v6396_v17  ;;  %8114 = vst [vmem:[#allocation32_spill] sm:$0xff] %v6402_v12 }
 0x370   :  { %v1696_v27 = vmul.f32 %v4985_v52, %v6241_v20  ;;  %v6390_v20 = vld [vmem:[#allocation10 + $0x80] ss:$16 sps:$4 sm:$0xff]   ;;  %v6408_v52 = vld [vmem:[#allocation10 + $0x44] ss:$16 sps:$4 sm:$0xff]  }
 0x371   :  { %1790 = vmatpush1.bf16.msra.mxu0 %v6375_v15  ;;  %1831 = vmatpush1.bf16.msra.mxu1 %v6378_v16  ;;  %8110 = vst [vmem:[#allocation28_spill] sm:$0xff] %v6390_v20  ;;  %8116 = vst [vmem:[#allocation34_spill] sm:$0xff] %v6408_v52 }
 0x372   :  { %v6381_v48 = vadd.f32 %v1697_v43, %v1696_v27  ;;  %1791 = vmatprep.subr.bf16.mxu0 %v6383_v59  ;;  %1832 = vmatprep.subr.bf16.mxu1 %v6386_v21  ;;  %v6405_v43 = vld [vmem:[#allocation10 + $0x68] ss:$16 sps:$4 sm:$0xff]   ;;  %v6414_v27 = vld [vmem:[#allocation10 + $0x40] ss:$16 sps:$4 sm:$0xff]  }
 0x373   :  { %8115 = vst [vmem:[#allocation33_spill] sm:$0xff] %v6405_v43  ;;  %8118 = vst [vmem:[#allocation37_spill] sm:$0xff] %v6414_v27 }
 0x374   :  { %4988 = vtanh.f32 %v6381_v48 }
 0x375   :  { %1792 = vmatpush1.bf16.msra.mxu0 %v6390_v20  ;;  %1833 = vmatpush1.bf16.msra.mxu1 %v6393_v23  ;;  %v6441_v23 = vld [vmem:[#allocation10 + $0x8] ss:$16 sps:$4 sm:$0xff]   ;;  %v6444_v20 = vld [vmem:[#allocation9 + $0xe4] ss:$16 sps:$4 sm:$0xff]  }
 0x376   :  { %1793 = vmatprep.subr.bf16.mxu0 %v6396_v17  ;;  %1834 = vmatprep.subr.bf16.mxu1 %v6399_v46  ;;  %v6426_v17 = vld [vmem:[#allocation10 + $0x20] ss:$16 sps:$4 sm:$0xff]  }
 0x377   :  { %8122 = vst [vmem:[#allocation41_spill] sm:$0xff] %v6426_v17 }
 0x379   :  { %1794 = vmatpush1.bf16.msra.mxu0 %v6402_v12  ;;  %1835 = vmatpush1.bf16.msra.mxu1 %v6405_v43  ;;  %v6420_v12 = vld [vmem:[#allocation10 + $0x24] ss:$16 sps:$4 sm:$0xff]   ;;  %v6423_v43 = vld [vmem:[#allocation10 + $0x2c] ss:$16 sps:$4 sm:$0xff]  }
 0x37a   :  { %1795 = vmatprep.subr.bf16.mxu0 %v6408_v52  ;;  %1836 = vmatprep.subr.bf16.mxu1 %v6411_v24  ;;  %8120 = vst [vmem:[#allocation39_spill] sm:$0xff] %v6420_v12  ;;  %8121 = vst [vmem:[#allocation40_spill] sm:$0xff] %v6423_v43  ;;  %v4987_v52 = vpop.eup %4986  ;;  %v6429_v24 = vld [vmem:[#allocation10 + $0x28] ss:$16 sps:$4 sm:$0xff]  }
 0x37b   :  { %8123 = vst [vmem:[#allocation42_spill] sm:$0xff] %v6429_v24 }
 0x37d   :  { %1796 = vmatpush1.bf16.msra.mxu0 %v6414_v27  ;;  %1837 = vmatpush1.bf16.msra.mxu1 %v6417_v14  ;;  %v6432_v27 = vld [vmem:[#allocation10 + $0x4] ss:$16 sps:$4 sm:$0xff]   ;;  %v6435_v14 = vld [vmem:[#allocation10 + $0xc] ss:$16 sps:$4 sm:$0xff]  }
 0x37e   :  { %1797 = vmatprep.subr.bf16.mxu0 %v6420_v12  ;;  %1838 = vmatprep.subr.bf16.mxu1 %v6423_v43  ;;  %v6438_v43 = vld [vmem:[#allocation10] ss:$16 sps:$4 sm:$0xff]  }
 0x381   :  { %v4989_v46 = vpop.eup %4988  ;;  %1798 = vmatpush1.bf16.msra.mxu0 %v6426_v17  ;;  %1839 = vmatpush1.bf16.msra.mxu1 %v6429_v24  ;;  %v6447_v24 = vld [vmem:[#allocation9 + $0xec] ss:$16 sps:$4 sm:$0xff]  }
 0x382   :  { %1799 = vmatprep.subr.bf16.mxu0 %v6432_v27  ;;  %1840 = vmatprep.subr.bf16.mxu1 %v6435_v14  ;;  %v1700_v12 = vmul.f32 %v4989_v46, %v4987_v52  ;;  %8124 = vst [vmem:[#allocation44_spill] sm:$0xff] %v6447_v24  ;;  %v6451_v46 = vld [vmem:[#allocation9 + $0xe8] ss:$16 sps:$4 sm:$0xff]   ;;  %v6454_v52 = vld [vmem:[#allocation9 + $0xc4] ss:$16 sps:$4 sm:$0xff]  }
 0x383   :  { %8125 = vst [vmem:[#allocation45_spill] sm:$0xff] %v6451_v46  ;;  %8126 = vst [vmem:[#allocation46_spill] sm:$0xff] %v6454_v52 }
 0x384   :  { %v1701_v17 = vpack.c.bf16 %v1700_v12, %v1700_v12  ;;  %v6457_v12 = vld [vmem:[#allocation9 + $0xcc] ss:$16 sps:$4 sm:$0xff]  }
 0x385   :  { %1800 = vmatpush1.bf16.msra.mxu0 %v6438_v43  ;;  %1841 = vmatpush1.bf16.msra.mxu1 %v6441_v23  ;;  %8127 = vst [vmem:[#allocation47_spill] sm:$0xff] %v6457_v12 }
 0x386   :  { %1902 = vmatprep.subr.bf16.mxu0 %v6444_v20  ;;  %1943 = vmatprep.subr.bf16.mxu1 %v6447_v24  ;;  %v6462_v24 = vld [vmem:[#allocation9 + $0xc0] ss:$16 sps:$4 sm:$0xff]  }
 0x387   :  { %8128 = vst [vmem:[#allocation48_spill] sm:$0xff] %v6462_v24 }
 0x388   :  { %1818 = vmatmul.mubr.bf16.vlgmr.msra.gmra.mxu0 %v1701_v17  ;;  %1859 = vmatmul.mubr.bf16.vlgmr.msra.gmra.mxu1 %v1701_v17 }
 0x389   :  { %1903 = vmatpush1.bf16.msra.mxu0 %v5916_v1  ;;  %1944 = vmatpush1.bf16.msra.mxu1 %v6451_v46  ;;  %v6465_v1 = vld [vmem:[#allocation9 + $0xc8] ss:$16 sps:$4 sm:$0xff]   ;;  %v6468_v46 = vld [vmem:[#allocation9 + $0xa4] ss:$16 sps:$4 sm:$0xff]  }
 0x38a   :  { %1904 = vmatprep.subr.bf16.mxu0 %v6454_v52  ;;  %1945 = vmatprep.subr.bf16.mxu1 %v6457_v12  ;;  %8129 = vst [vmem:[#allocation49_spill] sm:$0xff] %v6465_v1  ;;  %8130 = vst [vmem:[#allocation50_spill] sm:$0xff] %v6468_v46  ;;  %v6471_v52 = vld [vmem:[#allocation9 + $0xac] ss:$16 sps:$4 sm:$0xff]  }
 0x38b   :  { %1934 = vmatprep.mubr.bf16.mxu0 %v7964_v56  ;;  %1975 = vmatprep.mubr.bf16.mxu1 %v7964_v56  ;;  %8131 = vst [vmem:[#allocation51_spill] sm:$0xff] %v6471_v52 }
 0x38d   :  { %1905 = vmatpush1.bf16.msra.mxu0 %v6462_v24  ;;  %1946 = vmatpush1.bf16.msra.mxu1 %v6465_v1 }
 0x38e   :  { %1906 = vmatprep.subr.bf16.mxu0 %v6468_v46  ;;  %1947 = vmatprep.subr.bf16.mxu1 %v6471_v52 }
 0x391   :  { %1907 = vmatpush1.bf16.msra.mxu0 %v8043_v28  ;;  %1948 = vmatpush1.bf16.msra.mxu1 %v8044_v29  ;;  %v8132_v29 = vld [vmem:[#allocation59_spill] sm:$0xff] }
 0x392   :  { %1908 = vmatprep.subr.bf16.mxu0 %v8045_v30  ;;  %1949 = vmatprep.subr.bf16.mxu1 %v8046_v31  ;;  %v8133_v30 = vld [vmem:[#allocation60_spill] sm:$0xff]  ;;  %v8134_v31 = vld [vmem:[#allocation61_spill] sm:$0xff] }
 0x395   :  { %1909 = vmatpush1.bf16.msra.mxu0 %v8047_v32  ;;  %1950 = vmatpush1.bf16.msra.mxu1 %v8048_v33  ;;  %v8135_v32 = vld [vmem:[#allocation62_spill] sm:$0xff]  ;;  %v8136_v33 = vld [vmem:[#allocation63_spill] sm:$0xff] }
 0x396   :  { %1910 = vmatprep.subr.bf16.mxu0 %v8049_v34  ;;  %1951 = vmatprep.subr.bf16.mxu1 %v8050_v35  ;;  %v8137_v34 = vld [vmem:[#allocation64_spill] sm:$0xff]  ;;  %v8138_v35 = vld [vmem:[#allocation65_spill] sm:$0xff] }
 0x399   :  { %1911 = vmatpush1.bf16.msra.mxu0 %v8051_v36  ;;  %1952 = vmatpush1.bf16.msra.mxu1 %v8052_v37  ;;  %v8139_v37 = vld [vmem:[#allocation66_spill] sm:$0xff] }
 0x39a   :  { %1912 = vmatprep.subr.bf16.mxu0 %v8053_v38  ;;  %1953 = vmatprep.subr.bf16.mxu1 %v8054_v39  ;;  %v8140_v38 = vld [vmem:[#allocation67_spill] sm:$0xff]  ;;  %v8141_v39 = vld [vmem:[#allocation68_spill] sm:$0xff] }
 0x39d   :  { %1913 = vmatpush1.bf16.msra.mxu0 %v8055_v40  ;;  %1954 = vmatpush1.bf16.msra.mxu1 %v8056_v41  ;;  %v8142_v40 = vld [vmem:[#allocation69_spill] sm:$0xff]  ;;  %v8143_v41 = vld [vmem:[#allocation70_spill] sm:$0xff] }
 0x39e   :  { %1914 = vmatprep.subr.bf16.mxu0 %v8057_v42  ;;  %1955 = vmatprep.subr.bf16.mxu1 %v8058_v5  ;;  %v8144_v42 = vld [vmem:[#allocation71_spill] sm:$0xff]  ;;  %v8145_v5 = vld [vmem:[#allocation72_spill] sm:$0xff] }
 0x3a1   :  { %1915 = vmatpush1.bf16.msra.mxu0 %v8059_v57  ;;  %1956 = vmatpush1.bf16.msra.mxu1 %v8060_v44  ;;  %v8146_v44 = vld [vmem:[#allocation73_spill] sm:$0xff] }
 0x3a2   :  { %1916 = vmatprep.subr.bf16.mxu0 %v8061_v45  ;;  %1957 = vmatprep.subr.bf16.mxu1 %v8062_v7  ;;  %v8147_v45 = vld [vmem:[#allocation74_spill] sm:$0xff]  ;;  %v8148_v7 = vld [vmem:[#allocation75_spill] sm:$0xff] }
 0x3a5   :  { %1917 = vmatpush1.bf16.msra.mxu0 %v8063_v3  ;;  %1958 = vmatpush1.bf16.msra.mxu1 %v8064_v9  ;;  %v8149_v3 = vld [vmem:[#allocation76_spill] sm:$0xff]  ;;  %v8150_v9 = vld [vmem:[#allocation77_spill] sm:$0xff] }
 0x3a6   :  { %2014 = vmatprep.subr.bf16.mxu0 %v8065_v47  ;;  %2055 = vmatprep.subr.bf16.mxu1 %v8066_v4  ;;  %v8151_v47 = vld [vmem:[#allocation78_spill] sm:$0xff]  ;;  %v8152_v4 = vld [vmem:[#allocation79_spill] sm:$0xff] }
 0x3a8   :  { %1935 = vmatmul.mubr.bf16.vlgmr.msra.gmra.mxu0 %v1701_v17  ;;  %1976 = vmatmul.mubr.bf16.vlgmr.msra.gmra.mxu1 %v1701_v17 }
 0x3a9   :  { %2015 = vmatpush1.bf16.msra.mxu0 %v8067_v54  ;;  %2056 = vmatpush1.bf16.msra.mxu1 %v8068_v8  ;;  %v8153_v54 = vld [vmem:[#allocation80_spill] sm:$0xff] }
 0x3aa   :  { %2016 = vmatprep.subr.bf16.mxu0 %v8069_v50  ;;  %2057 = vmatprep.subr.bf16.mxu1 %v8070_v60  ;;  %v8154_v8 = vld [vmem:[#allocation24_spill] sm:$0xff]  ;;  %v8155_v50 = vld [vmem:[#allocation25_spill] sm:$0xff] }
 0x3ab   :  { %2046 = vmatprep.mubr.bf16.mxu0 %v7964_v56  ;;  %2087 = vmatprep.mubr.bf16.mxu1 %v7964_v56 }
 0x3ad   :  { %2017 = vmatpush1.bf16.msra.mxu0 %v8071_v11  ;;  %2058 = vmatpush1.bf16.msra.mxu1 %v8072_v51 }
 0x3ae   :  { %2018 = vmatprep.subr.bf16.mxu0 %v8073_v62  ;;  %2059 = vmatprep.subr.bf16.mxu1 %v8074_v0 }
 0x3b1   :  { %2019 = vmatpush1.bf16.msra.mxu0 %v8132_v29  ;;  %2060 = vmatpush1.bf16.msra.mxu1 %v8133_v30 }
 0x3b2   :  { %2020 = vmatprep.subr.bf16.mxu0 %v8134_v31  ;;  %2061 = vmatprep.subr.bf16.mxu1 %v8135_v32 }
 0x3b5   :  { %2021 = vmatpush1.bf16.msra.mxu0 %v8136_v33  ;;  %2062 = vmatpush1.bf16.msra.mxu1 %v8137_v34 }
 0x3b6   :  { %2022 = vmatprep.subr.bf16.mxu0 %v8138_v35  ;;  %2063 = vmatprep.subr.bf16.mxu1 %v8139_v37 }
 0x3b9   :  { %2023 = vmatpush1.bf16.msra.mxu0 %v8140_v38  ;;  %2064 = vmatpush1.bf16.msra.mxu1 %v8141_v39 }
 0x3ba   :  { %2024 = vmatprep.subr.bf16.mxu0 %v8142_v40  ;;  %2065 = vmatprep.subr.bf16.mxu1 %v8143_v41 }
 0x3bd   :  { %2025 = vmatpush1.bf16.msra.mxu0 %v8144_v42  ;;  %2066 = vmatpush1.bf16.msra.mxu1 %v8145_v5 }
 0x3be   :  { %2026 = vmatprep.subr.bf16.mxu0 %v8146_v44  ;;  %2067 = vmatprep.subr.bf16.mxu1 %v8147_v45 }
 0x3c1   :  { %2027 = vmatpush1.bf16.msra.mxu0 %v8148_v7  ;;  %2068 = vmatpush1.bf16.msra.mxu1 %v8149_v3 }
 0x3c2   :  { %2028 = vmatprep.subr.bf16.mxu0 %v8150_v9  ;;  %2069 = vmatprep.subr.bf16.mxu1 %v8151_v47 }
 0x3c5   :  { %2029 = vmatpush1.bf16.msra.mxu0 %v8152_v4  ;;  %2070 = vmatpush1.bf16.msra.mxu1 %v8153_v54  ;;  %v8156_v54 = vld [vmem:[#allocation86_spill] sm:$0xff] }
 0x3c6   :  { %2096 = vmatprep.subr.bf16.mxu0 %v8154_v8  ;;  %2137 = vmatprep.subr.bf16.mxu1 %v8155_v50 }
 0x428   :  { %v1737_v60 = vpop.f32.mrf.mxu0  ;;  %v1778_v11 = vpop.f32.mrf.mxu1 }
 0x42a   :  { %v1739_v51 = vpop.f32.mrf.mxu0  ;;  %v1780_v62 = vpop.f32.mrf.mxu1 }
 0x42c   :  { %v1741_v0 = vpop.f32.mrf.mxu0  ;;  %v1782_v17 = vpop.f32.mrf.mxu1 }
 0x42e   :  { %v1742_v29 = vpop.f32.mrf.mxu0  ;;  %v1783_v30 = vpop.f32.mrf.mxu1 }
 0x42f   :  { %v8157_v29 = vld [vmem:[#allocation22_spill] sm:$0xff]  ;;  %v8158_v30 = vld [vmem:[#allocation89_spill] sm:$0xff] }
 0x448   :  { %v1819_v31 = vpop.f32.mrf.mxu0  ;;  %v1860_v32 = vpop.f32.mrf.mxu1 }
 0x449   :  { %v1820_v33 = vadd.f32 %v1819_v31, %v1737_v60  ;;  %v1861_v9 = vadd.f32 %v1860_v32, %v1778_v11  ;;  %v824_v31 = vadd.f32 %v8158_v30, %v8157_v29 }
 0x44a   :  { %v1821_v34 = vpop.f32.mrf.mxu0  ;;  %v1862_v35 = vpop.f32.mrf.mxu1 }
 0x44b   :  { %v1867_v37 = vadd.f32 %v1820_v33, %v8099_v2  ;;  %v1822_v38 = vadd.f32 %v1821_v34, %v1739_v51  ;;  %v1863_v7 = vadd.f32 %v1862_v35, %v1780_v62  ;;  %v1869_v60 = vadd.f32 %v1861_v9, %v8156_v54  ;;  %v8159_v62 = vld [vmem:[#allocation91_spill] sm:$0xff] }
 0x44c   :  { %v1823_v39 = vpop.f32.mrf.mxu0  ;;  %v1864_v40 = vpop.f32.mrf.mxu1  ;;  %v826_v35 = vadd.f32 %v8159_v62, %v5881_v6 }
 0x44d   :  { %v4619_v41 = vmul.f32 -1.442695, %v1867_v37  ;;  %v1868_v42 = vadd.f32 %v1822_v38, %v8100_v25  ;;  %v1870_v3 = vadd.f32 %v1863_v7, %v8101_v19 }
 0x44e   :  { %v1824_v5 = vpop.f32.mrf.mxu0  ;;  %v1865_v44 = vpop.f32.mrf.mxu1 }
 0x44f   :  { %4990 = vpow2.f32 %v4619_v41  ;;  %v4620_v45 = vmul.f32 -1.442695, %v1868_v42  ;;  %v4621_v47 = vmul.f32 -1.442695, %v1870_v3 }
 0x451   :  { %4992 = vpow2.f32 %v4620_v45 }
 0x452   :  { %4994 = vpow2.f32 %v4621_v47 }
 0x45c   :  { %v4991_v4 = vpop.eup %4990 }
 0x45d   :  { %v1874_v0 = vadd.f32 1.0, %v4991_v4 }
 0x45e   :  { %v4993_v51 = vpop.eup %4992 }
 0x45f   :  { %4996 = vrcp.f32 %v1874_v0  ;;  %v1880_v17 = vadd.f32 1.0, %v4993_v51  ;;  %v4995_v38 = vpop.eup %4994  ;;  %v8160_v51 = vld [vmem:[#allocation92_spill] sm:$0xff] }
 0x460   :  { %4998 = vtanh.f32 %v1869_v60  ;;  %v1887_v3 = vadd.f32 1.0, %v4995_v38 }
 0x461   :  { %5000 = vrcp.f32 %v1880_v17  ;;  %v899_v17 = vadd.f32 %v8160_v51, %v5889_v53  ;;  %v8167_v51 = vld [vmem:[#allocation32_spill] sm:$0xff] }
 0x468   :  { %v1936_v33 = vpop.f32.mrf.mxu0  ;;  %v1977_v34 = vpop.f32.mrf.mxu1 }
 0x469   :  { %v1984_v11 = vadd.f32 %v1936_v33, %v824_v31  ;;  %v8161_v31 = vld [vmem:[#allocation90_spill] sm:$0xff] }
 0x46a   :  { %v1938_v32 = vpop.f32.mrf.mxu0  ;;  %v1979_v37 = vpop.f32.mrf.mxu1  ;;  %v897_v33 = vadd.f32 %v8161_v31, %v5893_v55  ;;  %v8170_v31 = vld [vmem:[#allocation36_spill] sm:$0xff] }
 0x46b   :  { %v4622_v39 = vmul.f32 -1.442695, %v1984_v11  ;;  %v1985_v40 = vadd.f32 %v1938_v32, %v826_v35  ;;  %v1987_v30 = vadd.f32 %v1979_v37, %v899_v17  ;;  %v8168_v17 = vld [vmem:[#allocation33_spill] sm:$0xff] }
 0x46c   :  { %v4997_v41 = vpop.eup %4996  ;;  %v1940_v42 = vpop.f32.mrf.mxu0  ;;  %v1986_v62 = vadd.f32 %v1977_v34, %v897_v33  ;;  %v8171_v33 = vld [vmem:[#allocation37_spill] sm:$0xff] }
 0x46d   :  { %v1981_v5 = vpop.f32.mrf.mxu1  ;;  %v4999_v44 = vpop.eup %4998  ;;  %5002 = vpow2.f32 %v4622_v39  ;;  %v4623_v45 = vmul.f32 -1.442695, %v1985_v40  ;;  %v4624_v35 = vmul.f32 -1.442695, %v1987_v30  ;;  %v8169_v30 = vld [vmem:[#allocation34_spill] sm:$0xff] }
 0x46e   :  { %v5001_v7 = vpop.eup %5000  ;;  %v1941_v9 = vpop.f32.mrf.mxu0  ;;  %v1891_v4 = vmul.f32 %v4999_v44, %v4997_v41 }
 0x46f   :  { %v1982_v47 = vpop.f32.mrf.mxu1  ;;  %v1890_v60 = vmul.f32 %v5001_v7, %v6337_v10  ;;  %5004 = vpow2.f32 %v4623_v45 }
 0x470   :  { %5006 = vrcp.f32 %v1887_v3  ;;  %v8163_v47 = vld [vmem:[#allocation28_spill] sm:$0xff] }
 0x471   :  { %v6541_v0 = vadd.f32 %v1891_v4, %v1890_v60  ;;  %v8164_v4 = vld [vmem:[#allocation29_spill] sm:$0xff]  ;;  %v8165_v60 = vld [vmem:[#allocation30_spill] sm:$0xff] }
 0x473   :  { %5008 = vtanh.f32 %v6541_v0 }
 0x474   :  { %5010 = vtanh.f32 %v1986_v62  ;;  %v8172_v62 = vld [vmem:[#allocation38_spill] sm:$0xff] }
 0x475   :  { %5012 = vpow2.f32 %v4624_v35  ;;  %v8173_v35 = vld [vmem:[#allocation39_spill] sm:$0xff] }
 0x47a   :  { %v5003_v11 = vpop.eup %5002 }
 0x47b   :  { %v1991_v32 = vadd.f32 1.0, %v5003_v11  ;;  %v8174_v11 = vld [vmem:[#allocation40_spill] sm:$0xff] }
 0x47c   :  { %v5005_v38 = vpop.eup %5004 }
 0x47d   :  { %5014 = vrcp.f32 %v1991_v32  ;;  %v1997_v10 = vadd.f32 1.0, %v5005_v38  ;;  %v5007_v39 = vpop.eup %5006 }
 0x47f   :  { %5016 = vrcp.f32 %v1997_v10  ;;  %v8175_v10 = vld [vmem:[#allocation41_spill] sm:$0xff] }
 0x480   :  { %v5009_v40 = vpop.eup %5008 }
 0x481   :  { %v6548_v41 = vmul.f32 %v5009_v40, %v5007_v39  ;;  %v5011_v34 = vpop.eup %5010  ;;  %v8176_v39 = vld [vmem:[#allocation42_spill] sm:$0xff] }
 0x482   :  { %v5013_v42 = vpop.eup %5012 }
 0x483   :  { %8162 = vst [vmem:[#allocation52_spill] sm:$0xff] %v6548_v41  ;;  %v2013_v37 = vpack.c.bf16 %v6548_v41, %v6548_v41  ;;  %v2004_v7 = vadd.f32 1.0, %v5013_v42  ;;  %v8178_v42 = vld [vmem:[#allocation23_spill] sm:$0xff]  ;;  %v6619_v41 = vld [vmem:[#allocation9 + $0x6c] ss:$16 sps:$4 sm:$0xff]  }
 0x484   :  { %8187 = vst [vmem:[#allocation81_spill] sm:$0xff] %v6619_v41 }
 0x485   :  { %2047 = vmatmul.mubr.bf16.vlgmr.msra.gmra.mxu0 %v2013_v37  ;;  %2088 = vmatmul.mubr.bf16.vlgmr.msra.gmra.mxu1 %v2013_v37  ;;  %5018 = vrcp.f32 %v2004_v7  ;;  %v6604_v7 = vld [vmem:[#allocation9 + $0x84] ss:$16 sps:$4 sm:$0xff]  }
 0x486   :  { %2097 = vmatpush1.bf16.msra.mxu0 %v6348_v58  ;;  %2138 = vmatpush1.bf16.msra.mxu1 %v6351_v63  ;;  %8182 = vst [vmem:[#allocation54_spill] sm:$0xff] %v6604_v7 }
 0x487   :  { %2098 = vmatprep.subr.bf16.mxu0 %v6354_v26  ;;  %2139 = vmatprep.subr.bf16.mxu1 %v6357_v13 }
 0x488   :  { %2128 = vmatprep.mubr.bf16.mxu0 %v7964_v56  ;;  %2169 = vmatprep.mubr.bf16.mxu1 %v7964_v56 }
 0x48a   :  { %v5015_v5 = vpop.eup %5014  ;;  %2099 = vmatpush1.bf16.msra.mxu0 %v6362_v49  ;;  %2140 = vmatpush1.bf16.msra.mxu1 %v6365_v61 }
 0x48b   :  { %v2008_v44 = vmul.f32 %v5015_v5, %v5011_v34  ;;  %2100 = vmatprep.subr.bf16.mxu0 %v6368_v18  ;;  %2141 = vmatprep.subr.bf16.mxu1 %v6371_v22  ;;  %v8177_v34 = vld [vmem:[#allocation44_spill] sm:$0xff]  ;;  %v8179_v5 = vld [vmem:[#allocation45_spill] sm:$0xff] }
 0x48c   :  { %v5017_v45 = vpop.eup %5016 }
 0x48d   :  { %v2007_v3 = vmul.f32 %v5017_v45, %v6381_v48  ;;  %v8166_v48 = vld [vmem:[#allocation31_spill] sm:$0xff]  ;;  %v6601_v45 = vld [vmem:[#allocation9 + $0xa8] ss:$16 sps:$4 sm:$0xff]  }
 0x48e   :  { %2101 = vmatpush1.bf16.msra.mxu0 %v6375_v15  ;;  %2142 = vmatpush1.bf16.msra.mxu1 %v6378_v16  ;;  %8181 = vst [vmem:[#allocation53_spill] sm:$0xff] %v6601_v45 }
 0x48f   :  { %v6565_v9 = vadd.f32 %v2008_v44, %v2007_v3  ;;  %2102 = vmatprep.subr.bf16.mxu0 %v6383_v59  ;;  %2143 = vmatprep.subr.bf16.mxu1 %v6386_v21  ;;  %v8180_v44 = vld [vmem:[#allocation46_spill] sm:$0xff] }
 0x490   :  { %v6607_v3 = vld [vmem:[#allocation9 + $0x8c] ss:$16 sps:$4 sm:$0xff]  }
 0x491   :  { %5020 = vtanh.f32 %v6565_v9  ;;  %8183 = vst [vmem:[#allocation55_spill] sm:$0xff] %v6607_v3 }
 0x492   :  { %2103 = vmatpush1.bf16.msra.mxu0 %v8163_v47  ;;  %2144 = vmatpush1.bf16.msra.mxu1 %v8164_v4  ;;  %v5019_v32 = vpop.eup %5018 }
 0x493   :  { %2104 = vmatprep.subr.bf16.mxu0 %v8165_v60  ;;  %2145 = vmatprep.subr.bf16.mxu1 %v8166_v48 }
 0x496   :  { %2105 = vmatpush1.bf16.msra.mxu0 %v8167_v51  ;;  %2146 = vmatpush1.bf16.msra.mxu1 %v8168_v17 }
 0x497   :  { %2106 = vmatprep.subr.bf16.mxu0 %v8169_v30  ;;  %2147 = vmatprep.subr.bf16.mxu1 %v8170_v31 }
 0x49a   :  { %2107 = vmatpush1.bf16.msra.mxu0 %v8171_v33  ;;  %2148 = vmatpush1.bf16.msra.mxu1 %v8172_v62 }
 0x49b   :  { %2108 = vmatprep.subr.bf16.mxu0 %v8173_v35  ;;  %2149 = vmatprep.subr.bf16.mxu1 %v8174_v11 }
 0x49e   :  { %v5021_v38 = vpop.eup %5020  ;;  %2109 = vmatpush1.bf16.msra.mxu0 %v8175_v10  ;;  %2150 = vmatpush1.bf16.msra.mxu1 %v8176_v39 }
 0x49f   :  { %2110 = vmatprep.subr.bf16.mxu0 %v6432_v27  ;;  %2151 = vmatprep.subr.bf16.mxu1 %v6435_v14  ;;  %v2011_v40 = vmul.f32 %v5021_v38, %v5019_v32  ;;  %v6610_v32 = vld [vmem:[#allocation9 + $0x80] ss:$16 sps:$4 sm:$0xff]   ;;  %v6613_v38 = vld [vmem:[#allocation9 + $0x88] ss:$16 sps:$4 sm:$0xff]  }
 0x4a0   :  { %8184 = vst [vmem:[#allocation56_spill] sm:$0xff] %v6610_v32  ;;  %8185 = vst [vmem:[#allocation57_spill] sm:$0xff] %v6613_v38 }
 0x4a1   :  { %v2012_v37 = vpack.c.bf16 %v2011_v40, %v2011_v40  ;;  %v6616_v40 = vld [vmem:[#allocation9 + $0x64] ss:$16 sps:$4 sm:$0xff]  }
 0x4a2   :  { %2111 = vmatpush1.bf16.msra.mxu0 %v6438_v43  ;;  %2152 = vmatpush1.bf16.msra.mxu1 %v6441_v23  ;;  %8186 = vst [vmem:[#allocation58_spill] sm:$0xff] %v6616_v40 }
 0x4a3   :  { %2213 = vmatprep.subr.bf16.mxu0 %v6444_v20  ;;  %2254 = vmatprep.subr.bf16.mxu1 %v8177_v34 }
 0x4a5   :  { %2129 = vmatmul.mubr.bf16.vlgmr.msra.gmra.mxu0 %v2012_v37  ;;  %2170 = vmatmul.mubr.bf16.vlgmr.msra.gmra.mxu1 %v2012_v37 }
 0x4a6   :  { %2214 = vmatpush1.bf16.msra.mxu0 %v8178_v42  ;;  %2255 = vmatpush1.bf16.msra.mxu1 %v8179_v5 }
 0x4a7   :  { %2215 = vmatprep.subr.bf16.mxu0 %v8180_v44  ;;  %2256 = vmatprep.subr.bf16.mxu1 %v6457_v12 }
 0x4a8   :  { %2245 = vmatprep.mubr.bf16.mxu0 %v7964_v56  ;;  %2286 = vmatprep.mubr.bf16.mxu1 %v7964_v56 }
 0x4aa   :  { %2216 = vmatpush1.bf16.msra.mxu0 %v6462_v24  ;;  %2257 = vmatpush1.bf16.msra.mxu1 %v6465_v1 }
 0x4ab   :  { %2217 = vmatprep.subr.bf16.mxu0 %v6468_v46  ;;  %2258 = vmatprep.subr.bf16.mxu1 %v6471_v52 }
 0x4ae   :  { %2218 = vmatpush1.bf16.msra.mxu0 %v8043_v28  ;;  %2259 = vmatpush1.bf16.msra.mxu1 %v6601_v45 }
 0x4af   :  { %2219 = vmatprep.subr.bf16.mxu0 %v6604_v7  ;;  %2260 = vmatprep.subr.bf16.mxu1 %v6607_v3  ;;  %v6623_v7 = vld [vmem:[#allocation9 + $0x68] ss:$16 sps:$4 sm:$0xff]   ;;  %v6626_v3 = vld [vmem:[#allocation9 + $0x44] ss:$16 sps:$4 sm:$0xff]  }
 0x4b0   :  { %8188 = vst [vmem:[#allocation82_spill] sm:$0xff] %v6623_v7  ;;  %8189 = vst [vmem:[#allocation83_spill] sm:$0xff] %v6626_v3 }
 0x4b2   :  { %2220 = vmatpush1.bf16.msra.mxu0 %v6610_v32  ;;  %2261 = vmatpush1.bf16.msra.mxu1 %v6613_v38  ;;  %v6629_v32 = vld [vmem:[#allocation9 + $0x4c] ss:$16 sps:$4 sm:$0xff]   ;;  %v6632_v38 = vld [vmem:[#allocation9 + $0x40] ss:$16 sps:$4 sm:$0xff]  }
 0x4b3   :  { %2221 = vmatprep.subr.bf16.mxu0 %v6616_v40  ;;  %2262 = vmatprep.subr.bf16.mxu1 %v6619_v41  ;;  %8190 = vst [vmem:[#allocation84_spill] sm:$0xff] %v6629_v32  ;;  %8191 = vst [vmem:[#allocation87_spill] sm:$0xff] %v6632_v38  ;;  %v6635_v40 = vld [vmem:[#allocation9 + $0x48] ss:$16 sps:$4 sm:$0xff]  }
 0x4b4   :  { %8192 = vst [vmem:[#allocation113_spill] sm:$0xff] %v6635_v40 }
 0x4b6   :  { %2222 = vmatpush1.bf16.msra.mxu0 %v8051_v36  ;;  %2263 = vmatpush1.bf16.msra.mxu1 %v6623_v7  ;;  %v6638_v36 = vld [vmem:[#allocation9 + $0x24] ss:$16 sps:$4 sm:$0xff]   ;;  %v6641_v7 = vld [vmem:[#allocation9 + $0x2c] ss:$16 sps:$4 sm:$0xff]  }
 0x4b7   :  { %2223 = vmatprep.subr.bf16.mxu0 %v6626_v3  ;;  %2264 = vmatprep.subr.bf16.mxu1 %v6629_v32  ;;  %8193 = vst [vmem:[#allocation88_spill] sm:$0xff] %v6638_v36  ;;  %8194 = vst [vmem:[#allocation85_spill] sm:$0xff] %v6641_v7  ;;  %v6645_v3 = vld [vmem:[#allocation9 + $0x28] ss:$16 sps:$4 sm:$0xff]   ;;  %v6648_v32 = vld [vmem:[#allocation9 + $0x4] ss:$16 sps:$4 sm:$0xff]  }
 0x4b8   :  { %8195 = vst [vmem:[#allocation59_spill] sm:$0xff] %v6645_v3  ;;  %8196 = vst [vmem:[#allocation60_spill] sm:$0xff] %v6648_v32 }
 0x4ba   :  { %2224 = vmatpush1.bf16.msra.mxu0 %v6632_v38  ;;  %2265 = vmatpush1.bf16.msra.mxu1 %v6635_v40  ;;  %v6651_v38 = vld [vmem:[#allocation9 + $0xc] ss:$16 sps:$4 sm:$0xff]   ;;  %v6654_v40 = vld [vmem:[#allocation9] ss:$16 sps:$4 sm:$0xff]  }
 0x4bb   :  { %2225 = vmatprep.subr.bf16.mxu0 %v6638_v36  ;;  %2266 = vmatprep.subr.bf16.mxu1 %v6641_v7  ;;  %8197 = vst [vmem:[#allocation61_spill] sm:$0xff] %v6651_v38  ;;  %8198 = vst [vmem:[#allocation62_spill] sm:$0xff] %v6654_v40  ;;  %v6657_v36 = vld [vmem:[#allocation9 + $0x8] ss:$16 sps:$4 sm:$0xff]  }
 0x4bc   :  { %8199 = vst [vmem:[#allocation63_spill] sm:$0xff] %v6657_v36 }
 0x4be   :  { %2226 = vmatpush1.bf16.msra.mxu0 %v8059_v57  ;;  %2267 = vmatpush1.bf16.msra.mxu1 %v6645_v3  ;;  %v6660_v57 = vld [vmem:[#allocation12 + $0xe4] ss:$16 sps:$4 sm:$0xff]   ;;  %v6663_v3 = vld [vmem:[#allocation12 + $0xec] ss:$16 sps:$4 sm:$0xff]  }
 0x4bf   :  { %2227 = vmatprep.subr.bf16.mxu0 %v6648_v32  ;;  %2268 = vmatprep.subr.bf16.mxu1 %v6651_v38  ;;  %8200 = vst [vmem:[#allocation64_spill] sm:$0xff] %v6660_v57  ;;  %8201 = vst [vmem:[#allocation65_spill] sm:$0xff] %v6663_v3  ;;  %v6666_v32 = vld [vmem:[#allocation12 + $0xe0] ss:$16 sps:$4 sm:$0xff]   ;;  %v6669_v38 = vld [vmem:[#allocation12 + $0xe8] ss:$16 sps:$4 sm:$0xff]  }
 0x4c0   :  { %8202 = vst [vmem:[#allocation66_spill] sm:$0xff] %v6666_v32  ;;  %8203 = vst [vmem:[#allocation67_spill] sm:$0xff] %v6669_v38 }
 0x4c2   :  { %2228 = vmatpush1.bf16.msra.mxu0 %v6654_v40  ;;  %2269 = vmatpush1.bf16.msra.mxu1 %v6657_v36  ;;  %v6672_v40 = vld [vmem:[#allocation12 + $0xc4] ss:$16 sps:$4 sm:$0xff]   ;;  %v6675_v36 = vld [vmem:[#allocation12 + $0xcc] ss:$16 sps:$4 sm:$0xff]  }
 0x4c3   :  { %2325 = vmatprep.subr.bf16.mxu0 %v6660_v57  ;;  %2366 = vmatprep.subr.bf16.mxu1 %v6663_v3  ;;  %8204 = vst [vmem:[#allocation68_spill] sm:$0xff] %v6672_v40  ;;  %8205 = vst [vmem:[#allocation69_spill] sm:$0xff] %v6675_v36  ;;  %v6695_v3 = vld [vmem:[#allocation12 + $0xa8] ss:$16 sps:$4 sm:$0xff]  }
 0x4c4   :  { %8211 = vst [vmem:[#allocation75_spill] sm:$0xff] %v6695_v3 }
 0x4c5   :  { %2246 = vmatmul.mubr.bf16.vlgmr.msra.gmra.mxu0 %v2012_v37  ;;  %2287 = vmatmul.mubr.bf16.vlgmr.msra.gmra.mxu1 %v2012_v37  ;;  %v6680_v37 = vld [vmem:[#allocation12 + $0xc0] ss:$16 sps:$4 sm:$0xff]  }
 0x4c6   :  { %2326 = vmatpush1.bf16.msra.mxu0 %v6666_v32  ;;  %2367 = vmatpush1.bf16.msra.mxu1 %v6669_v38  ;;  %8206 = vst [vmem:[#allocation70_spill] sm:$0xff] %v6680_v37  ;;  %v6683_v32 = vld [vmem:[#allocation12 + $0xc8] ss:$16 sps:$4 sm:$0xff]   ;;  %v6686_v38 = vld [vmem:[#allocation12 + $0xa4] ss:$16 sps:$4 sm:$0xff]  }
 0x4c7   :  { %2327 = vmatprep.subr.bf16.mxu0 %v6672_v40  ;;  %2368 = vmatprep.subr.bf16.mxu1 %v6675_v36  ;;  %8207 = vst [vmem:[#allocation71_spill] sm:$0xff] %v6683_v32  ;;  %8208 = vst [vmem:[#allocation72_spill] sm:$0xff] %v6686_v38  ;;  %v6689_v40 = vld [vmem:[#allocation12 + $0xac] ss:$16 sps:$4 sm:$0xff]   ;;  %v6692_v36 = vld [vmem:[#allocation12 + $0xa0] ss:$16 sps:$4 sm:$0xff]  }
 0x4c8   :  { %2357 = vmatprep.mubr.bf16.mxu0 %v7964_v56  ;;  %2398 = vmatprep.mubr.bf16.mxu1 %v7964_v56  ;;  %8209 = vst [vmem:[#allocation73_spill] sm:$0xff] %v6689_v40  ;;  %8210 = vst [vmem:[#allocation74_spill] sm:$0xff] %v6692_v36 }
 0x4ca   :  { %2328 = vmatpush1.bf16.msra.mxu0 %v6680_v37  ;;  %2369 = vmatpush1.bf16.msra.mxu1 %v6683_v32  ;;  %v6698_v37 = vld [vmem:[#allocation12 + $0x84] ss:$16 sps:$4 sm:$0xff]   ;;  %v6701_v32 = vld [vmem:[#allocation12 + $0x8c] ss:$16 sps:$4 sm:$0xff]  }
 0x4cb   :  { %2329 = vmatprep.subr.bf16.mxu0 %v6686_v38  ;;  %2370 = vmatprep.subr.bf16.mxu1 %v6689_v40  ;;  %8212 = vst [vmem:[#allocation76_spill] sm:$0xff] %v6698_v37  ;;  %8213 = vst [vmem:[#allocation77_spill] sm:$0xff] %v6701_v32  ;;  %v6704_v38 = vld [vmem:[#allocation12 + $0x80] ss:$16 sps:$4 sm:$0xff]   ;;  %v6707_v40 = vld [vmem:[#allocation12 + $0x88] ss:$16 sps:$4 sm:$0xff]  }
 0x4cc   :  { %8214 = vst [vmem:[#allocation78_spill] sm:$0xff] %v6704_v38  ;;  %8215 = vst [vmem:[#allocation79_spill] sm:$0xff] %v6707_v40 }
 0x4ce   :  { %2330 = vmatpush1.bf16.msra.mxu0 %v6692_v36  ;;  %2371 = vmatpush1.bf16.msra.mxu1 %v6695_v3  ;;  %v6710_v36 = vld [vmem:[#allocation12 + $0x64] ss:$16 sps:$4 sm:$0xff]   ;;  %v6713_v3 = vld [vmem:[#allocation12 + $0x6c] ss:$16 sps:$4 sm:$0xff]  }
 0x4cf   :  { %2331 = vmatprep.subr.bf16.mxu0 %v6698_v37  ;;  %2372 = vmatprep.subr.bf16.mxu1 %v6701_v32  ;;  %8216 = vst [vmem:[#allocation80_spill] sm:$0xff] %v6710_v36  ;;  %8217 = vst [vmem:[#allocation24_spill] sm:$0xff] %v6713_v3  ;;  %v6716_v37 = vld [vmem:[#allocation12 + $0x60] ss:$16 sps:$4 sm:$0xff]   ;;  %v6719_v32 = vld [vmem:[#allocation12 + $0x68] ss:$16 sps:$4 sm:$0xff]  }
 0x4d0   :  { %8218 = vst [vmem:[#allocation25_spill] sm:$0xff] %v6716_v37  ;;  %8219 = vst [vmem:[#allocation86_spill] sm:$0xff] %v6719_v32 }
 0x4d2   :  { %2332 = vmatpush1.bf16.msra.mxu0 %v6704_v38  ;;  %2373 = vmatpush1.bf16.msra.mxu1 %v6707_v40  ;;  %v6722_v38 = vld [vmem:[#allocation12 + $0x44] ss:$16 sps:$4 sm:$0xff]   ;;  %v6725_v40 = vld [vmem:[#allocation12 + $0x4c] ss:$16 sps:$4 sm:$0xff]  }
 0x4d3   :  { %2333 = vmatprep.subr.bf16.mxu0 %v6710_v36  ;;  %2374 = vmatprep.subr.bf16.mxu1 %v6713_v3  ;;  %8220 = vst [vmem:[#allocation22_spill] sm:$0xff] %v6722_v38  ;;  %8221 = vst [vmem:[#allocation89_spill] sm:$0xff] %v6725_v40  ;;  %v6728_v36 = vld [vmem:[#allocation12 + $0x40] ss:$16 sps:$4 sm:$0xff]   ;;  %v6731_v3 = vld [vmem:[#allocation12 + $0x48] ss:$16 sps:$4 sm:$0xff]  }
 0x4d4   :  { %8222 = vst [vmem:[#allocation91_spill] sm:$0xff] %v6728_v36  ;;  %8223 = vst [vmem:[#allocation92_spill] sm:$0xff] %v6731_v3 }
 0x4d6   :  { %2334 = vmatpush1.bf16.msra.mxu0 %v6716_v37  ;;  %2375 = vmatpush1.bf16.msra.mxu1 %v6719_v32  ;;  %v6734_v37 = vld [vmem:[#allocation12 + $0x24] ss:$16 sps:$4 sm:$0xff]   ;;  %v6737_v32 = vld [vmem:[#allocation12 + $0x2c] ss:$16 sps:$4 sm:$0xff]  }
 0x4d7   :  { %2335 = vmatprep.subr.bf16.mxu0 %v6722_v38  ;;  %2376 = vmatprep.subr.bf16.mxu1 %v6725_v40  ;;  %8224 = vst [vmem:[#allocation90_spill] sm:$0xff] %v6734_v37  ;;  %8225 = vst [vmem:[#allocation28_spill] sm:$0xff] %v6737_v32  ;;  %v6740_v38 = vld [vmem:[#allocation12 + $0x20] ss:$16 sps:$4 sm:$0xff]   ;;  %v6743_v40 = vld [vmem:[#allocation12 + $0x28] ss:$16 sps:$4 sm:$0xff]  }
 0x4d8   :  { %8226 = vst [vmem:[#allocation29_spill] sm:$0xff] %v6740_v38  ;;  %8227 = vst [vmem:[#allocation30_spill] sm:$0xff] %v6743_v40 }
 0x4da   :  { %2336 = vmatpush1.bf16.msra.mxu0 %v6728_v36  ;;  %2377 = vmatpush1.bf16.msra.mxu1 %v6731_v3  ;;  %v6746_v36 = vld [vmem:[#allocation12 + $0x4] ss:$16 sps:$4 sm:$0xff]   ;;  %v6749_v3 = vld [vmem:[#allocation12 + $0xc] ss:$16 sps:$4 sm:$0xff]  }
 0x4db   :  { %2337 = vmatprep.subr.bf16.mxu0 %v6734_v37  ;;  %2378 = vmatprep.subr.bf16.mxu1 %v6737_v32  ;;  %8228 = vst [vmem:[#allocation31_spill] sm:$0xff] %v6746_v36  ;;  %8229 = vst [vmem:[#allocation32_spill] sm:$0xff] %v6749_v3  ;;  %v6752_v37 = vld [vmem:[#allocation12] ss:$16 sps:$4 sm:$0xff]   ;;  %v6755_v32 = vld [vmem:[#allocation12 + $0x8] ss:$16 sps:$4 sm:$0xff]  }
 0x4dc   :  { %8230 = vst [vmem:[#allocation33_spill] sm:$0xff] %v6752_v37  ;;  %8231 = vst [vmem:[#allocation34_spill] sm:$0xff] %v6755_v32 }
 0x4de   :  { %2338 = vmatpush1.bf16.msra.mxu0 %v6740_v38  ;;  %2379 = vmatpush1.bf16.msra.mxu1 %v6743_v40 }
 0x4df   :  { %2339 = vmatprep.subr.bf16.mxu0 %v6746_v36  ;;  %2380 = vmatprep.subr.bf16.mxu1 %v6749_v3 }
 0x4e2   :  { %2340 = vmatpush1.bf16.msra.mxu0 %v6752_v37  ;;  %2381 = vmatpush1.bf16.msra.mxu1 %v6755_v32 }
 0x4e3   :  { %2407 = vmatprep.subr.bf16.mxu0 %v8154_v8  ;;  %2448 = vmatprep.subr.bf16.mxu1 %v8155_v50 }
 0x545   :  { %v2048_v40 = vpop.f32.mrf.mxu0  ;;  %v2089_v38 = vpop.f32.mrf.mxu1 }
 0x547   :  { %v2050_v57 = vpop.f32.mrf.mxu0  ;;  %v2091_v36 = vpop.f32.mrf.mxu1 }
 0x549   :  { %v2052_v7 = vpop.f32.mrf.mxu0  ;;  %v2093_v41 = vpop.f32.mrf.mxu1 }
 0x54b   :  { %v2053_v45 = vpop.f32.mrf.mxu0  ;;  %v2094_v3 = vpop.f32.mrf.mxu1 }
 0x565   :  { %v2130_v28 = vpop.f32.mrf.mxu0  ;;  %v2171_v52 = vpop.f32.mrf.mxu1 }
 0x566   :  { %v2131_v46 = vadd.f32 %v2130_v28, %v2048_v40  ;;  %v2172_v3 = vadd.f32 %v2171_v52, %v2089_v38 }
 0x567   :  { %v2132_v37 = vpop.f32.mrf.mxu0  ;;  %v2173_v1 = vpop.f32.mrf.mxu1 }
 0x568   :  { %v2178_v24 = vadd.f32 %v2131_v46, %v8099_v2  ;;  %v2133_v32 = vadd.f32 %v2132_v37, %v2050_v57  ;;  %v2174_v41 = vadd.f32 %v2173_v1, %v2091_v36  ;;  %v2180_v34 = vadd.f32 %v2172_v3, %v8156_v54  ;;  %v8233_v1 = vld [vmem:[#allocation95_spill] sm:$0xff] }
 0x569   :  { %v2134_v12 = vpop.f32.mrf.mxu0  ;;  %v2175_v8 = vpop.f32.mrf.mxu1  ;;  %v830_v36 = vadd.f32 %v8233_v1, %v5881_v6 }
 0x56a   :  { %v4625_v44 = vmul.f32 -1.442695, %v2178_v24  ;;  %v2179_v50 = vadd.f32 %v2133_v32, %v8100_v25  ;;  %v2181_v45 = vadd.f32 %v2174_v41, %v8101_v19  ;;  %v8232_v12 = vld [vmem:[#allocation93_spill] sm:$0xff] }
 0x56b   :  { %v2135_v5 = vpop.f32.mrf.mxu0  ;;  %v2176_v42 = vpop.f32.mrf.mxu1 }
 0x56c   :  { %5022 = vpow2.f32 %v4625_v44  ;;  %v4626_v7 = vmul.f32 -1.442695, %v2179_v50  ;;  %v4627_v28 = vmul.f32 -1.442695, %v2181_v45  ;;  %v828_v42 = vadd.f32 %v8232_v12, %v8157_v29 }
 0x56e   :  { %5024 = vpow2.f32 %v4626_v7 }
 0x56f   :  { %5026 = vpow2.f32 %v4627_v28 }
 0x579   :  { %v5023_v40 = vpop.eup %5022 }
 0x57a   :  { %v2185_v46 = vadd.f32 1.0, %v5023_v40 }
 0x57b   :  { %v5025_v57 = vpop.eup %5024 }
 0x57c   :  { %5028 = vrcp.f32 %v2185_v46  ;;  %v2191_v24 = vadd.f32 1.0, %v5025_v57  ;;  %v5027_v37 = vpop.eup %5026 }
 0x57d   :  { %5030 = vtanh.f32 %v2180_v34  ;;  %v2198_v40 = vadd.f32 1.0, %v5027_v37 }
 0x57e   :  { %5032 = vrcp.f32 %v2191_v24 }
 0x585   :  { %v2247_v5 = vpop.f32.mrf.mxu0  ;;  %v2288_v44 = vpop.f32.mrf.mxu1 }
 0x586   :  { %v2295_v52 = vadd.f32 %v2247_v5, %v828_v42  ;;  %v8234_v5 = vld [vmem:[#allocation96_spill] sm:$0xff] }
 0x587   :  { %v2249_v32 = vpop.f32.mrf.mxu0  ;;  %v2290_v38 = vpop.f32.mrf.mxu1  ;;  %v903_v1 = vadd.f32 %v8234_v5, %v5889_v53  ;;  %v8264_v5 = vld [vmem:[#allocation60_spill] sm:$0xff] }
 0x588   :  { %v4628_v8 = vmul.f32 -1.442695, %v2295_v52  ;;  %v2296_v50 = vadd.f32 %v2249_v32, %v830_v36  ;;  %v8235_v52 = vld [vmem:[#allocation94_spill] sm:$0xff] }
 0x589   :  { %v5029_v7 = vpop.eup %5028  ;;  %v2251_v41 = vpop.f32.mrf.mxu0  ;;  %v2298_v36 = vadd.f32 %v2290_v38, %v903_v1  ;;  %v901_v32 = vadd.f32 %v8235_v52, %v5893_v55  ;;  %v8265_v1 = vld [vmem:[#allocation61_spill] sm:$0xff]  ;;  %v8267_v52 = vld [vmem:[#allocation63_spill] sm:$0xff] }
 0x58a   :  { %v2292_v45 = vpop.f32.mrf.mxu1  ;;  %v5031_v3 = vpop.eup %5030  ;;  %5034 = vpow2.f32 %v4628_v8  ;;  %v4629_v34 = vmul.f32 -1.442695, %v2296_v50 }
 0x58b   :  { %v5033_v28 = vpop.eup %5032  ;;  %v2252_v46 = vpop.f32.mrf.mxu0  ;;  %v2202_v24 = vmul.f32 %v5031_v3, %v5029_v7  ;;  %v2297_v8 = vadd.f32 %v2288_v44, %v901_v32  ;;  %v4630_v37 = vmul.f32 -1.442695, %v2298_v36  ;;  %v8266_v36 = vld [vmem:[#allocation62_spill] sm:$0xff]  ;;  %v8268_v32 = vld [vmem:[#allocation64_spill] sm:$0xff] }
 0x58c   :  { %v2293_v57 = vpop.f32.mrf.mxu1  ;;  %v2201_v12 = vmul.f32 %v5033_v28, %v6541_v0  ;;  %5036 = vpow2.f32 %v4629_v34 }
 0x58d   :  { %5038 = vrcp.f32 %v2198_v40  ;;  %v8261_v57 = vld [vmem:[#allocation85_spill] sm:$0xff] }
 0x58e   :  { %v6769_v42 = vadd.f32 %v2202_v24, %v2201_v12  ;;  %v8262_v24 = vld [vmem:[#allocation43_spill] sm:$0xff] }
 0x58f   :  { %v8263_v12 = vld [vmem:[#allocation59_spill] sm:$0xff] }
 0x590   :  { %5040 = vtanh.f32 %v6769_v42 }
 0x591   :  { %5042 = vtanh.f32 %v2297_v8  ;;  %v8269_v8 = vld [vmem:[#allocation65_spill] sm:$0xff] }
 0x592   :  { %5044 = vpow2.f32 %v4630_v37  ;;  %v8270_v37 = vld [vmem:[#allocation66_spill] sm:$0xff] }
 0x597   :  { %v5035_v50 = vpop.eup %5034 }
 0x598   :  { %v2302_v41 = vadd.f32 1.0, %v5035_v50  ;;  %v8271_v50 = vld [vmem:[#allocation67_spill] sm:$0xff] }
 0x599   :  { %v5037_v7 = vpop.eup %5036 }
 0x59a   :  { %5046 = vrcp.f32 %v2302_v41  ;;  %v2308_v0 = vadd.f32 1.0, %v5037_v7  ;;  %v5039_v45 = vpop.eup %5038  ;;  %v8272_v41 = vld [vmem:[#allocation68_spill] sm:$0xff]  ;;  %v8273_v7 = vld [vmem:[#allocation69_spill] sm:$0xff] }
 0x59c   :  { %5048 = vrcp.f32 %v2308_v0  ;;  %v8274_v0 = vld [vmem:[#allocation70_spill] sm:$0xff] }
 0x59d   :  { %v5041_v3 = vpop.eup %5040 }
 0x59e   :  { %v6776_v34 = vmul.f32 %v5041_v3, %v5039_v45  ;;  %v5043_v44 = vpop.eup %5042  ;;  %v8275_v45 = vld [vmem:[#allocation71_spill] sm:$0xff]  ;;  %v8276_v3 = vld [vmem:[#allocation72_spill] sm:$0xff] }
 0x59f   :  { %v5045_v28 = vpop.eup %5044 }
 0x5a0   :  { %8236 = vst [vmem:[#allocation36_spill] sm:$0xff] %v6776_v34  ;;  %v2324_v38 = vpack.c.bf16 %v6776_v34, %v6776_v34  ;;  %v8297_v34 = vld [vmem:[#allocation32_spill] sm:$0xff] }
 0x5a2   :  { %2358 = vmatmul.mubr.bf16.vlgmr.msra.gmra.mxu0 %v2324_v38  ;;  %2399 = vmatmul.mubr.bf16.vlgmr.msra.gmra.mxu1 %v2324_v38  ;;  %v8277_v38 = vld [vmem:[#allocation73_spill] sm:$0xff] }
 0x5a3   :  { %2408 = vmatpush1.bf16.msra.mxu0 %v6348_v58  ;;  %2449 = vmatpush1.bf16.msra.mxu1 %v6351_v63  ;;  %v2315_v63 = vadd.f32 1.0, %v5045_v28  ;;  %v8279_v28 = vld [vmem:[#allocation75_spill] sm:$0xff] }
 0x5a4   :  { %2409 = vmatprep.subr.bf16.mxu0 %v6354_v26  ;;  %2450 = vmatprep.subr.bf16.mxu1 %v6357_v13 }
 0x5a5   :  { %2439 = vmatprep.mubr.bf16.mxu0 %v7964_v56  ;;  %2480 = vmatprep.mubr.bf16.mxu1 %v7964_v56  ;;  %5050 = vrcp.f32 %v2315_v63  ;;  %v8283_v63 = vld [vmem:[#allocation79_spill] sm:$0xff] }
 0x5a7   :  { %v5047_v40 = vpop.eup %5046  ;;  %2410 = vmatpush1.bf16.msra.mxu0 %v6362_v49  ;;  %2451 = vmatpush1.bf16.msra.mxu1 %v6365_v61 }
 0x5a8   :  { %v2319_v46 = vmul.f32 %v5047_v40, %v5043_v44  ;;  %2411 = vmatprep.subr.bf16.mxu0 %v6368_v18  ;;  %2452 = vmatprep.subr.bf16.mxu1 %v6371_v22  ;;  %v8278_v44 = vld [vmem:[#allocation74_spill] sm:$0xff]  ;;  %v8280_v40 = vld [vmem:[#allocation76_spill] sm:$0xff] }
 0x5a9   :  { %v5049_v58 = vpop.eup %5048 }
 0x5aa   :  { %v2318_v26 = vmul.f32 %v5049_v58, %v6565_v9  ;;  %v8246_v9 = vld [vmem:[#allocation27_spill] sm:$0xff]  ;;  %v8282_v58 = vld [vmem:[#allocation78_spill] sm:$0xff] }
 0x5ab   :  { %2412 = vmatpush1.bf16.msra.mxu0 %v6375_v15  ;;  %2453 = vmatpush1.bf16.msra.mxu1 %v6378_v16  ;;  %v8237_v15 = vld [vmem:[#allocation44_spill] sm:$0xff]  ;;  %v8238_v16 = vld [vmem:[#allocation23_spill] sm:$0xff] }
 0x5ac   :  { %v6793_v13 = vadd.f32 %v2319_v46, %v2318_v26  ;;  %2413 = vmatprep.subr.bf16.mxu0 %v6383_v59  ;;  %2454 = vmatprep.subr.bf16.mxu1 %v6386_v21  ;;  %v8239_v59 = vld [vmem:[#allocation45_spill] sm:$0xff]  ;;  %v8240_v21 = vld [vmem:[#allocation46_spill] sm:$0xff]  ;;  %v8284_v26 = vld [vmem:[#allocation80_spill] sm:$0xff] }
 0x5ad   :  { %v8281_v46 = vld [vmem:[#allocation77_spill] sm:$0xff] }
 0x5ae   :  { %5052 = vtanh.f32 %v6793_v13 }
 0x5af   :  { %2414 = vmatpush1.bf16.msra.mxu0 %v8163_v47  ;;  %2455 = vmatpush1.bf16.msra.mxu1 %v8164_v4  ;;  %v8247_v47 = vld [vmem:[#allocation53_spill] sm:$0xff]  ;;  %v8248_v4 = vld [vmem:[#allocation54_spill] sm:$0xff] }
 0x5b0   :  { %2415 = vmatprep.subr.bf16.mxu0 %v8165_v60  ;;  %2456 = vmatprep.subr.bf16.mxu1 %v8166_v48  ;;  %v8249_v60 = vld [vmem:[#allocation55_spill] sm:$0xff]  ;;  %v8250_v48 = vld [vmem:[#allocation56_spill] sm:$0xff] }
 0x5b2   :  { %v5051_v49 = vpop.eup %5050 }
 0x5b3   :  { %2416 = vmatpush1.bf16.msra.mxu0 %v8167_v51  ;;  %2457 = vmatpush1.bf16.msra.mxu1 %v8168_v17  ;;  %v8251_v51 = vld [vmem:[#allocation57_spill] sm:$0xff]  ;;  %v8252_v17 = vld [vmem:[#allocation58_spill] sm:$0xff] }
 0x5b4   :  { %2417 = vmatprep.subr.bf16.mxu0 %v8169_v30  ;;  %2458 = vmatprep.subr.bf16.mxu1 %v8170_v31  ;;  %v8253_v30 = vld [vmem:[#allocation81_spill] sm:$0xff]  ;;  %v8254_v31 = vld [vmem:[#allocation35_spill] sm:$0xff] }
 0x5b7   :  { %2418 = vmatpush1.bf16.msra.mxu0 %v8171_v33  ;;  %2459 = vmatpush1.bf16.msra.mxu1 %v8172_v62  ;;  %v8255_v33 = vld [vmem:[#allocation82_spill] sm:$0xff]  ;;  %v8256_v62 = vld [vmem:[#allocation83_spill] sm:$0xff] }
 0x5b8   :  { %2419 = vmatprep.subr.bf16.mxu0 %v8173_v35  ;;  %2460 = vmatprep.subr.bf16.mxu1 %v8174_v11  ;;  %v8257_v35 = vld [vmem:[#allocation84_spill] sm:$0xff]  ;;  %v8258_v11 = vld [vmem:[#allocation87_spill] sm:$0xff] }
 0x5bb   :  { %v5053_v61 = vpop.eup %5052  ;;  %2420 = vmatpush1.bf16.msra.mxu0 %v8175_v10  ;;  %2461 = vmatpush1.bf16.msra.mxu1 %v8176_v39  ;;  %v8259_v10 = vld [vmem:[#allocation113_spill] sm:$0xff]  ;;  %v8260_v39 = vld [vmem:[#allocation88_spill] sm:$0xff] }
 0x5bc   :  { %2421 = vmatprep.subr.bf16.mxu0 %v6432_v27  ;;  %2462 = vmatprep.subr.bf16.mxu1 %v6435_v14  ;;  %v2322_v18 = vmul.f32 %v5053_v61, %v5051_v49  ;;  %v8241_v27 = vld [vmem:[#allocation47_spill] sm:$0xff]  ;;  %v8242_v14 = vld [vmem:[#allocation48_spill] sm:$0xff]  ;;  %v8286_v61 = vld [vmem:[#allocation25_spill] sm:$0xff] }
 0x5bd   :  { %v8285_v49 = vld [vmem:[#allocation24_spill] sm:$0xff] }
 0x5be   :  { %v2323_v22 = vpack.c.bf16 %v2322_v18, %v2322_v18  ;;  %v8287_v18 = vld [vmem:[#allocation86_spill] sm:$0xff] }
 0x5bf   :  { %2422 = vmatpush1.bf16.msra.mxu0 %v6438_v43  ;;  %2463 = vmatpush1.bf16.msra.mxu1 %v6441_v23  ;;  %v8243_v23 = vld [vmem:[#allocation49_spill] sm:$0xff]  ;;  %v8245_v43 = vld [vmem:[#allocation51_spill] sm:$0xff] }
 0x5c0   :  { %2524 = vmatprep.subr.bf16.mxu0 %v6444_v20  ;;  %2565 = vmatprep.subr.bf16.mxu1 %v8237_v15  ;;  %v8244_v20 = vld [vmem:[#allocation50_spill] sm:$0xff]  ;;  %v8289_v15 = vld [vmem:[#allocation89_spill] sm:$0xff] }
 0x5c2   :  { %2440 = vmatmul.mubr.bf16.vlgmr.msra.gmra.mxu0 %v2323_v22  ;;  %2481 = vmatmul.mubr.bf16.vlgmr.msra.gmra.mxu1 %v2323_v22 }
 0x5c3   :  { %2525 = vmatpush1.bf16.msra.mxu0 %v8238_v16  ;;  %2566 = vmatpush1.bf16.msra.mxu1 %v8239_v59  ;;  %v8290_v59 = vld [vmem:[#allocation91_spill] sm:$0xff] }
 0x5c4   :  { %2526 = vmatprep.subr.bf16.mxu0 %v8240_v21  ;;  %2567 = vmatprep.subr.bf16.mxu1 %v8241_v27  ;;  %v8291_v21 = vld [vmem:[#allocation92_spill] sm:$0xff]  ;;  %v8292_v27 = vld [vmem:[#allocation90_spill] sm:$0xff] }
 0x5c5   :  { %2556 = vmatprep.mubr.bf16.mxu0 %v7964_v56  ;;  %2597 = vmatprep.mubr.bf16.mxu1 %v7964_v56 }
 0x5c7   :  { %2527 = vmatpush1.bf16.msra.mxu0 %v8242_v14  ;;  %2568 = vmatpush1.bf16.msra.mxu1 %v8243_v23  ;;  %v8293_v14 = vld [vmem:[#allocation28_spill] sm:$0xff]  ;;  %v8294_v23 = vld [vmem:[#allocation29_spill] sm:$0xff] }
 0x5c8   :  { %2528 = vmatprep.subr.bf16.mxu0 %v8244_v20  ;;  %2569 = vmatprep.subr.bf16.mxu1 %v8245_v43  ;;  %v8295_v20 = vld [vmem:[#allocation30_spill] sm:$0xff]  ;;  %v8296_v43 = vld [vmem:[#allocation31_spill] sm:$0xff] }
 0x5cb   :  { %2529 = vmatpush1.bf16.msra.mxu0 %v8246_v9  ;;  %2570 = vmatpush1.bf16.msra.mxu1 %v8247_v47 }
 0x5cc   :  { %2530 = vmatprep.subr.bf16.mxu0 %v8248_v4  ;;  %2571 = vmatprep.subr.bf16.mxu1 %v8249_v60 }
 0x5cf   :  { %2531 = vmatpush1.bf16.msra.mxu0 %v8250_v48  ;;  %2572 = vmatpush1.bf16.msra.mxu1 %v8251_v51 }
 0x5d0   :  { %2532 = vmatprep.subr.bf16.mxu0 %v8252_v17  ;;  %2573 = vmatprep.subr.bf16.mxu1 %v8253_v30 }
 0x5d3   :  { %2533 = vmatpush1.bf16.msra.mxu0 %v8254_v31  ;;  %2574 = vmatpush1.bf16.msra.mxu1 %v8255_v33 }
 0x5d4   :  { %2534 = vmatprep.subr.bf16.mxu0 %v8256_v62  ;;  %2575 = vmatprep.subr.bf16.mxu1 %v8257_v35 }
 0x5d7   :  { %2535 = vmatpush1.bf16.msra.mxu0 %v8258_v11  ;;  %2576 = vmatpush1.bf16.msra.mxu1 %v8259_v10 }
 0x5d8   :  { %2536 = vmatprep.subr.bf16.mxu0 %v8260_v39  ;;  %2577 = vmatprep.subr.bf16.mxu1 %v8261_v57 }
 0x5db   :  { %2537 = vmatpush1.bf16.msra.mxu0 %v8262_v24  ;;  %2578 = vmatpush1.bf16.msra.mxu1 %v8263_v12 }
 0x5dc   :  { %2538 = vmatprep.subr.bf16.mxu0 %v8264_v5  ;;  %2579 = vmatprep.subr.bf16.mxu1 %v8265_v1 }
 0x5df   :  { %2539 = vmatpush1.bf16.msra.mxu0 %v8266_v36  ;;  %2580 = vmatpush1.bf16.msra.mxu1 %v8267_v52 }
 0x5e0   :  { %2636 = vmatprep.subr.bf16.mxu0 %v8268_v32  ;;  %2677 = vmatprep.subr.bf16.mxu1 %v8269_v8 }
 0x5e2   :  { %2557 = vmatmul.mubr.bf16.vlgmr.msra.gmra.mxu0 %v2323_v22  ;;  %2598 = vmatmul.mubr.bf16.vlgmr.msra.gmra.mxu1 %v2323_v22  ;;  %v8288_v22 = vld [vmem:[#allocation22_spill] sm:$0xff] }
 0x5e3   :  { %2637 = vmatpush1.bf16.msra.mxu0 %v8270_v37  ;;  %2678 = vmatpush1.bf16.msra.mxu1 %v8271_v50 }
 0x5e4   :  { %2638 = vmatprep.subr.bf16.mxu0 %v8272_v41  ;;  %2679 = vmatprep.subr.bf16.mxu1 %v8273_v7 }
 0x5e5   :  { %2668 = vmatprep.mubr.bf16.mxu0 %v7964_v56  ;;  %2709 = vmatprep.mubr.bf16.mxu1 %v7964_v56 }
 0x5e7   :  { %2639 = vmatpush1.bf16.msra.mxu0 %v8274_v0  ;;  %2680 = vmatpush1.bf16.msra.mxu1 %v8275_v45 }
 0x5e8   :  { %2640 = vmatprep.subr.bf16.mxu0 %v8276_v3  ;;  %2681 = vmatprep.subr.bf16.mxu1 %v8277_v38 }
 0x5eb   :  { %2641 = vmatpush1.bf16.msra.mxu0 %v8278_v44  ;;  %2682 = vmatpush1.bf16.msra.mxu1 %v8279_v28 }
 0x5ec   :  { %2642 = vmatprep.subr.bf16.mxu0 %v8280_v40  ;;  %2683 = vmatprep.subr.bf16.mxu1 %v8281_v46 }
 0x5ef   :  { %2643 = vmatpush1.bf16.msra.mxu0 %v8282_v58  ;;  %2684 = vmatpush1.bf16.msra.mxu1 %v8283_v63 }
 0x5f0   :  { %2644 = vmatprep.subr.bf16.mxu0 %v8284_v26  ;;  %2685 = vmatprep.subr.bf16.mxu1 %v8285_v49 }
 0x5f3   :  { %2645 = vmatpush1.bf16.msra.mxu0 %v8286_v61  ;;  %2686 = vmatpush1.bf16.msra.mxu1 %v8287_v18  ;;  %v8298_v18 = vld [vmem:[#allocation33_spill] sm:$0xff] }
 0x5f4   :  { %2646 = vmatprep.subr.bf16.mxu0 %v8288_v22  ;;  %2687 = vmatprep.subr.bf16.mxu1 %v8289_v15  ;;  %v8299_v22 = vld [vmem:[#allocation34_spill] sm:$0xff]  ;;  %v6884_v15 = vld [vmem:[#allocation10 + $0xe4] ss:$16 sps:$4 sm:$0xff]  }
 0x5f5   :  { %8300 = vst [vmem:[#allocation37_spill] sm:$0xff] %v6884_v15 }
 0x5f7   :  { %2647 = vmatpush1.bf16.msra.mxu0 %v8290_v59  ;;  %2688 = vmatpush1.bf16.msra.mxu1 %v8291_v21  ;;  %v6887_v21 = vld [vmem:[#allocation10 + $0xec] ss:$16 sps:$4 sm:$0xff]  }
 0x5f8   :  { %2648 = vmatprep.subr.bf16.mxu0 %v8292_v27  ;;  %2689 = vmatprep.subr.bf16.mxu1 %v8293_v14  ;;  %8301 = vst [vmem:[#allocation38_spill] sm:$0xff] %v6887_v21 }
 0x5fb   :  { %2649 = vmatpush1.bf16.msra.mxu0 %v8294_v23  ;;  %2690 = vmatpush1.bf16.msra.mxu1 %v8295_v20 }
 0x5fc   :  { %2650 = vmatprep.subr.bf16.mxu0 %v8296_v43  ;;  %2691 = vmatprep.subr.bf16.mxu1 %v8297_v34 }
 0x5ff   :  { %2651 = vmatpush1.bf16.msra.mxu0 %v8298_v18  ;;  %2692 = vmatpush1.bf16.msra.mxu1 %v8299_v22 }
 0x600   :  { %2718 = vmatprep.subr.bf16.mxu0 %v6884_v15  ;;  %2759 = vmatprep.subr.bf16.mxu1 %v6887_v21 }
 0x662   :  { %v2359_v14 = vpop.f32.mrf.mxu0  ;;  %v2400_v23 = vpop.f32.mrf.mxu1 }
 0x664   :  { %v2361_v27 = vpop.f32.mrf.mxu0  ;;  %v2402_v20 = vpop.f32.mrf.mxu1 }
 0x666   :  { %v2363_v59 = vpop.f32.mrf.mxu0  ;;  %v2404_v43 = vpop.f32.mrf.mxu1 }
 0x668   :  { %v2364_v61 = vpop.f32.mrf.mxu0  ;;  %v2405_v34 = vpop.f32.mrf.mxu1 }
 0x682   :  { %v2441_v49 = vpop.f32.mrf.mxu0  ;;  %v2482_v18 = vpop.f32.mrf.mxu1 }
 0x683   :  { %v2442_v26 = vadd.f32 %v2441_v49, %v2359_v14  ;;  %v2483_v43 = vadd.f32 %v2482_v18, %v2400_v23 }
 0x684   :  { %v2443_v22 = vpop.f32.mrf.mxu0  ;;  %v2484_v63 = vpop.f32.mrf.mxu1 }
 0x685   :  { %v2489_v58 = vadd.f32 %v2442_v26, %v8099_v2  ;;  %v2444_v15 = vadd.f32 %v2443_v22, %v2361_v27  ;;  %v2485_v61 = vadd.f32 %v2484_v63, %v2402_v20  ;;  %v2491_v3 = vadd.f32 %v2483_v43, %v8156_v54 }
 0x686   :  { %v2445_v46 = vpop.f32.mrf.mxu0  ;;  %v2486_v40 = vpop.f32.mrf.mxu1 }
 0x687   :  { %v4631_v28 = vmul.f32 -1.442695, %v2489_v58  ;;  %v2490_v21 = vadd.f32 %v2444_v15, %v8100_v25  ;;  %v2492_v34 = vadd.f32 %v2485_v61, %v8101_v19  ;;  %v8303_v58 = vld [vmem:[#allocation99_spill] sm:$0xff] }
 0x688   :  { %v2446_v44 = vpop.f32.mrf.mxu0  ;;  %v2487_v38 = vpop.f32.mrf.mxu1  ;;  %v836_v63 = vadd.f32 %v8303_v58, %v5881_v6 }
 0x689   :  { %5054 = vpow2.f32 %v4631_v28  ;;  %v4632_v59 = vmul.f32 -1.442695, %v2490_v21  ;;  %v4633_v49 = vmul.f32 -1.442695, %v2492_v34  ;;  %v8302_v38 = vld [vmem:[#allocation97_spill] sm:$0xff] }
 0x68a   :  { %v834_v44 = vadd.f32 %v8302_v38, %v8157_v29 }
 0x68b   :  { %5056 = vpow2.f32 %v4632_v59 }
 0x68c   :  { %5058 = vpow2.f32 %v4633_v49 }
 0x696   :  { %v5055_v14 = vpop.eup %5054 }
 0x697   :  { %v2496_v26 = vadd.f32 1.0, %v5055_v14 }
 0x698   :  { %v5057_v22 = vpop.eup %5056 }
 0x699   :  { %5060 = vrcp.f32 %v2496_v26  ;;  %v2502_v40 = vadd.f32 1.0, %v5057_v22  ;;  %v5059_v27 = vpop.eup %5058 }
 0x69a   :  { %5062 = vtanh.f32 %v2491_v3  ;;  %v2509_v14 = vadd.f32 1.0, %v5059_v27 }
 0x69b   :  { %5064 = vrcp.f32 %v2502_v40 }
 0x6a2   :  { %v2558_v28 = vpop.f32.mrf.mxu0  ;;  %v2599_v46 = vpop.f32.mrf.mxu1 }
 0x6a3   :  { %v2606_v18 = vadd.f32 %v2558_v28, %v834_v44  ;;  %v8304_v28 = vld [vmem:[#allocation100_spill] sm:$0xff] }
 0x6a4   :  { %v2560_v15 = vpop.f32.mrf.mxu0  ;;  %v2601_v21 = vpop.f32.mrf.mxu1  ;;  %v909_v58 = vadd.f32 %v8304_v28, %v5889_v53  ;;  %v6924_v28 = vld [vmem:[#allocation10 + $0xc0] ss:$16 sps:$4 sm:$0xff]  }
 0x6a5   :  { %v4634_v23 = vmul.f32 -1.442695, %v2606_v18  ;;  %v2607_v20 = vadd.f32 %v2560_v15, %v836_v63  ;;  %v8305_v18 = vld [vmem:[#allocation98_spill] sm:$0xff] }
 0x6a6   :  { %v5061_v59 = vpop.eup %5060  ;;  %v2562_v61 = vpop.f32.mrf.mxu0  ;;  %v2609_v63 = vadd.f32 %v2601_v21, %v909_v58  ;;  %v907_v15 = vadd.f32 %v8305_v18, %v5893_v55  ;;  %v6927_v58 = vld [vmem:[#allocation10 + $0xc8] ss:$16 sps:$4 sm:$0xff]   ;;  %v6930_v18 = vld [vmem:[#allocation10 + $0xa4] ss:$16 sps:$4 sm:$0xff]  }
 0x6a7   :  { %v2603_v34 = vpop.f32.mrf.mxu1  ;;  %v5063_v43 = vpop.eup %5062  ;;  %5066 = vpow2.f32 %v4634_v23  ;;  %v4635_v3 = vmul.f32 -1.442695, %v2607_v20 }
 0x6a8   :  { %v5065_v49 = vpop.eup %5064  ;;  %v2563_v26 = vpop.f32.mrf.mxu0  ;;  %v2513_v40 = vmul.f32 %v5063_v43, %v5061_v59  ;;  %v2608_v23 = vadd.f32 %v2599_v46, %v907_v15  ;;  %v4636_v27 = vmul.f32 -1.442695, %v2609_v63  ;;  %v6913_v46 = vld [vmem:[#allocation10 + $0xe8] ss:$16 sps:$4 sm:$0xff]   ;;  %v6933_v15 = vld [vmem:[#allocation10 + $0xac] ss:$16 sps:$4 sm:$0xff]  }
 0x6a9   :  { %v2604_v22 = vpop.f32.mrf.mxu1  ;;  %v2512_v38 = vmul.f32 %v5065_v49, %v6769_v42  ;;  %5068 = vpow2.f32 %v4635_v3  ;;  %v6910_v49 = vld [vmem:[#allocation10 + $0xe0] ss:$16 sps:$4 sm:$0xff]   ;;  %v6919_v26 = vld [vmem:[#allocation10 + $0xcc] ss:$16 sps:$4 sm:$0xff]  }
 0x6aa   :  { %5070 = vrcp.f32 %v2509_v14  ;;  %v6916_v14 = vld [vmem:[#allocation10 + $0xc4] ss:$16 sps:$4 sm:$0xff]  }
 0x6ab   :  { %v6899_v44 = vadd.f32 %v2513_v40, %v2512_v38 }
 0x6ad   :  { %5072 = vtanh.f32 %v6899_v44 }
 0x6ae   :  { %5074 = vtanh.f32 %v2608_v23 }
 0x6af   :  { %5076 = vpow2.f32 %v4636_v27 }
 0x6b4   :  { %v5067_v20 = vpop.eup %5066 }
 0x6b5   :  { %v2613_v61 = vadd.f32 1.0, %v5067_v20 }
 0x6b6   :  { %v5069_v59 = vpop.eup %5068 }
 0x6b7   :  { %5078 = vrcp.f32 %v2613_v61  ;;  %v2619_v42 = vadd.f32 1.0, %v5069_v59  ;;  %v5071_v34 = vpop.eup %5070  ;;  %v6937_v61 = vld [vmem:[#allocation10 + $0xa0] ss:$16 sps:$4 sm:$0xff]   ;;  %v6940_v59 = vld [vmem:[#allocation10 + $0xa8] ss:$16 sps:$4 sm:$0xff]  }
 0x6b9   :  { %5080 = vrcp.f32 %v2619_v42 }
 0x6ba   :  { %v5073_v43 = vpop.eup %5072 }
 0x6bb   :  { %v6906_v3 = vmul.f32 %v5073_v43, %v5071_v34  ;;  %v5075_v22 = vpop.eup %5074  ;;  %v6945_v34 = vld [vmem:[#allocation10 + $0x84] ss:$16 sps:$4 sm:$0xff]   ;;  %v6948_v43 = vld [vmem:[#allocation10 + $0x8c] ss:$16 sps:$4 sm:$0xff]  }
 0x6bc   :  { %v5077_v40 = vpop.eup %5076 }
 0x6bd   :  { %8306 = vst [vmem:[#allocation39_spill] sm:$0xff] %v6906_v3  ;;  %v2635_v21 = vpack.c.bf16 %v6906_v3, %v6906_v3  ;;  %v2626_v27 = vadd.f32 1.0, %v5077_v40  ;;  %v6961_v40 = vld [vmem:[#allocation10 + $0x6c] ss:$16 sps:$4 sm:$0xff]   ;;  %v6979_v3 = vld [vmem:[#allocation10 + $0x48] ss:$16 sps:$4 sm:$0xff]  }
 0x6be   :  { %8310 = vst [vmem:[#allocation93_spill] sm:$0xff] %v6961_v40  ;;  %8316 = vst [vmem:[#allocation46_spill] sm:$0xff] %v6979_v3 }
 0x6bf   :  { %2669 = vmatmul.mubr.bf16.vlgmr.msra.gmra.mxu0 %v2635_v21  ;;  %2710 = vmatmul.mubr.bf16.vlgmr.msra.gmra.mxu1 %v2635_v21  ;;  %5082 = vrcp.f32 %v2626_v27  ;;  %v6955_v21 = vld [vmem:[#allocation10 + $0x88] ss:$16 sps:$4 sm:$0xff]   ;;  %v6973_v27 = vld [vmem:[#allocation10 + $0x4c] ss:$16 sps:$4 sm:$0xff]  }
 0x6c0   :  { %2719 = vmatpush1.bf16.msra.mxu0 %v6910_v49  ;;  %2760 = vmatpush1.bf16.msra.mxu1 %v6913_v46  ;;  %8308 = vst [vmem:[#allocation41_spill] sm:$0xff] %v6955_v21  ;;  %8314 = vst [vmem:[#allocation44_spill] sm:$0xff] %v6973_v27 }
 0x6c1   :  { %2720 = vmatprep.subr.bf16.mxu0 %v6916_v14  ;;  %2761 = vmatprep.subr.bf16.mxu1 %v6919_v26 }
 0x6c2   :  { %2750 = vmatprep.mubr.bf16.mxu0 %v7964_v56  ;;  %2791 = vmatprep.mubr.bf16.mxu1 %v7964_v56 }
 0x6c4   :  { %v5079_v38 = vpop.eup %5078  ;;  %2721 = vmatpush1.bf16.msra.mxu0 %v6924_v28  ;;  %2762 = vmatpush1.bf16.msra.mxu1 %v6927_v58 }
 0x6c5   :  { %v2630_v63 = vmul.f32 %v5079_v38, %v5075_v22  ;;  %2722 = vmatprep.subr.bf16.mxu0 %v6930_v18  ;;  %2763 = vmatprep.subr.bf16.mxu1 %v6933_v15  ;;  %v6958_v22 = vld [vmem:[#allocation10 + $0x64] ss:$16 sps:$4 sm:$0xff]   ;;  %v6964_v38 = vld [vmem:[#allocation10 + $0x60] ss:$16 sps:$4 sm:$0xff]  }
 0x6c6   :  { %v5081_v23 = vpop.eup %5080  ;;  %8309 = vst [vmem:[#allocation42_spill] sm:$0xff] %v6958_v22  ;;  %8311 = vst [vmem:[#allocation95_spill] sm:$0xff] %v6964_v38 }
 0x6c7   :  { %v2629_v20 = vmul.f32 %v5081_v23, %v6793_v13  ;;  %v6952_v13 = vld [vmem:[#allocation10 + $0x80] ss:$16 sps:$4 sm:$0xff]   ;;  %v6970_v23 = vld [vmem:[#allocation10 + $0x44] ss:$16 sps:$4 sm:$0xff]  }
 0x6c8   :  { %2723 = vmatpush1.bf16.msra.mxu0 %v6937_v61  ;;  %2764 = vmatpush1.bf16.msra.mxu1 %v6940_v59  ;;  %8307 = vst [vmem:[#allocation40_spill] sm:$0xff] %v6952_v13  ;;  %8313 = vst [vmem:[#allocation94_spill] sm:$0xff] %v6970_v23 }
 0x6c9   :  { %v6943_v42 = vadd.f32 %v2630_v63, %v2629_v20  ;;  %2724 = vmatprep.subr.bf16.mxu0 %v6945_v34  ;;  %2765 = vmatprep.subr.bf16.mxu1 %v6948_v43  ;;  %v6967_v63 = vld [vmem:[#allocation10 + $0x68] ss:$16 sps:$4 sm:$0xff]   ;;  %v6976_v20 = vld [vmem:[#allocation10 + $0x40] ss:$16 sps:$4 sm:$0xff]  }
 0x6ca   :  { %8312 = vst [vmem:[#allocation96_spill] sm:$0xff] %v6967_v63  ;;  %8315 = vst [vmem:[#allocation45_spill] sm:$0xff] %v6976_v20 }
 0x6cb   :  { %5084 = vtanh.f32 %v6943_v42 }
 0x6cc   :  { %2725 = vmatpush1.bf16.msra.mxu0 %v6952_v13  ;;  %2766 = vmatpush1.bf16.msra.mxu1 %v6955_v21  ;;  %v7000_v21 = vld [vmem:[#allocation10] ss:$16 sps:$4 sm:$0xff]   ;;  %v7003_v13 = vld [vmem:[#allocation10 + $0x8] ss:$16 sps:$4 sm:$0xff]  }
 0x6cd   :  { %2726 = vmatprep.subr.bf16.mxu0 %v6958_v22  ;;  %2767 = vmatprep.subr.bf16.mxu1 %v6961_v40  ;;  %v6988_v22 = vld [vmem:[#allocation10 + $0x20] ss:$16 sps:$4 sm:$0xff]  }
 0x6ce   :  { %8319 = vst [vmem:[#allocation49_spill] sm:$0xff] %v6988_v22 }
 0x6d0   :  { %2727 = vmatpush1.bf16.msra.mxu0 %v6964_v38  ;;  %2768 = vmatpush1.bf16.msra.mxu1 %v6967_v63  ;;  %v6982_v38 = vld [vmem:[#allocation10 + $0x24] ss:$16 sps:$4 sm:$0xff]   ;;  %v6985_v63 = vld [vmem:[#allocation10 + $0x2c] ss:$16 sps:$4 sm:$0xff]  }
 0x6d1   :  { %2728 = vmatprep.subr.bf16.mxu0 %v6970_v23  ;;  %2769 = vmatprep.subr.bf16.mxu1 %v6973_v27  ;;  %8317 = vst [vmem:[#allocation47_spill] sm:$0xff] %v6982_v38  ;;  %8318 = vst [vmem:[#allocation48_spill] sm:$0xff] %v6985_v63  ;;  %v5083_v23 = vpop.eup %5082  ;;  %v6991_v27 = vld [vmem:[#allocation10 + $0x28] ss:$16 sps:$4 sm:$0xff]  }
 0x6d2   :  { %8320 = vst [vmem:[#allocation50_spill] sm:$0xff] %v6991_v27 }
 0x6d4   :  { %2729 = vmatpush1.bf16.msra.mxu0 %v6976_v20  ;;  %2770 = vmatpush1.bf16.msra.mxu1 %v6979_v3  ;;  %v6994_v20 = vld [vmem:[#allocation10 + $0x4] ss:$16 sps:$4 sm:$0xff]   ;;  %v6997_v3 = vld [vmem:[#allocation10 + $0xc] ss:$16 sps:$4 sm:$0xff]  }
 0x6d5   :  { %2730 = vmatprep.subr.bf16.mxu0 %v6982_v38  ;;  %2771 = vmatprep.subr.bf16.mxu1 %v6985_v63 }
 0x6d8   :  { %v5085_v40 = vpop.eup %5084  ;;  %2731 = vmatpush1.bf16.msra.mxu0 %v6988_v22  ;;  %2772 = vmatpush1.bf16.msra.mxu1 %v6991_v27  ;;  %v7006_v22 = vld [vmem:[#allocation9 + $0xe4] ss:$16 sps:$4 sm:$0xff]   ;;  %v7009_v27 = vld [vmem:[#allocation9 + $0xec] ss:$16 sps:$4 sm:$0xff]  }
 0x6d9   :  { %2732 = vmatprep.subr.bf16.mxu0 %v6994_v20  ;;  %2773 = vmatprep.subr.bf16.mxu1 %v6997_v3  ;;  %v2633_v38 = vmul.f32 %v5085_v40, %v5083_v23  ;;  %8321 = vst [vmem:[#allocation51_spill] sm:$0xff] %v7009_v27  ;;  %v7013_v40 = vld [vmem:[#allocation9 + $0xe8] ss:$16 sps:$4 sm:$0xff]   ;;  %v7019_v23 = vld [vmem:[#allocation9 + $0xcc] ss:$16 sps:$4 sm:$0xff]  }
 0x6da   :  { %8322 = vst [vmem:[#allocation53_spill] sm:$0xff] %v7013_v40  ;;  %8324 = vst [vmem:[#allocation55_spill] sm:$0xff] %v7019_v23 }
 0x6db   :  { %v2634_v63 = vpack.c.bf16 %v2633_v38, %v2633_v38  ;;  %v7016_v38 = vld [vmem:[#allocation9 + $0xc4] ss:$16 sps:$4 sm:$0xff]  }
 0x6dc   :  { %2733 = vmatpush1.bf16.msra.mxu0 %v7000_v21  ;;  %2774 = vmatpush1.bf16.msra.mxu1 %v7003_v13  ;;  %8323 = vst [vmem:[#allocation54_spill] sm:$0xff] %v7016_v38 }
 0x6dd   :  { %2835 = vmatprep.subr.bf16.mxu0 %v7006_v22  ;;  %2876 = vmatprep.subr.bf16.mxu1 %v7009_v27  ;;  %v7024_v27 = vld [vmem:[#allocation9 + $0xc0] ss:$16 sps:$4 sm:$0xff]  }
 0x6de   :  { %8325 = vst [vmem:[#allocation56_spill] sm:$0xff] %v7024_v27 }
 0x6df   :  { %2751 = vmatmul.mubr.bf16.vlgmr.msra.gmra.mxu0 %v2634_v63  ;;  %2792 = vmatmul.mubr.bf16.vlgmr.msra.gmra.mxu1 %v2634_v63 }
 0x6e0   :  { %2836 = vmatpush1.bf16.msra.mxu0 %v8238_v16  ;;  %2877 = vmatpush1.bf16.msra.mxu1 %v7013_v40  ;;  %v7027_v16 = vld [vmem:[#allocation9 + $0xc8] ss:$16 sps:$4 sm:$0xff]   ;;  %v7030_v40 = vld [vmem:[#allocation9 + $0xa4] ss:$16 sps:$4 sm:$0xff]  }
 0x6e1   :  { %2837 = vmatprep.subr.bf16.mxu0 %v7016_v38  ;;  %2878 = vmatprep.subr.bf16.mxu1 %v7019_v23  ;;  %8326 = vst [vmem:[#allocation57_spill] sm:$0xff] %v7027_v16  ;;  %8327 = vst [vmem:[#allocation58_spill] sm:$0xff] %v7030_v40  ;;  %v7033_v38 = vld [vmem:[#allocation9 + $0xac] ss:$16 sps:$4 sm:$0xff]  }
 0x6e2   :  { %2867 = vmatprep.mubr.bf16.mxu0 %v7964_v56  ;;  %2908 = vmatprep.mubr.bf16.mxu1 %v7964_v56  ;;  %8328 = vst [vmem:[#allocation81_spill] sm:$0xff] %v7033_v38 }
 0x6e4   :  { %2838 = vmatpush1.bf16.msra.mxu0 %v7024_v27  ;;  %2879 = vmatpush1.bf16.msra.mxu1 %v7027_v16 }
 0x6e5   :  { %2839 = vmatprep.subr.bf16.mxu0 %v7030_v40  ;;  %2880 = vmatprep.subr.bf16.mxu1 %v7033_v38 }
 0x6e8   :  { %2840 = vmatpush1.bf16.msra.mxu0 %v8246_v9  ;;  %2881 = vmatpush1.bf16.msra.mxu1 %v8247_v47  ;;  %v8329_v47 = vld [vmem:[#allocation72_spill] sm:$0xff] }
 0x6e9   :  { %2841 = vmatprep.subr.bf16.mxu0 %v8248_v4  ;;  %2882 = vmatprep.subr.bf16.mxu1 %v8249_v60  ;;  %v8330_v4 = vld [vmem:[#allocation73_spill] sm:$0xff]  ;;  %v8331_v60 = vld [vmem:[#allocation74_spill] sm:$0xff] }
 0x6ec   :  { %2842 = vmatpush1.bf16.msra.mxu0 %v8250_v48  ;;  %2883 = vmatpush1.bf16.msra.mxu1 %v8251_v51  ;;  %v8332_v48 = vld [vmem:[#allocation75_spill] sm:$0xff]  ;;  %v8333_v51 = vld [vmem:[#allocation76_spill] sm:$0xff] }
 0x6ed   :  { %2843 = vmatprep.subr.bf16.mxu0 %v8252_v17  ;;  %2884 = vmatprep.subr.bf16.mxu1 %v8253_v30  ;;  %v8334_v17 = vld [vmem:[#allocation77_spill] sm:$0xff]  ;;  %v8335_v30 = vld [vmem:[#allocation78_spill] sm:$0xff] }
 0x6f0   :  { %2844 = vmatpush1.bf16.msra.mxu0 %v8254_v31  ;;  %2885 = vmatpush1.bf16.msra.mxu1 %v8255_v33  ;;  %v8336_v33 = vld [vmem:[#allocation79_spill] sm:$0xff] }
 0x6f1   :  { %2845 = vmatprep.subr.bf16.mxu0 %v8256_v62  ;;  %2886 = vmatprep.subr.bf16.mxu1 %v8257_v35  ;;  %v8337_v62 = vld [vmem:[#allocation80_spill] sm:$0xff] }
 0x6f2   :  { %v8338_v35 = vld [vmem:[#allocation24_spill] sm:$0xff] }
 0x6f4   :  { %2846 = vmatpush1.bf16.msra.mxu0 %v8258_v11  ;;  %2887 = vmatpush1.bf16.msra.mxu1 %v8259_v10  ;;  %v8339_v11 = vld [vmem:[#allocation25_spill] sm:$0xff]  ;;  %v8340_v10 = vld [vmem:[#allocation86_spill] sm:$0xff] }
 0x6f5   :  { %2847 = vmatprep.subr.bf16.mxu0 %v8260_v39  ;;  %2888 = vmatprep.subr.bf16.mxu1 %v8261_v57  ;;  %v8341_v39 = vld [vmem:[#allocation22_spill] sm:$0xff]  ;;  %v8342_v57 = vld [vmem:[#allocation89_spill] sm:$0xff] }
 0x6f8   :  { %2848 = vmatpush1.bf16.msra.mxu0 %v8262_v24  ;;  %2889 = vmatpush1.bf16.msra.mxu1 %v8263_v12  ;;  %v8343_v12 = vld [vmem:[#allocation91_spill] sm:$0xff] }
 0x6f9   :  { %2849 = vmatprep.subr.bf16.mxu0 %v8264_v5  ;;  %2890 = vmatprep.subr.bf16.mxu1 %v8265_v1  ;;  %v8344_v5 = vld [vmem:[#allocation92_spill] sm:$0xff]  ;;  %v8345_v1 = vld [vmem:[#allocation90_spill] sm:$0xff] }
 0x6fc   :  { %2850 = vmatpush1.bf16.msra.mxu0 %v8266_v36  ;;  %2891 = vmatpush1.bf16.msra.mxu1 %v8267_v52  ;;  %v8346_v36 = vld [vmem:[#allocation28_spill] sm:$0xff]  ;;  %v8347_v52 = vld [vmem:[#allocation29_spill] sm:$0xff] }
 0x6fd   :  { %2947 = vmatprep.subr.bf16.mxu0 %v8268_v32  ;;  %2988 = vmatprep.subr.bf16.mxu1 %v8269_v8  ;;  %v8348_v32 = vld [vmem:[#allocation30_spill] sm:$0xff]  ;;  %v8349_v8 = vld [vmem:[#allocation31_spill] sm:$0xff] }
 0x6ff   :  { %2868 = vmatmul.mubr.bf16.vlgmr.msra.gmra.mxu0 %v2634_v63  ;;  %2909 = vmatmul.mubr.bf16.vlgmr.msra.gmra.mxu1 %v2634_v63 }
 0x700   :  { %2948 = vmatpush1.bf16.msra.mxu0 %v8270_v37  ;;  %2989 = vmatpush1.bf16.msra.mxu1 %v8271_v50  ;;  %v8350_v37 = vld [vmem:[#allocation32_spill] sm:$0xff]  ;;  %v8351_v50 = vld [vmem:[#allocation33_spill] sm:$0xff] }
 0x701   :  { %2949 = vmatprep.subr.bf16.mxu0 %v8272_v41  ;;  %2990 = vmatprep.subr.bf16.mxu1 %v8273_v7  ;;  %v8352_v41 = vld [vmem:[#allocation34_spill] sm:$0xff]  ;;  %v8353_v7 = vld [vmem:[#allocation37_spill] sm:$0xff] }
 0x702   :  { %2979 = vmatprep.mubr.bf16.mxu0 %v7964_v56  ;;  %3020 = vmatprep.mubr.bf16.mxu1 %v7964_v56 }
 0x704   :  { %2950 = vmatpush1.bf16.msra.mxu0 %v8274_v0  ;;  %2991 = vmatpush1.bf16.msra.mxu1 %v8275_v45  ;;  %v8354_v0 = vld [vmem:[#allocation38_spill] sm:$0xff] }
 0x705   :  { %2951 = vmatprep.subr.bf16.mxu0 %v8329_v47  ;;  %2992 = vmatprep.subr.bf16.mxu1 %v8330_v4 }
 0x708   :  { %2952 = vmatpush1.bf16.msra.mxu0 %v8331_v60  ;;  %2993 = vmatpush1.bf16.msra.mxu1 %v8332_v48 }
 0x709   :  { %2953 = vmatprep.subr.bf16.mxu0 %v8333_v51  ;;  %2994 = vmatprep.subr.bf16.mxu1 %v8334_v17 }
 0x70c   :  { %2954 = vmatpush1.bf16.msra.mxu0 %v8335_v30  ;;  %2995 = vmatpush1.bf16.msra.mxu1 %v8336_v33 }
 0x70d   :  { %2955 = vmatprep.subr.bf16.mxu0 %v8337_v62  ;;  %2996 = vmatprep.subr.bf16.mxu1 %v8338_v35 }
 0x710   :  { %2956 = vmatpush1.bf16.msra.mxu0 %v8339_v11  ;;  %2997 = vmatpush1.bf16.msra.mxu1 %v8340_v10 }
 0x711   :  { %2957 = vmatprep.subr.bf16.mxu0 %v8341_v39  ;;  %2998 = vmatprep.subr.bf16.mxu1 %v8342_v57 }
 0x714   :  { %2958 = vmatpush1.bf16.msra.mxu0 %v8343_v12  ;;  %2999 = vmatpush1.bf16.msra.mxu1 %v8344_v5 }
 0x715   :  { %2959 = vmatprep.subr.bf16.mxu0 %v8345_v1  ;;  %3000 = vmatprep.subr.bf16.mxu1 %v8346_v36 }
 0x718   :  { %2960 = vmatpush1.bf16.msra.mxu0 %v8347_v52  ;;  %3001 = vmatpush1.bf16.msra.mxu1 %v8348_v32 }
 0x719   :  { %2961 = vmatprep.subr.bf16.mxu0 %v8349_v8  ;;  %3002 = vmatprep.subr.bf16.mxu1 %v8350_v37 }
 0x71c   :  { %2962 = vmatpush1.bf16.msra.mxu0 %v8351_v50  ;;  %3003 = vmatpush1.bf16.msra.mxu1 %v8352_v41 }
 0x71d   :  { %3029 = vmatprep.subr.bf16.mxu0 %v8353_v7  ;;  %3070 = vmatprep.subr.bf16.mxu1 %v8354_v0 }
 0x77f   :  { %v2670_v45 = vpop.f32.mrf.mxu0  ;;  %v2711_v63 = vpop.f32.mrf.mxu1 }
 0x781   :  { %v2672_v47 = vpop.f32.mrf.mxu0  ;;  %v2713_v4 = vpop.f32.mrf.mxu1 }
 0x783   :  { %v2674_v60 = vpop.f32.mrf.mxu0  ;;  %v2715_v48 = vpop.f32.mrf.mxu1 }
 0x785   :  { %v2675_v51 = vpop.f32.mrf.mxu0  ;;  %v2716_v17 = vpop.f32.mrf.mxu1 }
 0x786   :  { %v8355_v17 = vld [vmem:[#allocation101_spill] sm:$0xff] }
 0x79f   :  { %v2752_v30 = vpop.f32.mrf.mxu0  ;;  %v2793_v33 = vpop.f32.mrf.mxu1 }
 0x7a0   :  { %v2753_v62 = vadd.f32 %v2752_v30, %v2670_v45  ;;  %v2794_v50 = vadd.f32 %v2793_v33, %v2711_v63  ;;  %v838_v30 = vadd.f32 %v8355_v17, %v8157_v29 }
 0x7a1   :  { %v2754_v35 = vpop.f32.mrf.mxu0  ;;  %v2795_v11 = vpop.f32.mrf.mxu1 }
 0x7a2   :  { %v2800_v10 = vadd.f32 %v2753_v62, %v8099_v2  ;;  %v2755_v39 = vadd.f32 %v2754_v35, %v2672_v47  ;;  %v2796_v8 = vadd.f32 %v2795_v11, %v2713_v4  ;;  %v2802_v60 = vadd.f32 %v2794_v50, %v8156_v54  ;;  %v8356_v4 = vld [vmem:[#allocation103_spill] sm:$0xff] }
 0x7a3   :  { %v2756_v57 = vpop.f32.mrf.mxu0  ;;  %v2797_v12 = vpop.f32.mrf.mxu1  ;;  %v840_v11 = vadd.f32 %v8356_v4, %v5881_v6 }
 0x7a4   :  { %v4637_v5 = vmul.f32 -1.442695, %v2800_v10  ;;  %v2801_v1 = vadd.f32 %v2755_v39, %v8100_v25  ;;  %v2803_v37 = vadd.f32 %v2796_v8, %v8101_v19 }
 0x7a5   :  { %v2757_v36 = vpop.f32.mrf.mxu0  ;;  %v2798_v52 = vpop.f32.mrf.mxu1 }
 0x7a6   :  { %5086 = vpow2.f32 %v4637_v5  ;;  %v4638_v32 = vmul.f32 -1.442695, %v2801_v1  ;;  %v4639_v41 = vmul.f32 -1.442695, %v2803_v37 }
 0x7a8   :  { %5088 = vpow2.f32 %v4638_v32 }
 0x7a9   :  { %5090 = vpow2.f32 %v4639_v41 }
 0x7b3   :  { %v5087_v45 = vpop.eup %5086 }
 0x7b4   :  { %v2807_v48 = vadd.f32 1.0, %v5087_v45 }
 0x7b5   :  { %v5089_v47 = vpop.eup %5088 }
 0x7b6   :  { %5092 = vrcp.f32 %v2807_v48  ;;  %v2813_v51 = vadd.f32 1.0, %v5089_v47  ;;  %v5091_v39 = vpop.eup %5090  ;;  %v8357_v47 = vld [vmem:[#allocation104_spill] sm:$0xff] }
 0x7b7   :  { %5094 = vtanh.f32 %v2802_v60  ;;  %v2820_v37 = vadd.f32 1.0, %v5091_v39 }
 0x7b8   :  { %5096 = vrcp.f32 %v2813_v51  ;;  %v913_v51 = vadd.f32 %v8357_v47, %v5889_v53  ;;  %v8364_v47 = vld [vmem:[#allocation95_spill] sm:$0xff] }
 0x7bf   :  { %v2869_v62 = vpop.f32.mrf.mxu0  ;;  %v2910_v35 = vpop.f32.mrf.mxu1 }
 0x7c0   :  { %v2917_v63 = vadd.f32 %v2869_v62, %v838_v30  ;;  %v8358_v30 = vld [vmem:[#allocation102_spill] sm:$0xff] }
 0x7c1   :  { %v2871_v33 = vpop.f32.mrf.mxu0  ;;  %v2912_v10 = vpop.f32.mrf.mxu1  ;;  %v911_v62 = vadd.f32 %v8358_v30, %v5893_v55  ;;  %v8367_v30 = vld [vmem:[#allocation44_spill] sm:$0xff] }
 0x7c2   :  { %v4640_v57 = vmul.f32 -1.442695, %v2917_v63  ;;  %v2918_v12 = vadd.f32 %v2871_v33, %v840_v11  ;;  %v2920_v17 = vadd.f32 %v2912_v10, %v913_v51  ;;  %v8365_v51 = vld [vmem:[#allocation96_spill] sm:$0xff] }
 0x7c3   :  { %v5093_v5 = vpop.eup %5092  ;;  %v2873_v1 = vpop.f32.mrf.mxu0  ;;  %v2919_v4 = vadd.f32 %v2910_v35, %v911_v62  ;;  %v8368_v62 = vld [vmem:[#allocation45_spill] sm:$0xff] }
 0x7c4   :  { %v2914_v36 = vpop.f32.mrf.mxu1  ;;  %v5095_v52 = vpop.eup %5094  ;;  %5098 = vpow2.f32 %v4640_v57  ;;  %v4641_v32 = vmul.f32 -1.442695, %v2918_v12  ;;  %v4642_v11 = vmul.f32 -1.442695, %v2920_v17  ;;  %v8366_v17 = vld [vmem:[#allocation94_spill] sm:$0xff] }
 0x7c5   :  { %v5097_v8 = vpop.eup %5096  ;;  %v2874_v50 = vpop.f32.mrf.mxu0  ;;  %v2824_v45 = vmul.f32 %v5095_v52, %v5093_v5 }
 0x7c6   :  { %v2915_v41 = vpop.f32.mrf.mxu1  ;;  %v2823_v60 = vmul.f32 %v5097_v8, %v6899_v44  ;;  %5100 = vpow2.f32 %v4641_v32 }
 0x7c7   :  { %5102 = vrcp.f32 %v2820_v37  ;;  %v8360_v41 = vld [vmem:[#allocation40_spill] sm:$0xff] }
 0x7c8   :  { %v7103_v48 = vadd.f32 %v2824_v45, %v2823_v60  ;;  %v8361_v45 = vld [vmem:[#allocation41_spill] sm:$0xff]  ;;  %v8362_v60 = vld [vmem:[#allocation42_spill] sm:$0xff] }
 0x7ca   :  { %5104 = vtanh.f32 %v7103_v48 }
 0x7cb   :  { %5106 = vtanh.f32 %v2919_v4  ;;  %v8369_v4 = vld [vmem:[#allocation46_spill] sm:$0xff] }
 0x7cc   :  { %5108 = vpow2.f32 %v4642_v11  ;;  %v8370_v11 = vld [vmem:[#allocation47_spill] sm:$0xff] }
 0x7d1   :  { %v5099_v63 = vpop.eup %5098 }
 0x7d2   :  { %v2924_v33 = vadd.f32 1.0, %v5099_v63  ;;  %v8371_v63 = vld [vmem:[#allocation48_spill] sm:$0xff] }
 0x7d3   :  { %v5101_v39 = vpop.eup %5100 }
 0x7d4   :  { %5110 = vrcp.f32 %v2924_v33  ;;  %v2930_v44 = vadd.f32 1.0, %v5101_v39  ;;  %v5103_v57 = vpop.eup %5102 }
 0x7d6   :  { %5112 = vrcp.f32 %v2930_v44  ;;  %v8372_v44 = vld [vmem:[#allocation49_spill] sm:$0xff] }
 0x7d7   :  { %v5105_v12 = vpop.eup %5104 }
 0x7d8   :  { %v7110_v5 = vmul.f32 %v5105_v12, %v5103_v57  ;;  %v5107_v35 = vpop.eup %5106  ;;  %v8373_v57 = vld [vmem:[#allocation50_spill] sm:$0xff] }
 0x7d9   :  { %v5109_v1 = vpop.eup %5108 }
 0x7da   :  { %8359 = vst [vmem:[#allocation82_spill] sm:$0xff] %v7110_v5  ;;  %v2946_v10 = vpack.c.bf16 %v7110_v5, %v7110_v5  ;;  %v2937_v8 = vadd.f32 1.0, %v5109_v1  ;;  %v8375_v1 = vld [vmem:[#allocation23_spill] sm:$0xff]  ;;  %v7181_v5 = vld [vmem:[#allocation9 + $0x6c] ss:$16 sps:$4 sm:$0xff]  }
 0x7db   :  { %8384 = vst [vmem:[#allocation59_spill] sm:$0xff] %v7181_v5 }
 0x7dc   :  { %2980 = vmatmul.mubr.bf16.vlgmr.msra.gmra.mxu0 %v2946_v10  ;;  %3021 = vmatmul.mubr.bf16.vlgmr.msra.gmra.mxu1 %v2946_v10  ;;  %5114 = vrcp.f32 %v2937_v8  ;;  %v7166_v8 = vld [vmem:[#allocation9 + $0x84] ss:$16 sps:$4 sm:$0xff]  }
 0x7dd   :  { %3030 = vmatpush1.bf16.msra.mxu0 %v6910_v49  ;;  %3071 = vmatpush1.bf16.msra.mxu1 %v6913_v46  ;;  %8379 = vst [vmem:[#allocation84_spill] sm:$0xff] %v7166_v8 }
 0x7de   :  { %3031 = vmatprep.subr.bf16.mxu0 %v6916_v14  ;;  %3072 = vmatprep.subr.bf16.mxu1 %v6919_v26 }
 0x7df   :  { %3061 = vmatprep.mubr.bf16.mxu0 %v7964_v56  ;;  %3102 = vmatprep.mubr.bf16.mxu1 %v7964_v56 }
 0x7e1   :  { %v5111_v36 = vpop.eup %5110  ;;  %3032 = vmatpush1.bf16.msra.mxu0 %v6924_v28  ;;  %3073 = vmatpush1.bf16.msra.mxu1 %v6927_v58 }
 0x7e2   :  { %v2941_v52 = vmul.f32 %v5111_v36, %v5107_v35  ;;  %3033 = vmatprep.subr.bf16.mxu0 %v6930_v18  ;;  %3074 = vmatprep.subr.bf16.mxu1 %v6933_v15  ;;  %v8374_v35 = vld [vmem:[#allocation51_spill] sm:$0xff]  ;;  %v8376_v36 = vld [vmem:[#allocation53_spill] sm:$0xff] }
 0x7e3   :  { %v5113_v32 = vpop.eup %5112 }
 0x7e4   :  { %v2940_v37 = vmul.f32 %v5113_v32, %v6943_v42  ;;  %v8363_v42 = vld [vmem:[#allocation93_spill] sm:$0xff]  ;;  %v7163_v32 = vld [vmem:[#allocation9 + $0xa8] ss:$16 sps:$4 sm:$0xff]  }
 0x7e5   :  { %3034 = vmatpush1.bf16.msra.mxu0 %v6937_v61  ;;  %3075 = vmatpush1.bf16.msra.mxu1 %v6940_v59  ;;  %8378 = vst [vmem:[#allocation83_spill] sm:$0xff] %v7163_v32 }
 0x7e6   :  { %v7127_v50 = vadd.f32 %v2941_v52, %v2940_v37  ;;  %3035 = vmatprep.subr.bf16.mxu0 %v6945_v34  ;;  %3076 = vmatprep.subr.bf16.mxu1 %v6948_v43  ;;  %v8377_v52 = vld [vmem:[#allocation54_spill] sm:$0xff] }
 0x7e7   :  { %v7169_v37 = vld [vmem:[#allocation9 + $0x8c] ss:$16 sps:$4 sm:$0xff]  }
 0x7e8   :  { %5116 = vtanh.f32 %v7127_v50  ;;  %8380 = vst [vmem:[#allocation87_spill] sm:$0xff] %v7169_v37 }
 0x7e9   :  { %3036 = vmatpush1.bf16.msra.mxu0 %v8360_v41  ;;  %3077 = vmatpush1.bf16.msra.mxu1 %v8361_v45  ;;  %v5115_v33 = vpop.eup %5114 }
 0x7ea   :  { %3037 = vmatprep.subr.bf16.mxu0 %v8362_v60  ;;  %3078 = vmatprep.subr.bf16.mxu1 %v8363_v42 }
 0x7ed   :  { %3038 = vmatpush1.bf16.msra.mxu0 %v8364_v47  ;;  %3079 = vmatpush1.bf16.msra.mxu1 %v8365_v51 }
 0x7ee   :  { %3039 = vmatprep.subr.bf16.mxu0 %v8366_v17  ;;  %3080 = vmatprep.subr.bf16.mxu1 %v8367_v30 }
 0x7f1   :  { %3040 = vmatpush1.bf16.msra.mxu0 %v8368_v62  ;;  %3081 = vmatpush1.bf16.msra.mxu1 %v8369_v4 }
 0x7f2   :  { %3041 = vmatprep.subr.bf16.mxu0 %v8370_v11  ;;  %3082 = vmatprep.subr.bf16.mxu1 %v8371_v63 }
 0x7f5   :  { %v5117_v39 = vpop.eup %5116  ;;  %3042 = vmatpush1.bf16.msra.mxu0 %v8372_v44  ;;  %3083 = vmatpush1.bf16.msra.mxu1 %v8373_v57 }
 0x7f6   :  { %3043 = vmatprep.subr.bf16.mxu0 %v6994_v20  ;;  %3084 = vmatprep.subr.bf16.mxu1 %v6997_v3  ;;  %v2944_v12 = vmul.f32 %v5117_v39, %v5115_v33  ;;  %v7172_v33 = vld [vmem:[#allocation9 + $0x80] ss:$16 sps:$4 sm:$0xff]   ;;  %v7175_v39 = vld [vmem:[#allocation9 + $0x88] ss:$16 sps:$4 sm:$0xff]  }
 0x7f7   :  { %8381 = vst [vmem:[#allocation113_spill] sm:$0xff] %v7172_v33  ;;  %8382 = vst [vmem:[#allocation88_spill] sm:$0xff] %v7175_v39 }
 0x7f8   :  { %v2945_v10 = vpack.c.bf16 %v2944_v12, %v2944_v12  ;;  %v7178_v12 = vld [vmem:[#allocation9 + $0x64] ss:$16 sps:$4 sm:$0xff]  }
 0x7f9   :  { %3044 = vmatpush1.bf16.msra.mxu0 %v7000_v21  ;;  %3085 = vmatpush1.bf16.msra.mxu1 %v7003_v13  ;;  %8383 = vst [vmem:[#allocation85_spill] sm:$0xff] %v7178_v12 }
 0x7fa   :  { %3146 = vmatprep.subr.bf16.mxu0 %v7006_v22  ;;  %3187 = vmatprep.subr.bf16.mxu1 %v8374_v35 }
 0x7fc   :  { %3062 = vmatmul.mubr.bf16.vlgmr.msra.gmra.mxu0 %v2945_v10  ;;  %3103 = vmatmul.mubr.bf16.vlgmr.msra.gmra.mxu1 %v2945_v10 }
 0x7fd   :  { %3147 = vmatpush1.bf16.msra.mxu0 %v8375_v1  ;;  %3188 = vmatpush1.bf16.msra.mxu1 %v8376_v36 }
 0x7fe   :  { %3148 = vmatprep.subr.bf16.mxu0 %v8377_v52  ;;  %3189 = vmatprep.subr.bf16.mxu1 %v7019_v23 }
 0x7ff   :  { %3178 = vmatprep.mubr.bf16.mxu0 %v7964_v56  ;;  %3219 = vmatprep.mubr.bf16.mxu1 %v7964_v56 }
 0x801   :  { %3149 = vmatpush1.bf16.msra.mxu0 %v7024_v27  ;;  %3190 = vmatpush1.bf16.msra.mxu1 %v7027_v16 }
 0x802   :  { %3150 = vmatprep.subr.bf16.mxu0 %v7030_v40  ;;  %3191 = vmatprep.subr.bf16.mxu1 %v7033_v38 }
 0x805   :  { %3151 = vmatpush1.bf16.msra.mxu0 %v8246_v9  ;;  %3192 = vmatpush1.bf16.msra.mxu1 %v7163_v32 }
 0x806   :  { %3152 = vmatprep.subr.bf16.mxu0 %v7166_v8  ;;  %3193 = vmatprep.subr.bf16.mxu1 %v7169_v37  ;;  %v7185_v8 = vld [vmem:[#allocation9 + $0x68] ss:$16 sps:$4 sm:$0xff]   ;;  %v7188_v37 = vld [vmem:[#allocation9 + $0x44] ss:$16 sps:$4 sm:$0xff]  }
 0x807   :  { %8385 = vst [vmem:[#allocation60_spill] sm:$0xff] %v7185_v8  ;;  %8386 = vst [vmem:[#allocation61_spill] sm:$0xff] %v7188_v37 }
 0x809   :  { %3153 = vmatpush1.bf16.msra.mxu0 %v7172_v33  ;;  %3194 = vmatpush1.bf16.msra.mxu1 %v7175_v39  ;;  %v7191_v33 = vld [vmem:[#allocation9 + $0x4c] ss:$16 sps:$4 sm:$0xff]   ;;  %v7194_v39 = vld [vmem:[#allocation9 + $0x40] ss:$16 sps:$4 sm:$0xff]  }
 0x80a   :  { %3154 = vmatprep.subr.bf16.mxu0 %v7178_v12  ;;  %3195 = vmatprep.subr.bf16.mxu1 %v7181_v5  ;;  %8387 = vst [vmem:[#allocation62_spill] sm:$0xff] %v7191_v33  ;;  %8388 = vst [vmem:[#allocation63_spill] sm:$0xff] %v7194_v39  ;;  %v7197_v12 = vld [vmem:[#allocation9 + $0x48] ss:$16 sps:$4 sm:$0xff]  }
 0x80b   :  { %8389 = vst [vmem:[#allocation64_spill] sm:$0xff] %v7197_v12 }
 0x80d   :  { %3155 = vmatpush1.bf16.msra.mxu0 %v8254_v31  ;;  %3196 = vmatpush1.bf16.msra.mxu1 %v7185_v8  ;;  %v7200_v31 = vld [vmem:[#allocation9 + $0x24] ss:$16 sps:$4 sm:$0xff]   ;;  %v7203_v8 = vld [vmem:[#allocation9 + $0x2c] ss:$16 sps:$4 sm:$0xff]  }
 0x80e   :  { %3156 = vmatprep.subr.bf16.mxu0 %v7188_v37  ;;  %3197 = vmatprep.subr.bf16.mxu1 %v7191_v33  ;;  %8390 = vst [vmem:[#allocation65_spill] sm:$0xff] %v7200_v31  ;;  %8391 = vst [vmem:[#allocation66_spill] sm:$0xff] %v7203_v8  ;;  %v7207_v37 = vld [vmem:[#allocation9 + $0x28] ss:$16 sps:$4 sm:$0xff]   ;;  %v7210_v33 = vld [vmem:[#allocation9 + $0x4] ss:$16 sps:$4 sm:$0xff]  }
 0x80f   :  { %8392 = vst [vmem:[#allocation67_spill] sm:$0xff] %v7207_v37  ;;  %8393 = vst [vmem:[#allocation68_spill] sm:$0xff] %v7210_v33 }
 0x811   :  { %3157 = vmatpush1.bf16.msra.mxu0 %v7194_v39  ;;  %3198 = vmatpush1.bf16.msra.mxu1 %v7197_v12  ;;  %v7213_v39 = vld [vmem:[#allocation9 + $0xc] ss:$16 sps:$4 sm:$0xff]   ;;  %v7216_v12 = vld [vmem:[#allocation9] ss:$16 sps:$4 sm:$0xff]  }
 0x812   :  { %3158 = vmatprep.subr.bf16.mxu0 %v7200_v31  ;;  %3199 = vmatprep.subr.bf16.mxu1 %v7203_v8  ;;  %8394 = vst [vmem:[#allocation69_spill] sm:$0xff] %v7213_v39  ;;  %8395 = vst [vmem:[#allocation70_spill] sm:$0xff] %v7216_v12  ;;  %v7219_v31 = vld [vmem:[#allocation9 + $0x8] ss:$16 sps:$4 sm:$0xff]  }
 0x813   :  { %8396 = vst [vmem:[#allocation71_spill] sm:$0xff] %v7219_v31 }
 0x815   :  { %3159 = vmatpush1.bf16.msra.mxu0 %v8262_v24  ;;  %3200 = vmatpush1.bf16.msra.mxu1 %v7207_v37  ;;  %v7222_v24 = vld [vmem:[#allocation12 + $0xe4] ss:$16 sps:$4 sm:$0xff]   ;;  %v7225_v37 = vld [vmem:[#allocation12 + $0xec] ss:$16 sps:$4 sm:$0xff]  }
 0x816   :  { %3160 = vmatprep.subr.bf16.mxu0 %v7210_v33  ;;  %3201 = vmatprep.subr.bf16.mxu1 %v7213_v39  ;;  %8397 = vst [vmem:[#allocation97_spill] sm:$0xff] %v7222_v24  ;;  %8398 = vst [vmem:[#allocation99_spill] sm:$0xff] %v7225_v37  ;;  %v7228_v33 = vld [vmem:[#allocation12 + $0xe0] ss:$16 sps:$4 sm:$0xff]   ;;  %v7231_v39 = vld [vmem:[#allocation12 + $0xe8] ss:$16 sps:$4 sm:$0xff]  }
 0x817   :  { %8399 = vst [vmem:[#allocation100_spill] sm:$0xff] %v7228_v33  ;;  %8400 = vst [vmem:[#allocation98_spill] sm:$0xff] %v7231_v39 }
 0x819   :  { %3161 = vmatpush1.bf16.msra.mxu0 %v7216_v12  ;;  %3202 = vmatpush1.bf16.msra.mxu1 %v7219_v31  ;;  %v7234_v12 = vld [vmem:[#allocation12 + $0xc4] ss:$16 sps:$4 sm:$0xff]   ;;  %v7237_v31 = vld [vmem:[#allocation12 + $0xcc] ss:$16 sps:$4 sm:$0xff]  }
 0x81a   :  { %3258 = vmatprep.subr.bf16.mxu0 %v7222_v24  ;;  %3299 = vmatprep.subr.bf16.mxu1 %v7225_v37  ;;  %8401 = vst [vmem:[#allocation72_spill] sm:$0xff] %v7234_v12  ;;  %8402 = vst [vmem:[#allocation73_spill] sm:$0xff] %v7237_v31  ;;  %v7257_v37 = vld [vmem:[#allocation12 + $0xa8] ss:$16 sps:$4 sm:$0xff]  }
 0x81b   :  { %8408 = vst [vmem:[#allocation79_spill] sm:$0xff] %v7257_v37 }
 0x81c   :  { %3179 = vmatmul.mubr.bf16.vlgmr.msra.gmra.mxu0 %v2945_v10  ;;  %3220 = vmatmul.mubr.bf16.vlgmr.msra.gmra.mxu1 %v2945_v10  ;;  %v7242_v10 = vld [vmem:[#allocation12 + $0xc0] ss:$16 sps:$4 sm:$0xff]  }
 0x81d   :  { %3259 = vmatpush1.bf16.msra.mxu0 %v7228_v33  ;;  %3300 = vmatpush1.bf16.msra.mxu1 %v7231_v39  ;;  %8403 = vst [vmem:[#allocation74_spill] sm:$0xff] %v7242_v10  ;;  %v7245_v33 = vld [vmem:[#allocation12 + $0xc8] ss:$16 sps:$4 sm:$0xff]   ;;  %v7248_v39 = vld [vmem:[#allocation12 + $0xa4] ss:$16 sps:$4 sm:$0xff]  }
 0x81e   :  { %3260 = vmatprep.subr.bf16.mxu0 %v7234_v12  ;;  %3301 = vmatprep.subr.bf16.mxu1 %v7237_v31  ;;  %8404 = vst [vmem:[#allocation75_spill] sm:$0xff] %v7245_v33  ;;  %8405 = vst [vmem:[#allocation76_spill] sm:$0xff] %v7248_v39  ;;  %v7251_v12 = vld [vmem:[#allocation12 + $0xac] ss:$16 sps:$4 sm:$0xff]   ;;  %v7254_v31 = vld [vmem:[#allocation12 + $0xa0] ss:$16 sps:$4 sm:$0xff]  }
 0x81f   :  { %3290 = vmatprep.mubr.bf16.mxu0 %v7964_v56  ;;  %3331 = vmatprep.mubr.bf16.mxu1 %v7964_v56  ;;  %8406 = vst [vmem:[#allocation77_spill] sm:$0xff] %v7251_v12  ;;  %8407 = vst [vmem:[#allocation78_spill] sm:$0xff] %v7254_v31 }
 0x821   :  { %3261 = vmatpush1.bf16.msra.mxu0 %v7242_v10  ;;  %3302 = vmatpush1.bf16.msra.mxu1 %v7245_v33  ;;  %v7260_v10 = vld [vmem:[#allocation12 + $0x84] ss:$16 sps:$4 sm:$0xff]   ;;  %v7263_v33 = vld [vmem:[#allocation12 + $0x8c] ss:$16 sps:$4 sm:$0xff]  }
 0x822   :  { %3262 = vmatprep.subr.bf16.mxu0 %v7248_v39  ;;  %3303 = vmatprep.subr.bf16.mxu1 %v7251_v12  ;;  %8409 = vst [vmem:[#allocation80_spill] sm:$0xff] %v7260_v10  ;;  %8410 = vst [vmem:[#allocation24_spill] sm:$0xff] %v7263_v33  ;;  %v7266_v39 = vld [vmem:[#allocation12 + $0x80] ss:$16 sps:$4 sm:$0xff]   ;;  %v7269_v12 = vld [vmem:[#allocation12 + $0x88] ss:$16 sps:$4 sm:$0xff]  }
 0x823   :  { %8411 = vst [vmem:[#allocation25_spill] sm:$0xff] %v7266_v39  ;;  %8412 = vst [vmem:[#allocation86_spill] sm:$0xff] %v7269_v12 }
 0x825   :  { %3263 = vmatpush1.bf16.msra.mxu0 %v7254_v31  ;;  %3304 = vmatpush1.bf16.msra.mxu1 %v7257_v37  ;;  %v7272_v31 = vld [vmem:[#allocation12 + $0x64] ss:$16 sps:$4 sm:$0xff]   ;;  %v7275_v37 = vld [vmem:[#allocation12 + $0x6c] ss:$16 sps:$4 sm:$0xff]  }
 0x826   :  { %3264 = vmatprep.subr.bf16.mxu0 %v7260_v10  ;;  %3305 = vmatprep.subr.bf16.mxu1 %v7263_v33  ;;  %8413 = vst [vmem:[#allocation22_spill] sm:$0xff] %v7272_v31  ;;  %8414 = vst [vmem:[#allocation89_spill] sm:$0xff] %v7275_v37  ;;  %v7278_v10 = vld [vmem:[#allocation12 + $0x60] ss:$16 sps:$4 sm:$0xff]   ;;  %v7281_v33 = vld [vmem:[#allocation12 + $0x68] ss:$16 sps:$4 sm:$0xff]  }
 0x827   :  { %8415 = vst [vmem:[#allocation91_spill] sm:$0xff] %v7278_v10  ;;  %8416 = vst [vmem:[#allocation92_spill] sm:$0xff] %v7281_v33 }
 0x829   :  { %3265 = vmatpush1.bf16.msra.mxu0 %v7266_v39  ;;  %3306 = vmatpush1.bf16.msra.mxu1 %v7269_v12  ;;  %v7284_v39 = vld [vmem:[#allocation12 + $0x44] ss:$16 sps:$4 sm:$0xff]   ;;  %v7287_v12 = vld [vmem:[#allocation12 + $0x4c] ss:$16 sps:$4 sm:$0xff]  }
 0x82a   :  { %3266 = vmatprep.subr.bf16.mxu0 %v7272_v31  ;;  %3307 = vmatprep.subr.bf16.mxu1 %v7275_v37  ;;  %8417 = vst [vmem:[#allocation90_spill] sm:$0xff] %v7284_v39  ;;  %8418 = vst [vmem:[#allocation28_spill] sm:$0xff] %v7287_v12  ;;  %v7290_v31 = vld [vmem:[#allocation12 + $0x40] ss:$16 sps:$4 sm:$0xff]   ;;  %v7293_v37 = vld [vmem:[#allocation12 + $0x48] ss:$16 sps:$4 sm:$0xff]  }
 0x82b   :  { %8419 = vst [vmem:[#allocation29_spill] sm:$0xff] %v7290_v31  ;;  %8420 = vst [vmem:[#allocation30_spill] sm:$0xff] %v7293_v37 }
 0x82d   :  { %3267 = vmatpush1.bf16.msra.mxu0 %v7278_v10  ;;  %3308 = vmatpush1.bf16.msra.mxu1 %v7281_v33  ;;  %v7296_v10 = vld [vmem:[#allocation12 + $0x24] ss:$16 sps:$4 sm:$0xff]   ;;  %v7299_v33 = vld [vmem:[#allocation12 + $0x2c] ss:$16 sps:$4 sm:$0xff]  }
 0x82e   :  { %3268 = vmatprep.subr.bf16.mxu0 %v7284_v39  ;;  %3309 = vmatprep.subr.bf16.mxu1 %v7287_v12  ;;  %8421 = vst [vmem:[#allocation31_spill] sm:$0xff] %v7296_v10  ;;  %8422 = vst [vmem:[#allocation32_spill] sm:$0xff] %v7299_v33  ;;  %v7302_v39 = vld [vmem:[#allocation12 + $0x20] ss:$16 sps:$4 sm:$0xff]   ;;  %v7305_v12 = vld [vmem:[#allocation12 + $0x28] ss:$16 sps:$4 sm:$0xff]  }
 0x82f   :  { %8423 = vst [vmem:[#allocation33_spill] sm:$0xff] %v7302_v39  ;;  %8424 = vst [vmem:[#allocation34_spill] sm:$0xff] %v7305_v12 }
 0x831   :  { %3269 = vmatpush1.bf16.msra.mxu0 %v7290_v31  ;;  %3310 = vmatpush1.bf16.msra.mxu1 %v7293_v37  ;;  %v7308_v31 = vld [vmem:[#allocation12 + $0x4] ss:$16 sps:$4 sm:$0xff]   ;;  %v7311_v37 = vld [vmem:[#allocation12 + $0xc] ss:$16 sps:$4 sm:$0xff]  }
 0x832   :  { %3270 = vmatprep.subr.bf16.mxu0 %v7296_v10  ;;  %3311 = vmatprep.subr.bf16.mxu1 %v7299_v33  ;;  %8425 = vst [vmem:[#allocation37_spill] sm:$0xff] %v7308_v31  ;;  %8426 = vst [vmem:[#allocation38_spill] sm:$0xff] %v7311_v37  ;;  %v7314_v10 = vld [vmem:[#allocation12] ss:$16 sps:$4 sm:$0xff]   ;;  %v7317_v33 = vld [vmem:[#allocation12 + $0x8] ss:$16 sps:$4 sm:$0xff]  }
 0x833   :  { %8427 = vst [vmem:[#allocation101_spill] sm:$0xff] %v7314_v10  ;;  %8428 = vst [vmem:[#allocation103_spill] sm:$0xff] %v7317_v33 }
 0x835   :  { %3271 = vmatpush1.bf16.msra.mxu0 %v7302_v39  ;;  %3312 = vmatpush1.bf16.msra.mxu1 %v7305_v12 }
 0x836   :  { %3272 = vmatprep.subr.bf16.mxu0 %v7308_v31  ;;  %3313 = vmatprep.subr.bf16.mxu1 %v7311_v37 }
 0x839   :  { %3273 = vmatpush1.bf16.msra.mxu0 %v7314_v10  ;;  %3314 = vmatpush1.bf16.msra.mxu1 %v7317_v33 }
 0x83a   :  { %3340 = vmatprep.subr.bf16.mxu0 %v8353_v7  ;;  %3381 = vmatprep.subr.bf16.mxu1 %v8354_v0 }
 0x89c   :  { %v2981_v12 = vpop.f32.mrf.mxu0  ;;  %v3022_v39 = vpop.f32.mrf.mxu1 }
 0x89e   :  { %v2983_v24 = vpop.f32.mrf.mxu0  ;;  %v3024_v31 = vpop.f32.mrf.mxu1 }
 0x8a0   :  { %v2985_v8 = vpop.f32.mrf.mxu0  ;;  %v3026_v5 = vpop.f32.mrf.mxu1 }
 0x8a2   :  { %v2986_v32 = vpop.f32.mrf.mxu0  ;;  %v3027_v37 = vpop.f32.mrf.mxu1 }
 0x8bc   :  { %v3063_v9 = vpop.f32.mrf.mxu0  ;;  %v3104_v38 = vpop.f32.mrf.mxu1 }
 0x8bd   :  { %v3064_v40 = vadd.f32 %v3063_v9, %v2981_v12  ;;  %v3105_v37 = vadd.f32 %v3104_v38, %v3022_v39 }
 0x8be   :  { %v3065_v10 = vpop.f32.mrf.mxu0  ;;  %v3106_v16 = vpop.f32.mrf.mxu1 }
 0x8bf   :  { %v3111_v27 = vadd.f32 %v3064_v40, %v8099_v2  ;;  %v3066_v33 = vadd.f32 %v3065_v10, %v2983_v24  ;;  %v3107_v5 = vadd.f32 %v3106_v16, %v3024_v31  ;;  %v3113_v35 = vadd.f32 %v3105_v37, %v8156_v54  ;;  %v8430_v16 = vld [vmem:[#allocation107_spill] sm:$0xff] }
 0x8c0   :  { %v3067_v23 = vpop.f32.mrf.mxu0  ;;  %v3108_v7 = vpop.f32.mrf.mxu1  ;;  %v846_v31 = vadd.f32 %v8430_v16, %v5881_v6 }
 0x8c1   :  { %v4643_v52 = vmul.f32 -1.442695, %v3111_v27  ;;  %v3112_v0 = vadd.f32 %v3066_v33, %v8100_v25  ;;  %v3114_v32 = vadd.f32 %v3107_v5, %v8101_v19  ;;  %v8429_v23 = vld [vmem:[#allocation105_spill] sm:$0xff] }
 0x8c2   :  { %v3068_v36 = vpop.f32.mrf.mxu0  ;;  %v3109_v1 = vpop.f32.mrf.mxu1 }
 0x8c3   :  { %5118 = vpow2.f32 %v4643_v52  ;;  %v4644_v8 = vmul.f32 -1.442695, %v3112_v0  ;;  %v4645_v9 = vmul.f32 -1.442695, %v3114_v32  ;;  %v844_v1 = vadd.f32 %v8429_v23, %v8157_v29 }
 0x8c5   :  { %5120 = vpow2.f32 %v4644_v8 }
 0x8c6   :  { %5122 = vpow2.f32 %v4645_v9 }
 0x8d0   :  { %v5119_v12 = vpop.eup %5118 }
 0x8d1   :  { %v3118_v40 = vadd.f32 1.0, %v5119_v12 }
 0x8d2   :  { %v5121_v24 = vpop.eup %5120 }
 0x8d3   :  { %5124 = vrcp.f32 %v3118_v40  ;;  %v3124_v27 = vadd.f32 1.0, %v5121_v24  ;;  %v5123_v10 = vpop.eup %5122 }
 0x8d4   :  { %5126 = vtanh.f32 %v3113_v35  ;;  %v3131_v12 = vadd.f32 1.0, %v5123_v10 }
 0x8d5   :  { %5128 = vrcp.f32 %v3124_v27 }
 0x8dc   :  { %v3180_v36 = vpop.f32.mrf.mxu0  ;;  %v3221_v52 = vpop.f32.mrf.mxu1 }
 0x8dd   :  { %v3228_v38 = vadd.f32 %v3180_v36, %v844_v1  ;;  %v8431_v36 = vld [vmem:[#allocation108_spill] sm:$0xff] }
 0x8de   :  { %v3182_v33 = vpop.f32.mrf.mxu0  ;;  %v3223_v39 = vpop.f32.mrf.mxu1  ;;  %v919_v16 = vadd.f32 %v8431_v36, %v5889_v53  ;;  %v8460_v36 = vld [vmem:[#allocation68_spill] sm:$0xff] }
 0x8df   :  { %v4646_v7 = vmul.f32 -1.442695, %v3228_v38  ;;  %v3229_v0 = vadd.f32 %v3182_v33, %v846_v31  ;;  %v8432_v38 = vld [vmem:[#allocation106_spill] sm:$0xff] }
 0x8e0   :  { %v5125_v8 = vpop.eup %5124  ;;  %v3184_v5 = vpop.f32.mrf.mxu0  ;;  %v3231_v31 = vadd.f32 %v3223_v39, %v919_v16  ;;  %v917_v33 = vadd.f32 %v8432_v38, %v5893_v55  ;;  %v8461_v16 = vld [vmem:[#allocation69_spill] sm:$0xff]  ;;  %v8463_v38 = vld [vmem:[#allocation71_spill] sm:$0xff] }
 0x8e1   :  { %v3225_v32 = vpop.f32.mrf.mxu1  ;;  %v5127_v37 = vpop.eup %5126  ;;  %5130 = vpow2.f32 %v4646_v7  ;;  %v4647_v35 = vmul.f32 -1.442695, %v3229_v0 }
 0x8e2   :  { %v5129_v9 = vpop.eup %5128  ;;  %v3185_v40 = vpop.f32.mrf.mxu0  ;;  %v3135_v27 = vmul.f32 %v5127_v37, %v5125_v8  ;;  %v3230_v7 = vadd.f32 %v3221_v52, %v917_v33  ;;  %v4648_v10 = vmul.f32 -1.442695, %v3231_v31  ;;  %v8462_v31 = vld [vmem:[#allocation70_spill] sm:$0xff]  ;;  %v8464_v33 = vld [vmem:[#allocation97_spill] sm:$0xff] }
 0x8e3   :  { %v3226_v24 = vpop.f32.mrf.mxu1  ;;  %v3134_v23 = vmul.f32 %v5129_v9, %v7103_v48  ;;  %5132 = vpow2.f32 %v4647_v35 }
 0x8e4   :  { %5134 = vrcp.f32 %v3131_v12  ;;  %v8457_v24 = vld [vmem:[#allocation66_spill] sm:$0xff] }
 0x8e5   :  { %v7331_v1 = vadd.f32 %v3135_v27, %v3134_v23  ;;  %v8458_v27 = vld [vmem:[#allocation43_spill] sm:$0xff] }
 0x8e6   :  { %v8459_v23 = vld [vmem:[#allocation67_spill] sm:$0xff] }
 0x8e7   :  { %5136 = vtanh.f32 %v7331_v1 }
 0x8e8   :  { %5138 = vtanh.f32 %v3230_v7  ;;  %v8465_v7 = vld [vmem:[#allocation99_spill] sm:$0xff] }
 0x8e9   :  { %5140 = vpow2.f32 %v4648_v10  ;;  %v8466_v10 = vld [vmem:[#allocation100_spill] sm:$0xff] }
 0x8ee   :  { %v5131_v0 = vpop.eup %5130 }
 0x8ef   :  { %v3235_v5 = vadd.f32 1.0, %v5131_v0  ;;  %v8467_v0 = vld [vmem:[#allocation98_spill] sm:$0xff] }
 0x8f0   :  { %v5133_v8 = vpop.eup %5132 }
 0x8f1   :  { %5142 = vrcp.f32 %v3235_v5  ;;  %v3241_v48 = vadd.f32 1.0, %v5133_v8  ;;  %v5135_v32 = vpop.eup %5134  ;;  %v8468_v5 = vld [vmem:[#allocation72_spill] sm:$0xff]  ;;  %v8469_v8 = vld [vmem:[#allocation73_spill] sm:$0xff] }
 0x8f3   :  { %5144 = vrcp.f32 %v3241_v48  ;;  %v8470_v48 = vld [vmem:[#allocation74_spill] sm:$0xff] }
 0x8f4   :  { %v5137_v37 = vpop.eup %5136 }
 0x8f5   :  { %v7338_v35 = vmul.f32 %v5137_v37, %v5135_v32  ;;  %v5139_v52 = vpop.eup %5138  ;;  %v8471_v32 = vld [vmem:[#allocation75_spill] sm:$0xff]  ;;  %v8472_v37 = vld [vmem:[#allocation76_spill] sm:$0xff] }
 0x8f6   :  { %v5141_v9 = vpop.eup %5140 }
 0x8f7   :  { %v3257_v39 = vpack.c.bf16 %v7338_v35, %v7338_v35 }
 0x8f9   :  { %3291 = vmatmul.mubr.bf16.vlgmr.msra.gmra.mxu0 %v3257_v39  ;;  %3332 = vmatmul.mubr.bf16.vlgmr.msra.gmra.mxu1 %v3257_v39  ;;  %v8473_v39 = vld [vmem:[#allocation77_spill] sm:$0xff] }
 0x8fa   :  { %3341 = vmatpush1.bf16.msra.mxu0 %v6910_v49  ;;  %3382 = vmatpush1.bf16.msra.mxu1 %v6913_v46  ;;  %v3248_v46 = vadd.f32 1.0, %v5141_v9  ;;  %v8475_v9 = vld [vmem:[#allocation79_spill] sm:$0xff] }
 0x8fb   :  { %3342 = vmatprep.subr.bf16.mxu0 %v6916_v14  ;;  %3383 = vmatprep.subr.bf16.mxu1 %v6919_v26 }
 0x8fc   :  { %3372 = vmatprep.mubr.bf16.mxu0 %v7964_v56  ;;  %3413 = vmatprep.mubr.bf16.mxu1 %v7964_v56  ;;  %5146 = vrcp.f32 %v3248_v46  ;;  %v8479_v46 = vld [vmem:[#allocation86_spill] sm:$0xff] }
 0x8fe   :  { %v5143_v12 = vpop.eup %5142  ;;  %3343 = vmatpush1.bf16.msra.mxu0 %v6924_v28  ;;  %3384 = vmatpush1.bf16.msra.mxu1 %v6927_v58 }
 0x8ff   :  { %v3252_v40 = vmul.f32 %v5143_v12, %v5139_v52  ;;  %3344 = vmatprep.subr.bf16.mxu0 %v6930_v18  ;;  %3385 = vmatprep.subr.bf16.mxu1 %v6933_v15  ;;  %v8474_v52 = vld [vmem:[#allocation78_spill] sm:$0xff]  ;;  %v8476_v12 = vld [vmem:[#allocation80_spill] sm:$0xff] }
 0x900   :  { %v5145_v49 = vpop.eup %5144 }
 0x901   :  { %v3251_v14 = vmul.f32 %v5145_v49, %v7127_v50  ;;  %v8442_v50 = vld [vmem:[#allocation27_spill] sm:$0xff]  ;;  %v8478_v49 = vld [vmem:[#allocation25_spill] sm:$0xff] }
 0x902   :  { %3345 = vmatpush1.bf16.msra.mxu0 %v6937_v61  ;;  %3386 = vmatpush1.bf16.msra.mxu1 %v6940_v59  ;;  %v8433_v61 = vld [vmem:[#allocation51_spill] sm:$0xff] }
 0x903   :  { %v7355_v26 = vadd.f32 %v3252_v40, %v3251_v14  ;;  %3346 = vmatprep.subr.bf16.mxu0 %v6945_v34  ;;  %3387 = vmatprep.subr.bf16.mxu1 %v6948_v43  ;;  %v8434_v59 = vld [vmem:[#allocation23_spill] sm:$0xff]  ;;  %v8435_v34 = vld [vmem:[#allocation53_spill] sm:$0xff]  ;;  %v8436_v43 = vld [vmem:[#allocation54_spill] sm:$0xff] }
 0x904   :  { %v8477_v40 = vld [vmem:[#allocation24_spill] sm:$0xff]  ;;  %v8480_v14 = vld [vmem:[#allocation22_spill] sm:$0xff] }
 0x905   :  { %5148 = vtanh.f32 %v7355_v26 }
 0x906   :  { %3347 = vmatpush1.bf16.msra.mxu0 %v8360_v41  ;;  %3388 = vmatpush1.bf16.msra.mxu1 %v8361_v45  ;;  %v8443_v41 = vld [vmem:[#allocation83_spill] sm:$0xff]  ;;  %v8444_v45 = vld [vmem:[#allocation84_spill] sm:$0xff] }
 0x907   :  { %3348 = vmatprep.subr.bf16.mxu0 %v8362_v60  ;;  %3389 = vmatprep.subr.bf16.mxu1 %v8363_v42  ;;  %v8445_v60 = vld [vmem:[#allocation87_spill] sm:$0xff]  ;;  %v8446_v42 = vld [vmem:[#allocation113_spill] sm:$0xff] }
 0x909   :  { %v5147_v28 = vpop.eup %5146 }
 0x90a   :  { %3349 = vmatpush1.bf16.msra.mxu0 %v8364_v47  ;;  %3390 = vmatpush1.bf16.msra.mxu1 %v8365_v51  ;;  %v8447_v47 = vld [vmem:[#allocation88_spill] sm:$0xff]  ;;  %v8448_v51 = vld [vmem:[#allocation85_spill] sm:$0xff] }
 0x90b   :  { %3350 = vmatprep.subr.bf16.mxu0 %v8366_v17  ;;  %3391 = vmatprep.subr.bf16.mxu1 %v8367_v30  ;;  %v8449_v17 = vld [vmem:[#allocation59_spill] sm:$0xff] }
 0x90c   :  { %v8450_v30 = vld [vmem:[#allocation35_spill] sm:$0xff] }
 0x90e   :  { %3351 = vmatpush1.bf16.msra.mxu0 %v8368_v62  ;;  %3392 = vmatpush1.bf16.msra.mxu1 %v8369_v4  ;;  %v8451_v62 = vld [vmem:[#allocation60_spill] sm:$0xff]  ;;  %v8452_v4 = vld [vmem:[#allocation61_spill] sm:$0xff] }
 0x90f   :  { %3352 = vmatprep.subr.bf16.mxu0 %v8370_v11  ;;  %3393 = vmatprep.subr.bf16.mxu1 %v8371_v63  ;;  %v8453_v11 = vld [vmem:[#allocation62_spill] sm:$0xff]  ;;  %v8454_v63 = vld [vmem:[#allocation63_spill] sm:$0xff] }
 0x912   :  { %v5149_v58 = vpop.eup %5148  ;;  %3353 = vmatpush1.bf16.msra.mxu0 %v8372_v44  ;;  %3394 = vmatpush1.bf16.msra.mxu1 %v8373_v57  ;;  %v8455_v44 = vld [vmem:[#allocation64_spill] sm:$0xff]  ;;  %v8456_v57 = vld [vmem:[#allocation65_spill] sm:$0xff] }
 0x913   :  { %3354 = vmatprep.subr.bf16.mxu0 %v6994_v20  ;;  %3395 = vmatprep.subr.bf16.mxu1 %v6997_v3  ;;  %v3255_v18 = vmul.f32 %v5149_v58, %v5147_v28  ;;  %v8437_v20 = vld [vmem:[#allocation55_spill] sm:$0xff]  ;;  %v8438_v3 = vld [vmem:[#allocation56_spill] sm:$0xff]  ;;  %v8481_v28 = vld [vmem:[#allocation89_spill] sm:$0xff] }
 0x914   :  { %v8482_v58 = vld [vmem:[#allocation91_spill] sm:$0xff] }
 0x915   :  { %v3256_v15 = vpack.c.bf16 %v3255_v18, %v3255_v18  ;;  %v8483_v18 = vld [vmem:[#allocation92_spill] sm:$0xff] }
 0x916   :  { %3355 = vmatpush1.bf16.msra.mxu0 %v7000_v21  ;;  %3396 = vmatpush1.bf16.msra.mxu1 %v7003_v13  ;;  %v8439_v13 = vld [vmem:[#allocation57_spill] sm:$0xff]  ;;  %v8440_v21 = vld [vmem:[#allocation58_spill] sm:$0xff] }
 0x917   :  { %3457 = vmatprep.subr.bf16.mxu0 %v7006_v22  ;;  %3498 = vmatprep.subr.bf16.mxu1 %v8433_v61  ;;  %v8441_v22 = vld [vmem:[#allocation81_spill] sm:$0xff]  ;;  %v8485_v61 = vld [vmem:[#allocation28_spill] sm:$0xff] }
 0x919   :  { %3373 = vmatmul.mubr.bf16.vlgmr.msra.gmra.mxu0 %v3256_v15  ;;  %3414 = vmatmul.mubr.bf16.vlgmr.msra.gmra.mxu1 %v3256_v15 }
 0x91a   :  { %3458 = vmatpush1.bf16.msra.mxu0 %v8434_v59  ;;  %3499 = vmatpush1.bf16.msra.mxu1 %v8435_v34  ;;  %v8486_v59 = vld [vmem:[#allocation29_spill] sm:$0xff]  ;;  %v8487_v34 = vld [vmem:[#allocation30_spill] sm:$0xff] }
 0x91b   :  { %3459 = vmatprep.subr.bf16.mxu0 %v8436_v43  ;;  %3500 = vmatprep.subr.bf16.mxu1 %v8437_v20  ;;  %v8488_v43 = vld [vmem:[#allocation31_spill] sm:$0xff]  ;;  %v8489_v20 = vld [vmem:[#allocation32_spill] sm:$0xff] }
 0x91c   :  { %3489 = vmatprep.mubr.bf16.mxu0 %v7964_v56  ;;  %3530 = vmatprep.mubr.bf16.mxu1 %v7964_v56 }
 0x91e   :  { %3460 = vmatpush1.bf16.msra.mxu0 %v8438_v3  ;;  %3501 = vmatpush1.bf16.msra.mxu1 %v8439_v13  ;;  %v8490_v3 = vld [vmem:[#allocation33_spill] sm:$0xff]  ;;  %v8491_v13 = vld [vmem:[#allocation34_spill] sm:$0xff] }
 0x91f   :  { %3461 = vmatprep.subr.bf16.mxu0 %v8440_v21  ;;  %3502 = vmatprep.subr.bf16.mxu1 %v8441_v22  ;;  %v8492_v21 = vld [vmem:[#allocation37_spill] sm:$0xff]  ;;  %v8493_v22 = vld [vmem:[#allocation38_spill] sm:$0xff] }
 0x922   :  { %3462 = vmatpush1.bf16.msra.mxu0 %v8442_v50  ;;  %3503 = vmatpush1.bf16.msra.mxu1 %v8443_v41  ;;  %v8494_v50 = vld [vmem:[#allocation101_spill] sm:$0xff]  ;;  %v8495_v41 = vld [vmem:[#allocation103_spill] sm:$0xff] }
 0x923   :  { %3463 = vmatprep.subr.bf16.mxu0 %v8444_v45  ;;  %3504 = vmatprep.subr.bf16.mxu1 %v8445_v60  ;;  %v5382_v45 = vld [vmem:[#allocation10 + $0xe4] ss:$16 sps:$4 sm:$0xff]   ;;  %v5383_v60 = vld [vmem:[#allocation10 + $0xec] ss:$16 sps:$4 sm:$0xff]  }
 0x926   :  { %3464 = vmatpush1.bf16.msra.mxu0 %v8446_v42  ;;  %3505 = vmatpush1.bf16.msra.mxu1 %v8447_v47 }
 0x927   :  { %3465 = vmatprep.subr.bf16.mxu0 %v8448_v51  ;;  %3506 = vmatprep.subr.bf16.mxu1 %v8449_v17 }
 0x92a   :  { %3466 = vmatpush1.bf16.msra.mxu0 %v8450_v30  ;;  %3507 = vmatpush1.bf16.msra.mxu1 %v8451_v62 }
 0x92b   :  { %3467 = vmatprep.subr.bf16.mxu0 %v8452_v4  ;;  %3508 = vmatprep.subr.bf16.mxu1 %v8453_v11 }
 0x92e   :  { %3468 = vmatpush1.bf16.msra.mxu0 %v8454_v63  ;;  %3509 = vmatpush1.bf16.msra.mxu1 %v8455_v44 }
 0x92f   :  { %3469 = vmatprep.subr.bf16.mxu0 %v8456_v57  ;;  %3510 = vmatprep.subr.bf16.mxu1 %v8457_v24 }
 0x932   :  { %3470 = vmatpush1.bf16.msra.mxu0 %v8458_v27  ;;  %3511 = vmatpush1.bf16.msra.mxu1 %v8459_v23 }
 0x933   :  { %3471 = vmatprep.subr.bf16.mxu0 %v8460_v36  ;;  %3512 = vmatprep.subr.bf16.mxu1 %v8461_v16 }
 0x936   :  { %3472 = vmatpush1.bf16.msra.mxu0 %v8462_v31  ;;  %3513 = vmatpush1.bf16.msra.mxu1 %v8463_v38 }
 0x937   :  { %3569 = vmatprep.subr.bf16.mxu0 %v8464_v33  ;;  %3610 = vmatprep.subr.bf16.mxu1 %v8465_v7 }
 0x939   :  { %3490 = vmatmul.mubr.bf16.vlgmr.msra.gmra.mxu0 %v3256_v15  ;;  %3531 = vmatmul.mubr.bf16.vlgmr.msra.gmra.mxu1 %v3256_v15  ;;  %v8484_v15 = vld [vmem:[#allocation90_spill] sm:$0xff] }
 0x93a   :  { %3570 = vmatpush1.bf16.msra.mxu0 %v8466_v10  ;;  %3611 = vmatpush1.bf16.msra.mxu1 %v8467_v0 }
 0x93b   :  { %3571 = vmatprep.subr.bf16.mxu0 %v8468_v5  ;;  %3612 = vmatprep.subr.bf16.mxu1 %v8469_v8 }
 0x93c   :  { %3601 = vmatprep.mubr.bf16.mxu0 %v7964_v56  ;;  %3642 = vmatprep.mubr.bf16.mxu1 %v7964_v56 }
 0x93e   :  { %3572 = vmatpush1.bf16.msra.mxu0 %v8470_v48  ;;  %3613 = vmatpush1.bf16.msra.mxu1 %v8471_v32 }
 0x93f   :  { %3573 = vmatprep.subr.bf16.mxu0 %v8472_v37  ;;  %3614 = vmatprep.subr.bf16.mxu1 %v8473_v39 }
 0x942   :  { %3574 = vmatpush1.bf16.msra.mxu0 %v8474_v52  ;;  %3615 = vmatpush1.bf16.msra.mxu1 %v8475_v9 }
 0x943   :  { %3575 = vmatprep.subr.bf16.mxu0 %v8476_v12  ;;  %3616 = vmatprep.subr.bf16.mxu1 %v8477_v40  ;;  %v8496_v40 = vld [vmem:[#allocation109_spill] sm:$0xff] }
 0x946   :  { %3576 = vmatpush1.bf16.msra.mxu0 %v8478_v49  ;;  %3617 = vmatpush1.bf16.msra.mxu1 %v8479_v46  ;;  %v848_v49 = vadd.f32 %v8496_v40, %v8157_v29  ;;  %v5395_v40 = vld [vmem:[#allocation10 + $0x8c] ss:$16 sps:$4 sm:$0xff]  }
 0x947   :  { %3577 = vmatprep.subr.bf16.mxu0 %v8480_v14  ;;  %3618 = vmatprep.subr.bf16.mxu1 %v8481_v28  ;;  %v8497_v28 = vld [vmem:[#allocation111_spill] sm:$0xff] }
 0x94a   :  { %3578 = vmatpush1.bf16.msra.mxu0 %v8482_v58  ;;  %3619 = vmatpush1.bf16.msra.mxu1 %v8483_v18  ;;  %v850_v58 = vadd.f32 %v8497_v28, %v5881_v6  ;;  %v5399_v28 = vld [vmem:[#allocation10 + $0x6c] ss:$16 sps:$4 sm:$0xff]  }
 0x94b   :  { %3579 = vmatprep.subr.bf16.mxu0 %v8484_v15  ;;  %3620 = vmatprep.subr.bf16.mxu1 %v8485_v61 }
 0x94e   :  { %3580 = vmatpush1.bf16.msra.mxu0 %v8486_v59  ;;  %3621 = vmatpush1.bf16.msra.mxu1 %v8487_v34 }
 0x94f   :  { %3581 = vmatprep.subr.bf16.mxu0 %v8488_v43  ;;  %3622 = vmatprep.subr.bf16.mxu1 %v8489_v20 }
 0x952   :  { %3582 = vmatpush1.bf16.msra.mxu0 %v8490_v3  ;;  %3623 = vmatpush1.bf16.msra.mxu1 %v8491_v13 }
 0x953   :  { %3583 = vmatprep.subr.bf16.mxu0 %v8492_v21  ;;  %3624 = vmatprep.subr.bf16.mxu1 %v8493_v22 }
 0x956   :  { %3584 = vmatpush1.bf16.msra.mxu0 %v8494_v50  ;;  %3625 = vmatpush1.bf16.msra.mxu1 %v8495_v41 }
 0x957   :  { %3651 = vmatprep.subr.bf16.mxu0 %v5382_v45  ;;  %3692 = vmatprep.subr.bf16.mxu1 %v5383_v60 }
 0x9b9   :  { %v3292_v42 = vpop.f32.mrf.mxu0  ;;  %v3333_v47 = vpop.f32.mrf.mxu1 }
 0x9bb   :  { %v3294_v51 = vpop.f32.mrf.mxu0  ;;  %v3335_v17 = vpop.f32.mrf.mxu1 }
 0x9bd   :  { %v3296_v30 = vpop.f32.mrf.mxu0  ;;  %v3337_v62 = vpop.f32.mrf.mxu1 }
 0x9be   :  { %v8499_v30 = vld [vmem:[#allocation110_spill] sm:$0xff] }
 0x9bf   :  { %v3297_v4 = vpop.f32.mrf.mxu0  ;;  %v3338_v11 = vpop.f32.mrf.mxu1  ;;  %v921_v62 = vadd.f32 %v8499_v30, %v5893_v55  ;;  %v5384_v55 = vld [vmem:[#allocation10 + $0xe0] ss:$16 sps:$4 sm:$0xff]  }
 0x9d9   :  { %v3374_v63 = vpop.f32.mrf.mxu0  ;;  %v3415_v44 = vpop.f32.mrf.mxu1 }
 0x9da   :  { %v3375_v57 = vadd.f32 %v3374_v63, %v3292_v42  ;;  %v3416_v48 = vadd.f32 %v3415_v44, %v3333_v47  ;;  %v8498_v47 = vld [vmem:[#allocation112_spill] sm:$0xff] }
 0x9db   :  { %v3376_v24 = vpop.f32.mrf.mxu0  ;;  %v3417_v27 = vpop.f32.mrf.mxu1 }
 0x9dc   :  { %v3422_v23 = vadd.f32 %v3375_v57, %v8099_v2  ;;  %v3377_v36 = vadd.f32 %v3376_v24, %v3294_v51  ;;  %v3418_v5 = vadd.f32 %v3417_v27, %v3335_v17  ;;  %v3424_v39 = vadd.f32 %v3416_v48, %v8156_v54  ;;  %v5391_v48 = vld [vmem:[#allocation10 + $0xac] ss:$16 sps:$4 sm:$0xff]  }
 0x9dd   :  { %v3378_v16 = vpop.f32.mrf.mxu0  ;;  %v3419_v31 = vpop.f32.mrf.mxu1  ;;  %v923_v51 = vadd.f32 %v8498_v47, %v5889_v53  ;;  %v4903_v47 = vld [vmem:[#allocation13 + $0x30] sm:$0xff]  }
 0x9de   :  { %v4649_v38 = vmul.f32 -1.442695, %v3422_v23  ;;  %v3423_v33 = vadd.f32 %v3377_v36, %v8100_v25  ;;  %v3425_v8 = vadd.f32 %v3418_v5, %v8101_v19  ;;  %v5385_v36 = vld [vmem:[#allocation10 + $0xe8] ss:$16 sps:$4 sm:$0xff]   ;;  %v5386_v16 = vld [vmem:[#allocation10 + $0xc4] ss:$16 sps:$4 sm:$0xff]  }
 0x9df   :  { %v3379_v7 = vpop.f32.mrf.mxu0  ;;  %v3420_v10 = vpop.f32.mrf.mxu1  ;;  %v5387_v31 = vld [vmem:[#allocation10 + $0xcc] ss:$16 sps:$4 sm:$0xff]  }
 0x9e0   :  { %5150 = vpow2.f32 %v4649_v38  ;;  %v4650_v0 = vmul.f32 -1.442695, %v3423_v33  ;;  %v4651_v32 = vmul.f32 -1.442695, %v3425_v8  ;;  %v5388_v10 = vld [vmem:[#allocation10 + $0xc0] ss:$16 sps:$4 sm:$0xff]  }
 0x9e1   :  { %v5390_v8 = vld [vmem:[#allocation10 + $0xa4] ss:$16 sps:$4 sm:$0xff]  }
 0x9e2   :  { %5152 = vpow2.f32 %v4650_v0  ;;  %v5389_v0 = vld [vmem:[#allocation10 + $0xc8] ss:$16 sps:$4 sm:$0xff]  }
 0x9e3   :  { %5154 = vpow2.f32 %v4651_v32 }
 0x9ed   :  { %v5151_v37 = vpop.eup %5150 }
 0x9ee   :  { %v3429_v52 = vadd.f32 1.0, %v5151_v37 }
 0x9ef   :  { %v5153_v9 = vpop.eup %5152 }
 0x9f0   :  { %5156 = vrcp.f32 %v3429_v52  ;;  %v3435_v12 = vadd.f32 1.0, %v5153_v9  ;;  %v5155_v59 = vpop.eup %5154  ;;  %v5392_v52 = vld [vmem:[#allocation10 + $0xa0] ss:$16 sps:$4 sm:$0xff]   ;;  %v5393_v9 = vld [vmem:[#allocation10 + $0xa8] ss:$16 sps:$4 sm:$0xff]  }
 0x9f1   :  { %5158 = vtanh.f32 %v3424_v39  ;;  %v3442_v41 = vadd.f32 1.0, %v5155_v59  ;;  %v5405_v59 = vld [vmem:[#allocation10 + $0x48] ss:$16 sps:$4 sm:$0xff]  }
 0x9f2   :  { %5160 = vrcp.f32 %v3435_v12  ;;  %v5394_v12 = vld [vmem:[#allocation10 + $0x84] ss:$16 sps:$4 sm:$0xff]  }
 0x9f9   :  { %v3491_v46 = vpop.f32.mrf.mxu0  ;;  %v3532_v14 = vpop.f32.mrf.mxu1 }
 0x9fa   :  { %v3539_v18 = vadd.f32 %v3491_v46, %v848_v49  ;;  %v3541_v4 = vadd.f32 %v3532_v14, %v921_v62  ;;  %v5396_v49 = vld [vmem:[#allocation10 + $0x80] ss:$16 sps:$4 sm:$0xff]   ;;  %v5397_v46 = vld [vmem:[#allocation10 + $0x88] ss:$16 sps:$4 sm:$0xff]   ;;  %v5398_v14 = vld [vmem:[#allocation10 + $0x64] ss:$16 sps:$4 sm:$0xff]  }
 0x9fb   :  { %v3493_v15 = vpop.f32.mrf.mxu0  ;;  %v3534_v61 = vpop.f32.mrf.mxu1  ;;  %v4904_v62 = vld [vmem:[#allocation13 + $0x28] sm:$0xff]  }
 0x9fc   :  { %v4652_v34 = vmul.f32 -1.442695, %v3539_v18  ;;  %v3540_v43 = vadd.f32 %v3493_v15, %v850_v58  ;;  %v3542_v17 = vadd.f32 %v3534_v61, %v923_v51  ;;  %v5401_v58 = vld [vmem:[#allocation10 + $0x68] ss:$16 sps:$4 sm:$0xff]   ;;  %v5402_v18 = vld [vmem:[#allocation10 + $0x44] ss:$16 sps:$4 sm:$0xff]  }
 0x9fd   :  { %v5157_v20 = vpop.eup %5156  ;;  %v3495_v3 = vpop.f32.mrf.mxu0  ;;  %v5403_v15 = vld [vmem:[#allocation10 + $0x4c] ss:$16 sps:$4 sm:$0xff]   ;;  %v5404_v61 = vld [vmem:[#allocation10 + $0x40] ss:$16 sps:$4 sm:$0xff]  }
 0x9fe   :  { %v3536_v13 = vpop.f32.mrf.mxu1  ;;  %v5159_v21 = vpop.eup %5158  ;;  %5162 = vpow2.f32 %v4652_v34  ;;  %v4653_v22 = vmul.f32 -1.442695, %v3540_v43  ;;  %v4654_v11 = vmul.f32 -1.442695, %v3542_v17  ;;  %v5406_v34 = vld [vmem:[#allocation10 + $0x24] ss:$16 sps:$4 sm:$0xff]  }
 0x9ff   :  { %v5161_v50 = vpop.eup %5160  ;;  %v3496_v29 = vpop.f32.mrf.mxu0  ;;  %v3446_v60 = vmul.f32 %v5159_v21, %v5157_v20  ;;  %v5407_v43 = vld [vmem:[#allocation10 + $0x2c] ss:$16 sps:$4 sm:$0xff]   ;;  %v5408_v13 = vld [vmem:[#allocation10 + $0x20] ss:$16 sps:$4 sm:$0xff]   ;;  %v5409_v21 = vld [vmem:[#allocation10 + $0x28] ss:$16 sps:$4 sm:$0xff]  }
 0xa00   :  { %v3537_v45 = vpop.f32.mrf.mxu1  ;;  %v3445_v42 = vmul.f32 %v5161_v50, %v7331_v1  ;;  %5164 = vpow2.f32 %v4653_v22  ;;  %v5410_v22 = vld [vmem:[#allocation10 + $0x4] ss:$16 sps:$4 sm:$0xff]   ;;  %v5411_v50 = vld [vmem:[#allocation10 + $0xc] ss:$16 sps:$4 sm:$0xff]  }
 0xa01   :  { %5166 = vrcp.f32 %v3442_v41  ;;  %v4902_v29 = vld [vmem:[#allocation13 + $0x38] sm:$0xff]   ;;  %v8500_v51 = vld [vmem:[#allocation26_spill] sm:$0xff] }
 0xa02   :  { %v7455_v6 = vadd.f32 %v3446_v60, %v3445_v42  ;;  %v5412_v60 = vld [vmem:[#allocation10] ss:$16 sps:$4 sm:$0xff]   ;;  %v5413_v42 = vld [vmem:[#allocation10 + $0x8] ss:$16 sps:$4 sm:$0xff]  }
 0xa03   :  { %v8501_v17 = vld [vmem:[#allocation52_spill] sm:$0xff] }
 0xa04   :  { %5168 = vtanh.f32 %v7455_v6  ;;  %v3788_v30 = vpack.c.bf16 %v8501_v17, %v8500_v51 }
 0xa05   :  { %5170 = vtanh.f32 %v3541_v4  ;;  %v4905_v4 = vld [vmem:[#allocation13 + $0x20] sm:$0xff]  }
 0xa06   :  { %5172 = vpow2.f32 %v4654_v11  ;;  %v4906_v11 = vld [vmem:[#allocation13 + $0x18] sm:$0xff]  }
 0xa0b   :  { %v5163_v63 = vpop.eup %5162 }
 0xa0c   :  { %v3546_v44 = vadd.f32 1.0, %v5163_v63  ;;  %v4907_v63 = vld [vmem:[#allocation13 + $0x10] sm:$0xff]  }
 0xa0d   :  { %v5165_v57 = vpop.eup %5164 }
 0xa0e   :  { %5174 = vrcp.f32 %v3546_v44  ;;  %v3552_v1 = vadd.f32 1.0, %v5165_v57  ;;  %v5167_v24 = vpop.eup %5166  ;;  %v4908_v44 = vld [vmem:[#allocation13 + $0x8] sm:$0xff]   ;;  %v4909_v57 = vld [vmem:[#allocation13] sm:$0xff]  }
 0xa10   :  { %5176 = vrcp.f32 %v3552_v1  ;;  %v8502_v1 = vld [vmem:[#allocation36_spill] sm:$0xff] }
 0xa11   :  { %v5169_v27 = vpop.eup %5168 }
 0xa12   :  { %v7462_v53 = vmul.f32 %v5169_v27, %v5167_v24  ;;  %v5171_v38 = vpop.eup %5170  ;;  %v8503_v24 = vld [vmem:[#allocation39_spill] sm:$0xff] }
 0xa13   :  { %v5173_v33 = vpop.eup %5172  ;;  %v3789_v27 = vpack.c.bf16 %v8503_v24, %v8502_v1 }
 0xa14   :  { %v3568_v23 = vpack.c.bf16 %v7462_v53, %v7462_v53  ;;  %v3559_v37 = vadd.f32 1.0, %v5173_v33 }
 0xa16   :  { %3602 = vmatmul.mubr.bf16.vlgmr.msra.gmra.mxu0 %v3568_v23  ;;  %3643 = vmatmul.mubr.bf16.vlgmr.msra.gmra.mxu1 %v3568_v23  ;;  %5178 = vrcp.f32 %v3559_v37  ;;  %v8504_v23 = vld [vmem:[#allocation82_spill] sm:$0xff] }
 0xa17   :  { %3652 = vmatpush1.bf16.msra.mxu0 %v5384_v55  ;;  %3693 = vmatpush1.bf16.msra.mxu1 %v5385_v36  ;;  %v3790_v55 = vpack.c.bf16 %v7338_v35, %v8504_v23 }
 0xa18   :  { %3653 = vmatprep.subr.bf16.mxu0 %v5386_v16  ;;  %3694 = vmatprep.subr.bf16.mxu1 %v5387_v31 }
 0xa19   :  { %3683 = vmatprep.mubr.bf16.mxu0 %v7964_v56  ;;  %3724 = vmatprep.mubr.bf16.mxu1 %v7964_v56 }
 0xa1b   :  { %v5175_v7 = vpop.eup %5174  ;;  %3654 = vmatpush1.bf16.msra.mxu0 %v5388_v10  ;;  %3695 = vmatpush1.bf16.msra.mxu1 %v5389_v0 }
 0xa1c   :  { %v3563_v5 = vmul.f32 %v5175_v7, %v5171_v38  ;;  %3655 = vmatprep.subr.bf16.mxu0 %v5390_v8  ;;  %3696 = vmatprep.subr.bf16.mxu1 %v5391_v48 }
 0xa1d   :  { %v5177_v32 = vpop.eup %5176 }
 0xa1e   :  { %v3562_v39 = vmul.f32 %v5177_v32, %v7355_v26  ;;  %v5400_v26 = vld [vmem:[#allocation10 + $0x60] ss:$16 sps:$4 sm:$0xff]  }
 0xa1f   :  { %3656 = vmatpush1.bf16.msra.mxu0 %v5392_v52  ;;  %3697 = vmatpush1.bf16.msra.mxu1 %v5393_v9 }
 0xa20   :  { %v3564_v56 = vadd.f32 %v3563_v5, %v3562_v39  ;;  %3657 = vmatprep.subr.bf16.mxu0 %v5394_v12  ;;  %3698 = vmatprep.subr.bf16.mxu1 %v5395_v40 }
 0xa22   :  { %5180 = vtanh.f32 %v3564_v56 }
 0xa23   :  { %3658 = vmatpush1.bf16.msra.mxu0 %v5396_v49  ;;  %3699 = vmatpush1.bf16.msra.mxu1 %v5397_v46  ;;  %v5179_v20 = vpop.eup %5178 }
 0xa24   :  { %3659 = vmatprep.subr.bf16.mxu0 %v5398_v14  ;;  %3700 = vmatprep.subr.bf16.mxu1 %v5399_v28 }
 0xa27   :  { %3660 = vmatpush1.bf16.msra.mxu0 %v5400_v26  ;;  %3701 = vmatpush1.bf16.msra.mxu1 %v5401_v58 }
 0xa28   :  { %3661 = vmatprep.subr.bf16.mxu0 %v5402_v18  ;;  %3702 = vmatprep.subr.bf16.mxu1 %v5403_v15 }
 0xa2b   :  { %3662 = vmatpush1.bf16.msra.mxu0 %v5404_v61  ;;  %3703 = vmatpush1.bf16.msra.mxu1 %v5405_v59  ;;  %v5547_v59 = vmov 1966171168  }
 0xa2c   :  { %3663 = vmatprep.subr.bf16.mxu0 %v5406_v34  ;;  %3704 = vmatprep.subr.bf16.mxu1 %v5407_v43  ;;  %v3914_v34 = vunpack.c.l.s4 %v5547_v59 }
 0xa2e   :  { %v3915_v43 = vunpack.c.0.s8 %v3914_v34 }
 0xa2f   :  { %v5181_v3 = vpop.eup %5180  ;;  %3664 = vmatpush1.bf16.msra.mxu0 %v5408_v13  ;;  %3705 = vmatpush1.bf16.msra.mxu1 %v5409_v21 }
 0xa30   :  { %3665 = vmatprep.subr.bf16.mxu0 %v5410_v22  ;;  %3706 = vmatprep.subr.bf16.mxu1 %v5411_v50  ;;  %v3566_v41 = vmul.f32 %v5181_v3, %v5179_v20  ;;  %v8505_v3 = vld [vmem:[#allocation21_spill] sm:$0xff] }
 0xa31   :  { %v7485_v13 = vsub.s32 %v3915_v43, %v8505_v3 }
 0xa32   :  { %v3567_v45 = vpack.c.bf16 %v3566_v41, %v3566_v41 }
 0xa33   :  { %3666 = vmatpush1.bf16.msra.mxu0 %v5412_v60  ;;  %3707 = vmatpush1.bf16.msra.mxu1 %v5413_v42 }
 0xa34   :  { %4711 = vmatprep.subr.bf16.mxu0 %v4902_v29 }
 0xa36   :  { %3684 = vmatmul.mubr.bf16.vlgmr.msra.gmra.mxu0 %v3567_v45  ;;  %3725 = vmatmul.mubr.bf16.vlgmr.msra.gmra.mxu1 %v3567_v45 }
 0xa37   :  { %4712 = vmatpush3.bf16.msra.mxu0 %v4902_v29  ;;  %4727 = vmatprep.mubr.bf16.mxu0 %v3788_v30 }
 0xa38   :  { %4713 = vmatprep.subr.bf16.mxu0 %v4903_v47 }
 0xa3b   :  { %4714 = vmatpush3.bf16.msra.mxu0 %v4903_v47 }
 0xa3c   :  { %4715 = vmatprep.subr.bf16.mxu0 %v4904_v62 }
 0xa3f   :  { %4716 = vmatpush3.bf16.msra.mxu0 %v4904_v62 }
 0xa40   :  { %4717 = vmatprep.subr.bf16.mxu0 %v4905_v4 }
 0xa43   :  { %4718 = vmatpush3.bf16.msra.mxu0 %v4905_v4 }
 0xa44   :  { %4719 = vmatprep.subr.bf16.mxu0 %v4906_v11 }
 0xa47   :  { %4720 = vmatpush3.bf16.msra.mxu0 %v4906_v11 }
 0xa48   :  { %4721 = vmatprep.subr.bf16.mxu0 %v4907_v63 }
 0xa4b   :  { %4722 = vmatpush3.bf16.msra.mxu0 %v4907_v63 }
 0xa4c   :  { %4723 = vmatprep.subr.bf16.mxu0 %v4908_v44 }
 0xa4f   :  { %4724 = vmatpush3.bf16.msra.mxu0 %v4908_v44 }
 0xa50   :  { %4725 = vmatprep.subr.bf16.mxu0 %v4909_v57 }
 0xa53   :  { %4726 = vmatpush3.bf16.msra.mxu0 %v4909_v57 }
 0xa56   :  { %4728 = vmatmul.mubr.bf16.vlgmr.msra.gmra.mxu0 %v3789_v27 }
 0xa57   :  { %4731 = vmatprep.mubr.bf16.mxu0 %v3790_v55 }
 0xad6   :  { %v3603_v36 = vpop.f32.mrf.mxu0  ;;  %v3644_v16 = vpop.f32.mrf.mxu1 }
 0xad8   :  { %v3605_v31 = vpop.f32.mrf.mxu0  ;;  %v3646_v38 = vpop.f32.mrf.mxu1 }
 0xada   :  { %v3607_v33 = vpop.f32.mrf.mxu0  ;;  %v3648_v7 = vpop.f32.mrf.mxu1 }
 0xadc   :  { %v3608_v10 = vpop.f32.mrf.mxu0  ;;  %v3649_v0 = vpop.f32.mrf.mxu1 }
 0xaf6   :  { %v3685_v5 = vpop.f32.mrf.mxu0  ;;  %v3726_v8 = vpop.f32.mrf.mxu1 }
 0xaf7   :  { %v3686_v48 = vadd.f32 %v3685_v5, %v3603_v36  ;;  %v3727_v58 = vadd.f32 %v3726_v8, %v3644_v16 }
 0xaf8   :  { %v3687_v32 = vpop.f32.mrf.mxu0  ;;  %v3728_v37 = vpop.f32.mrf.mxu1 }
 0xaf9   :  { %v3733_v39 = vadd.f32 %v3686_v48, %v8099_v2  ;;  %v3688_v52 = vadd.f32 %v3687_v32, %v3605_v31  ;;  %v3729_v40 = vadd.f32 %v3728_v37, %v3646_v38  ;;  %v3735_v2 = vadd.f32 %v3727_v58, %v8156_v54 }
 0xafa   :  { %v3689_v9 = vpop.f32.mrf.mxu0  ;;  %v3730_v35 = vpop.f32.mrf.mxu1 }
 0xafb   :  { %v4655_v56 = vmul.f32 -1.442695, %v3733_v39  ;;  %v3734_v12 = vadd.f32 %v3688_v52, %v8100_v25  ;;  %v3736_v28 = vadd.f32 %v3729_v40, %v8101_v19  ;;  %v7482_v19 = vld [vmem:[%s7558_s10] ss:$0 sm:$0xff]  ;;  %s5548_s10 = smov [#allocation15]  }
 0xafc   :  { %v3690_v49 = vpop.f32.mrf.mxu0  ;;  %v3731_v46 = vpop.f32.mrf.mxu1  ;;  %s4444_s28 = sshll.u32 %s5548_s10, 4  ;;  %s4445_s28 = int_to_ptr.vmem [resolvable:$true] %s4444_s28 }
 0xafd   :  { %5182 = vpow2.f32 %v4655_v56  ;;  %v4656_v14 = vmul.f32 -1.442695, %v3734_v12  ;;  %v4657_v26 = vmul.f32 -1.442695, %v3736_v28  ;;  %s5506_s29 = scalar_lea.vmem %s4445_s28, 1024  ;;  %p5511_p12 = scmp.lt.s32.totalorder %s4445_s28, %s4445_s28 }
 0xafe   :  { %p5507_p11 = scmp.ne.s32.totalorder %s4445_s28, %s5506_s29  ;;  %p5512_p13 = scmp.lt.s32.totalorder %s5506_s29, %s5506_s29 }
 0xaff   :  { %5184 = vpow2.f32 %v4656_v14 }
 0xb00   :  { %5186 = vpow2.f32 %v4657_v26  ;;  %p5513_p0 = por %p5512_p13, %p5511_p12 }
 0xb02   :  { %p5514_p1 = pnand %p5513_p0, %p5507_p11 }
 0xb0a   :  { %v5183_v18 = vpop.eup %5182 }
 0xb0b   :  { %v3740_v15 = vadd.f32 1.0, %v5183_v18 }
 0xb0c   :  { %v5185_v61 = vpop.eup %5184 }
 0xb0d   :  { %5188 = vrcp.f32 %v3740_v15  ;;  %v3746_v25 = vadd.f32 1.0, %v5185_v61  ;;  %v5187_v20 = vpop.eup %5186 }
 0xb0e   :  { %5190 = vtanh.f32 %v3735_v2  ;;  %v3753_v54 = vadd.f32 1.0, %v5187_v20 }
 0xb0f   :  { %5192 = vrcp.f32 %v3746_v25 }
 0xb10   :  { %5194 = vrcp.f32 %v3753_v54 }
 0xb16   :  { %v4729_v21 = vpop.f32.mrf.mxu0 }
 0xb17   :  { %v3889_v22 = vadd.f32 %v4729_v21, %v7482_v19 }
 0xb18   :  { %v3880_v50 = vpop.f32.mrf.mxu0 }
 0xb19   :  { %v4044_v41 = vcombine.high %v3889_v22, %v3889_v22  ;;  %v4051_v29 = vrot.slane %v3889_v22, %v7485_v13  ;;  %v3881_v45 = vadd.f32 %v7482_v19, %v3880_v50 }
 0xb1a   :  { %v5189_v60 = vpop.eup %5188  ;;  %v4730_v42 = vpop.f32.mrf.mxu0 }
 0xb1b   :  { %v5191_v47 = vpop.eup %5190  ;;  %v4058_v51 = vrot.slane %v4044_v41, %v7485_v13  ;;  %v4059_v17 = vcombine.high %v4051_v29, %v4051_v29  ;;  %v4067_v30 = vrot.slane %v4051_v29, %v7485_v13  ;;  %4675 = vst.sshfl [vmem:[#allocation15 + $0x2] sm:$0x1 pattern:$0x73625140] %v4051_v29  ;;  %v3912_v11 = vcombine.high %v3881_v45, %v3881_v45 }
 0xb1c   :  { %v5193_v62 = vpop.eup %5192  ;;  %v3757_v4 = vmul.f32 %v5191_v47, %v5189_v60  ;;  %v3919_v63 = vrot.slane %v3881_v45, %v7485_v13  ;;  %v3892_v44 = vadd.f32 %v4730_v42, %v7482_v19  ;;  %v3883_v31 = vpop.f32.mrf.mxu0 }
 0xb1d   :  { %v3756_v57 = vmul.f32 %v5193_v62, %v7455_v6  ;;  %v4060_v1 = vcombine.high %v4058_v51, %v4058_v51  ;;  %v4074_v24 = vrot.slane %v4058_v51, %v7485_v13  ;;  %v4081_v27 = vrot.slane %v4059_v17, %v7485_v13  ;;  %4676 = vst.sshfl [vmem:[#allocation15 + $0xa] sm:$0x1 pattern:$0x73625140] %v4059_v17  ;;  %v5195_v43 = vpop.eup %5194 }
 0xb1e   :  { %4677 = vst.sshfl [vmem:[#allocation15 + $0x22] sm:$0x1 pattern:$0x73625140] %v4058_v51  ;;  %v4089_v23 = vcombine.high %v4067_v30, %v4067_v30  ;;  %v3926_v55 = vrot.slane %v3912_v11, %v7485_v13  ;;  %v3927_v36 = vcombine.high %v3919_v63, %v3919_v63  ;;  %v3935_v16 = vrot.slane %v3919_v63, %v7485_v13 }
 0xb1f   :  { %4667 = vst.sshfl [vmem:[#allocation15] sm:$0x1 pattern:$0x73625140] %v3919_v63  ;;  %v3758_v38 = vadd.f32 %v3757_v4, %v3756_v57  ;;  %v4088_v33 = vrot.slane %v4060_v1, %v7485_v13  ;;  %v4090_v7 = vcombine.high %v4074_v24, %v4074_v24  ;;  %v4091_v6 = vcombine.high %v4081_v27, %v4081_v27 }
 0xb20   :  { %4678 = vst.sshfl [vmem:[#allocation15 + $0x2a] sm:$0x1 pattern:$0x73625140] %v4060_v1  ;;  %4103 = vst [vmem:[#allocation15 + $0x12] sm:$0x1] %v4089_v23  ;;  %v3928_v10 = vcombine.high %v3926_v55, %v3926_v55  ;;  %v3942_v0 = vrot.slane %v3926_v55, %v7485_v13  ;;  %v3949_v5 = vrot.slane %v3927_v36, %v7485_v13 }
 0xb21   :  { %v3957_v8 = vcombine.high %v3935_v16, %v3935_v16  ;;  %4668 = vst.sshfl [vmem:[#allocation15 + $0x8] sm:$0x1 pattern:$0x73625140] %v3927_v36  ;;  %v4092_v48 = vcombine.high %v4088_v33, %v4088_v33  ;;  %4104 = vst [vmem:[#allocation15 + $0x1a] sm:$0x1] %v4091_v6  ;;  %v4110_v32 = vcombine.high %v3892_v44, %v3892_v44  ;;  %5196 = vtanh.f32 %v3758_v38 }
 0xb22   :  { %4669 = vst.sshfl [vmem:[#allocation15 + $0x20] sm:$0x1 pattern:$0x73625140] %v3926_v55  ;;  %4107 = vst [vmem:[#allocation15 + $0x32] sm:$0x1] %v4090_v7  ;;  %v4117_v37 = vrot.slane %v3892_v44, %v7485_v13  ;;  %v3884_v39 = vadd.f32 %v7482_v19, %v3883_v31  ;;  %v3956_v52 = vrot.slane %v3928_v10, %v7485_v13 }
 0xb23   :  { %v3958_v9 = vcombine.high %v3942_v0, %v3942_v0  ;;  %v3959_v35 = vcombine.high %v3949_v5, %v3949_v5  ;;  %3971 = vst [vmem:[#allocation15 + $0x10] sm:$0x1] %v3957_v8  ;;  %4670 = vst.sshfl [vmem:[#allocation15 + $0x28] sm:$0x1 pattern:$0x73625140] %v3928_v10  ;;  %v4124_v56 = vrot.slane %v4110_v32, %v7485_v13 }
 0xb24   :  { %4108 = vst [vmem:[#allocation15 + $0x3a] sm:$0x1] %v4092_v48  ;;  %v4125_v12 = vcombine.high %v4117_v37, %v4117_v37  ;;  %v4133_v40 = vrot.slane %v4117_v37, %v7485_v13  ;;  %4679 = vst.sshfl [vmem:[#allocation15 + $0x3] sm:$0x1 pattern:$0x73625140] %v4117_v37  ;;  %v3978_v49 = vcombine.high %v3884_v39, %v3884_v39 }
 0xb25   :  { %v3960_v46 = vcombine.high %v3956_v52, %v3956_v52  ;;  %3972 = vst [vmem:[#allocation15 + $0x18] sm:$0x1] %v3959_v35  ;;  %3975 = vst [vmem:[#allocation15 + $0x30] sm:$0x1] %v3958_v9  ;;  %v3985_v14 = vrot.slane %v3884_v39, %v7485_v13  ;;  %v4126_v28 = vcombine.high %v4124_v56, %v4124_v56 }
 0xb26   :  { %v4140_v26 = vrot.slane %v4124_v56, %v7485_v13  ;;  %v4147_v58 = vrot.slane %v4125_v12, %v7485_v13  ;;  %v4155_v18 = vcombine.high %v4133_v40, %v4133_v40  ;;  %4680 = vst.sshfl [vmem:[#allocation15 + $0xb] sm:$0x1 pattern:$0x73625140] %v4125_v12  ;;  %v3992_v2 = vrot.slane %v3978_v49, %v7485_v13 }
 0xb27   :  { %4681 = vst.sshfl [vmem:[#allocation15 + $0x23] sm:$0x1 pattern:$0x73625140] %v4124_v56  ;;  %3976 = vst [vmem:[#allocation15 + $0x38] sm:$0x1] %v3960_v46  ;;  %v3993_v15 = vcombine.high %v3985_v14, %v3985_v14  ;;  %v4001_v61 = vrot.slane %v3985_v14, %v7485_v13  ;;  %v4154_v59 = vrot.slane %v4126_v28, %v7485_v13 }
 0xb28   :  { %4671 = vst.sshfl [vmem:[#allocation15 + $0x1] sm:$0x1 pattern:$0x73625140] %v3985_v14  ;;  %v4156_v34 = vcombine.high %v4140_v26, %v4140_v26  ;;  %v4157_v25 = vcombine.high %v4147_v58, %v4147_v58  ;;  %4169 = vst [vmem:[#allocation15 + $0x13] sm:$0x1] %v4155_v18  ;;  %v3994_v20 = vcombine.high %v3992_v2, %v3992_v2 }
 0xb29   :  { %4682 = vst.sshfl [vmem:[#allocation15 + $0x2b] sm:$0x1 pattern:$0x73625140] %v4126_v28  ;;  %v4008_v3 = vrot.slane %v3992_v2, %v7485_v13  ;;  %v4015_v21 = vrot.slane %v3993_v15, %v7485_v13  ;;  %v4023_v54 = vcombine.high %v4001_v61, %v4001_v61  ;;  %v4158_v22 = vcombine.high %v4154_v59, %v4154_v59 }
 0xb2a   :  { %4672 = vst.sshfl [vmem:[#allocation15 + $0x9] sm:$0x1 pattern:$0x73625140] %v3993_v15  ;;  %4170 = vst [vmem:[#allocation15 + $0x1b] sm:$0x1] %v4157_v25  ;;  %v4022_v50 = vrot.slane %v3994_v20, %v7485_v13 }
 0xb2b   :  { %4673 = vst.sshfl [vmem:[#allocation15 + $0x21] sm:$0x1 pattern:$0x73625140] %v3992_v2  ;;  %4173 = vst [vmem:[#allocation15 + $0x33] sm:$0x1] %v4156_v34  ;;  %v4024_v41 = vcombine.high %v4008_v3, %v4008_v3  ;;  %v4025_v29 = vcombine.high %v4015_v21, %v4015_v21 }
 0xb2c   :  { %4037 = vst [vmem:[#allocation15 + $0x11] sm:$0x1] %v4023_v54  ;;  %4674 = vst.sshfl [vmem:[#allocation15 + $0x29] sm:$0x1 pattern:$0x73625140] %v3994_v20  ;;  %v4026_v45 = vcombine.high %v4022_v50, %v4022_v50 }
 0xb2d   :  { %4174 = vst [vmem:[#allocation15 + $0x3b] sm:$0x1] %v4158_v22  ;;  %4038 = vst [vmem:[#allocation15 + $0x19] sm:$0x1] %v4025_v29 }
 0xb2e   :  { %4041 = vst [vmem:[#allocation15 + $0x31] sm:$0x1] %v4024_v41  ;;  %4042 = vst [vmem:[#allocation15 + $0x39] sm:$0x1] %v4026_v45  ;;  %v5197_v60 = vpop.eup %5196 }
 0xb2f   :  { %v3760_v42 = vmul.f32 %v5197_v60, %v5195_v43 }
 0xb31   :  { %v3791_v47 = vpack.c.bf16 %v3760_v42, %v7462_v53 }
 0xb33   :  { %4732 = vmatmul.mubr.bf16.gmra.mxu0 %v3791_v47 }
 0xbf3   :  { %v4733_v51 = vpop.f32.mrf.mxu0 }
 0xbf4   :  { %v3905_v17 = vadd.f32 %v4733_v51, %v7482_v19 }
 0xbf5   :  { %v3896_v30 = vpop.f32.mrf.mxu0 }
 0xbf6   :  { %v4308_v62 = vcombine.high %v3905_v17, %v3905_v17  ;;  %v4315_v4 = vrot.slane %v3905_v17, %v7485_v13  ;;  %v3897_v11 = vadd.f32 %v7482_v19, %v3896_v30 }
 0xbf7   :  { %v4734_v63 = vpop.f32.mrf.mxu0 }
 0xbf8   :  { %v4322_v44 = vrot.slane %v4308_v62, %v7485_v13  ;;  %v4323_v57 = vcombine.high %v4315_v4, %v4315_v4  ;;  %v4331_v1 = vrot.slane %v4315_v4, %v7485_v13  ;;  %4691 = vst.sshfl [vmem:[#allocation15 + $0x6] sm:$0x1 pattern:$0x73625140] %v4315_v4  ;;  %v4176_v24 = vcombine.high %v3897_v11, %v3897_v11 }
 0xbf9   :  { %v4183_v53 = vrot.slane %v3897_v11, %v7485_v13  ;;  %v3908_v27 = vadd.f32 %v4734_v63, %v7482_v19  ;;  %v3899_v8 = vpop.f32.mrf.mxu0 }
 0xbfa   :  { %v4324_v23 = vcombine.high %v4322_v44, %v4322_v44  ;;  %v4338_v55 = vrot.slane %v4322_v44, %v7485_v13  ;;  %v4345_v36 = vrot.slane %v4323_v57, %v7485_v13  ;;  %v4353_v16 = vcombine.high %v4331_v1, %v4331_v1  ;;  %4692 = vst.sshfl [vmem:[#allocation15 + $0xe] sm:$0x1 pattern:$0x73625140] %v4323_v57 }
 0xbfb   :  { %4693 = vst.sshfl [vmem:[#allocation15 + $0x26] sm:$0x1 pattern:$0x73625140] %v4322_v44  ;;  %v4190_v31 = vrot.slane %v4176_v24, %v7485_v13  ;;  %v4191_v38 = vcombine.high %v4183_v53, %v4183_v53  ;;  %v4199_v33 = vrot.slane %v4183_v53, %v7485_v13  ;;  %v4374_v7 = vcombine.high %v3908_v27, %v3908_v27 }
 0xbfc   :  { %4683 = vst.sshfl [vmem:[#allocation15 + $0x4] sm:$0x1 pattern:$0x73625140] %v4183_v53  ;;  %v4352_v6 = vrot.slane %v4324_v23, %v7485_v13  ;;  %v4354_v10 = vcombine.high %v4338_v55, %v4338_v55  ;;  %v4355_v0 = vcombine.high %v4345_v36, %v4345_v36  ;;  %4367 = vst [vmem:[#allocation15 + $0x16] sm:$0x1] %v4353_v16 }
 0xbfd   :  { %4694 = vst.sshfl [vmem:[#allocation15 + $0x2e] sm:$0x1 pattern:$0x73625140] %v4324_v23  ;;  %v4381_v5 = vrot.slane %v3908_v27, %v7485_v13  ;;  %v4192_v48 = vcombine.high %v4190_v31, %v4190_v31  ;;  %v4206_v32 = vrot.slane %v4190_v31, %v7485_v13  ;;  %v4213_v37 = vrot.slane %v4191_v38, %v7485_v13 }
 0xbfe   :  { %v4221_v39 = vcombine.high %v4199_v33, %v4199_v33  ;;  %4684 = vst.sshfl [vmem:[#allocation15 + $0xc] sm:$0x1 pattern:$0x73625140] %v4191_v38  ;;  %v4356_v52 = vcombine.high %v4352_v6, %v4352_v6  ;;  %4368 = vst [vmem:[#allocation15 + $0x1e] sm:$0x1] %v4355_v0  ;;  %v4388_v9 = vrot.slane %v4374_v7, %v7485_v13 }
 0xbff   :  { %4685 = vst.sshfl [vmem:[#allocation15 + $0x24] sm:$0x1 pattern:$0x73625140] %v4190_v31  ;;  %4371 = vst [vmem:[#allocation15 + $0x36] sm:$0x1] %v4354_v10  ;;  %v4389_v35 = vcombine.high %v4381_v5, %v4381_v5  ;;  %v4397_v56 = vrot.slane %v4381_v5, %v7485_v13  ;;  %v4220_v12 = vrot.slane %v4192_v48, %v7485_v13 }
 0xc00   :  { %4695 = vst.sshfl [vmem:[#allocation15 + $0x7] sm:$0x1 pattern:$0x73625140] %v4381_v5  ;;  %v4222_v40 = vcombine.high %v4206_v32, %v4206_v32  ;;  %v4223_v49 = vcombine.high %v4213_v37, %v4213_v37  ;;  %4235 = vst [vmem:[#allocation15 + $0x14] sm:$0x1] %v4221_v39  ;;  %v3900_v46 = vadd.f32 %v7482_v19, %v3899_v8 }
 0xc01   :  { %4686 = vst.sshfl [vmem:[#allocation15 + $0x2c] sm:$0x1 pattern:$0x73625140] %v4192_v48  ;;  %4372 = vst [vmem:[#allocation15 + $0x3e] sm:$0x1] %v4356_v52  ;;  %v4390_v14 = vcombine.high %v4388_v9, %v4388_v9  ;;  %v4404_v28 = vrot.slane %v4388_v9, %v7485_v13  ;;  %v4411_v26 = vrot.slane %v4389_v35, %v7485_v13 }
 0xc02   :  { %v4419_v58 = vcombine.high %v4397_v56, %v4397_v56  ;;  %4696 = vst.sshfl [vmem:[#allocation15 + $0xf] sm:$0x1 pattern:$0x73625140] %v4389_v35  ;;  %v4224_v18 = vcombine.high %v4220_v12, %v4220_v12  ;;  %4236 = vst [vmem:[#allocation15 + $0x1c] sm:$0x1] %v4223_v49  ;;  %v4242_v2 = vcombine.high %v3900_v46, %v3900_v46 }
 0xc03   :  { %4697 = vst.sshfl [vmem:[#allocation15 + $0x27] sm:$0x1 pattern:$0x73625140] %v4388_v9  ;;  %4239 = vst [vmem:[#allocation15 + $0x34] sm:$0x1] %v4222_v40  ;;  %v4249_v15 = vrot.slane %v3900_v46, %v7485_v13  ;;  %v4418_v61 = vrot.slane %v4390_v14, %v7485_v13  ;;  %v4420_v59 = vcombine.high %v4404_v28, %v4404_v28 }
 0xc04   :  { %v4421_v34 = vcombine.high %v4411_v26, %v4411_v26  ;;  %4433 = vst [vmem:[#allocation15 + $0x17] sm:$0x1] %v4419_v58  ;;  %4698 = vst.sshfl [vmem:[#allocation15 + $0x2f] sm:$0x1 pattern:$0x73625140] %v4390_v14  ;;  %v4256_v19 = vrot.slane %v4242_v2, %v7485_v13 }
 0xc05   :  { %4240 = vst [vmem:[#allocation15 + $0x3c] sm:$0x1] %v4224_v18  ;;  %v4257_v25 = vcombine.high %v4249_v15, %v4249_v15  ;;  %v4265_v43 = vrot.slane %v4249_v15, %v7485_v13  ;;  %4687 = vst.sshfl [vmem:[#allocation15 + $0x5] sm:$0x1 pattern:$0x73625140] %v4249_v15  ;;  %v4422_v20 = vcombine.high %v4418_v61, %v4418_v61 }
 0xc06   :  { %4434 = vst [vmem:[#allocation15 + $0x1f] sm:$0x1] %v4421_v34  ;;  %4437 = vst [vmem:[#allocation15 + $0x37] sm:$0x1] %v4420_v59  ;;  %v4258_v3 = vcombine.high %v4256_v19, %v4256_v19  ;;  %v4272_v21 = vrot.slane %v4256_v19, %v7485_v13 }
 0xc07   :  { %v4279_v54 = vrot.slane %v4257_v25, %v7485_v13  ;;  %v4287_v22 = vcombine.high %v4265_v43, %v4265_v43  ;;  %4688 = vst.sshfl [vmem:[#allocation15 + $0xd] sm:$0x1 pattern:$0x73625140] %v4257_v25  ;;  %4438 = vst [vmem:[#allocation15 + $0x3f] sm:$0x1] %v4422_v20 }
 0xc08   :  { %4689 = vst.sshfl [vmem:[#allocation15 + $0x25] sm:$0x1 pattern:$0x73625140] %v4256_v19  ;;  %v4286_v50 = vrot.slane %v4258_v3, %v7485_v13  ;;  %v4288_v41 = vcombine.high %v4272_v21, %v4272_v21 }
 0xc09   :  { %v4289_v29 = vcombine.high %v4279_v54, %v4279_v54  ;;  %4301 = vst [vmem:[#allocation15 + $0x15] sm:$0x1] %v4287_v22  ;;  %4690 = vst.sshfl [vmem:[#allocation15 + $0x2d] sm:$0x1 pattern:$0x73625140] %v4258_v3 }
 0xc0a   :  { %v4290_v45 = vcombine.high %v4286_v50, %v4286_v50  ;;  %4305 = vst [vmem:[#allocation15 + $0x35] sm:$0x1] %v4288_v41 }
 0xc0b   :  { %4302 = vst [vmem:[#allocation15 + $0x1d] sm:$0x1] %v4289_v29 }
 0xc0c   :  { %4306 = vst [vmem:[#allocation15 + $0x3d] sm:$0x1] %v4290_v45 }
 0xc0d   :  { %5517 = shalt.err (!%p5514_p1)
}
 0xc0e   :  { %s5549_s30 = smov 128   ;;  %s5550_s12 = smov 8  }
 0xc0f   :  { %4450 = dma.vmem_to_hbm [thread:$0]  %s4445_s28, 1024, %s7559_s11, [#allocation7], %s5549_s30, %s5549_s30, %s5550_s12  }
 0xc10   :  { %5534 = dma.done.wait [#allocation7], 1024  }
 0xc11   :  { %5535 = vsyncadd [#allocation7], 4294966272 }
 0xc12   :  { %4454 = vsyncpa [#allocation6], 1 }
 0xc13   :  { %4455 = vsyncpa [#allocation11], 1 }
 0xc14   :  { %4456 = vsyncpa [#allocation14], 1 }
 0xc15   :  { %4457 = vsyncpa [#allocation7], 1 }
 0xc16   :  { %4458 = vsyncpa [#allocation8], 1 }

</bundles_post_ra>
